<compile_context>
chip_gen: v6e
topology: v6e:2x2x1
jax: 0.10.0
libtpu: 0.0.40
codegen_flags: <defaults>
</compile_context>

<pallas_src>
import jax
import jax.numpy as jnp
from jax.experimental import pallas as pl
from jax.experimental.pallas import tpu as pltpu


# ---------------------------------------------------------------------------
# Fused Pallas kernel: one branch x one block of NB batch images per grid step.
# ---------------------------------------------------------------------------

def _bottleneck_kernel(x_ref, w1_ref, b1_ref, w2_ref, b2_ref, w3_ref, b3_ref,
                       o_ref, y1p_ref):
    # x_ref : (NB, H, W, Cin)      bf16   (branch dim squeezed by BlockSpec)
    # w1_ref: (Cin, P)             bf16   (BN1 scale folded in)
    # b1_ref: (1, P)               f32
    # w2_ref: (9*P, P)             bf16   (BN2 scale folded in, im2col layout)
    # b2_ref: (1, P)               f32
    # w3_ref: (P, 4P)              bf16   (BN3 scale folded in)
    # b3_ref: (1, 4P)              f32
    # o_ref : (NB, H, W, 4P)       bf16
    # y1p_ref: (NB, H+2, W+2, P)   bf16 VMEM scratch (zero halo ring for 3x3)
    NB, H, W, Cin = x_ref.shape
    P = w1_ref.shape[1]
    C4 = w3_ref.shape[1]
    M = NB * H * W

    # ---- stage 1: 1x1 conv (+ folded BN scale) + bias + ReLU --------------
    x_in = x_ref[...].reshape(M, Cin)                      # bf16
    y1 = jnp.dot(x_in, w1_ref[...], preferred_element_type=jnp.float32)
    y1 = jnp.maximum(y1 + b1_ref[...], 0.0)                # (M, P) f32

    # ---- halo scratch: zero ONLY the 1-pixel ring; interior is overwritten -
    zrow = jnp.zeros((NB, 1, W + 2, P), y1p_ref.dtype)
    y1p_ref[:, 0:1, :, :] = zrow
    y1p_ref[:, H + 1:H + 2, :, :] = zrow
    zcol = jnp.zeros((NB, H, 1, P), y1p_ref.dtype)
    y1p_ref[:, 1:H + 1, 0:1, :] = zcol
    y1p_ref[:, 1:H + 1, W + 1:W + 2, :] = zcol
    # single f32->bf16 cast at the store
    y1p_ref[:, 1:H + 1, 1:W + 1, :] = y1.reshape(NB, H, W, P).astype(y1p_ref.dtype)

    # ---- stage 2: 3x3 conv (padding=1) as ONE K=9P MXU matmul --------------
    taps = [y1p_ref[:, kh:kh + H, kw:kw + W, :].reshape(M, P)
            for kh in range(3) for kw in range(3)]
    patches = jnp.concatenate(taps, axis=-1)               # (M, 9P) bf16, lane-dense
    y2 = jnp.dot(patches, w2_ref[...], preferred_element_type=jnp.float32)
    y2 = jnp.maximum(y2 + b2_ref[...], 0.0)                # (M, P) f32

    # ---- stage 3: 1x1 conv + bias + residual + ReLU -------------------------
    y3 = jnp.dot(y2.astype(w3_ref.dtype), w3_ref[...],
                 preferred_element_type=jnp.float32)
    # residual re-read from the VMEM-resident input block (short live range)
    resid = x_ref[...].reshape(M, Cin).astype(jnp.float32)
    y3 = y3 + b3_ref[...] + resid
    o_ref[...] = jnp.maximum(y3, 0.0).reshape(NB, H, W, C4).astype(o_ref.dtype)


# ---------------------------------------------------------------------------
# Parameter prep: fold inference BatchNorm per branch into the shared conv
# weights; matmul layouts; bf16 MXU operands (biases stay f32).
# ---------------------------------------------------------------------------

def fold_bn(gamma, beta, mean, var, eps=1e-5):
    scale = gamma / jnp.sqrt(var + eps)
    bias = beta - mean * scale
    return scale, bias


def prepare_fused_params(params, compute_dtype=jnp.bfloat16):
    # PyTorch OIHW -> matmul layouts.
    w1 = params["w1"][:, :, 0, 0].T                       # (Cin, P)
    w2 = jnp.transpose(params["w2"], (2, 3, 1, 0))        # (3, 3, P, P)  HWIO
    w3 = params["w3"][:, :, 0, 0].T                       # (P, 4P)
    P = w2.shape[2]

    s1, b1 = fold_bn(*params["bn1"])                      # (L, P)
    s2, b2 = fold_bn(*params["bn2"])                      # (L, P)
    s3, b3 = fold_bn(*params["bn3"])                      # (L, 4P)

    # Fold per-branch BN scale into the shared conv weights -> per-branch weights.
    w1s = (w1[None, :, :] * s1[:, None, :]).astype(compute_dtype)         # (L, Cin, P)
    w2s = (w2[None] * s2[:, None, None, None, :]).astype(compute_dtype)   # (L, 3, 3, P, P)
    w2s = w2s.reshape(w2s.shape[0], 9 * P, P)                             # (L, 9P, P) im2col
    w3s = (w3[None, :, :] * s3[:, None, :]).astype(compute_dtype)         # (L, P, 4P)
    return (w1s, b1[:, None, :].astype(jnp.float32),
            w2s, b2[:, None, :].astype(jnp.float32),
            w3s, b3[:, None, :].astype(jnp.float32))


def make_params(inplanes, planes, num_parallel, key):
    ks = jax.random.split(key, 16)
    p = {}
    p["w1"] = jax.random.normal(ks[0], (planes, inplanes, 1, 1), jnp.float32) * 0.1
    p["w2"] = jax.random.normal(ks[1], (planes, planes, 3, 3), jnp.float32) * 0.1
    p["w3"] = jax.random.normal(ks[2], (4 * planes, planes, 1, 1), jnp.float32) * 0.1

    def bn(kidx, C):
        gamma = 1.0 + 0.1 * jax.random.normal(ks[kidx], (num_parallel, C), jnp.float32)
        beta = 0.1 * jax.random.normal(ks[kidx + 1], (num_parallel, C), jnp.float32)
        mean = 0.1 * jax.random.normal(ks[kidx + 2], (num_parallel, C), jnp.float32)
        var = 0.5 + jnp.abs(jax.random.normal(ks[kidx + 3], (num_parallel, C), jnp.float32)) * 0.5
        return gamma, beta, mean, var

    p["bn1"] = bn(3, planes)
    p["bn2"] = bn(7, planes)
    p["bn3"] = bn(11, 4 * planes)
    return p


# ---------------------------------------------------------------------------
# Fused forward (single pallas_call for all branches / batch blocks)
# ---------------------------------------------------------------------------

def _pick_batch_block(N, H, W, target_rows=512):
    nb = 1
    for cand in range(1, N + 1):
        if N % cand == 0 and cand * H * W <= max(target_rows, H * W):
            nb = cand
    return nb


def bottleneck_forward(x_list, params, num_parallel,
                       compute_dtype=jnp.bfloat16, out_dtype=jnp.bfloat16):
    L = num_parallel
    planes = params["w1"].shape[0]
    x = jnp.stack(x_list, axis=0)                         # (L, N, Cin, H, W)
    _, N, Cin, H, W = x.shape
    if Cin != 4 * planes or Cin != params["w1"].shape[1]:
        raise ValueError("This kernel implements the stride=1 / downsample=None "
                         "Bottleneck path and requires inplanes == 4*planes.")
    C4 = 4 * planes
    NB = _pick_batch_block(N, H, W)                       # M = NB*H*W rows per step

    # Single NCHW -> NHWC transpose for all branches; channels on the lane dim.
    x_nhwc = jnp.transpose(x, (0, 1, 3, 4, 2)).astype(compute_dtype)   # (L,N,H,W,Cin)

    w1s, b1, w2s, b2, w3s, b3 = prepare_fused_params(params, compute_dtype)

    m_total = L * N * H * W
    out_bytes = jnp.dtype(out_dtype).itemsize
    flops = 2 * m_total * (Cin * planes + 9 * planes * planes + planes * C4)
    bytes_accessed = (x_nhwc.size * 2 + m_total * C4 * out_bytes +
                      w1s.size * 2 + w2s.size * 2 + w3s.size * 2 +
                      (b1.size + b2.size + b3.size) * 4)

    out_nhwc = pl.pallas_call(
        _bottleneck_kernel,
        out_shape=jax.ShapeDtypeStruct((L, N, H, W, C4), out_dtype),
        grid_spec=pltpu.PrefetchScalarGridSpec(
            num_scalar_prefetch=0,
            grid=(L, N // NB),
            in_specs=[
                pl.BlockSpec((None, NB, H, W, Cin), lambda l, n: (l, n, 0, 0, 0)),
                pl.BlockSpec((None, Cin, planes), lambda l, n: (l, 0, 0)),
                pl.BlockSpec((None, 1, planes), lambda l, n: (l, 0, 0)),
                pl.BlockSpec((None, 9 * planes, planes), lambda l, n: (l, 0, 0)),
                pl.BlockSpec((None, 1, planes), lambda l, n: (l, 0, 0)),
                pl.BlockSpec((None, planes, C4), lambda l, n: (l, 0, 0)),
                pl.BlockSpec((None, 1, C4), lambda l, n: (l, 0, 0)),
            ],
            out_specs=pl.BlockSpec((None, NB, H, W, C4),
                                   lambda l, n: (l, n, 0, 0, 0)),
            scratch_shapes=[pltpu.VMEM((NB, H + 2, W + 2, planes), compute_dtype)],
        ),
        compiler_params=pltpu.CompilerParams(
            dimension_semantics=("parallel", "parallel"),
            vmem_limit_bytes=32 * 1024 * 1024),
        cost_estimate=pl.CostEstimate(flops=int(flops), transcendentals=0,
                                      bytes_accessed=int(bytes_accessed)),
    )(x_nhwc, w1s, b1, w2s, b2, w3s, b3)

    out = jnp.transpose(out_nhwc, (0, 1, 4, 2, 3))        # (L, N, C4, H, W)
    return [out[l] for l in range(L)]


# ---------------------------------------------------------------------------
# Pure-JAX reference (same math, same bf16-operand / f32-accumulate policy)
# ---------------------------------------------------------------------------

def bottleneck_reference(x_list, params, num_parallel, compute_dtype=jnp.bfloat16):
    w1s, b1, w2s, b2, w3s, b3 = prepare_fused_params(params, compute_dtype)
    outs = []
    for l in range(num_parallel):
        x = x_list[l]
        N, C, H, W = x.shape
        xh = jnp.transpose(x, (0, 2, 3, 1)).astype(compute_dtype)        # NHWC
        y1 = jnp.einsum("nhwc,cp->nhwp", xh, w1s[l],
                        preferred_element_type=jnp.float32) + b1[l, 0]
        y1 = jax.nn.relu(y1).astype(compute_dtype)
        y1p = jnp.pad(y1, ((0, 0), (1, 1), (1, 1), (0, 0)))
        patches = jnp.concatenate(
            [y1p[:, kh:kh + H, kw:kw + W, :] for kh in range(3) for kw in range(3)],
            axis=-1)                                                     # (N,H,W,9P)
        y2 = jnp.einsum("nhwk,ko->nhwo", patches, w2s[l],
                        preferred_element_type=jnp.float32)
        y2 = jax.nn.relu(y2 + b2[l, 0])
        y3 = jnp.einsum("nhwc,co->nhwo", y2.astype(compute_dtype), w3s[l],
                        preferred_element_type=jnp.float32)
        y3 = y3 + b3[l, 0] + xh.astype(jnp.float32)
        outs.append(jnp.transpose(jax.nn.relu(y3), (0, 3, 1, 2)))
    return outs


if __name__ == "__main__":
    # Small but lane-friendly: inplanes == 4*planes == 128 (residual path), and
    # batch N=8 so one grid step sees M = 8*8*8 = 512 matmul rows.
    planes, num_parallel = 32, 2
    inplanes = 4 * planes
    N, H, W = 8, 8, 8

    key = jax.random.PRNGKey(0)
    kx, kp = jax.random.split(key)
    x_list = [
        jax.random.normal(jax.random.fold_in(kx, l), (N, inplanes, H, W), jnp.float32)
        for l in range(num_parallel)
    ]
    params = make_params(inplanes, planes, num_parallel, kp)

    out = bottleneck_forward(x_list, params, num_parallel)
    out = [jax.block_until_ready(o) for o in out]

    ref = bottleneck_reference(x_list, params, num_parallel)
    for o, r in zip(out, ref):
        assert o.shape == (N, 4 * planes, H, W)
        assert jnp.allclose(o.astype(jnp.float32), r, atol=5e-2, rtol=5e-2), \
            "mismatch vs reference"

    print("KERNEL_OK")
</pallas_src>

<mosaic_0001>
module attributes {stable_mosaic.version = 11 : i64} {
  func.func @_bottleneck_kernel(%arg0: i32, %arg1: i32, %arg2: memref<1x8x8x8x128xbf16, #tpu.memory_space<vmem>>, %arg3: memref<1x128x32xbf16, #tpu.memory_space<vmem>>, %arg4: memref<1x1x32xf32, #tpu.memory_space<vmem>>, %arg5: memref<1x288x32xbf16, #tpu.memory_space<vmem>>, %arg6: memref<1x1x32xf32, #tpu.memory_space<vmem>>, %arg7: memref<1x32x128xbf16, #tpu.memory_space<vmem>>, %arg8: memref<1x1x128xf32, #tpu.memory_space<vmem>>, %arg9: memref<1x8x8x8x128xbf16, #tpu.memory_space<vmem>>, %arg10: memref<8x10x10x32xbf16, #tpu.memory_space<vmem>>) attributes {dimension_semantics = [#tpu.dimension_semantics<parallel>, #tpu.dimension_semantics<parallel>], iteration_bounds = array<i64: 2, 1>, scalar_prefetch = 0 : i64, scratch_operands = 1 : i64, tpu.core_type = #tpu.core_type<tc>, window_params = [{transform_indices = @transform_0, window_bounds = array<i64: 1, 8, 8, 8, 128>}, {transform_indices = @transform_1, window_bounds = array<i64: 1, 128, 32>}, {transform_indices = @transform_2, window_bounds = array<i64: 1, 1, 32>}, {transform_indices = @transform_3, window_bounds = array<i64: 1, 288, 32>}, {transform_indices = @transform_4, window_bounds = array<i64: 1, 1, 32>}, {transform_indices = @transform_5, window_bounds = array<i64: 1, 32, 128>}, {transform_indices = @transform_6, window_bounds = array<i64: 1, 1, 128>}, {transform_indices = @transform_7, window_bounds = array<i64: 1, 8, 8, 8, 128>}]} {
    %c0 = arith.constant 0 : index
    %c0_0 = arith.constant 0 : index
    %c0_1 = arith.constant 0 : index
    %c0_2 = arith.constant 0 : index
    %c0_3 = arith.constant 0 : index
    %0 = vector.load %arg2[%c0, %c0_0, %c0_1, %c0_2, %c0_3] : memref<1x8x8x8x128xbf16, #tpu.memory_space<vmem>>, vector<1x8x8x8x128xbf16>
    %1 = vector.shape_cast %0 : vector<1x8x8x8x128xbf16> to vector<8x8x8x128xbf16>
    %2 = vector.shape_cast %1 : vector<8x8x8x128xbf16> to vector<512x128xbf16>
    %c0_4 = arith.constant 0 : index
    %c0_5 = arith.constant 0 : index
    %c0_6 = arith.constant 0 : index
    %3 = vector.load %arg3[%c0_4, %c0_5, %c0_6] : memref<1x128x32xbf16, #tpu.memory_space<vmem>>, vector<1x128x32xbf16>
    %4 = vector.shape_cast %3 : vector<1x128x32xbf16> to vector<128x32xbf16>
    %cst = arith.constant dense<0.000000e+00> : vector<512x32xf32>
    %5 = tpu.matmul %2, %4, %cst {dimension_numbers = #tpu.dot_dimension_numbers<[1], [0], [0], [1], [0, 0, 1, 1], [], []>} : vector<512x128xbf16>, vector<128x32xbf16>, vector<512x32xf32> -> vector<512x32xf32>
    %c0_7 = arith.constant 0 : index
    %c0_8 = arith.constant 0 : index
    %c0_9 = arith.constant 0 : index
    %6 = vector.load %arg4[%c0_7, %c0_8, %c0_9] : memref<1x1x32xf32, #tpu.memory_space<vmem>>, vector<1x1x32xf32>
    %7 = vector.shape_cast %6 : vector<1x1x32xf32> to vector<1x32xf32>
    %8 = vector.broadcast %7 : vector<1x32xf32> to vector<512x32xf32>
    %9 = arith.addf %5, %8 : vector<512x32xf32>
    %cst_10 = arith.constant 0.000000e+00 : f32
    %10 = vector.broadcast %cst_10 : f32 to vector<512x32xf32>
    %11 = arith.maximumf %9, %10 : vector<512x32xf32>
    %cst_11 = arith.constant 0.000000e+00 : bf16
    %12 = vector.broadcast %cst_11 : bf16 to vector<8x1x10x32xbf16>
    %c0_12 = arith.constant 0 : index
    %c0_13 = arith.constant 0 : index
    %c0_14 = arith.constant 0 : index
    %c0_15 = arith.constant 0 : index
    %13 = vector.load %arg10[%c0_12, %c0_13, %c0_14, %c0_15] : memref<8x10x10x32xbf16, #tpu.memory_space<vmem>>, vector<8x1x10x32xbf16>
    tpu.vector_store %arg10[%c0_12, %c0_13, %c0_14, %c0_15], %12 {strides = array<i32>} : memref<8x10x10x32xbf16, #tpu.memory_space<vmem>>, vector<8x1x10x32xbf16>,
    %c0_16 = arith.constant 0 : index
    %c9 = arith.constant 9 : index
    %c0_17 = arith.constant 0 : index
    %c0_18 = arith.constant 0 : index
    %14 = vector.load %arg10[%c0_16, %c9, %c0_17, %c0_18] : memref<8x10x10x32xbf16, #tpu.memory_space<vmem>>, vector<8x1x10x32xbf16>
    tpu.vector_store %arg10[%c0_16, %c9, %c0_17, %c0_18], %12 {strides = array<i32>} : memref<8x10x10x32xbf16, #tpu.memory_space<vmem>>, vector<8x1x10x32xbf16>,
    %cst_19 = arith.constant 0.000000e+00 : bf16
    %15 = vector.broadcast %cst_19 : bf16 to vector<8x8x1x32xbf16>
    %c0_20 = arith.constant 0 : index
    %c1 = arith.constant 1 : index
    %c0_21 = arith.constant 0 : index
    %c0_22 = arith.constant 0 : index
    %16 = vector.load %arg10[%c0_20, %c1, %c0_21, %c0_22] : memref<8x10x10x32xbf16, #tpu.memory_space<vmem>>, vector<8x8x1x32xbf16>
    tpu.vector_store %arg10[%c0_20, %c1, %c0_21, %c0_22], %15 {strides = array<i32>} : memref<8x10x10x32xbf16, #tpu.memory_space<vmem>>, vector<8x8x1x32xbf16>,
    %c0_23 = arith.constant 0 : index
    %c1_24 = arith.constant 1 : index
    %c9_25 = arith.constant 9 : index
    %c0_26 = arith.constant 0 : index
    %17 = vector.load %arg10[%c0_23, %c1_24, %c9_25, %c0_26] : memref<8x10x10x32xbf16, #tpu.memory_space<vmem>>, vector<8x8x1x32xbf16>
    tpu.vector_store %arg10[%c0_23, %c1_24, %c9_25, %c0_26], %15 {strides = array<i32>} : memref<8x10x10x32xbf16, #tpu.memory_space<vmem>>, vector<8x8x1x32xbf16>,
    %18 = vector.shape_cast %11 : vector<512x32xf32> to vector<8x8x8x32xf32>
    %19 = arith.truncf %18 : vector<8x8x8x32xf32> to vector<8x8x8x32xbf16>
    %c0_27 = arith.constant 0 : index
    %c1_28 = arith.constant 1 : index
    %c1_29 = arith.constant 1 : index
    %c0_30 = arith.constant 0 : index
    %20 = vector.load %arg10[%c0_27, %c1_28, %c1_29, %c0_30] : memref<8x10x10x32xbf16, #tpu.memory_space<vmem>>, vector<8x8x8x32xbf16>
    tpu.vector_store %arg10[%c0_27, %c1_28, %c1_29, %c0_30], %19 {strides = array<i32>} : memref<8x10x10x32xbf16, #tpu.memory_space<vmem>>, vector<8x8x8x32xbf16>,
    %c0_31 = arith.constant 0 : index
    %c0_32 = arith.constant 0 : index
    %c0_33 = arith.constant 0 : index
    %c0_34 = arith.constant 0 : index
    %21 = vector.load %arg10[%c0_31, %c0_32, %c0_33, %c0_34] : memref<8x10x10x32xbf16, #tpu.memory_space<vmem>>, vector<8x8x8x32xbf16>
    %22 = vector.shape_cast %21 : vector<8x8x8x32xbf16> to vector<512x32xbf16>
    %c0_35 = arith.constant 0 : index
    %c0_36 = arith.constant 0 : index
    %c1_37 = arith.constant 1 : index
    %c0_38 = arith.constant 0 : index
    %23 = vector.load %arg10[%c0_35, %c0_36, %c1_37, %c0_38] : memref<8x10x10x32xbf16, #tpu.memory_space<vmem>>, vector<8x8x8x32xbf16>
    %24 = vector.shape_cast %23 : vector<8x8x8x32xbf16> to vector<512x32xbf16>
    %c0_39 = arith.constant 0 : index
    %c0_40 = arith.constant 0 : index
    %c2 = arith.constant 2 : index
    %c0_41 = arith.constant 0 : index
    %25 = vector.load %arg10[%c0_39, %c0_40, %c2, %c0_41] : memref<8x10x10x32xbf16, #tpu.memory_space<vmem>>, vector<8x8x8x32xbf16>
    %26 = vector.shape_cast %25 : vector<8x8x8x32xbf16> to vector<512x32xbf16>
    %c0_42 = arith.constant 0 : index
    %c1_43 = arith.constant 1 : index
    %c0_44 = arith.constant 0 : index
    %c0_45 = arith.constant 0 : index
    %27 = vector.load %arg10[%c0_42, %c1_43, %c0_44, %c0_45] : memref<8x10x10x32xbf16, #tpu.memory_space<vmem>>, vector<8x8x8x32xbf16>
    %28 = vector.shape_cast %27 : vector<8x8x8x32xbf16> to vector<512x32xbf16>
    %c0_46 = arith.constant 0 : index
    %c1_47 = arith.constant 1 : index
    %c1_48 = arith.constant 1 : index
    %c0_49 = arith.constant 0 : index
    %29 = vector.load %arg10[%c0_46, %c1_47, %c1_48, %c0_49] : memref<8x10x10x32xbf16, #tpu.memory_space<vmem>>, vector<8x8x8x32xbf16>
    %30 = vector.shape_cast %29 : vector<8x8x8x32xbf16> to vector<512x32xbf16>
    %c0_50 = arith.constant 0 : index
    %c1_51 = arith.constant 1 : index
    %c2_52 = arith.constant 2 : index
    %c0_53 = arith.constant 0 : index
    %31 = vector.load %arg10[%c0_50, %c1_51, %c2_52, %c0_53] : memref<8x10x10x32xbf16, #tpu.memory_space<vmem>>, vector<8x8x8x32xbf16>
    %32 = vector.shape_cast %31 : vector<8x8x8x32xbf16> to vector<512x32xbf16>
    %c0_54 = arith.constant 0 : index
    %c2_55 = arith.constant 2 : index
    %c0_56 = arith.constant 0 : index
    %c0_57 = arith.constant 0 : index
    %33 = vector.load %arg10[%c0_54, %c2_55, %c0_56, %c0_57] : memref<8x10x10x32xbf16, #tpu.memory_space<vmem>>, vector<8x8x8x32xbf16>
    %34 = vector.shape_cast %33 : vector<8x8x8x32xbf16> to vector<512x32xbf16>
    %c0_58 = arith.constant 0 : index
    %c2_59 = arith.constant 2 : index
    %c1_60 = arith.constant 1 : index
    %c0_61 = arith.constant 0 : index
    %35 = vector.load %arg10[%c0_58, %c2_59, %c1_60, %c0_61] : memref<8x10x10x32xbf16, #tpu.memory_space<vmem>>, vector<8x8x8x32xbf16>
    %36 = vector.shape_cast %35 : vector<8x8x8x32xbf16> to vector<512x32xbf16>
    %c0_62 = arith.constant 0 : index
    %c2_63 = arith.constant 2 : index
    %c2_64 = arith.constant 2 : index
    %c0_65 = arith.constant 0 : index
    %37 = vector.load %arg10[%c0_62, %c2_63, %c2_64, %c0_65] : memref<8x10x10x32xbf16, #tpu.memory_space<vmem>>, vector<8x8x8x32xbf16>
    %38 = vector.shape_cast %37 : vector<8x8x8x32xbf16> to vector<512x32xbf16>
    %39 = tpu.concatenate %22, %24, %26, %28, %30, %32, %34, %36, %38 in 1 : vector<512x32xbf16>, vector<512x32xbf16>, vector<512x32xbf16>, vector<512x32xbf16>, vector<512x32xbf16>, vector<512x32xbf16>, vector<512x32xbf16>, vector<512x32xbf16>, vector<512x32xbf16> -> vector<512x288xbf16>
    %c0_66 = arith.constant 0 : index
    %c0_67 = arith.constant 0 : index
    %c0_68 = arith.constant 0 : index
    %40 = vector.load %arg5[%c0_66, %c0_67, %c0_68] : memref<1x288x32xbf16, #tpu.memory_space<vmem>>, vector<1x288x32xbf16>
    %41 = vector.shape_cast %40 : vector<1x288x32xbf16> to vector<288x32xbf16>
    %cst_69 = arith.constant dense<0.000000e+00> : vector<512x32xf32>
    %42 = tpu.matmul %39, %41, %cst_69 {dimension_numbers = #tpu.dot_dimension_numbers<[1], [0], [0], [1], [0, 0, 1, 1], [], []>} : vector<512x288xbf16>, vector<288x32xbf16>, vector<512x32xf32> -> vector<512x32xf32>
    %c0_70 = arith.constant 0 : index
    %c0_71 = arith.constant 0 : index
    %c0_72 = arith.constant 0 : index
    %43 = vector.load %arg6[%c0_70, %c0_71, %c0_72] : memref<1x1x32xf32, #tpu.memory_space<vmem>>, vector<1x1x32xf32>
    %44 = vector.shape_cast %43 : vector<1x1x32xf32> to vector<1x32xf32>
    %45 = vector.broadcast %44 : vector<1x32xf32> to vector<512x32xf32>
    %46 = arith.addf %42, %45 : vector<512x32xf32>
    %cst_73 = arith.constant 0.000000e+00 : f32
    %47 = vector.broadcast %cst_73 : f32 to vector<512x32xf32>
    %48 = arith.maximumf %46, %47 : vector<512x32xf32>
    %49 = arith.truncf %48 : vector<512x32xf32> to vector<512x32xbf16>
    %c0_74 = arith.constant 0 : index
    %c0_75 = arith.constant 0 : index
    %c0_76 = arith.constant 0 : index
    %50 = vector.load %arg7[%c0_74, %c0_75, %c0_76] : memref<1x32x128xbf16, #tpu.memory_space<vmem>>, vector<1x32x128xbf16>
    %51 = vector.shape_cast %50 : vector<1x32x128xbf16> to vector<32x128xbf16>
    %cst_77 = arith.constant dense<0.000000e+00> : vector<512x128xf32>
    %52 = tpu.matmul %49, %51, %cst_77 {dimension_numbers = #tpu.dot_dimension_numbers<[1], [0], [0], [1], [0, 0, 1, 1], [], []>} : vector<512x32xbf16>, vector<32x128xbf16>, vector<512x128xf32> -> vector<512x128xf32>
    %c0_78 = arith.constant 0 : index
    %c0_79 = arith.constant 0 : index
    %c0_80 = arith.constant 0 : index
    %c0_81 = arith.constant 0 : index
    %c0_82 = arith.constant 0 : index
    %53 = vector.load %arg2[%c0_78, %c0_79, %c0_80, %c0_81, %c0_82] : memref<1x8x8x8x128xbf16, #tpu.memory_space<vmem>>, vector<1x8x8x8x128xbf16>
    %54 = vector.shape_cast %53 : vector<1x8x8x8x128xbf16> to vector<8x8x8x128xbf16>
    %55 = vector.shape_cast %54 : vector<8x8x8x128xbf16> to vector<512x128xbf16>
    %56 = arith.extf %55 : vector<512x128xbf16> to vector<512x128xf32>
    %c0_83 = arith.constant 0 : index
    %c0_84 = arith.constant 0 : index
    %c0_85 = arith.constant 0 : index
    %57 = vector.load %arg8[%c0_83, %c0_84, %c0_85] : memref<1x1x128xf32, #tpu.memory_space<vmem>>, vector<1x1x128xf32>
    %58 = vector.shape_cast %57 : vector<1x1x128xf32> to vector<1x128xf32>
    %59 = vector.broadcast %58 : vector<1x128xf32> to vector<512x128xf32>
    %60 = arith.addf %52, %59 : vector<512x128xf32>
    %61 = arith.addf %60, %56 : vector<512x128xf32>
    %cst_86 = arith.constant 0.000000e+00 : f32
    %62 = vector.broadcast %cst_86 : f32 to vector<512x128xf32>
    %63 = arith.maximumf %61, %62 : vector<512x128xf32>
    %64 = vector.shape_cast %63 : vector<512x128xf32> to vector<8x8x8x128xf32>
    %65 = arith.truncf %64 : vector<8x8x8x128xf32> to vector<8x8x8x128xbf16>
    %c0_87 = arith.constant 0 : index
    %c0_88 = arith.constant 0 : index
    %c0_89 = arith.constant 0 : index
    %c0_90 = arith.constant 0 : index
    %c0_91 = arith.constant 0 : index
    %66 = vector.load %arg9[%c0_87, %c0_88, %c0_89, %c0_90, %c0_91] : memref<1x8x8x8x128xbf16, #tpu.memory_space<vmem>>, vector<1x8x8x8x128xbf16>
    %67 = vector.shape_cast %66 : vector<1x8x8x8x128xbf16> to vector<8x8x8x128xbf16>
    %68 = vector.shape_cast %65 : vector<8x8x8x128xbf16> to vector<1x8x8x8x128xbf16>
    tpu.vector_store %arg9[%c0_87, %c0_88, %c0_89, %c0_90, %c0_91], %68 {strides = array<i32>} : memref<1x8x8x8x128xbf16, #tpu.memory_space<vmem>>, vector<1x8x8x8x128xbf16>,
    return
  }
  func.func @transform_0(%arg0: i32, %arg1: i32) -> (i32, i32, i32, i32, i32) {
    %c0_i32 = arith.constant 0 : i32
    %c0_i32_0 = arith.constant 0 : i32
    %c0_i32_1 = arith.constant 0 : i32
    %c0_i32_2 = arith.constant 0 : i32
    return %arg0, %arg1, %c0_i32, %c0_i32_0, %c0_i32_1 : i32, i32, i32, i32, i32
  }
  func.func @transform_1(%arg0: i32, %arg1: i32) -> (i32, i32, i32) {
    %c0_i32 = arith.constant 0 : i32
    %c0_i32_0 = arith.constant 0 : i32
    %c0_i32_1 = arith.constant 0 : i32
    return %arg0, %c0_i32, %c0_i32_0 : i32, i32, i32
  }
  func.func @transform_2(%arg0: i32, %arg1: i32) -> (i32, i32, i32) {
    %c0_i32 = arith.constant 0 : i32
    %c0_i32_0 = arith.constant 0 : i32
    %c0_i32_1 = arith.constant 0 : i32
    return %arg0, %c0_i32, %c0_i32_0 : i32, i32, i32
  }
  func.func @transform_3(%arg0: i32, %arg1: i32) -> (i32, i32, i32) {
    %c0_i32 = arith.constant 0 : i32
    %c0_i32_0 = arith.constant 0 : i32
    %c0_i32_1 = arith.constant 0 : i32
    return %arg0, %c0_i32, %c0_i32_0 : i32, i32, i32
  }
  func.func @transform_4(%arg0: i32, %arg1: i32) -> (i32, i32, i32) {
    %c0_i32 = arith.constant 0 : i32
    %c0_i32_0 = arith.constant 0 : i32
    %c0_i32_1 = arith.constant 0 : i32
    return %arg0, %c0_i32, %c0_i32_0 : i32, i32, i32
  }
  func.func @transform_5(%arg0: i32, %arg1: i32) -> (i32, i32, i32) {
    %c0_i32 = arith.constant 0 : i32
    %c0_i32_0 = arith.constant 0 : i32
    %c0_i32_1 = arith.constant 0 : i32
    return %arg0, %c0_i32, %c0_i32_0 : i32, i32, i32
  }
  func.func @transform_6(%arg0: i32, %arg1: i32) -> (i32, i32, i32) {
    %c0_i32 = arith.constant 0 : i32
    %c0_i32_0 = arith.constant 0 : i32
    %c0_i32_1 = arith.constant 0 : i32
    return %arg0, %c0_i32, %c0_i32_0 : i32, i32, i32
  }
  func.func @transform_7(%arg0: i32, %arg1: i32) -> (i32, i32, i32, i32, i32) {
    %c0_i32 = arith.constant 0 : i32
    %c0_i32_0 = arith.constant 0 : i32
    %c0_i32_1 = arith.constant 0 : i32
    %c0_i32_2 = arith.constant 0 : i32
    return %arg0, %arg1, %c0_i32, %c0_i32_0, %c0_i32_1 : i32, i32, i32, i32, i32
  }
}

</mosaic_0001>

<bundles_post_ra>
// kernel: tpu_custom_call.1
= control target key start
LH: loop header
LB: loop body
LE: loop exit
PB: predicated region body
PF: predicated region fallthrough
CT: control target
= control target key end

     0   :  { %12 = vsyncpa [#allocation4], 0  ;;  %s18281_s0 = inlined_call_operand.vmem [shape: bf16[2,8,8,8,128], index: 0, kind: input, shape index: {}]   ;;  %s18282_s1 = inlined_call_operand.vmem [shape: bf16[2,128,32], index: 1, kind: input, shape index: {}]   ;;  %s18283_s2 = inlined_call_operand.hbm [shape: f32[2,1,32], index: 2, kind: input, shape index: {}]   ;;  %s18284_s3 = inlined_call_operand.vmem [shape: bf16[2,288,32], index: 3, kind: input, shape index: {}]   ;;  %s18285_s4 = inlined_call_operand.vmem [shape: f32[2,1,32], index: 4, kind: input, shape index: {}]   ;;  %s18286_s5 = inlined_call_operand.vmem [shape: bf16[2,32,128], index: 5, kind: input, shape index: {}]   ;;  %s18287_s6 = inlined_call_operand.vmem [shape: f32[2,1,128], index: 6, kind: input, shape index: {}]   ;;  %s18288_s7 = inlined_call_operand.hbm [shape: bf16[2,8,8,8,128], index: 7, kind: output, shape index: {}]  }
   0x1   :  { %14 = vsyncpa [#allocation4 + $0x1], 0 }
   0x2   :  { %15 = vsyncpa [#allocation5], 0 }
   0x3   :  { %17 = vsyncpa [#allocation5 + $0x1], 0  ;;  %s13069_s24 = smov 0   ;;  %s13071_s25 = smov 0  }
   0x4   :  { %s13073_s26 = smov 0   ;;  %s13075_s27 = smov 0  }
   0x5   :  { %s13077_s28 = smov 0   ;;  %s13079_s29 = smov 0  }
   0x6 LB: > { %s11085_s30 = sadd.s32 4294967295, %s13020_s29   ;;  %s11086_s8 = sadd.s32 4294967294, %s13020_s29   ;;  %s13020_s29 = sphi %s13079_s29, %s23_s29   ;;  %s13016_s28 = sphi %s13077_s28, %s18880_s28   ;;  %s13012_s27 = sphi %s13075_s27, %s18879_s27   ;;  %s13008_s26 = sphi %s13073_s26, %s18878_s26   ;;  %s13004_s25 = sphi %s13071_s25, %s18877_s25   ;;  %s13000_s24 = sphi %s13069_s24, %s18876_s24  }
   0x7   : > { %s35_s9 = sadd.s32 1, %s13016_s28  ;;  %s96_s10 = sadd.s32 1, %s13008_s26 }
   0x8   : > { %p37_p0 = scmp.ge.s32.totalorder %s35_s9, 2  ;;  %p103_p1 = scmp.ne.s32.totalorder %s13008_s26, %s13004_s25 }
   0x9   : > { %p104_p2 = scmp.eq.s32.totalorder %s13020_s29, 0  ;;  %p109_p3 = scmp.ne.s32.totalorder %s13004_s25, %s13000_s24 }
   0xa   : > { %s18882_s9 = smov (%p37_p0, %s35_s9), 0  ;;  %p110_p5 = scmp.eq.s32.totalorder %s11085_s30, 0 }
   0xb   : > { %p13110_p4 = por %p104_p2, %p103_p1  ;;  %s93_s12 = ssub.s32 %s13016_s28, %s18882_s9 }
   0xc   : > { %p239_p6 = scmp.eq.s32.totalorder %s11085_s30, 1  ;;  %p94_p7 = scmp.eq.s32.totalorder %s93_s12, 0 }
   0xd   : > { %p13116_p8 = por %p110_p5, %p109_p3  ;;  %p245_p10 = scmp.eq.s32.totalorder %s11086_s8, 1 }
   0xe   : > { %p13120_p9 = por %p239_p6, %p103_p1  ;;  %p12546_p13 = scmp.lt.s32.totalorder %s13020_s29, 2 }
   0xf   : > { %s13125_s15 = scalar_select %p94_p7, %s13008_s26, %s96_s10  }
  0x10   : > { %p13127_p11 = por %p245_p10, %p109_p3  ;;  %s287_s17 = sand.u32 1, %s13008_s26  }
  0x11   : > { %s11089_s18 = sshll.u32 %s13016_s28, 4  ;;  %s290_s19 = scalar_lea.vmem [#allocation3], %s287_s17 }
  0x12   : > { %s18346_s16 = scalar_select %p13127_p11, 1, 0 }
  0x13   : > { %s297_s20 = sshll.u32 %s290_s19, 4  ;;  %s295_s23 = scalar_lea.hbm %s18283_s2, %s11089_s18  ;;  %s298_s20 = int_to_ptr.vmem [resolvable:$true] %s297_s20 }
  0x14   : > { %p13140_p0 = pnand %p12546_p13, %p13110_p4  ;;  %p11090_p1 = scmp.ge.s32.totalorder %s13020_s29, 1 }
  0x15   : > { %p330_p2 = scmp.lt.s32.totalorder %s13020_s29, 3  ;;  %s288_s8 = scalar_lea.sflag [#allocation4], %s287_s17 }
  0x16   : > { %p12914_p3 = pneg %p13140_p0  ;;  %s12925_s10 = scalar_lea.vmem %s298_s20, 16 }
  0x17   : > { %p12926_p5 = scmp.ne.s32.totalorder %s298_s20, %s12925_s10  ;;  %s13022_s12 = smov [#allocation3]  }
  0x18   : > { %s12930_s19 = sshll.u32 %s13022_s12, 4  ;;  %s12931_s19 = int_to_ptr.vmem [resolvable:$false] %s12930_s19 }
  0x19   : > { %p12928_p6 = pnand %p12926_p5, %p12914_p3  ;;  %s12932_s18 = scalar_lea.vmem %s12931_s19, 32 }
  0x1a   : > { %p12933_p10 = scmp.lt.s32.totalorder %s298_s20, %s12931_s19  ;;  %p12934_p12 = scmp.lt.s32.totalorder %s12932_s18, %s12925_s10 }
  0x1b   : > { %p12929_p7 = pneg %p12928_p6 }
  0x1c   : > { %p12935_p4 = por %p12934_p12, %p12933_p10 }
  0x1e   : > { %p12936_p13 = pnand %p12935_p4, %p12929_p7 }
  0x20   : > { %12939 = shalt.err (!%p12936_p13)
}
  0x21   : > { %12541 = dma.hbm_to_vmem [thread:$0]  (!%p13140_p0), %s295_s23, 16, %s298_s20, %s288_s8  }
  0x22   : > { %p331_p11 = pnand %p11090_p1, %p330_p2 }
  0x24   : > { %334 = sbr.rel (%p331_p11) target bundleno = 1680 (0x690), region = 48 }
  0x29   : > { %s13155_s11 = sand.u32 1, %s13004_s25  }
  0x2a   : > { %s337_s17 = scalar_lea.sflag [#allocation4], %s13155_s11  ;;  %s13159_s21 = scalar_lea.vmem [#allocation3], %s13155_s11 }
  0x2b   : > { %12991 = dma.done.wait (%p13116_p8), %s337_s17, 16  }
  0x2c   : > { %12993 = vsyncadd (%p13116_p8), %s337_s17, 4294967280  ;;  %p401_p12 = scmp.lt.s32.totalorder %s13012_s27, 1  ;;  %vm1116_vm0 = vcmask 253952   ;;  %vm1151_vm1 = vsmask.f32 256  ;;  %v18348_v32 = vmov 0 }
  0x2d   : > { %vm1345_vm2 = vsmask.f32 7938  ;;  %vm13220_vm3 = vmand %vm1116_vm0, %vm1151_vm1  ;;  %v1159_v33 = vld [vmem:[#allocation2 + $0x18] sm:$0x1]  ;;  %v1353_v34 = vld [vmem:[#allocation2 + $0x1c] sm:$0x1] }
  0x2e   : > { %s13167_s20 = scalar_select %p401_p12, %s13012_s27, 1  ;;  %v18349_v32 = vsel %vm13220_vm3, 4294967295, %v18348_v32  ;;  %v1160_v35 = vsel %vm13220_vm3, 0, %v1159_v33  ;;  %vm13228_vm4 = vmand %vm1116_vm0, %vm1345_vm2  ;;  %v18351_v36 = vmov 0  ;;  %v1255_v37 = vld [vmem:[#allocation2 + $0x158] sm:$0x1] }
  0x2f   : > { %18350 = vst [vmem:[#allocation9_spill] sm:$0xff] %v18349_v32  ;;  %v18352_v36 = vsel %vm13228_vm4, 4294967295, %v18351_v36  ;;  %v1449_v38 = vld [vmem:[#allocation2 + $0x15c] sm:$0x1]  ;;  %1161 = vst [vmem:[#allocation2 + $0x18] sm:$0x1] %v1160_v35 }
  0x30   : > { %s11776_s22 = sshll.u32 %s13167_s20, 6  ;;  %s11775_s13 = sshll.u32 %s13167_s20, 8  ;;  %18353 = vst [vmem:[#allocation10_spill] sm:$0xff] %v18352_v36  ;;  %v1354_v39 = vsel %vm13228_vm4, 0, %v1353_v34  ;;  %v1256_v40 = vsel %vm13220_vm3, 0, %v1255_v37  ;;  %v1450_v41 = vsel %vm13228_vm4, 0, %v1449_v38 }
  0x31   : > { %s13173_s8 = scalar_lea.vmem %s18282_s1, %s11776_s22  ;;  %s13182_s19 = scalar_lea.vmem %s18281_s0, %s11775_s13  ;;  %v1153_v42 = vld [vmem:[#allocation2 + $0x8] sm:$0x1]  ;;  %1355 = vst [vmem:[#allocation2 + $0x1c] sm:$0x1] %v1354_v39  ;;  %1257 = vst [vmem:[#allocation2 + $0x158] sm:$0x1] %v1256_v40 }
  0x32   : > { %v12601_v0 = vld [vmem:[%s13173_s8 + $0x38] sm:$0xff]   ;;  %v12602_v1 = vld [vmem:[%s13173_s8 + $0x30] sm:$0xff]   ;;  %v12603_v2 = vld [vmem:[%s13173_s8 + $0x28] sm:$0xff]   ;;  %s12533_s18 = smul.u32 144, %s13167_s20  ;;  %1451 = vst [vmem:[#allocation2 + $0x15c] sm:$0x1] %v1450_v41 }
  0x33   : > { %12301 = vmatprep.subr.bf16.mxu0 %v12601_v0  ;;  %12517 = vmatprep.subr.bf16.mxu1 %v12601_v0  ;;  %v12604_v3 = vld [vmem:[%s13173_s8 + $0x20] sm:$0xff]   ;;  %v12605_v6 = vld [vmem:[%s13173_s8 + $0x18] sm:$0xff]   ;;  %v12606_v7 = vld [vmem:[%s13173_s8 + $0x10] sm:$0xff]   ;;  %v1154_v43 = vsel %vm13220_vm3, 0, %v1153_v42  ;;  %vm1114_vm5 = vcmask 257024   ;;  %v18354_v54 = vmov 0 }
  0x34   : > { %12302 = vmatpush3.bf16.msra.mxu0 %v12601_v0  ;;  %12525 = vmatpush3.bf16.msra.mxu1 %v12601_v0  ;;  %v12609_v4 = vld [vmem:[%s13182_s19] sm:$0xff]   ;;  %v12607_v8 = vld [vmem:[%s13173_s8 + $0x8] sm:$0xff]   ;;  %v12613_v12 = vld [vmem:[%s13182_s19 + $0x10] sm:$0xff]   ;;  %s13198_s23 = scalar_lea.vmem %s18284_s3, %s12533_s18  ;;  %1155 = vst [vmem:[#allocation2 + $0x8] sm:$0x1] %v1154_v43  ;;  %s13024_s30 = smov 96  }
  0x35   : > { %12303 = vmatprep.subr.bf16.mxu0 %v12602_v1  ;;  %12518 = vmatprep.subr.bf16.mxu1 %v12602_v1  ;;  %v12610_v5 = vld [vmem:[%s13182_s19 + $0x80] sm:$0xff]   ;;  %v12611_v10 = vld [vmem:[%s13182_s19 + $0x8] sm:$0xff]   ;;  %v12614_v13 = vld [vmem:[%s13182_s19 + $0x90] sm:$0xff]   ;;  %vm4040_vm7 = vcmask 1042432   ;;  %vm4041_vm8 = vcmask 1046532   ;;  %vm8684_vm10 = vcmask 261120  }
  0x36   : > { %12317 = vmatprep.mubr.bf16.mxu0 %v12609_v4  ;;  %12349 = vmatprep.mubr.bf16.mxu1 %v12610_v5  ;;  %v12608_v9 = vld [vmem:[%s13173_s8] sm:$0xff]   ;;  %v12612_v11 = vld [vmem:[%s13182_s19 + $0x88] sm:$0xff]   ;;  %v12615_v14 = vld [vmem:[%s13182_s19 + $0x18] sm:$0xff]   ;;  %s13025_s8 = smov 64   ;;  %s13026_s13 = smov 32   ;;  %vm8781_vm14 = vcmask 523264  }
  0x37   : > { %v12616_v15 = vld [vmem:[%s13182_s19 + $0x98] sm:$0xff]   ;;  %v12617_v16 = vld [vmem:[%s13182_s19 + $0x20] sm:$0xff]   ;;  %v12618_v18 = vld [vmem:[%s13182_s19 + $0x28] sm:$0xff]   ;;  %vm2949_vm11 = vsmask.f32 3328  ;;  %vm8846_vm15 = vcmask 785408  }
  0x38   : > { %12304 = vmatpush3.bf16.msra.mxu0 %v12602_v1  ;;  %12526 = vmatpush3.bf16.msra.mxu1 %v12602_v1  ;;  %v12629_v17 = vld [vmem:[%s13182_s19 + $0xa0] sm:$0xff]   ;;  %v12630_v19 = vld [vmem:[%s13182_s19 + $0xa8] sm:$0xff]   ;;  %v12619_v20 = vld [vmem:[%s13182_s19 + $0x30] sm:$0xff]   ;;  %vm2950_vm12 = vsmask.f32 7440 }
  0x39   : > { %12305 = vmatprep.subr.bf16.mxu0 %v12603_v2  ;;  %12519 = vmatprep.subr.bf16.mxu1 %v12603_v2  ;;  %v12631_v21 = vld [vmem:[%s13182_s19 + $0xb0] sm:$0xff]   ;;  %v12620_v22 = vld [vmem:[%s13182_s19 + $0x38] sm:$0xff]   ;;  %v12621_v24 = vld [vmem:[%s13182_s19 + $0x40] sm:$0xff]  }
  0x3a   : > { %v12632_v23 = vld [vmem:[%s13182_s19 + $0xb8] sm:$0xff]   ;;  %v12622_v25 = vld [vmem:[%s13182_s19 + $0x48] sm:$0xff]   ;;  %v12623_v26 = vld [vmem:[%s13182_s19 + $0x50] sm:$0xff]  }
  0x3b   : > { %v12624_v27 = vld [vmem:[%s13182_s19 + $0x58] sm:$0xff]   ;;  %v12625_v28 = vld [vmem:[%s13182_s19 + $0x60] sm:$0xff]   ;;  %v12626_v29 = vld [vmem:[%s13182_s19 + $0x68] sm:$0xff]  }
  0x3c   : > { %12306 = vmatpush3.bf16.msra.mxu0 %v12603_v2  ;;  %12527 = vmatpush3.bf16.msra.mxu1 %v12603_v2  ;;  %v12627_v30 = vld [vmem:[%s13182_s19 + $0x70] sm:$0xff]   ;;  %v12628_v31 = vld [vmem:[%s13182_s19 + $0x78] sm:$0xff]   ;;  %v1347_v44 = vld [vmem:[#allocation2 + $0xc] sm:$0x1] }
  0x3d   : > { %12307 = vmatprep.subr.bf16.mxu0 %v12604_v3  ;;  %12520 = vmatprep.subr.bf16.mxu1 %v12604_v3  ;;  %v1249_v45 = vld [vmem:[#allocation2 + $0x148] sm:$0x1]  ;;  %v1348_v46 = vsel %vm13228_vm4, 0, %v1347_v44  ;;  %v1443_v48 = vld [vmem:[#allocation2 + $0x14c] sm:$0x1]  ;;  %vm13252_vm6 = vmand %vm1114_vm5, %vm1345_vm2 }
  0x3e   : > { %v1250_v47 = vsel %vm13220_vm3, 0, %v1249_v45  ;;  %1349 = vst [vmem:[#allocation2 + $0xc] sm:$0x1] %v1348_v46  ;;  %v1444_v49 = vsel %vm13228_vm4, 0, %v1443_v48  ;;  %v1162_v50 = vld [vmem:[#allocation2 + $0x20] sm:$0x1]  ;;  %vm13599_vm9 = vmor %vm4040_vm7, %vm4041_vm8 }
  0x3f   : > { %1251 = vst [vmem:[#allocation2 + $0x148] sm:$0x1] %v1250_v47  ;;  %v1356_v51 = vld [vmem:[#allocation2 + $0x24] sm:$0x1]  ;;  %1445 = vst [vmem:[#allocation2 + $0x14c] sm:$0x1] %v1444_v49 }
  0x40   : > { %12308 = vmatpush3.bf16.msra.mxu0 %v12604_v3  ;;  %12528 = vmatpush3.bf16.msra.mxu1 %v12604_v3  ;;  %v1163_v52 = vsel %vm13220_vm3, 0, %v1162_v50  ;;  %v1357_v53 = vsel %vm13228_vm4, 0, %v1356_v51  ;;  %v18355_v54 = vsel %vm13252_vm6, 4294967295, %v18354_v54  ;;  %v1258_v55 = vld [vmem:[#allocation2 + $0x160] sm:$0x1]  ;;  %vm13932_vm13 = vmor %vm2949_vm11, %vm2950_vm12 }
  0x41   : > { %12309 = vmatprep.subr.bf16.mxu0 %v12605_v6  ;;  %12521 = vmatprep.subr.bf16.mxu1 %v12605_v6  ;;  %1164 = vst [vmem:[#allocation2 + $0x20] sm:$0x1] %v1163_v52  ;;  %1358 = vst [vmem:[#allocation2 + $0x24] sm:$0x1] %v1357_v53  ;;  %v1452_v56 = vld [vmem:[#allocation2 + $0x164] sm:$0x1] }
  0x42   : > { %18356 = vst [vmem:[#allocation11_spill] sm:$0xff] %v18355_v54  ;;  %v1259_v57 = vsel %vm13220_vm3, 0, %v1258_v55  ;;  %v1453_v58 = vsel %vm13228_vm4, 0, %v1452_v56  ;;  %v1156_v59 = vld [vmem:[#allocation2 + $0x10] sm:$0x1] }
  0x43   : > { %1260 = vst [vmem:[#allocation2 + $0x160] sm:$0x1] %v1259_v57  ;;  %1454 = vst [vmem:[#allocation2 + $0x164] sm:$0x1] %v1453_v58  ;;  %v1350_v60 = vld [vmem:[#allocation2 + $0x14] sm:$0x1] }
  0x44   : > { %12310 = vmatpush3.bf16.msra.mxu0 %v12605_v6  ;;  %12529 = vmatpush3.bf16.msra.mxu1 %v12605_v6  ;;  %v1157_v61 = vsel %vm13220_vm3, 0, %v1156_v59  ;;  %v1351_v62 = vsel %vm13228_vm4, 0, %v1350_v60  ;;  %v1252_v63 = vld [vmem:[#allocation2 + $0x150] sm:$0x1]  ;;  %v1446_v0 = vld [vmem:[#allocation2 + $0x154] sm:$0x1] }
  0x45   : > { %12311 = vmatprep.subr.bf16.mxu0 %v12606_v7  ;;  %12522 = vmatprep.subr.bf16.mxu1 %v12606_v7  ;;  %1158 = vst [vmem:[#allocation2 + $0x10] sm:$0x1] %v1157_v61  ;;  %1352 = vst [vmem:[#allocation2 + $0x14] sm:$0x1] %v1351_v62  ;;  %v1253_v1 = vsel %vm13220_vm3, 0, %v1252_v63  ;;  %v1447_v2 = vsel %vm13228_vm4, 0, %v1446_v0 }
  0x46   : > { %1254 = vst [vmem:[#allocation2 + $0x150] sm:$0x1] %v1253_v1  ;;  %1448 = vst [vmem:[#allocation2 + $0x154] sm:$0x1] %v1447_v2  ;;  %v1165_v3 = vld [vmem:[#allocation2 + $0x28] sm:$0x1] }
  0x47   : > { %v1359_v4 = vld [vmem:[#allocation2 + $0x2c] sm:$0x1]  ;;  %v1166_v5 = vsel %vm13220_vm3, 0, %v1165_v3  ;;  %v1380_v34 = vld [vmem:[#allocation2 + $0x74] sm:$0x1]  ;;  %v18289_v3 = vmov 0  }
  0x48   : > { %12312 = vmatpush3.bf16.msra.mxu0 %v12606_v7  ;;  %12530 = vmatpush3.bf16.msra.mxu1 %v12606_v7  ;;  %v1360_v6 = vsel %vm13228_vm4, 0, %v1359_v4  ;;  %1167 = vst [vmem:[#allocation2 + $0x28] sm:$0x1] %v1166_v5  ;;  %v1261_v7 = vld [vmem:[#allocation2 + $0x168] sm:$0x1]  ;;  %v1381_v35 = vsel %vm13228_vm4, 0, %v1380_v34 }
  0x49   : > { %12313 = vmatprep.subr.bf16.mxu0 %v12607_v8  ;;  %12523 = vmatprep.subr.bf16.mxu1 %v12607_v8  ;;  %1361 = vst [vmem:[#allocation2 + $0x2c] sm:$0x1] %v1360_v6  ;;  %v1180_v37 = vld [vmem:[#allocation2 + $0x60] sm:$0x1]  ;;  %v1374_v38 = vld [vmem:[#allocation2 + $0x64] sm:$0x1] }
  0x4a   : > { %1382 = vst [vmem:[#allocation2 + $0x74] sm:$0x1] %v1381_v35  ;;  %v1181_v39 = vsel %vm13220_vm3, 0, %v1180_v37  ;;  %v1375_v40 = vsel %vm13228_vm4, 0, %v1374_v38  ;;  %v1177_v41 = vld [vmem:[#allocation2 + $0x58] sm:$0x1] }
  0x4b   : > { %v1371_v42 = vld [vmem:[#allocation2 + $0x5c] sm:$0x1]  ;;  %1182 = vst [vmem:[#allocation2 + $0x60] sm:$0x1] %v1181_v39  ;;  %1376 = vst [vmem:[#allocation2 + $0x64] sm:$0x1] %v1375_v40 }
  0x4c   : > { %12314 = vmatpush3.bf16.msra.mxu0 %v12607_v8  ;;  %12531 = vmatpush3.bf16.msra.mxu1 %v12607_v8  ;;  %v1455_v8 = vld [vmem:[#allocation2 + $0x16c] sm:$0x1]  ;;  %v1270_v43 = vld [vmem:[#allocation2 + $0x180] sm:$0x1]  ;;  %v1178_v44 = vsel %vm13220_vm3, 0, %v1177_v41  ;;  %v1372_v45 = vsel %vm13228_vm4, 0, %v1371_v42 }
  0x4d   : > { %12315 = vmatprep.subr.bf16.mxu0 %v12608_v9  ;;  %12524 = vmatprep.subr.bf16.mxu1 %v12608_v9  ;;  %v1271_v46 = vsel %vm13220_vm3, 0, %v1270_v43  ;;  %1179 = vst [vmem:[#allocation2 + $0x58] sm:$0x1] %v1178_v44  ;;  %1373 = vst [vmem:[#allocation2 + $0x5c] sm:$0x1] %v1372_v45  ;;  %v12634_v62 = vld [vmem:[%s13198_s23 + $0x88] sm:$0xff]  }
  0x4e   : > { %1272 = vst [vmem:[#allocation2 + $0x180] sm:$0x1] %v1271_v46  ;;  %v1464_v47 = vld [vmem:[#allocation2 + $0x184] sm:$0x1]  ;;  %v1264_v49 = vld [vmem:[#allocation2 + $0x170] sm:$0x1] }
  0x4f   : > { %v1465_v48 = vsel %vm13228_vm4, 0, %v1464_v47  ;;  %v1265_v50 = vsel %vm13220_vm3, 0, %v1264_v49  ;;  %v1458_v51 = vld [vmem:[#allocation2 + $0x174] sm:$0x1]  ;;  %v1189_v53 = vld [vmem:[#allocation2 + $0x78] sm:$0x1] }
  0x50   : > { %12316 = vmatpush3.bf16.msra.mxu0 %v12608_v9  ;;  %12532 = vmatpush3.bf16.msra.mxu1 %v12608_v9  ;;  %v1262_v9 = vsel %vm13220_vm3, 0, %v1261_v7  ;;  %1466 = vst [vmem:[#allocation2 + $0x184] sm:$0x1] %v1465_v48  ;;  %1266 = vst [vmem:[#allocation2 + $0x170] sm:$0x1] %v1265_v50  ;;  %v1459_v52 = vsel %vm13228_vm4, 0, %v1458_v51 }
  0x51   : > { %1263 = vst [vmem:[#allocation2 + $0x168] sm:$0x1] %v1262_v9  ;;  %1460 = vst [vmem:[#allocation2 + $0x174] sm:$0x1] %v1459_v52  ;;  %v1190_v55 = vsel %vm13220_vm3, 0, %v1189_v53  ;;  %12381 = vmatprep.subr.bf16.mxu0 %v12634_v62  ;;  %9446 = vmatprep.subr.bf16.mxu1 %v18289_v3 }
  0x52   : > { %1191 = vst [vmem:[#allocation2 + $0x78] sm:$0x1] %v1190_v55  ;;  %v1383_v56 = vld [vmem:[#allocation2 + $0x7c] sm:$0x1]  ;;  %v1195_v57 = vld [vmem:[#allocation2 + $0x88] sm:$0x1] }
  0x53   : > { %12318 = vmatmul.mubr.bf16.vlgmr.msra.gmra.mxu0 %v12611_v10  ;;  %12350 = vmatmul.mubr.bf16.vlgmr.msra.gmra.mxu1 %v12612_v11  ;;  %v1456_v10 = vsel %vm13228_vm4, 0, %v1455_v8  ;;  %v1171_v11 = vld [vmem:[#allocation2 + $0x38] sm:$0x1]  ;;  %v1389_v58 = vld [vmem:[#allocation2 + $0x8c] sm:$0x1]  ;;  %v1384_v59 = vsel %vm13228_vm4, 0, %v1383_v56 }
  0x54   : > { %12321 = vmatprep.mubr.bf16.mxu0 %v12613_v12  ;;  %12353 = vmatprep.mubr.bf16.mxu1 %v12614_v13  ;;  %v1365_v12 = vld [vmem:[#allocation2 + $0x3c] sm:$0x1]  ;;  %1457 = vst [vmem:[#allocation2 + $0x16c] sm:$0x1] %v1456_v10  ;;  %v1172_v13 = vsel %vm13220_vm3, 0, %v1171_v11  ;;  %v1196_v60 = vsel %vm13220_vm3, 0, %v1195_v57 }
  0x55   : > { %1173 = vst [vmem:[#allocation2 + $0x38] sm:$0x1] %v1172_v13  ;;  %v1390_v61 = vsel %vm13228_vm4, 0, %v1389_v58  ;;  %1385 = vst [vmem:[#allocation2 + $0x7c] sm:$0x1] %v1384_v59  ;;  %12382 = vmatpush3.bf16.msra.mxu0 %v12634_v62 }
  0x56   : > { %1197 = vst [vmem:[#allocation2 + $0x88] sm:$0x1] %v1196_v60  ;;  %1391 = vst [vmem:[#allocation2 + $0x8c] sm:$0x1] %v1390_v61  ;;  %v1198_v63 = vld [vmem:[#allocation2 + $0x90] sm:$0x1] }
  0x57   : > { %v1199_v0 = vsel %vm13220_vm3, 0, %v1198_v63  ;;  %v1392_v1 = vld [vmem:[#allocation2 + $0x94] sm:$0x1]  ;;  %1115 = vst.msk [vmem:[#allocation2] sm:$0xf] %vm1114_vm5, %v18289_v3 }
  0x58   : > { %1200 = vst [vmem:[#allocation2 + $0x90] sm:$0x1] %v1199_v0  ;;  %v1393_v2 = vsel %vm13228_vm4, 0, %v1392_v1  ;;  %1117 = vst.msk [vmem:[#allocation2 + $0x4] sm:$0x1] %vm1116_vm0, %v18289_v3 }
  0x59   : > { %1394 = vst [vmem:[#allocation2 + $0x94] sm:$0x1] %v1393_v2  ;;  %1118 = vst.msk [vmem:[#allocation2 + $0x50] sm:$0xf] %vm1114_vm5, %v18289_v3  ;;  %v1192_v4 = vld [vmem:[#allocation2 + $0x80] sm:$0x1] }
  0x5a   : > { %1119 = vst.msk [vmem:[#allocation2 + $0x54] sm:$0x1] %vm1116_vm0, %v18289_v3  ;;  %1121 = vst.msk [vmem:[#allocation2 + $0xa4] sm:$0x1] %vm1116_vm0, %v18289_v3  ;;  %v1386_v5 = vld [vmem:[#allocation2 + $0x84] sm:$0x1] }
  0x5b   : > { %12322 = vmatmul.mubr.bf16.gmra.mxu0 %v12615_v14  ;;  %12354 = vmatmul.mubr.bf16.gmra.mxu1 %v12616_v15  ;;  %v1366_v14 = vsel %vm13228_vm4, 0, %v1365_v12  ;;  %v1267_v15 = vld [vmem:[#allocation2 + $0x178] sm:$0x1]  ;;  %1120 = vst.msk [vmem:[#allocation2 + $0xa0] sm:$0xf] %vm1114_vm5, %v18289_v3  ;;  %v1193_v6 = vsel %vm13220_vm3, 0, %v1192_v4 }
  0x5c   : > { %12325 = vmatprep.mubr.bf16.mxu0 %v12617_v16  ;;  %12357 = vmatprep.mubr.bf16.mxu1 %v12629_v17  ;;  %1367 = vst [vmem:[#allocation2 + $0x3c] sm:$0x1] %v1366_v14  ;;  %v1461_v16 = vld [vmem:[#allocation2 + $0x17c] sm:$0x1]  ;;  %v1268_v17 = vsel %vm13220_vm3, 0, %v1267_v15  ;;  %v1387_v7 = vsel %vm13228_vm4, 0, %v1386_v5 }
  0x5d   : > { %1269 = vst [vmem:[#allocation2 + $0x178] sm:$0x1] %v1268_v17  ;;  %1122 = vst.msk [vmem:[#allocation2 + $0xf0] sm:$0xf] %vm1114_vm5, %v18289_v3  ;;  %v1207_v8 = vld [vmem:[#allocation2 + $0xb8] sm:$0x1] }
  0x5e   : > { %1123 = vst.msk [vmem:[#allocation2 + $0xf4] sm:$0x1] %vm1116_vm0, %v18289_v3  ;;  %1125 = vst.msk [vmem:[#allocation2 + $0x144] sm:$0x1] %vm1116_vm0, %v18289_v3  ;;  %v1401_v9 = vld [vmem:[#allocation2 + $0xbc] sm:$0x1] }
  0x5f   : > { %1124 = vst.msk [vmem:[#allocation2 + $0x140] sm:$0xf] %vm1114_vm5, %v18289_v3  ;;  %1126 = vst.msk [vmem:[#allocation2 + $0x190] sm:$0xf] %vm1114_vm5, %v18289_v3  ;;  %v1208_v10 = vsel %vm13220_vm3, 0, %v1207_v8  ;;  %v1402_v11 = vsel %vm13228_vm4, 0, %v1401_v9 }
  0x60   : > { %1127 = vst.msk [vmem:[#allocation2 + $0x194] sm:$0x1] %vm1116_vm0, %v18289_v3  ;;  %1129 = vst.msk [vmem:[#allocation2 + $0x1e4] sm:$0x1] %vm1116_vm0, %v18289_v3  ;;  %v12637_v12 = vld [vmem:[%s13198_s23 + $0x80] sm:$0xff]  }
  0x61   : > { %1128 = vst.msk [vmem:[#allocation2 + $0x1e0] sm:$0xf] %vm1114_vm5, %v18289_v3  ;;  %1130 = vst.msk [vmem:[#allocation2 + $0x230] sm:$0xf] %vm1114_vm5, %v18289_v3  ;;  %12383 = vmatprep.subr.bf16.mxu0 %v12637_v12  ;;  %v1201_v13 = vld [vmem:[#allocation2 + $0xa8] sm:$0x1] }
  0x62   : > { %1131 = vst.msk [vmem:[#allocation2 + $0x234] sm:$0x1] %vm1116_vm0, %v18289_v3  ;;  %1134 = vst.msk [vmem:[#allocation2 + $0x4c] sm:$0x1] %vm1116_vm0, %v18289_v3  ;;  %12384 = vmatpush3.bf16.msra.mxu0 %v12637_v12  ;;  %v1395_v14 = vld [vmem:[#allocation2 + $0xac] sm:$0x1] }
  0x63   : > { %12326 = vmatmul.mubr.bf16.gmra.mxu0 %v12618_v18  ;;  %12358 = vmatmul.mubr.bf16.gmra.mxu1 %v12630_v19  ;;  %v1462_v18 = vsel %vm13228_vm4, 0, %v1461_v16  ;;  %v1168_v19 = vld [vmem:[#allocation2 + $0x30] sm:$0x1]  ;;  %1133 = vst.msk [vmem:[#allocation2 + $0x48] sm:$0xf] %vm1114_vm5, %v18289_v3  ;;  %v1202_v15 = vsel %vm13220_vm3, 0, %v1201_v13 }
  0x64   : > { %12329 = vmatprep.mubr.bf16.mxu0 %v12619_v20  ;;  %12361 = vmatprep.mubr.bf16.mxu1 %v12631_v21  ;;  %v1362_v20 = vld [vmem:[#allocation2 + $0x34] sm:$0x1]  ;;  %1463 = vst [vmem:[#allocation2 + $0x17c] sm:$0x1] %v1462_v18  ;;  %v1174_v21 = vld [vmem:[#allocation2 + $0x40] sm:$0x1] }
  0x65   : > { %1135 = vst.msk [vmem:[#allocation2 + $0x98] sm:$0xf] %vm1114_vm5, %v18289_v3  ;;  %1137 = vst.msk [vmem:[#allocation2 + $0xe8] sm:$0xf] %vm1114_vm5, %v18289_v3  ;;  %v1396_v16 = vsel %vm13228_vm4, 0, %v1395_v14 }
  0x66   : > { %1136 = vst.msk [vmem:[#allocation2 + $0x9c] sm:$0x1] %vm1116_vm0, %v18289_v3  ;;  %1138 = vst.msk [vmem:[#allocation2 + $0xec] sm:$0x1] %vm1116_vm0, %v18289_v3  ;;  %v1210_v17 = vld [vmem:[#allocation2 + $0xc0] sm:$0x1] }
  0x67   : > { %1139 = vst.msk [vmem:[#allocation2 + $0x138] sm:$0xf] %vm1114_vm5, %v18289_v3  ;;  %1141 = vst.msk [vmem:[#allocation2 + $0x188] sm:$0xf] %vm1114_vm5, %v18289_v3  ;;  %v1404_v18 = vld [vmem:[#allocation2 + $0xc4] sm:$0x1] }
  0x68   : > { %1140 = vst.msk [vmem:[#allocation2 + $0x13c] sm:$0x1] %vm1116_vm0, %v18289_v3  ;;  %1142 = vst.msk [vmem:[#allocation2 + $0x18c] sm:$0x1] %vm1116_vm0, %v18289_v3  ;;  %v1222_v34 = vld [vmem:[#allocation2 + $0xe0] sm:$0x1] }
  0x69   : > { %1143 = vst.msk [vmem:[#allocation2 + $0x1d8] sm:$0xf] %vm1114_vm5, %v18289_v3  ;;  %1145 = vst.msk [vmem:[#allocation2 + $0x228] sm:$0xf] %vm1114_vm5, %v18289_v3  ;;  %v1416_v35 = vld [vmem:[#allocation2 + $0xe4] sm:$0x1] }
  0x6a   : > { %1144 = vst.msk [vmem:[#allocation2 + $0x1dc] sm:$0x1] %vm1116_vm0, %v18289_v3  ;;  %1146 = vst.msk [vmem:[#allocation2 + $0x22c] sm:$0x1] %vm1116_vm0, %v18289_v3  ;;  %v1223_v37 = vsel %vm13220_vm3, 0, %v1222_v34  ;;  %v1417_v38 = vsel %vm13228_vm4, 0, %v1416_v35 }
  0x6b   : > { %12330 = vmatmul.mubr.bf16.gmra.mxu0 %v12620_v22  ;;  %12362 = vmatmul.mubr.bf16.gmra.mxu1 %v12632_v23  ;;  %v1368_v22 = vld [vmem:[#allocation2 + $0x44] sm:$0x1]  ;;  %v1175_v23 = vsel %vm13220_vm3, 0, %v1174_v21  ;;  %1147 = vst.msk [vmem:[#allocation2 + $0x278] sm:$0xf] %vm1114_vm5, %v18289_v3 }
  0x6c   : > { %12333 = vmatprep.mubr.bf16.mxu0 %v12621_v24  ;;  %v1369_v24 = vsel %vm13228_vm4, 0, %v1368_v22  ;;  %1176 = vst [vmem:[#allocation2 + $0x40] sm:$0x1] %v1175_v23  ;;  %1148 = vst.msk [vmem:[#allocation2 + $0x27c] sm:$0x1] %vm1116_vm0, %v18289_v3 }
  0x6d   : > { %1370 = vst [vmem:[#allocation2 + $0x44] sm:$0x1] %v1369_v24  ;;  %1194 = vst [vmem:[#allocation2 + $0x80] sm:$0x1] %v1193_v6  ;;  %v1204_v21 = vld [vmem:[#allocation2 + $0xb0] sm:$0x1] }
  0x6e   : > { %1388 = vst [vmem:[#allocation2 + $0x84] sm:$0x1] %v1387_v7  ;;  %1209 = vst [vmem:[#allocation2 + $0xb8] sm:$0x1] %v1208_v10  ;;  %v1205_v22 = vsel %vm13220_vm3, 0, %v1204_v21 }
  0x6f   : > { %1403 = vst [vmem:[#allocation2 + $0xbc] sm:$0x1] %v1402_v11  ;;  %1203 = vst [vmem:[#allocation2 + $0xa8] sm:$0x1] %v1202_v15  ;;  %v1398_v23 = vld [vmem:[#allocation2 + $0xb4] sm:$0x1] }
  0x70   : > { %1397 = vst [vmem:[#allocation2 + $0xac] sm:$0x1] %v1396_v16  ;;  %1206 = vst [vmem:[#allocation2 + $0xb0] sm:$0x1] %v1205_v22  ;;  %v1399_v24 = vsel %vm13228_vm4, 0, %v1398_v23 }
  0x71   : > { %1400 = vst [vmem:[#allocation2 + $0xb4] sm:$0x1] %v1399_v24  ;;  %1224 = vst [vmem:[#allocation2 + $0xe0] sm:$0x1] %v1223_v37  ;;  %v1216_v39 = vld [vmem:[#allocation2 + $0xd0] sm:$0x1] }
  0x72   : > { %1418 = vst [vmem:[#allocation2 + $0xe4] sm:$0x1] %v1417_v38  ;;  %v1410_v40 = vld [vmem:[#allocation2 + $0xd4] sm:$0x1]  ;;  %v1217_v41 = vsel %vm13220_vm3, 0, %v1216_v39 }
  0x73   : > { %12334 = vmatmul.mubr.bf16.gmra.mxu0 %v12622_v25  ;;  %v1169_v25 = vsel %vm13220_vm3, 0, %v1168_v19  ;;  %v1211_v19 = vsel %vm13220_vm3, 0, %v1210_v17  ;;  %v1411_v42 = vsel %vm13228_vm4, 0, %v1410_v40  ;;  %1218 = vst [vmem:[#allocation2 + $0xd0] sm:$0x1] %v1217_v41 }
  0x74   : > { %12337 = vmatprep.mubr.bf16.mxu0 %v12623_v26  ;;  %v1363_v26 = vsel %vm13228_vm4, 0, %v1362_v20  ;;  %1170 = vst [vmem:[#allocation2 + $0x30] sm:$0x1] %v1169_v25  ;;  %v1405_v20 = vsel %vm13228_vm4, 0, %v1404_v18  ;;  %1212 = vst [vmem:[#allocation2 + $0xc0] sm:$0x1] %v1211_v19 }
  0x75   : > { %1364 = vst [vmem:[#allocation2 + $0x34] sm:$0x1] %v1363_v26  ;;  %1406 = vst [vmem:[#allocation2 + $0xc4] sm:$0x1] %v1405_v20  ;;  %v1219_v25 = vld [vmem:[#allocation2 + $0xd8] sm:$0x1] }
  0x76   : > { %v1220_v26 = vsel %vm13220_vm3, 0, %v1219_v25  ;;  %1412 = vst [vmem:[#allocation2 + $0xd4] sm:$0x1] %v1411_v42  ;;  %v1231_v43 = vld [vmem:[#allocation2 + $0x108] sm:$0x1] }
  0x77   : > { %1221 = vst [vmem:[#allocation2 + $0xd8] sm:$0x1] %v1220_v26  ;;  %v1232_v44 = vsel %vm13220_vm3, 0, %v1231_v43  ;;  %v1425_v45 = vld [vmem:[#allocation2 + $0x10c] sm:$0x1] }
  0x78   : > { %1233 = vst [vmem:[#allocation2 + $0x108] sm:$0x1] %v1232_v44  ;;  %v1426_v46 = vsel %vm13228_vm4, 0, %v1425_v45  ;;  %v1225_v47 = vld [vmem:[#allocation2 + $0xf8] sm:$0x1] }
  0x79   : > { %1427 = vst [vmem:[#allocation2 + $0x10c] sm:$0x1] %v1426_v46  ;;  %v1419_v48 = vld [vmem:[#allocation2 + $0xfc] sm:$0x1]  ;;  %v1226_v49 = vsel %vm13220_vm3, 0, %v1225_v47 }
  0x7a   : > { %v1420_v50 = vsel %vm13228_vm4, 0, %v1419_v48  ;;  %1227 = vst [vmem:[#allocation2 + $0xf8] sm:$0x1] %v1226_v49  ;;  %v13440_v51 = vld [vmem:[%s13159_s21] ss:$0 sm:$0xff] }
  0x7b   : > { %12338 = vmatmul.mubr.bf16.gmra.mxu0 %v12624_v27  ;;  %v1183_v27 = vld [vmem:[#allocation2 + $0x68] sm:$0x1]  ;;  %1421 = vst [vmem:[#allocation2 + $0xfc] sm:$0x1] %v1420_v50  ;;  %v1234_v55 = vld [vmem:[#allocation2 + $0x110] sm:$0x1] }
  0x7c   : > { %12341 = vmatprep.mubr.bf16.mxu0 %v12625_v28  ;;  %v1184_v28 = vsel %vm13220_vm3, 0, %v1183_v27  ;;  %v1413_v27 = vld [vmem:[#allocation2 + $0xdc] sm:$0x1]  ;;  %v1428_v56 = vld [vmem:[#allocation2 + $0x114] sm:$0x1]  ;;  %v1235_v59 = vsel %vm13220_vm3, 0, %v1234_v55 }
  0x7d   : > { %1185 = vst [vmem:[#allocation2 + $0x68] sm:$0x1] %v1184_v28  ;;  %v1213_v28 = vld [vmem:[#allocation2 + $0xc8] sm:$0x1]  ;;  %v1429_v60 = vsel %vm13228_vm4, 0, %v1428_v56 }
  0x7e   : > { %1236 = vst [vmem:[#allocation2 + $0x110] sm:$0x1] %v1235_v59  ;;  %1430 = vst [vmem:[#allocation2 + $0x114] sm:$0x1] %v1429_v60  ;;  %v2449_v18 = vld [vmem:[#allocation2 + $0x18] sm:$0xf] }
  0x7f   : > { %v2452_v25 = vld [vmem:[#allocation2 + $0x1c] sm:$0x1]  ;;  %v2437_v44 = vld [vmem:[#allocation2 + $0x8] sm:$0xf]  ;;  %v2440_v55 = vld [vmem:[#allocation2 + $0xc] sm:$0x1] }
  0x80   : > { %v2629_v56 = vld [vmem:[#allocation2 + $0x148] sm:$0xf] }
  0x83   : > { %12342 = vmatmul.mubr.bf16.gmra.mxu0 %v12626_v29  ;;  %v1377_v29 = vld [vmem:[#allocation2 + $0x6c] sm:$0x1] }
  0x84   : > { %12345 = vmatprep.mubr.bf16.mxu0 %v12627_v30  ;;  %v1186_v30 = vld [vmem:[#allocation2 + $0x70] sm:$0x1] }
  0x85   : > { %v1187_v33 = vsel %vm13220_vm3, 0, %v1186_v30  ;;  %v1214_v30 = vsel %vm13220_vm3, 0, %v1213_v28 }
  0x86   : > { %1188 = vst [vmem:[#allocation2 + $0x70] sm:$0x1] %v1187_v33  ;;  %1215 = vst [vmem:[#allocation2 + $0xc8] sm:$0x1] %v1214_v30  ;;  %v2644_v30 = vld [vmem:[#allocation2 + $0x15c] sm:$0x1] }
  0x8b   : > { %12346 = vmatmul.mubr.bf16.gmra.mxu0 %v12628_v31  ;;  %v1378_v31 = vsel %vm13228_vm4, 0, %v1377_v29  ;;  %v1414_v29 = vsel %vm13228_vm4, 0, %v1413_v27  ;;  %v2641_v27 = vld [vmem:[#allocation2 + $0x158] sm:$0xf] }
  0x8c   : > { %1379 = vst [vmem:[#allocation2 + $0x6c] sm:$0x1] %v1378_v31  ;;  %v1407_v31 = vld [vmem:[#allocation2 + $0xcc] sm:$0x1]  ;;  %1415 = vst [vmem:[#allocation2 + $0xdc] sm:$0x1] %v1414_v29 }
  0x8d   : > { %v1408_v33 = vsel %vm13228_vm4, 0, %v1407_v31 }
  0x8e   : > { %1409 = vst [vmem:[#allocation2 + $0xcc] sm:$0x1] %v1408_v33 }
 0x113   : > { %v12319_v52 = vpop.f32.mrf.mxu0  ;;  %v12351_v53 = vpop.f32.mrf.mxu1 }
 0x114   : > { %v804_v57 = vadd.f32 %v12319_v52, %v13440_v51  ;;  %v932_v58 = vadd.f32 %v12351_v53, %v13440_v51 }
 0x115   : > { %v795_v61 = vpop.f32.mrf.mxu0  ;;  %v923_v62 = vpop.f32.mrf.mxu1 }
 0x116   : > { %v1052_v63 = vmax.f32 %v804_v57, 0.0  ;;  %v1084_v0 = vmax.f32 %v932_v58, 0.0  ;;  %v796_v1 = vadd.f32 %v13440_v51, %v795_v61  ;;  %v924_v2 = vadd.f32 %v13440_v51, %v923_v62  ;;  %v2632_v57 = vld [vmem:[#allocation2 + $0x14c] sm:$0x1] }
 0x117   : > { %v12320_v4 = vpop.f32.mrf.mxu0  ;;  %v12352_v5 = vpop.f32.mrf.mxu1 }
 0x118   : > { %v11780_v6 = vpack.c.bf16 %v1052_v63, %v1052_v63  ;;  %v11812_v7 = vpack.c.bf16 %v1084_v0, %v1084_v0  ;;  %v1050_v8 = vmax.f32 %v796_v1, 0.0  ;;  %v1082_v9 = vmax.f32 %v924_v2, 0.0 }
 0x119   : > { %v807_v10 = vadd.f32 %v12320_v4, %v13440_v51  ;;  %v935_v11 = vadd.f32 %v12352_v5, %v13440_v51  ;;  %v798_v12 = vpop.f32.mrf.mxu0  ;;  %v926_v13 = vpop.f32.mrf.mxu1 }
 0x11a   : > { %v1812_v14 = vshrl.u32 %v11780_v6, 16  ;;  %v1815_v15 = vshll.u32 %v11780_v6, 16  ;;  %v2068_v16 = vshrl.u32 %v11812_v7, 16  ;;  %v2071_v17 = vshll.u32 %v11812_v7, 16 }
 0x11b   : > { %v11778_v19 = vpack.c.bf16 %v1050_v8, %v1050_v8  ;;  %v11810_v20 = vpack.c.bf16 %v1082_v9, %v1082_v9  ;;  %v1053_v21 = vmax.f32 %v807_v10, 0.0  ;;  %v1085_v22 = vmax.f32 %v935_v11, 0.0  ;;  %v12323_v23 = vpop.f32.mrf.mxu0  ;;  %v12355_v42 = vpop.f32.mrf.mxu1  ;;  %v2455_v10 = vld [vmem:[#allocation2 + $0x20] sm:$0xf] }
 0x11c   : > { %v1814_v24 = vrot.slane %v1812_v14, 7  ;;  %v2070_v26 = vrot.slane %v2068_v16, 7  ;;  %v13453_v28 = vadd.f32 %v13440_v51, %v798_v12  ;;  %v13456_v29 = vadd.f32 %v13440_v51, %v926_v13  ;;  %v2458_v14 = vld [vmem:[#allocation2 + $0x24] sm:$0x1] }
 0x11d   : > { %v1796_v31 = vshrl.u32 %v11778_v19, 16  ;;  %v1799_v33 = vshll.u32 %v11778_v19, 16  ;;  %v2052_v34 = vshrl.u32 %v11810_v20, 16  ;;  %v2055_v35 = vshll.u32 %v11810_v20, 16  ;;  %v811_v37 = vpop.f32.mrf.mxu0  ;;  %v939_v2 = vpop.f32.mrf.mxu1  ;;  %v2650_v16 = vld [vmem:[#allocation2 + $0x164] sm:$0x1] }
 0x11e   : > { %v1817_v38 = vor.u32 %v1815_v15, %v1814_v24  ;;  %v1818_v39 = vrot.slane %v1814_v24, 4  ;;  %v2073_v40 = vor.u32 %v2071_v17, %v2070_v26  ;;  %v2074_v41 = vrot.slane %v2070_v26, 4  ;;  %v2647_v15 = vld [vmem:[#allocation2 + $0x160] sm:$0xf] }
 0x11f   : > { %v1798_v43 = vrot.slane %v1796_v31, 7  ;;  %v2054_v45 = vrot.slane %v2052_v34, 7  ;;  %v11781_v46 = vpack.c.bf16 %v1053_v21, %v1053_v21  ;;  %v11813_v47 = vpack.c.bf16 %v1085_v22, %v1085_v22  ;;  %v13458_v48 = vpop.f32.mrf.mxu0 }
 0x120   : > { %v2450_v49 = vsel %vm13252_vm6, %v1817_v38, %v2449_v18  ;;  %v2453_v50 = vsel %vm13220_vm3, %v1818_v39, %v2452_v25  ;;  %v2642_v52 = vsel %vm13252_vm6, %v2073_v40, %v2641_v27  ;;  %v2645_v53 = vsel %vm13220_vm3, %v2074_v41, %v2644_v30  ;;  %v2443_v40 = vld [vmem:[#allocation2 + $0x10] sm:$0xf] }
 0x121   : > { %2451 = vst [vmem:[#allocation2 + $0x18] sm:$0xf] %v2450_v49  ;;  %2454 = vst [vmem:[#allocation2 + $0x1c] sm:$0x1] %v2453_v50  ;;  %v1801_v58 = vor.u32 %v1799_v33, %v1798_v43  ;;  %v1802_v59 = vrot.slane %v1798_v43, 4  ;;  %v2057_v60 = vor.u32 %v2055_v35, %v2054_v45  ;;  %v2058_v61 = vrot.slane %v2054_v45, 4  ;;  %v814_v8 = vpop.f32.mrf.mxu0 }
 0x122   : > { %2643 = vst [vmem:[#allocation2 + $0x158] sm:$0xf] %v2642_v52  ;;  %2646 = vst [vmem:[#allocation2 + $0x15c] sm:$0x1] %v2645_v53  ;;  %v1820_v62 = vshrl.u32 %v11781_v46, 16  ;;  %v1823_v63 = vshll.u32 %v11781_v46, 16  ;;  %v820_v17 = vadd.f32 %v12323_v23, %v13440_v51  ;;  %v948_v18 = vadd.f32 %v12355_v42, %v13440_v51 }
 0x123   : > { %v2076_v0 = vshrl.u32 %v11813_v47, 16  ;;  %v2079_v1 = vshll.u32 %v11813_v47, 16  ;;  %v2438_v4 = vsel %vm13252_vm6, %v1801_v58, %v2437_v44  ;;  %v2441_v5 = vsel %vm13220_vm3, %v1802_v59, %v2440_v55  ;;  %v2446_v46 = vld [vmem:[#allocation2 + $0x14] sm:$0x1]  ;;  %v2635_v49 = vld [vmem:[#allocation2 + $0x150] sm:$0xf] }
 0x124   : > { %v2630_v6 = vsel %vm13252_vm6, %v2057_v60, %v2629_v56  ;;  %v2633_v7 = vsel %vm13220_vm3, %v2058_v61, %v2632_v57  ;;  %2439 = vst [vmem:[#allocation2 + $0x8] sm:$0xf] %v2438_v4  ;;  %2442 = vst [vmem:[#allocation2 + $0xc] sm:$0x1] %v2441_v5  ;;  %v1822_v9 = vrot.slane %v1820_v62, 7  ;;  %v1051_v12 = vmax.f32 %v13453_v28, 0.0 }
 0x125   : > { %2631 = vst [vmem:[#allocation2 + $0x148] sm:$0xf] %v2630_v6  ;;  %2634 = vst [vmem:[#allocation2 + $0x14c] sm:$0x1] %v2633_v7  ;;  %v2078_v11 = vrot.slane %v2076_v0, 7  ;;  %v1083_v13 = vmax.f32 %v13456_v29, 0.0  ;;  %v812_v19 = vadd.f32 %v13440_v51, %v811_v37  ;;  %v940_v20 = vadd.f32 %v13440_v51, %v939_v2  ;;  %v13482_v29 = vpop.f32.mrf.mxu0 }
 0x126   : > { %v1825_v21 = vor.u32 %v1823_v63, %v1822_v9  ;;  %v1826_v22 = vrot.slane %v1822_v9, 4  ;;  %v11779_v26 = vpack.c.bf16 %v1051_v12, %v1051_v12  ;;  %v1056_v28 = vmax.f32 %v820_v17, 0.0  ;;  %v2638_v55 = vld [vmem:[#allocation2 + $0x154] sm:$0x1]  ;;  %v2476_v9 = vld [vmem:[#allocation2 + $0x3c] sm:$0x1] }
 0x127   : > { %v2081_v24 = vor.u32 %v2079_v1, %v2078_v11  ;;  %v2082_v25 = vrot.slane %v2078_v11, 4  ;;  %v11811_v27 = vpack.c.bf16 %v1083_v13, %v1083_v13  ;;  %v1088_v30 = vmax.f32 %v948_v18, 0.0  ;;  %v827_v53 = vpop.f32.mrf.mxu0  ;;  %v2473_v1 = vld [vmem:[#allocation2 + $0x38] sm:$0xf]  ;;  %v2668_v11 = vld [vmem:[#allocation2 + $0x17c] sm:$0x1] }
 0x128   : > { %v2456_v31 = vsel %vm13252_vm6, %v1825_v21, %v2455_v10  ;;  %v2459_v23 = vsel %vm13220_vm3, %v1826_v22, %v2458_v14  ;;  %v1804_v35 = vshrl.u32 %v11779_v26, 16  ;;  %v1807_v37 = vshll.u32 %v11779_v26, 16  ;;  %v2665_v10 = vld [vmem:[#allocation2 + $0x178] sm:$0xf] }
 0x129   : > { %v2648_v33 = vsel %vm13252_vm6, %v2081_v24, %v2647_v15  ;;  %v2651_v34 = vsel %vm13220_vm3, %v2082_v25, %v2650_v16  ;;  %2457 = vst [vmem:[#allocation2 + $0x20] sm:$0xf] %v2456_v31  ;;  %2460 = vst [vmem:[#allocation2 + $0x24] sm:$0x1] %v2459_v23  ;;  %v2060_v38 = vshrl.u32 %v11811_v27, 16  ;;  %v2063_v39 = vshll.u32 %v11811_v27, 16  ;;  %v12328_v12 = vpop.f32.mrf.mxu0 }
 0x12a   : > { %2649 = vst [vmem:[#allocation2 + $0x160] sm:$0xf] %v2648_v33  ;;  %2652 = vst [vmem:[#allocation2 + $0x164] sm:$0x1] %v2651_v34  ;;  %v11784_v41 = vpack.c.bf16 %v1056_v28, %v1056_v28  ;;  %v11816_v42 = vpack.c.bf16 %v1088_v30, %v1088_v30  ;;  %v1054_v43 = vmax.f32 %v812_v19, 0.0  ;;  %v1086_v44 = vmax.f32 %v940_v20, 0.0 }
 0x12b   : > { %v1806_v45 = vrot.slane %v1804_v35, 7  ;;  %v2062_v47 = vrot.slane %v2060_v38, 7  ;;  %v13494_v50 = vadd.f32 %v13458_v48, %v13440_v51  ;;  %v13497_v52 = vadd.f32 %v13440_v51, %v814_v8  ;;  %v2461_v27 = vld [vmem:[#allocation2 + $0x28] sm:$0xf]  ;;  %v830_v23 = vpop.f32.mrf.mxu0  ;;  %v2464_v33 = vld [vmem:[#allocation2 + $0x2c] sm:$0x1] }
 0x12c   : > { %v1844_v56 = vshrl.u32 %v11784_v41, 16  ;;  %v1847_v57 = vshll.u32 %v11784_v41, 16  ;;  %v2100_v58 = vshrl.u32 %v11816_v42, 16  ;;  %v2103_v59 = vshll.u32 %v11816_v42, 16  ;;  %v2653_v34 = vld [vmem:[#allocation2 + $0x168] sm:$0xf] }
 0x12d   : > { %v1809_v60 = vor.u32 %v1807_v37, %v1806_v45  ;;  %v1810_v61 = vrot.slane %v1806_v45, 4  ;;  %v2065_v62 = vor.u32 %v2063_v39, %v2062_v47  ;;  %v2066_v63 = vrot.slane %v2062_v47, 4  ;;  %v2656_v35 = vld [vmem:[#allocation2 + $0x16c] sm:$0x1]  ;;  %v6829_v54 = vld [vmem:[#allocation2 + $0x158] sm:$0xe] }
 0x12e   : > { %v1846_v0 = vrot.slane %v1844_v56, 7  ;;  %v2102_v2 = vrot.slane %v2100_v58, 7  ;;  %v11782_v4 = vpack.c.bf16 %v1054_v43, %v1054_v43  ;;  %v11814_v5 = vpack.c.bf16 %v1086_v44, %v1086_v44 }
 0x12f   : > { %v2444_v48 = vsel %vm13252_vm6, %v1809_v60, %v2443_v40  ;;  %v2447_v6 = vsel %vm13220_vm3, %v1810_v61, %v2446_v46  ;;  %v2636_v7 = vsel %vm13252_vm6, %v2065_v62, %v2635_v49  ;;  %v2639_v8 = vsel %vm13220_vm3, %v2066_v63, %v2638_v55 }
 0x130   : > { %2445 = vst [vmem:[#allocation2 + $0x10] sm:$0xf] %v2444_v48  ;;  %2448 = vst [vmem:[#allocation2 + $0x14] sm:$0x1] %v2447_v6  ;;  %v1849_v13 = vor.u32 %v1847_v57, %v1846_v0  ;;  %v1850_v14 = vrot.slane %v1846_v0, 4  ;;  %v2105_v15 = vor.u32 %v2103_v59, %v2102_v2  ;;  %v2106_v16 = vrot.slane %v2102_v2, 4  ;;  %v12356_v0 = vpop.f32.mrf.mxu1 }
 0x131   : > { %2637 = vst [vmem:[#allocation2 + $0x150] sm:$0xf] %v2636_v7  ;;  %2640 = vst [vmem:[#allocation2 + $0x154] sm:$0x1] %v2639_v8  ;;  %v1828_v17 = vshrl.u32 %v11782_v4, 16  ;;  %v1831_v18 = vshll.u32 %v11782_v4, 16  ;;  %v836_v37 = vadd.f32 %v13482_v29, %v13440_v51  ;;  %v828_v38 = vadd.f32 %v13440_v51, %v827_v53 }
 0x132   : > { %v2084_v19 = vshrl.u32 %v11814_v5, 16  ;;  %v2087_v20 = vshll.u32 %v11814_v5, 16  ;;  %v2474_v21 = vsel %vm13252_vm6, %v1849_v13, %v2473_v1  ;;  %v2477_v22 = vsel %vm13220_vm3, %v1850_v14, %v2476_v9  ;;  %v2479_v59 = vld [vmem:[#allocation2 + $0x40] sm:$0xf]  ;;  %v12331_v1 = vpop.f32.mrf.mxu0  ;;  %v2482_v4 = vld [vmem:[#allocation2 + $0x44] sm:$0x1] }
 0x133   : > { %v2666_v24 = vsel %vm13252_vm6, %v2105_v15, %v2665_v10  ;;  %v2669_v25 = vsel %vm13220_vm3, %v2106_v16, %v2668_v11  ;;  %2475 = vst [vmem:[#allocation2 + $0x38] sm:$0xf] %v2474_v21  ;;  %2478 = vst [vmem:[#allocation2 + $0x3c] sm:$0x1] %v2477_v22  ;;  %v1830_v26 = vrot.slane %v1828_v17, 7  ;;  %v1057_v30 = vmax.f32 %v13494_v50, 0.0 }
 0x134   : > { %2667 = vst [vmem:[#allocation2 + $0x178] sm:$0xf] %v2666_v24  ;;  %2670 = vst [vmem:[#allocation2 + $0x17c] sm:$0x1] %v2669_v25  ;;  %v2086_v28 = vrot.slane %v2084_v19, 7  ;;  %v1055_v31 = vmax.f32 %v13497_v52, 0.0  ;;  %v839_v39 = vadd.f32 %v12328_v12, %v13440_v51  ;;  %v831_v40 = vadd.f32 %v13440_v51, %v830_v23 }
 0x135   : > { %v1833_v41 = vor.u32 %v1831_v18, %v1830_v26  ;;  %v1834_v42 = vrot.slane %v1830_v26, 4  ;;  %v11785_v45 = vpack.c.bf16 %v1057_v30, %v1057_v30  ;;  %v1060_v47 = vmax.f32 %v836_v37, 0.0  ;;  %v2467_v48 = vld [vmem:[#allocation2 + $0x30] sm:$0xf]  ;;  %v2470_v8 = vld [vmem:[#allocation2 + $0x34] sm:$0x1] }
 0x136   : > { %v2089_v43 = vor.u32 %v2087_v20, %v2086_v28  ;;  %v2090_v44 = vrot.slane %v2086_v28, 4  ;;  %v11783_v46 = vpack.c.bf16 %v1055_v31, %v1055_v31  ;;  %v1058_v49 = vmax.f32 %v828_v38, 0.0  ;;  %v2497_v18 = vld [vmem:[#allocation2 + $0x68] sm:$0xf]  ;;  %v2485_v28 = vld [vmem:[#allocation2 + $0x58] sm:$0xf] }
 0x137   : > { %v2462_v50 = vsel %vm13252_vm6, %v1833_v41, %v2461_v27  ;;  %v2465_v29 = vsel %vm13220_vm3, %v1834_v42, %v2464_v33  ;;  %v1852_v55 = vshrl.u32 %v11785_v45, 16  ;;  %v1855_v56 = vshll.u32 %v11785_v45, 16  ;;  %v2500_v27 = vld [vmem:[#allocation2 + $0x6c] sm:$0x1]  ;;  %v2488_v30 = vld [vmem:[#allocation2 + $0x5c] sm:$0x1]  ;;  %v843_v41 = vpop.f32.mrf.mxu0 }
 0x138   : > { %v2654_v52 = vsel %vm13252_vm6, %v2089_v43, %v2653_v34  ;;  %v2657_v53 = vsel %vm13220_vm3, %v2090_v44, %v2656_v35  ;;  %2463 = vst [vmem:[#allocation2 + $0x28] sm:$0xf] %v2462_v50  ;;  %2466 = vst [vmem:[#allocation2 + $0x2c] sm:$0x1] %v2465_v29  ;;  %v1836_v57 = vshrl.u32 %v11783_v46, 16  ;;  %v1839_v58 = vshll.u32 %v11783_v46, 16 }
 0x139   : > { %2655 = vst [vmem:[#allocation2 + $0x168] sm:$0xf] %v2654_v52  ;;  %2658 = vst [vmem:[#allocation2 + $0x16c] sm:$0x1] %v2657_v53  ;;  %v11788_v60 = vpack.c.bf16 %v1060_v47, %v1060_v47  ;;  %v11786_v61 = vpack.c.bf16 %v1058_v49, %v1058_v49  ;;  %v1061_v62 = vmax.f32 %v839_v39, 0.0  ;;  %v1059_v63 = vmax.f32 %v831_v40, 0.0  ;;  %v942_v40 = vpop.f32.mrf.mxu1 }
 0x13a   : > { %v1854_v2 = vrot.slane %v1852_v55, 7  ;;  %v1838_v5 = vrot.slane %v1836_v57, 7  ;;  %v951_v6 = vadd.f32 %v12356_v0, %v13440_v51  ;;  %v852_v7 = vadd.f32 %v12331_v1, %v13440_v51  ;;  %v2503_v47 = vld [vmem:[#allocation2 + $0x70] sm:$0xf]  ;;  %v2506_v52 = vld [vmem:[#allocation2 + $0x74] sm:$0x1] }
 0x13b   : > { %v1876_v9 = vshrl.u32 %v11788_v60, 16  ;;  %v1879_v10 = vshll.u32 %v11788_v60, 16  ;;  %v1860_v11 = vshrl.u32 %v11786_v61, 16  ;;  %v1863_v12 = vshll.u32 %v11786_v61, 16  ;;  %v2491_v53 = vld [vmem:[#allocation2 + $0x60] sm:$0xf] }
 0x13c   : > { %v1857_v13 = vor.u32 %v1855_v56, %v1854_v2  ;;  %v1858_v14 = vrot.slane %v1854_v2, 4  ;;  %v1841_v15 = vor.u32 %v1839_v58, %v1838_v5  ;;  %v1842_v16 = vrot.slane %v1838_v5, 4  ;;  %v2494_v55 = vld [vmem:[#allocation2 + $0x64] sm:$0x1] }
 0x13d   : > { %v1878_v17 = vrot.slane %v1876_v9, 7  ;;  %v1862_v19 = vrot.slane %v1860_v11, 7  ;;  %v11789_v20 = vpack.c.bf16 %v1061_v62, %v1061_v62  ;;  %v11787_v21 = vpack.c.bf16 %v1059_v63, %v1059_v63  ;;  %v2671_v11 = vld [vmem:[#allocation2 + $0x180] sm:$0xf] }
 0x13e   : > { %v2480_v22 = vsel %vm13252_vm6, %v1857_v13, %v2479_v59  ;;  %v2483_v24 = vsel %vm13220_vm3, %v1858_v14, %v2482_v4  ;;  %v2468_v25 = vsel %vm13252_vm6, %v1841_v15, %v2467_v48  ;;  %v2471_v26 = vsel %vm13220_vm3, %v1842_v16, %v2470_v8  ;;  %v13560_v14 = vld [vmem:[#allocation2 + $0x18] sm:$0xf]  ;;  %v2674_v16 = vld [vmem:[#allocation2 + $0x184] sm:$0x1] }
 0x13f   : > { %2481 = vst [vmem:[#allocation2 + $0x40] sm:$0xf] %v2480_v22  ;;  %2484 = vst [vmem:[#allocation2 + $0x44] sm:$0x1] %v2483_v24  ;;  %v1881_v31 = vor.u32 %v1879_v10, %v1878_v17  ;;  %v1882_v23 = vrot.slane %v1878_v17, 4  ;;  %v1865_v33 = vor.u32 %v1863_v12, %v1862_v19  ;;  %v1866_v34 = vrot.slane %v1862_v19, 4 }
 0x140   : > { %2469 = vst [vmem:[#allocation2 + $0x30] sm:$0xf] %v2468_v25  ;;  %2472 = vst [vmem:[#allocation2 + $0x34] sm:$0x1] %v2471_v26  ;;  %v1884_v35 = vshrl.u32 %v11789_v20, 16  ;;  %v1887_v37 = vshll.u32 %v11789_v20, 16  ;;  %v943_v56 = vadd.f32 %v13440_v51, %v942_v40  ;;  %v844_v57 = vadd.f32 %v13440_v51, %v843_v41 }
 0x141   : > { %v1868_v38 = vshrl.u32 %v11787_v21, 16  ;;  %v1871_v39 = vshll.u32 %v11787_v21, 16  ;;  %v2498_v42 = vsel %vm13252_vm6, %v1881_v31, %v2497_v18  ;;  %v2501_v43 = vsel %vm13220_vm3, %v1882_v23, %v2500_v27  ;;  %v2521_v18 = vld [vmem:[#allocation2 + $0x88] sm:$0xf]  ;;  %v2524_v20 = vld [vmem:[#allocation2 + $0x8c] sm:$0x1] }
 0x142   : > { %v2486_v44 = vsel %vm13252_vm6, %v1865_v33, %v2485_v28  ;;  %v2489_v45 = vsel %vm13220_vm3, %v1866_v34, %v2488_v30  ;;  %2499 = vst [vmem:[#allocation2 + $0x68] sm:$0xf] %v2498_v42  ;;  %2502 = vst [vmem:[#allocation2 + $0x6c] sm:$0x1] %v2501_v43  ;;  %v1886_v46 = vrot.slane %v1884_v35, 7  ;;  %v1089_v50 = vmax.f32 %v951_v6, 0.0  ;;  %v12332_v42 = vpop.f32.mrf.mxu0 }
 0x143   : > { %2487 = vst [vmem:[#allocation2 + $0x58] sm:$0xf] %v2486_v44  ;;  %2490 = vst [vmem:[#allocation2 + $0x5c] sm:$0x1] %v2489_v45  ;;  %v1870_v49 = vrot.slane %v1868_v38, 7  ;;  %v1064_v29 = vmax.f32 %v852_v7, 0.0 }
 0x144   : > { %v1889_v58 = vor.u32 %v1887_v37, %v1886_v46  ;;  %v1890_v59 = vrot.slane %v1886_v46, 4  ;;  %v11817_v62 = vpack.c.bf16 %v1089_v50, %v1089_v50  ;;  %v1087_v0 = vmax.f32 %v943_v56, 0.0  ;;  %v13558_v6 = vld [vmem:[#allocation2 + $0x20] sm:$0xf]  ;;  %v2659_v23 = vld [vmem:[#allocation2 + $0x170] sm:$0xf] }
 0x145   : > { %v1873_v60 = vor.u32 %v1871_v39, %v1870_v49  ;;  %v1874_v61 = vrot.slane %v1870_v49, 4  ;;  %v11792_v63 = vpack.c.bf16 %v1064_v29, %v1064_v29  ;;  %v1062_v1 = vmax.f32 %v844_v57, 0.0  ;;  %v2662_v39 = vld [vmem:[#allocation2 + $0x174] sm:$0x1]  ;;  %v2509_v40 = vld [vmem:[#allocation2 + $0x78] sm:$0xf] }
 0x146   : > { %v2504_v2 = vsel %vm13252_vm6, %v1889_v58, %v2503_v47  ;;  %v2507_v4 = vsel %vm13220_vm3, %v1890_v59, %v2506_v52  ;;  %v2108_v7 = vshrl.u32 %v11817_v62, 16  ;;  %v2111_v8 = vshll.u32 %v11817_v62, 16  ;;  %v2512_v41 = vld [vmem:[#allocation2 + $0x7c] sm:$0x1]  ;;  %v13573_v47 = vld [vmem:[#allocation2 + $0x4] sm:$0x1] }
 0x147   : > { %v2492_v5 = vsel %vm13252_vm6, %v1873_v60, %v2491_v53  ;;  %v2495_v48 = vsel %vm13220_vm3, %v1874_v61, %v2494_v55  ;;  %2505 = vst [vmem:[#allocation2 + $0x70] sm:$0xf] %v2504_v2  ;;  %2508 = vst [vmem:[#allocation2 + $0x74] sm:$0x1] %v2507_v4  ;;  %v1908_v9 = vshrl.u32 %v11792_v63, 16  ;;  %v1911_v10 = vshll.u32 %v11792_v63, 16  ;;  %v846_v63 = vpop.f32.mrf.mxu0 }
 0x148   : > { %2493 = vst [vmem:[#allocation2 + $0x60] sm:$0xf] %v2492_v5  ;;  %2496 = vst [vmem:[#allocation2 + $0x64] sm:$0x1] %v2495_v48  ;;  %v11815_v12 = vpack.c.bf16 %v1087_v0, %v1087_v0  ;;  %v11790_v13 = vpack.c.bf16 %v1062_v1, %v1062_v1  ;;  %v2110_v15 = vrot.slane %v2108_v7, 7  ;;  %v11493_v19 = vcombine.low %v13560_v14, %v13558_v6  ;;  %v12648_v52 = vld [vmem:[%s13182_s19 + $0xc0] sm:$0xff]  }
 0x149   : > { %v1910_v17 = vrot.slane %v1908_v9, 7  ;;  %v855_v49 = vadd.f32 %v12332_v42, %v13440_v51  ;;  %v13576_v50 = vld [vmem:[#allocation2 + $0x150] sm:$0xf]  ;;  %v3848_v29 = vld [vmem:[#allocation2] sm:$0xe]  ;;  %12365 = vmatprep.mubr.bf16.mxu1 %v12648_v52  ;;  %v847_v2 = vadd.f32 %v13440_v51, %v846_v63  ;;  %v12649_v4 = vld [vmem:[%s13182_s19 + $0xc8] sm:$0xff]  }
 0x14a   : > { %v2092_v21 = vshrl.u32 %v11815_v12, 16  ;;  %v2095_v22 = vshll.u32 %v11815_v12, 16  ;;  %v1892_v24 = vshrl.u32 %v11790_v13, 16  ;;  %v1895_v25 = vshll.u32 %v11790_v13, 16  ;;  %7886 = vrot.lane.b32.xlu1 %v11493_v19, %s13024_s30  ;;  %v2917_v58 = vld [vmem:[#allocation2 + $0x144] sm:$0x1]  ;;  %12366 = vmatmul.mubr.bf16.gmra.mxu1 %v12649_v4 }
 0x14b   : > { %v2113_v26 = vor.u32 %v2111_v8, %v2110_v15  ;;  %v2114_v27 = vrot.slane %v2110_v15, 4  ;;  %v1913_v28 = vor.u32 %v1911_v10, %v1910_v17  ;;  %v1914_v30 = vrot.slane %v1910_v17, 4  ;;  %v3880_v59 = vld [vmem:[#allocation2 + $0x140] sm:$0xe]  ;;  %v5843_v60 = vld [vmem:[#allocation2 + $0x4c] sm:$0x1] }
 0x14c   : > { %v2094_v31 = vrot.slane %v2092_v21, 7  ;;  %v1894_v33 = vrot.slane %v1892_v24, 7  ;;  %v1065_v61 = vmax.f32 %v855_v49, 0.0  ;;  %v13587_v62 = vld [vmem:[#allocation2 + $0x158] sm:$0xf]  ;;  %v11204_v48 = vrot.slane %v3848_v29, 9 }
 0x14d   : > { %v2672_v34 = vsel %vm13252_vm6, %v2113_v26, %v2671_v11  ;;  %v2675_v35 = vsel %vm13220_vm3, %v2114_v27, %v2674_v16  ;;  %v2522_v37 = vsel %vm13252_vm6, %v1913_v28, %v2521_v18  ;;  %v2525_v38 = vsel %vm13220_vm3, %v1914_v30, %v2524_v20  ;;  %v6803_v0 = vld [vmem:[#allocation2 + $0x48] sm:$0xe]  ;;  %v2527_v18 = vld [vmem:[#allocation2 + $0x90] sm:$0xf]  ;;  %v13603_v24 = vld [vmem:[#allocation2 + $0x160] sm:$0xf]  ;;  %v12335_v28 = vpop.f32.mrf.mxu0 }
 0x14e   : > { %2673 = vst [vmem:[#allocation2 + $0x180] sm:$0xf] %v2672_v34  ;;  %2676 = vst [vmem:[#allocation2 + $0x184] sm:$0x1] %v2675_v35  ;;  %v2097_v43 = vor.u32 %v2095_v22, %v2094_v31  ;;  %v2098_v44 = vrot.slane %v2094_v31, 4  ;;  %v1897_v45 = vor.u32 %v1895_v25, %v1894_v33  ;;  %v1898_v46 = vrot.slane %v1894_v33, 4 }
 0x14f   : > { %2523 = vst [vmem:[#allocation2 + $0x88] sm:$0xf] %v2522_v37  ;;  %2526 = vst [vmem:[#allocation2 + $0x8c] sm:$0x1] %v2525_v38  ;;  %v11604_v1 = vcombine.low %v13576_v50, %v13587_v62  ;;  %v11793_v5 = vpack.c.bf16 %v1065_v61, %v1065_v61  ;;  %v4045_v7 = vrot.slane %v13573_v47, 5  ;;  %v11236_v8 = vrot.slane %v3880_v59, 9 }
 0x150   : > { %v2660_v53 = vsel %vm13252_vm6, %v2097_v43, %v2659_v23  ;;  %v2663_v55 = vsel %vm13220_vm3, %v2098_v44, %v2662_v39  ;;  %v2510_v56 = vsel %vm13252_vm6, %v1897_v45, %v2509_v40  ;;  %v2513_v57 = vsel %vm13220_vm3, %v1898_v46, %v2512_v41  ;;  %v2530_v22 = vld [vmem:[#allocation2 + $0x94] sm:$0x1]  ;;  %v6796_v30 = vld [vmem:[#allocation2 + $0x10] sm:$0xe]  ;;  %v2515_v38 = vld [vmem:[#allocation2 + $0x80] sm:$0xf] }
 0x151   : > { %2661 = vst [vmem:[#allocation2 + $0x170] sm:$0xf] %v2660_v53  ;;  %2664 = vst [vmem:[#allocation2 + $0x174] sm:$0x1] %v2663_v55  ;;  %8396 = vrot.lane.b32.xlu0 %v11604_v1, %s13025_s8  ;;  %v1063_v9 = vmax.f32 %v847_v2, 0.0  ;;  %v4173_v10 = vrot.slane %v2917_v58, 5  ;;  %v13607_v25 = vsel %vm13599_vm9, %v11204_v48, %v4045_v7  ;;  %v868_v43 = vadd.f32 %v12335_v28, %v13440_v51 }
 0x152   : > { %2511 = vst [vmem:[#allocation2 + $0x78] sm:$0xf] %v2510_v56  ;;  %2514 = vst [vmem:[#allocation2 + $0x7c] sm:$0x1] %v2513_v57  ;;  %v11339_v11 = vrot.slane %v6803_v0, 9  ;;  %v7018_v12 = vrot.slane %v5843_v60, 5 }
 0x153   : > { %v4456_v13 = vshrl.u32 %v13560_v14, 16  ;;  %v1916_v15 = vshrl.u32 %v11793_v5, 16  ;;  %v1919_v16 = vshll.u32 %v11793_v5, 16  ;;  %v4459_v17 = vshll.u32 %v13560_v14, 16  ;;  %v13609_v14 = vld [vmem:[#allocation2 + $0x158] sm:$0xf] }
 0x154   : > { %v11791_v19 = vpack.c.bf16 %v1063_v9, %v1063_v9  ;;  %v13613_v31 = vsel %vm13599_vm9, %v11236_v8, %v4173_v10  ;;  %v13617_v23 = vsel %vm13599_vm9, %v11339_v11, %v7018_v12  ;;  %v4470_v34 = vshrl.u32 %v13558_v6, 16  ;;  %v5836_v39 = vld [vmem:[#allocation2 + $0x14] sm:$0x1]  ;;  %v5837_v44 = vld [vmem:[#allocation2 + $0x1c] sm:$0x1] }
 0x155   : > { %v1918_v21 = vrot.slane %v1916_v15, 7  ;;  %v13619_v33 = vrot.slane %v4456_v13, 4  ;;  %v13622_v40 = vrot.slane %v4459_v17, 5  ;;  %v11509_v42 = vcombine.low %v13609_v14, %v13603_v24  ;;  %v6797_v45 = vld [vmem:[#allocation2 + $0x18] sm:$0xe] }
 0x156   : > { %v1900_v26 = vshrl.u32 %v11791_v19, 16  ;;  %v1903_v27 = vshll.u32 %v11791_v19, 16  ;;  %v4473_v46 = vshll.u32 %v13558_v6, 16  ;;  %v2518_v52 = vld [vmem:[#allocation2 + $0x84] sm:$0x1]  ;;  %v11332_v53 = vrot.slane %v6796_v30, 9  ;;  %v859_v6 = vpop.f32.mrf.mxu0 }
 0x157   : > { %v1921_v35 = vor.u32 %v1919_v16, %v1918_v21  ;;  %v1922_v37 = vrot.slane %v1918_v21, 4  ;;  %v13632_v55 = vld [vmem:[#allocation2 + $0x1c] sm:$0x1]  ;;  %7918 = vrot.lane.b32.xlu1 %v11509_v42, %s13024_s30  ;;  %v1068_v58 = vmax.f32 %v868_v43, 0.0  ;;  %v6990_v59 = vrot.slane %v5836_v39, 5 }
 0x158   : > { %v1902_v41 = vrot.slane %v1900_v26, 7  ;;  %18359 = vst [vmem:[#allocation12_spill] sm:$0xff] %v13632_v55  ;;  %v5325_v60 = vld [vmem:[#allocation2 + $0x18] sm:$0xe]  ;;  %v13635_v61 = vrot.slane %v4470_v34, 4  ;;  %v6363_v63 = vshrl.u32 %v13587_v62, 16 }
 0x159   : > { %v2528_v49 = vsel %vm13252_vm6, %v1921_v35, %v2527_v18  ;;  %v2531_v29 = vsel %vm13220_vm3, %v1922_v37, %v2530_v22  ;;  %v11333_v0 = vrot.slane %v6797_v45, 9  ;;  %v6994_v1 = vrot.slane %v5837_v44, 5  ;;  %v5326_v2 = vld [vmem:[#allocation2 + $0x20] sm:$0xe]  ;;  %v13644_v8 = vld [vmem:[#allocation2 + $0x24] sm:$0x1]  ;;  %v12336_v22 = vpop.f32.mrf.mxu0 }
 0x15a   : > { %2529 = vst [vmem:[#allocation2 + $0x90] sm:$0xf] %v2528_v49  ;;  %2532 = vst [vmem:[#allocation2 + $0x94] sm:$0x1] %v2531_v29  ;;  %v1905_v56 = vor.u32 %v1903_v27, %v1902_v41  ;;  %v1906_v57 = vrot.slane %v1902_v41, 4  ;;  %v11796_v48 = vpack.c.bf16 %v1068_v58, %v1068_v58  ;;  %v6991_v7 = vsel %vm13599_vm9, %v11332_v53, %v6990_v59 }
 0x15b   : > { %18360 = vst [vmem:[#allocation13_spill] sm:$0xff] %v13644_v8  ;;  %v13646_v9 = vld [vmem:[#allocation2 + $0xc] sm:$0x1]  ;;  %v3849_v10 = vld [vmem:[#allocation2 + $0x8] sm:$0xe]  ;;  %v13648_v11 = vrot.slane %v4473_v46, 5  ;;  %v6995_v12 = vsel %vm13599_vm9, %v11333_v0, %v6994_v1  ;;  %v860_v35 = vadd.f32 %v13440_v51, %v859_v6  ;;  %v871_v37 = vadd.f32 %v12336_v22, %v13440_v51  ;;  %v862_v59 = vpop.f32.mrf.mxu0 }
 0x15c   : > { %v2516_v4 = vsel %vm13252_vm6, %v1905_v56, %v2515_v38  ;;  %v2519_v5 = vsel %vm13220_vm3, %v1906_v57, %v2518_v52  ;;  %v11270_v13 = vrot.slane %v5325_v60, 9  ;;  %v5525_v15 = vrot.slane %v13632_v55, 5  ;;  %v6798_v16 = vld [vmem:[#allocation2 + $0x20] sm:$0xe]  ;;  %v5838_v26 = vld [vmem:[#allocation2 + $0x24] sm:$0x1] }
 0x15d   : > { %2517 = vst [vmem:[#allocation2 + $0x80] sm:$0xf] %v2516_v4  ;;  %2520 = vst [vmem:[#allocation2 + $0x84] sm:$0x1] %v2519_v5  ;;  %v1940_v17 = vshrl.u32 %v11796_v48, 16  ;;  %v1943_v18 = vshll.u32 %v11796_v48, 16  ;;  %v11652_v19 = vcombine.low %v6991_v7, %v6995_v12 }
 0x15e   : > { %v11271_v21 = vrot.slane %v5326_v2, 9  ;;  %v2545_v27 = vld [vmem:[#allocation2 + $0xb8] sm:$0xf]  ;;  %v2548_v28 = vld [vmem:[#allocation2 + $0xbc] sm:$0x1]  ;;  %v5526_v30 = vsel %vm13599_vm9, %v11270_v13, %v5525_v15  ;;  %v5529_v34 = vrot.slane %v13644_v8, 5 }
 0x15f   : > { %v12651_v38 = vld [vmem:[%s13182_s19 + $0xd0] sm:$0xff]   ;;  %v1942_v39 = vrot.slane %v1940_v17, 7  ;;  %12385 = vmatprep.mubr.msk.bf16.mxu0 %vm8684_vm10, %v11652_v19  ;;  %v11205_v41 = vrot.slane %v3849_v10, 9  ;;  %v4049_v42 = vrot.slane %v13646_v9, 5  ;;  %v5839_v43 = vld [vmem:[#allocation2 + $0x2c] sm:$0x1] }
 0x160   : > { %v11334_v44 = vrot.slane %v6798_v16, 9  ;;  %v5530_v45 = vsel %vm13599_vm9, %v11271_v21, %v5529_v34  ;;  %v1066_v46 = vmax.f32 %v860_v35, 0.0  ;;  %v1069_v49 = vmax.f32 %v871_v37, 0.0  ;;  %v6799_v29 = vld [vmem:[#allocation2 + $0x28] sm:$0xe]  ;;  %12369 = vmatprep.mubr.bf16.mxu1 %v12651_v38  ;;  %v12652_v17 = vld [vmem:[%s13182_s19 + $0xd8] sm:$0xff]  }
 0x161   : > { %v6998_v52 = vrot.slane %v5838_v26, 5  ;;  %v1945_v53 = vor.u32 %v1943_v18, %v1942_v39  ;;  %v1946_v56 = vrot.slane %v1942_v39, 4  ;;  %v11557_v57 = vcombine.low %v5526_v30, %v5530_v45  ;;  %v13668_v2 = vld [vmem:[#allocation2 + $0x15c] sm:$0x1]  ;;  %v5357_v4 = vld [vmem:[#allocation2 + $0x158] sm:$0xe]  ;;  %12370 = vmatmul.mubr.bf16.gmra.mxu1 %v12652_v17 }
 0x162   : > { %v4050_v58 = vsel %vm13599_vm9, %v11205_v41, %v4049_v42  ;;  %v13665_v60 = vrot.slane %v6363_v63, 4  ;;  %v11794_v6 = vpack.c.bf16 %v1066_v46, %v1066_v46  ;;  %v11797_v0 = vpack.c.bf16 %v1069_v49, %v1069_v49  ;;  %18361 = vst [vmem:[#allocation14_spill] sm:$0xff] %v13668_v2  ;;  %v13675_v10 = vld [vmem:[#allocation2 + $0x164] sm:$0x1]  ;;  %v5358_v12 = vld [vmem:[#allocation2 + $0x160] sm:$0xe] }
 0x163   : > { %v11460_v1 = vcombine.low %v13607_v25, %v4050_v58  ;;  %v2546_v5 = vsel %vm13252_vm6, %v1945_v53, %v2545_v27  ;;  %v2549_v48 = vsel %vm13220_vm3, %v1946_v56, %v2548_v28  ;;  %8142 = vrot.lane.b32.xlu0 %v11557_v57, %s13026_s13  ;;  %v11335_v7 = vrot.slane %v6799_v29, 9  ;;  %18362 = vst [vmem:[#allocation15_spill] sm:$0xff] %v13675_v10  ;;  %v2533_v19 = vld [vmem:[#allocation2 + $0xa8] sm:$0xf]  ;;  %v12339_v27 = vpop.f32.mrf.mxu0  ;;  %v2536_v30 = vld [vmem:[#allocation2 + $0xac] sm:$0x1] }
 0x164   : > { %v7002_v63 = vrot.slane %v5839_v43, 5  ;;  %2547 = vst [vmem:[#allocation2 + $0xb8] sm:$0xf] %v2546_v5  ;;  %2550 = vst [vmem:[#allocation2 + $0xbc] sm:$0x1] %v2549_v48  ;;  %v1924_v25 = vshrl.u32 %v11794_v6, 16  ;;  %v6999_v21 = vsel %vm13599_vm9, %v11334_v44, %v6998_v52  ;;  %v863_v43 = vadd.f32 %v13440_v51, %v862_v59 }
 0x165   : > { %v1927_v13 = vshll.u32 %v11794_v6, 16  ;;  %v1948_v15 = vshrl.u32 %v11797_v0, 16  ;;  %v1951_v16 = vshll.u32 %v11797_v0, 16  ;;  %7660 = vrot.lane.b32.xlu1 %v11460_v1, %s13025_s8  ;;  %v6366_v18 = vshll.u32 %v13587_v62, 16  ;;  %v2551_v38 = vld [vmem:[#allocation2 + $0xc0] sm:$0xf]  ;;  %v875_v59 = vpop.f32.mrf.mxu0 }
 0x166   : > { %v7003_v22 = vsel %vm13599_vm9, %v11335_v7, %v7002_v63  ;;  %v11302_v26 = vrot.slane %v5357_v4, 9  ;;  %v1926_v28 = vrot.slane %v1924_v25, 7  ;;  %v5653_v37 = vrot.slane %v13668_v2, 5  ;;  %v2554_v39 = vld [vmem:[#allocation2 + $0xc4] sm:$0x1] }
 0x167   : > { %v1950_v34 = vrot.slane %v1948_v15, 7  ;;  %v11653_v35 = vcombine.low %v6999_v21, %v7003_v22  ;;  %v11303_v41 = vrot.slane %v5358_v12, 9  ;;  %v5657_v42 = vrot.slane %v13675_v10, 5  ;;  %v3881_v52 = vld [vmem:[#allocation2 + $0x148] sm:$0xe] }
 0x168   : > { %v884_v44 = vadd.f32 %v12339_v27, %v13440_v51  ;;  %v1929_v45 = vor.u32 %v1927_v13, %v1926_v28  ;;  %v1930_v46 = vrot.slane %v1926_v28, 4  ;;  %v5654_v53 = vsel %vm13599_vm9, %v11302_v26, %v5653_v37  ;;  %v13693_v6 = vld [vmem:[#allocation2 + $0x14c] sm:$0x1]  ;;  %v5323_v25 = vld [vmem:[#allocation2 + $0x8] sm:$0xe] }
 0x169   : > { %v1953_v49 = vor.u32 %v1951_v16, %v1950_v34  ;;  %v1954_v29 = vrot.slane %v1950_v34, 4  ;;  %12386 = vmatmul.mubr.msk.bf16.vlgmr.msra.gmra.mxu0 %vm8684_vm10, %v11653_v35  ;;  %v5658_v56 = vsel %vm13599_vm9, %v11303_v41, %v5657_v42  ;;  %v1067_v57 = vmax.f32 %v863_v43, 0.0  ;;  %v13703_v12 = vld [vmem:[#allocation2 + $0xc] sm:$0x1]  ;;  %v13709_v17 = vld [vmem:[%s13159_s21] ss:$0 sm:$0xff] }
 0x16a   : > { %v1072_v58 = vmax.f32 %v884_v44, 0.0  ;;  %v2534_v51 = vsel %vm13252_vm6, %v1929_v45, %v2533_v19  ;;  %v2537_v0 = vsel %vm13220_vm3, %v1930_v46, %v2536_v30  ;;  %v11573_v5 = vcombine.low %v5654_v53, %v5658_v56  ;;  %18363 = vst [vmem:[#allocation16_spill] sm:$0xff] %v13703_v12  ;;  %v5324_v21 = vld [vmem:[#allocation2 + $0x10] sm:$0xe]  ;;  %v13713_v30 = vld [vmem:[#allocation2 + $0x14] sm:$0x1] }
 0x16b   : > { %v2552_v1 = vsel %vm13252_vm6, %v1953_v49, %v2551_v38  ;;  %v2555_v4 = vsel %vm13220_vm3, %v1954_v29, %v2554_v39  ;;  %2535 = vst [vmem:[#allocation2 + $0xa8] sm:$0xf] %v2534_v51  ;;  %2538 = vst [vmem:[#allocation2 + $0xac] sm:$0x1] %v2537_v0  ;;  %v11795_v48 = vpack.c.bf16 %v1067_v57, %v1067_v57  ;;  %v11237_v63 = vrot.slane %v3881_v52, 9  ;;  %v12340_v49 = vpop.f32.mrf.mxu0 }
 0x16c   : > { %2553 = vst [vmem:[#allocation2 + $0xc0] sm:$0xf] %v2552_v1  ;;  %2556 = vst [vmem:[#allocation2 + $0xc4] sm:$0x1] %v2555_v4  ;;  %v11800_v7 = vpack.c.bf16 %v1072_v58, %v1072_v58  ;;  %v6349_v13 = vshrl.u32 %v13576_v50, 16  ;;  %v6352_v15 = vshll.u32 %v13576_v50, 16  ;;  %v876_v19 = vadd.f32 %v13709_v17, %v875_v59  ;;  %8174 = vrot.lane.b32.xlu0 %v11573_v5, %s13026_s13 }
 0x16d   : > { %v4177_v16 = vrot.slane %v13693_v6, 5  ;;  %v1932_v22 = vshrl.u32 %v11795_v48, 16  ;;  %v1935_v26 = vshll.u32 %v11795_v48, 16  ;;  %18364 = vst [vmem:[#allocation17_spill] sm:$0xff] %v13713_v30  ;;  %v2539_v34 = vld [vmem:[#allocation2 + $0xb0] sm:$0xf]  ;;  %v887_v57 = vadd.f32 %v13709_v17, %v12340_v49 }
 0x16e   : > { %v1972_v27 = vshrl.u32 %v11800_v7, 16  ;;  %v1975_v28 = vshll.u32 %v11800_v7, 16  ;;  %v2542_v35 = vld [vmem:[#allocation2 + $0xb4] sm:$0x1]  ;;  %v1070_v38 = vmax.f32 %v876_v19, 0.0  ;;  %v11268_v39 = vrot.slane %v5323_v25, 9 }
 0x16f   : > { %v4178_v37 = vsel %vm13599_vm9, %v11237_v63, %v4177_v16  ;;  %v5517_v41 = vrot.slane %v13703_v12, 5  ;;  %v1934_v42 = vrot.slane %v1932_v22, 7  ;;  %v2569_v44 = vld [vmem:[#allocation2 + $0xd8] sm:$0xf]  ;;  %v11269_v46 = vrot.slane %v5324_v21, 9 }
 0x170   : > { %v1974_v43 = vrot.slane %v1972_v27, 7  ;;  %v11476_v45 = vcombine.low %v13613_v31, %v4178_v37  ;;  %v2572_v29 = vld [vmem:[#allocation2 + $0xdc] sm:$0x1]  ;;  %v11798_v52 = vpack.c.bf16 %v1070_v38, %v1070_v38  ;;  %v5521_v56 = vrot.slane %v13713_v30, 5  ;;  %v6800_v4 = vld [vmem:[#allocation2 + $0x30] sm:$0xe] }
 0x171   : > { %v5518_v53 = vsel %vm13599_vm9, %v11268_v39, %v5517_v41  ;;  %v5841_v58 = vld [vmem:[#allocation2 + $0x3c] sm:$0x1]  ;;  %v1937_v59 = vor.u32 %v1935_v26, %v1934_v42  ;;  %v1938_v51 = vrot.slane %v1934_v42, 4  ;;  %v6801_v31 = vld [vmem:[#allocation2 + $0x38] sm:$0xe]  ;;  %v1073_v63 = vmax.f32 %v887_v57, 0.0 }
 0x172   : > { %v1977_v0 = vor.u32 %v1975_v28, %v1974_v43  ;;  %v1978_v1 = vrot.slane %v1974_v43, 4  ;;  %7692 = vrot.lane.b32.xlu1 %v11476_v45, %s13025_s8  ;;  %v1956_v5 = vshrl.u32 %v11798_v52, 16  ;;  %v1959_v48 = vshll.u32 %v11798_v52, 16  ;;  %v5840_v25 = vld [vmem:[#allocation2 + $0x34] sm:$0x1] }
 0x173   : > { %v5522_v7 = vsel %vm13599_vm9, %v11269_v46, %v5521_v56  ;;  %v2540_v16 = vsel %vm13252_vm6, %v1937_v59, %v2539_v34  ;;  %v2543_v19 = vsel %vm13220_vm3, %v1938_v51, %v2542_v35  ;;  %v2557_v27 = vld [vmem:[#allocation2 + $0xc8] sm:$0xf]  ;;  %v11801_v37 = vpack.c.bf16 %v1073_v63, %v1073_v63  ;;  %v2560_v39 = vld [vmem:[#allocation2 + $0xcc] sm:$0x1]  ;;  %v13736_v49 = vld [vmem:[#allocation2 + $0x10] sm:$0xf] }
 0x174   : > { %v2570_v21 = vsel %vm13252_vm6, %v1977_v0, %v2569_v44  ;;  %v2573_v22 = vsel %vm13220_vm3, %v1978_v1, %v2572_v29  ;;  %2541 = vst [vmem:[#allocation2 + $0xb0] sm:$0xf] %v2540_v16  ;;  %2544 = vst [vmem:[#allocation2 + $0xb4] sm:$0x1] %v2543_v19  ;;  %v1958_v26 = vrot.slane %v1956_v5, 7  ;;  %v11556_v28 = vcombine.low %v5518_v53, %v5522_v7  ;;  %v878_v16 = vpop.f32.mrf.mxu0 }
 0x175   : > { %2571 = vst [vmem:[#allocation2 + $0xd8] sm:$0xf] %v2570_v21  ;;  %2574 = vst [vmem:[#allocation2 + $0xdc] sm:$0x1] %v2573_v22  ;;  %v11336_v38 = vrot.slane %v6800_v4, 9  ;;  %v4904_v34 = vshrl.u32 %v13609_v14, 16 }
 0x176   : > { %v7006_v41 = vrot.slane %v5840_v25, 5  ;;  %v11337_v35 = vrot.slane %v6801_v31, 9  ;;  %v7010_v42 = vrot.slane %v5841_v58, 5  ;;  %v1961_v43 = vor.u32 %v1959_v48, %v1958_v26  ;;  %8140 = vrot.lane.b32.xlu0 %v11556_v28, %s13026_s13  ;;  %v2575_v53 = vld [vmem:[#allocation2 + $0xe0] sm:$0xf] }
 0x177   : > { %v1962_v44 = vrot.slane %v1958_v26, 4  ;;  %v1980_v45 = vshrl.u32 %v11801_v37, 16  ;;  %v1983_v46 = vshll.u32 %v11801_v37, 16  ;;  %v4907_v29 = vshll.u32 %v13609_v14, 16  ;;  %v2578_v56 = vld [vmem:[#allocation2 + $0xe4] sm:$0x1] }
 0x178   : > { %v4918_v52 = vshrl.u32 %v13603_v24, 16  ;;  %v7007_v57 = vsel %vm13599_vm9, %v11336_v38, %v7006_v41  ;;  %v7011_v58 = vsel %vm13599_vm9, %v11337_v35, %v7010_v42  ;;  %v5842_v59 = vld [vmem:[#allocation2 + $0x44] sm:$0x1]  ;;  %v6802_v51 = vld [vmem:[#allocation2 + $0x40] sm:$0xe]  ;;  %v2558_v0 = vsel %vm13252_vm6, %v1961_v43, %v2557_v27  ;;  %v12343_v43 = vpop.f32.mrf.mxu0 }
 0x179   : > { %v2561_v1 = vsel %vm13220_vm3, %v1962_v44, %v2560_v39  ;;  %v1982_v4 = vrot.slane %v1980_v45, 7  ;;  %v11654_v14 = vcombine.low %v7007_v57, %v7011_v58  ;;  %v13748_v31 = vld [vmem:[#allocation2 + $0x18] sm:$0xf]  ;;  %v13750_v5 = vld [vmem:[#allocation2 + $0x14c] sm:$0x1]  ;;  %v13754_v48 = vrot.slane %v6366_v18, 5 }
 0x17a   : > { %18365 = vst [vmem:[#allocation18_spill] sm:$0xff] %v13750_v5  ;;  %v13758_v7 = vrot.slane %v6349_v13, 4  ;;  %v4921_v63 = vshll.u32 %v13603_v24, 16  ;;  %2559 = vst [vmem:[#allocation2 + $0xc8] sm:$0xf] %v2558_v0  ;;  %v11588_v25 = vcombine.low %v13736_v49, %v13748_v31  ;;  %v11338_v62 = vrot.slane %v6802_v51, 9 }
 0x17b   : > { %2562 = vst [vmem:[#allocation2 + $0xcc] sm:$0x1] %v2561_v1  ;;  %v5355_v19 = vld [vmem:[#allocation2 + $0x148] sm:$0xe]  ;;  %v1985_v21 = vor.u32 %v1983_v46, %v1982_v4  ;;  %v1986_v22 = vrot.slane %v1982_v4, 4  ;;  %12389 = vmatprep.mubr.msk.bf16.mxu0 %vm8684_vm10, %v11654_v14  ;;  %v7014_v18 = vrot.slane %v5842_v59, 5  ;;  %v879_v28 = vadd.f32 %v13709_v17, %v878_v16 }
 0x17c   : > { %v13764_v26 = vld [vmem:[#allocation2 + $0x154] sm:$0x1]  ;;  %v6354_v13 = vrot.slane %v6352_v15, 5  ;;  %v4906_v27 = vrot.slane %v4904_v34, 4  ;;  %v4909_v24 = vrot.slane %v4907_v29, 5  ;;  %8364 = vrot.lane.b32.xlu1 %v11588_v25, %s13025_s8  ;;  %v4920_v38 = vrot.slane %v4918_v52, 4 }
 0x17d   : > { %18366 = vst [vmem:[#allocation19_spill] sm:$0xff] %v13764_v26  ;;  %v5356_v37 = vld [vmem:[#allocation2 + $0x150] sm:$0xe]  ;;  %v2576_v39 = vsel %vm13252_vm6, %v1985_v21, %v2575_v53  ;;  %v2579_v41 = vsel %vm13220_vm3, %v1986_v22, %v2578_v56  ;;  %v7015_v35 = vsel %vm13599_vm9, %v11338_v62, %v7014_v18  ;;  %v1071_v15 = vmax.f32 %v879_v28, 0.0  ;;  %v2566_v21 = vld [vmem:[#allocation2 + $0xd4] sm:$0x1] }
 0x17e   : > { %2577 = vst [vmem:[#allocation2 + $0xe0] sm:$0xf] %v2576_v39  ;;  %2580 = vst [vmem:[#allocation2 + $0xe4] sm:$0x1] %v2579_v41  ;;  %v11655_v50 = vcombine.low %v7015_v35, %v13617_v23  ;;  %v11300_v34 = vrot.slane %v5355_v19, 9  ;;  %v5645_v42 = vrot.slane %v13750_v5, 5  ;;  %v900_v29 = vadd.f32 %v13709_v17, %v12343_v43 }
 0x17f   : > { %v4923_v44 = vrot.slane %v4921_v63, 5  ;;  %v11301_v45 = vrot.slane %v5356_v37, 9  ;;  %v5649_v46 = vrot.slane %v13764_v26, 5  ;;  %v4462_v52 = vor.u32 %v13622_v40, %v13619_v33  ;;  %v13785_v56 = vld [vmem:[#allocation2 + $0x10] sm:$0xf] }
 0x180   : > { %v4476_v53 = vor.u32 %v13648_v11, %v13635_v61  ;;  %12390 = vmatmul.mubr.msk.bf16.gmra.mxu0 %vm8684_vm10, %v11655_v50  ;;  %v11799_v23 = vpack.c.bf16 %v1071_v15, %v1071_v15  ;;  %v6369_v57 = vor.u32 %v13754_v48, %v13665_v60  ;;  %v5646_v58 = vsel %vm13599_vm9, %v11300_v34, %v5645_v42  ;;  %v13794_v11 = vld [vmem:[#allocation2 + $0x8] sm:$0xf]  ;;  %v891_v48 = vpop.f32.mrf.mxu0  ;;  %v2563_v25 = vld [vmem:[#allocation2 + $0xd0] sm:$0xf]  ;;  %v2596_v50 = vld [vmem:[#allocation2 + $0x10c] sm:$0x1] }
 0x181   : > { %v5650_v59 = vsel %vm13599_vm9, %v11301_v45, %v5649_v46  ;;  %v1076_v51 = vmax.f32 %v900_v29, 0.0  ;;  %v6355_v33 = vor.u32 %v6354_v13, %v13758_v7  ;;  %v4910_v1 = vor.u32 %v4909_v24, %v4906_v27  ;;  %v2593_v24 = vld [vmem:[#allocation2 + $0x108] sm:$0xf]  ;;  %v6804_v45 = vld [vmem:[#allocation2 + $0x60] sm:$0xe] }
 0x182   : > { %v1964_v40 = vshrl.u32 %v11799_v23, 16  ;;  %v1967_v0 = vshll.u32 %v11799_v23, 16  ;;  %v11572_v61 = vcombine.low %v5646_v58, %v5650_v59  ;;  %v4924_v4 = vor.u32 %v4923_v44, %v4920_v38  ;;  %v13807_v37 = vld [vmem:[#allocation2 + $0x28] sm:$0xf]  ;;  %v13820_v44 = vld [vmem:[#allocation2 + $0x20] sm:$0xf]  ;;  %v12344_v23 = vpop.f32.mrf.mxu0 }
 0x183   : > { %v11804_v14 = vpack.c.bf16 %v1076_v51, %v1076_v51  ;;  %v11492_v60 = vcombine.low %v13794_v11, %v13785_v56  ;;  %v892_v16 = vadd.f32 %v13709_v17, %v891_v48  ;;  %v13800_v19 = vrot.slane %v4462_v52, 4  ;;  %v6805_v58 = vld [vmem:[#allocation2 + $0x68] sm:$0xe]  ;;  %v3883_v12 = vld [vmem:[#allocation2 + $0x158] sm:$0xe] }
 0x184   : > { %v1966_v63 = vrot.slane %v1964_v40, 7  ;;  %8172 = vrot.lane.b32.xlu0 %v11572_v61, %s13026_s13  ;;  %v13802_v7 = vrot.slane %v4476_v53, 4  ;;  %v13805_v18 = vrot.slane %v6369_v57, 4  ;;  %v13809_v38 = vrot.slane %v6355_v33, 4  ;;  %v5844_v57 = vld [vmem:[#allocation2 + $0x64] sm:$0x1] }
 0x185   : > { %18367 = vst [vmem:[#allocation20_spill] sm:$0xff] %v13800_v19  ;;  %v2004_v22 = vshrl.u32 %v11804_v14, 16  ;;  %v2007_v62 = vshll.u32 %v11804_v14, 16  ;;  %7884 = vrot.lane.b32.xlu1 %v11492_v60, %s13024_s30  ;;  %v1074_v28 = vmax.f32 %v892_v16, 0.0  ;;  %v13811_v39 = vrot.slane %v4910_v1, 4 }
 0x186   : > { %18368 = vst [vmem:[#allocation21_spill] sm:$0xff] %v13802_v7  ;;  %v1969_v13 = vor.u32 %v1967_v0, %v1966_v63  ;;  %v1970_v27 = vrot.slane %v1966_v63, 4  ;;  %v13813_v41 = vrot.slane %v4924_v4, 4  ;;  %v11589_v53 = vcombine.low %v13820_v44, %v13807_v37  ;;  %v5845_v0 = vld [vmem:[#allocation2 + $0x6c] sm:$0x1] }
 0x187   : > { %18369 = vst [vmem:[#allocation22_spill] sm:$0xff] %v13811_v39  ;;  %v2006_v35 = vrot.slane %v2004_v22, 7  ;;  %v11802_v43 = vpack.c.bf16 %v1074_v28, %v1074_v28  ;;  %v903_v40 = vadd.f32 %v13709_v17, %v12344_v23  ;;  %v2581_v14 = vld [vmem:[#allocation2 + $0xf8] sm:$0xf]  ;;  %v11340_v60 = vrot.slane %v6804_v45, 9 }
 0x188   : > { %18370 = vst [vmem:[#allocation23_spill] sm:$0xff] %v13813_v41  ;;  %v2564_v34 = vsel %vm13252_vm6, %v1969_v13, %v2563_v25  ;;  %v2567_v42 = vsel %vm13220_vm3, %v1970_v27, %v2566_v21  ;;  %8366 = vrot.lane.b32.xlu0 %v11589_v53, %s13025_s8  ;;  %v2584_v63 = vld [vmem:[#allocation2 + $0xfc] sm:$0x1]  ;;  %v7022_v16 = vrot.slane %v5844_v57, 5  ;;  %v11341_v21 = vrot.slane %v6805_v58, 9 }
 0x189   : > { %2565 = vst [vmem:[#allocation2 + $0xd0] sm:$0xf] %v2564_v34  ;;  %2568 = vst [vmem:[#allocation2 + $0xd4] sm:$0x1] %v2567_v42  ;;  %v2009_v29 = vor.u32 %v2007_v62, %v2006_v35  ;;  %v2010_v52 = vrot.slane %v2006_v35, 4  ;;  %v1988_v51 = vshrl.u32 %v11802_v43, 16 }
 0x18a   : > { %v1991_v33 = vshll.u32 %v11802_v43, 16  ;;  %v1077_v25 = vmax.f32 %v903_v40, 0.0  ;;  %v5901_v62 = vshrl.u32 %v13736_v49, 16  ;;  %v5904_v13 = vshll.u32 %v13736_v49, 16  ;;  %v5846_v42 = vld [vmem:[#allocation2 + $0x74] sm:$0x1] }
 0x18b   : > { %v2594_v1 = vsel %vm13252_vm6, %v2009_v29, %v2593_v24  ;;  %v2597_v4 = vsel %vm13220_vm3, %v2010_v52, %v2596_v50  ;;  %v1990_v48 = vrot.slane %v1988_v51, 7  ;;  %v7026_v27 = vrot.slane %v5845_v0, 5  ;;  %v13836_v24 = vld [vmem:[#allocation2 + $0x150] sm:$0xf]  ;;  %v6807_v53 = vld [vmem:[#allocation2 + $0x78] sm:$0xe] }
 0x18c   : > { %2595 = vst [vmem:[#allocation2 + $0x108] sm:$0xf] %v2594_v1  ;;  %2598 = vst [vmem:[#allocation2 + $0x10c] sm:$0x1] %v2597_v4  ;;  %v11805_v50 = vpack.c.bf16 %v1077_v25, %v1077_v25  ;;  %v7023_v34 = vsel %vm13599_vm9, %v11340_v60, %v7022_v16  ;;  %v6806_v43 = vld [vmem:[#allocation2 + $0x70] sm:$0xe]  ;;  %v894_v60 = vpop.f32.mrf.mxu0 }
 0x18d   : > { %v1993_v28 = vor.u32 %v1991_v33, %v1990_v48  ;;  %v1994_v35 = vrot.slane %v1990_v48, 4  ;;  %v5915_v45 = vshrl.u32 %v13748_v31, 16  ;;  %v5918_v29 = vshll.u32 %v13748_v31, 16  ;;  %v13849_v33 = vld [vmem:[#allocation2 + $0x148] sm:$0xf] }
 0x18e   : > { %v4428_v52 = vshrl.u32 %v13794_v11, 16  ;;  %v7027_v49 = vsel %vm13599_vm9, %v11341_v21, %v7026_v27  ;;  %v2012_v58 = vshrl.u32 %v11805_v50, 16  ;;  %v2015_v51 = vshll.u32 %v11805_v50, 16  ;;  %v5847_v40 = vld [vmem:[#allocation2 + $0x7c] sm:$0x1] }
 0x18f   : > { %v2582_v23 = vsel %vm13252_vm6, %v1993_v28, %v2581_v14  ;;  %v2585_v57 = vsel %vm13220_vm3, %v1994_v35, %v2584_v63  ;;  %v4431_v0 = vshll.u32 %v13794_v11, 16  ;;  %v4442_v31 = vshrl.u32 %v13785_v56, 16  ;;  %v1228_v14 = vld [vmem:[#allocation2 + $0x100] sm:$0x1]  ;;  %v1422_v48 = vld [vmem:[#allocation2 + $0x104] sm:$0x1] }
 0x190   : > { %2583 = vst [vmem:[#allocation2 + $0xf8] sm:$0xf] %v2582_v23  ;;  %2586 = vst [vmem:[#allocation2 + $0xfc] sm:$0x1] %v2585_v57  ;;  %v11656_v1 = vcombine.low %v7023_v34, %v7027_v49  ;;  %v11508_v4 = vcombine.low %v13849_v33, %v13836_v24  ;;  %v2014_v25 = vrot.slane %v2012_v58, 7  ;;  %v11342_v16 = vrot.slane %v6806_v43, 9 }
 0x191   : > { %v2599_v63 = vld [vmem:[#allocation2 + $0x110] sm:$0xf]  ;;  %v7030_v21 = vrot.slane %v5846_v42, 5  ;;  %v11343_v27 = vrot.slane %v6807_v53, 9  ;;  %v13855_v28 = vrot.slane %v4428_v52, 4  ;;  %v4445_v11 = vshll.u32 %v13785_v56, 16 }
 0x192   : > { %v2602_v35 = vld [vmem:[#allocation2 + $0x114] sm:$0x1]  ;;  %12393 = vmatprep.mubr.msk.bf16.mxu0 %vm8684_vm10, %v11656_v1  ;;  %7916 = vrot.lane.b32.xlu1 %v11508_v4, %s13024_s30  ;;  %v7034_v50 = vrot.slane %v5847_v40, 5  ;;  %v895_v34 = vadd.f32 %v13709_v17, %v894_v60  ;;  %v2017_v49 = vor.u32 %v2015_v51, %v2014_v25  ;;  %v2018_v23 = vrot.slane %v2014_v25, 4  ;;  %v13871_v58 = vld [vmem:[#allocation2 + $0x168] sm:$0xf]  ;;  %v12347_v51 = vpop.f32.mrf.mxu0 }
 0x193   : > { %v7031_v57 = vsel %vm13599_vm9, %v11342_v16, %v7030_v21  ;;  %v1229_v42 = vsel %vm13220_vm3, 0, %v1228_v14  ;;  %v13865_v43 = vrot.slane %v4431_v0, 5  ;;  %v1423_v53 = vsel %vm13228_vm4, 0, %v1422_v48  ;;  %v1243_v40 = vld [vmem:[#allocation2 + $0x128] sm:$0x1] }
 0x194   : > { %v7035_v56 = vsel %vm13599_vm9, %v11343_v27, %v7034_v50  ;;  %v1075_v52 = vmax.f32 %v895_v34, 0.0  ;;  %1230 = vst [vmem:[#allocation2 + $0x100] sm:$0x1] %v1229_v42  ;;  %v2600_v4 = vsel %vm13252_vm6, %v2017_v49, %v2599_v63  ;;  %v2603_v0 = vsel %vm13220_vm3, %v2018_v23, %v2602_v35  ;;  %1424 = vst [vmem:[#allocation2 + $0x104] sm:$0x1] %v1423_v53 }
 0x195   : > { %v11657_v60 = vcombine.low %v7031_v57, %v7035_v56  ;;  %v13878_v14 = vld [vmem:[#allocation2 + $0x160] sm:$0xf]  ;;  %v1437_v25 = vld [vmem:[#allocation2 + $0x12c] sm:$0x1]  ;;  %v13880_v16 = vrot.slane %v5901_v62, 4  ;;  %v13882_v48 = vrot.slane %v5904_v13, 5  ;;  %v916_v62 = vadd.f32 %v13709_v17, %v12347_v51 }
 0x196   : > { %v13884_v21 = vrot.slane %v5915_v45, 4  ;;  %2601 = vst [vmem:[#allocation2 + $0x110] sm:$0xf] %v2600_v4  ;;  %2604 = vst [vmem:[#allocation2 + $0x114] sm:$0x1] %v2603_v0  ;;  %v11803_v27 = vpack.c.bf16 %v1075_v52, %v1075_v52  ;;  %v13886_v63 = vrot.slane %v5918_v29, 5  ;;  %v11605_v35 = vcombine.low %v13878_v14, %v13871_v58  ;;  %v907_v52 = vpop.f32.mrf.mxu0 }
 0x197   : > { %v2887_v50 = vld [vmem:[#allocation2 + $0x14] sm:$0x1]  ;;  %v1237_v34 = vld [vmem:[#allocation2 + $0x118] sm:$0x1]  ;;  %v13888_v49 = vrot.slane %v4442_v31, 4  ;;  %12394 = vmatmul.mubr.msk.bf16.gmra.mxu0 %vm8684_vm10, %v11657_v60  ;;  %v13896_v57 = vrot.slane %v4445_v11, 5  ;;  %v908_v46 = vadd.f32 %v13709_v17, %v907_v52 }
 0x198   : > { %v3850_v13 = vld [vmem:[#allocation2 + $0x10] sm:$0xe]  ;;  %v3851_v23 = vld [vmem:[#allocation2 + $0x18] sm:$0xe]  ;;  %v1996_v42 = vshrl.u32 %v11803_v27, 16  ;;  %v1999_v56 = vshll.u32 %v11803_v27, 16  ;;  %8398 = vrot.lane.b32.xlu0 %v11605_v35, %s13025_s8 }
 0x199   : > { %v2888_v29 = vld [vmem:[#allocation2 + $0x1c] sm:$0x1]  ;;  %v1080_v53 = vmax.f32 %v916_v62, 0.0  ;;  %v1244_v4 = vsel %vm13220_vm3, 0, %v1243_v40  ;;  %v1438_v51 = vsel %vm13228_vm4, 0, %v1437_v25  ;;  %v11206_v11 = vrot.slane %v3850_v13, 9 }
 0x19a   : > { %v1431_v0 = vld [vmem:[#allocation2 + $0x11c] sm:$0x1]  ;;  %v1998_v60 = vrot.slane %v1996_v42, 7  ;;  %1245 = vst [vmem:[#allocation2 + $0x128] sm:$0x1] %v1244_v4  ;;  %v4053_v1 = vrot.slane %v2887_v50, 5 }
 0x19b   : > { %1439 = vst [vmem:[#allocation2 + $0x12c] sm:$0x1] %v1438_v51  ;;  %v11207_v27 = vrot.slane %v3851_v23, 9  ;;  %v2587_v22 = vld [vmem:[#allocation2 + $0x100] sm:$0xf]  ;;  %v11808_v61 = vpack.c.bf16 %v1080_v53, %v1080_v53  ;;  %v4057_v59 = vrot.slane %v2888_v29, 5 }
 0x19c   : > { %v1238_v35 = vsel %vm13220_vm3, 0, %v1237_v34  ;;  %v2001_v62 = vor.u32 %v1999_v56, %v1998_v60  ;;  %v2002_v40 = vrot.slane %v1998_v60, 4  ;;  %v2590_v15 = vld [vmem:[#allocation2 + $0x104] sm:$0x1]  ;;  %v4054_v25 = vsel %vm13599_vm9, %v11206_v11, %v4053_v1  ;;  %v2821_v50 = vld [vmem:[#allocation2] sm:$0xf] }
 0x19d   : > { %1239 = vst [vmem:[#allocation2 + $0x118] sm:$0x1] %v1238_v35  ;;  %v1432_v13 = vsel %vm13228_vm4, 0, %v1431_v0  ;;  %v2036_v23 = vshrl.u32 %v11808_v61, 16  ;;  %v2039_v42 = vshll.u32 %v11808_v61, 16  ;;  %v4058_v29 = vsel %vm13599_vm9, %v11207_v27, %v4057_v59 }
 0x19e   : > { %v1078_v52 = vmax.f32 %v908_v46, 0.0  ;;  %1433 = vst [vmem:[#allocation2 + $0x11c] sm:$0x1] %v1432_v13  ;;  %v2822_v53 = vld [vmem:[#allocation2 + $0x8] sm:$0xf]  ;;  %v2588_v34 = vsel %vm13252_vm6, %v2001_v62, %v2587_v22  ;;  %v2591_v56 = vsel %vm13220_vm3, %v2002_v40, %v2590_v15  ;;  %v11461_v1 = vcombine.low %v4054_v25, %v4058_v29 }
 0x19f   : > { %2589 = vst [vmem:[#allocation2 + $0x100] sm:$0xf] %v2588_v34  ;;  %2592 = vst [vmem:[#allocation2 + $0x104] sm:$0x1] %v2591_v56  ;;  %v2038_v4 = vrot.slane %v2036_v23, 7  ;;  %v2953_v61 = vshrl.u32 %v2821_v50, 16 }
 0x1a0   : > { %v11806_v51 = vpack.c.bf16 %v1078_v52, %v1078_v52  ;;  %7662 = vrot.lane.b32.xlu1 %v11461_v1, %s13025_s8  ;;  %v2956_v59 = vshll.u32 %v2821_v50, 16  ;;  %v2962_v46 = vshll.u32 %v13573_v47, 16  ;;  %v2967_v0 = vshrl.u32 %v2822_v53, 16  ;;  %v6808_v11 = vld [vmem:[#allocation2 + $0x80] sm:$0xe] }
 0x1a1   : > { %v2970_v60 = vshll.u32 %v2822_v53, 16  ;;  %v6809_v22 = vld [vmem:[#allocation2 + $0x88] sm:$0xe]  ;;  %v2041_v27 = vor.u32 %v2039_v42, %v2038_v4  ;;  %v2042_v35 = vrot.slane %v2038_v4, 4  ;;  %v2955_v23 = vrot.slane %v2953_v61, 4 }
 0x1a2   : > { %v2617_v62 = vld [vmem:[#allocation2 + $0x128] sm:$0xf]  ;;  %v2620_v40 = vld [vmem:[#allocation2 + $0x12c] sm:$0x1]  ;;  %v2020_v25 = vshrl.u32 %v11806_v51, 16  ;;  %v2023_v13 = vshll.u32 %v11806_v51, 16 }
 0x1a3   : > { %v2958_v29 = vrot.slane %v2956_v59, 5  ;;  %v2964_v52 = vrot.slane %v2962_v46, 5  ;;  %v5848_v34 = vld [vmem:[#allocation2 + $0x84] sm:$0x1]  ;;  %v3882_v50 = vld [vmem:[#allocation2 + $0x150] sm:$0xe]  ;;  %v2618_v47 = vsel %vm13252_vm6, %v2041_v27, %v2617_v62  ;;  %v2621_v53 = vsel %vm13220_vm3, %v2042_v35, %v2620_v40 }
 0x1a4   : > { %v2022_v56 = vrot.slane %v2020_v25, 7  ;;  %v2605_v1 = vld [vmem:[#allocation2 + $0x118] sm:$0xf]  ;;  %v2969_v3 = vrot.slane %v2967_v0, 4  ;;  %v5849_v42 = vld [vmem:[#allocation2 + $0x8c] sm:$0x1] }
 0x1a5   : > { %v2919_v4 = vld [vmem:[#allocation2 + $0x154] sm:$0x1]  ;;  %2619 = vst [vmem:[#allocation2 + $0x128] sm:$0xf] %v2618_v47  ;;  %2622 = vst [vmem:[#allocation2 + $0x12c] sm:$0x1] %v2621_v53  ;;  %v2959_v51 = vor.u32 %v2958_v29, %v2955_v23 }
 0x1a6   : > { %v2608_v31 = vld [vmem:[#allocation2 + $0x11c] sm:$0x1]  ;;  %v2972_v61 = vrot.slane %v2970_v60, 5  ;;  %v2976_v59 = vshll.u32 %v13646_v9, 16  ;;  %v11344_v46 = vrot.slane %v6808_v11, 9  ;;  %v2025_v45 = vor.u32 %v2023_v13, %v2022_v56 }
 0x1a7   : > { %v2920_v15 = vld [vmem:[#allocation2 + $0x15c] sm:$0x1]  ;;  %v2026_v30 = vrot.slane %v2022_v56, 4  ;;  %v7038_v27 = vrot.slane %v5848_v34, 5  ;;  %v11345_v62 = vrot.slane %v6809_v22, 9  ;;  %v2960_v35 = vrot.slane %v2959_v51, 4 }
 0x1a8   : > { %v2973_v40 = vor.u32 %v2972_v61, %v2969_v3  ;;  %v2978_v25 = vrot.slane %v2976_v59, 5  ;;  %v7042_v0 = vrot.slane %v5849_v42, 5  ;;  %v6810_v41 = vld [vmem:[#allocation2 + $0x90] sm:$0xe]  ;;  %v2606_v47 = vsel %vm13252_vm6, %v2025_v45, %v2605_v1  ;;  %v5850_v3 = vld [vmem:[#allocation2 + $0x94] sm:$0x1]  ;;  %v12348_v59 = vpop.f32.mrf.mxu0 }
 0x1a9   : > { %v2609_v60 = vsel %vm13220_vm3, %v2026_v30, %v2608_v31  ;;  %v7039_v11 = vsel %vm13599_vm9, %v11344_v46, %v7038_v27  ;;  %v11238_v22 = vrot.slane %v3882_v50, 9  ;;  %v6811_v13 = vld [vmem:[#allocation2 + $0x98] sm:$0xe]  ;;  %2607 = vst [vmem:[#allocation2 + $0x118] sm:$0xf] %v2606_v47  ;;  %v2965_v45 = vsel %vm13932_vm13, %v2960_v35, %v2964_v52 }
 0x1aa   : > { %2610 = vst [vmem:[#allocation2 + $0x11c] sm:$0x1] %v2609_v60  ;;  %v2974_v23 = vrot.slane %v2973_v40, 4  ;;  %v7043_v30 = vsel %vm13599_vm9, %v11345_v62, %v7042_v0  ;;  %v4181_v31 = vrot.slane %v2919_v4, 5  ;;  %v5851_v29 = vld [vmem:[#allocation2 + $0x9c] sm:$0x1]  ;;  %v18373_v0 = vor.u32 %v13865_v43, %v13855_v28 }
 0x1ab   : > { %v11658_v34 = vcombine.low %v7039_v11, %v7043_v30  ;;  %v11239_v53 = vrot.slane %v3883_v12, 9  ;;  %v4185_v56 = vrot.slane %v2920_v15, 5  ;;  %v11346_v1 = vrot.slane %v6810_v41, 9  ;;  %v1246_v15 = vld [vmem:[#allocation2 + $0x130] sm:$0x1] }
 0x1ac   : > { %v2979_v50 = vsel %vm13932_vm13, %v2974_v23, %v2978_v25  ;;  %v4182_v42 = vsel %vm13599_vm9, %v11238_v22, %v4181_v31  ;;  %v7046_v51 = vrot.slane %v5850_v3, 5  ;;  %v11347_v61 = vrot.slane %v6811_v13, 9  ;;  %v1440_v40 = vld [vmem:[#allocation2 + $0x134] sm:$0x1]  ;;  %v2853_v25 = vld [vmem:[#allocation2 + $0x140] sm:$0xf]  ;;  %v910_v31 = vpop.f32.mrf.mxu0 }
 0x1ad   : > { %v11428_v46 = vcombine.low %v2965_v45, %v2979_v50  ;;  %12397 = vmatprep.mubr.msk.bf16.mxu0 %vm8684_vm10, %v11658_v34  ;;  %v4186_v4 = vsel %vm13599_vm9, %v11239_v53, %v4185_v56  ;;  %v7050_v12 = vrot.slane %v5851_v29, 5  ;;  %v5932_v27 = vshll.u32 %v13820_v44, 16  ;;  %v13967_v3 = vld [vmem:[#allocation2 + $0x48] sm:$0xf]  ;;  %v12758_v50 = vld [vmem:[#allocation2 + $0x144] sm:$0x1] }
 0x1ae   : > { %v11477_v62 = vcombine.low %v4182_v42, %v4186_v4  ;;  %v7047_v35 = vsel %vm13599_vm9, %v11346_v1, %v7046_v51  ;;  %v13957_v47 = vrot.slane %v18373_v0, 4  ;;  %v18375_v60 = vor.u32 %v13896_v57, %v13888_v49  ;;  %v2854_v45 = vld [vmem:[#allocation2 + $0x148] sm:$0xf]  ;;  %v13976_v57 = vld [vmem:[#allocation2 + $0x40] sm:$0xf] }
 0x1af   : > { %7500 = vrot.lane.b32.xlu0 %v11428_v46, %s13026_s13  ;;  %v7051_v22 = vsel %vm13599_vm9, %v11347_v61, %v7050_v12  ;;  %v919_v13 = vadd.f32 %v13709_v17, %v12348_v59  ;;  %v18377_v23 = vshrl.u32 %v13820_v44, 16  ;;  %v5943_v43 = vshrl.u32 %v13807_v37, 16  ;;  %v5858_v2 = vld [vmem:[#allocation2 + $0xe4] sm:$0x1] }
 0x1b0   : > { %18374 = vst [vmem:[#allocation24_spill] sm:$0xff] %v13957_v47  ;;  %v13962_v11 = vrot.slane %v18375_v60, 4  ;;  %7694 = vrot.lane.b32.xlu1 %v11477_v62, %s13025_s8  ;;  %v11659_v49 = vcombine.low %v7047_v35, %v7051_v22  ;;  %v1247_v30 = vsel %vm13220_vm3, 0, %v1246_v15  ;;  %v11591_v29 = vcombine.low %v13976_v57, %v13967_v3  ;;  %v1240_v15 = vld [vmem:[#allocation2 + $0x120] sm:$0x1] }
 0x1b1   : > { %v13972_v28 = vrot.slane %v18377_v23, 4  ;;  %v1081_v34 = vmax.f32 %v919_v13, 0.0  ;;  %1248 = vst [vmem:[#allocation2 + $0x130] sm:$0x1] %v1247_v30  ;;  %v1441_v53 = vsel %vm13228_vm4, 0, %v1440_v40  ;;  %v3401_v56 = vshrl.u32 %v2853_v25, 16 }
 0x1b2   : > { %18376 = vst [vmem:[#allocation25_spill] sm:$0xff] %v13962_v11  ;;  %12398 = vmatmul.mubr.msk.bf16.gmra.mxu0 %vm8684_vm10, %v11659_v49  ;;  %1442 = vst [vmem:[#allocation2 + $0x134] sm:$0x1] %v1441_v53  ;;  %v3404_v1 = vshll.u32 %v2853_v25, 16  ;;  %v3410_v42 = vshll.u32 %v12758_v50, 16  ;;  %v3415_v51 = vshrl.u32 %v2854_v45, 16  ;;  %v911_v12 = vadd.f32 %v13709_v17, %v910_v31 }
 0x1b3   : > { %v3418_v61 = vshll.u32 %v2854_v45, 16  ;;  %v4876_v59 = vshrl.u32 %v13849_v33, 16  ;;  %8370 = vrot.lane.b32.xlu0 %v11591_v29, %s13025_s8  ;;  %v11809_v46 = vpack.c.bf16 %v1081_v34, %v1081_v34  ;;  %v3403_v4 = vrot.slane %v3401_v56, 4  ;;  %v1434_v62 = vld [vmem:[#allocation2 + $0x124] sm:$0x1] }
 0x1b4   : > { %v3406_v35 = vrot.slane %v3404_v1, 5  ;;  %v3417_v40 = vrot.slane %v3415_v51, 4  ;;  %v3424_v60 = vshll.u32 %v13693_v6, 16  ;;  %v3412_v13 = vrot.slane %v3410_v42, 5  ;;  %v6812_v53 = vld [vmem:[#allocation2 + $0xb0] sm:$0xe] }
 0x1b5   : > { %v3420_v0 = vrot.slane %v3418_v61, 5  ;;  %v2044_v25 = vshrl.u32 %v11809_v46, 16  ;;  %v2047_v22 = vshll.u32 %v11809_v46, 16  ;;  %v1079_v45 = vmax.f32 %v911_v12, 0.0  ;;  %v12657_v56 = vld [vmem:[%s13182_s19 + $0xe0] sm:$0xff]   ;;  %v12658_v1 = vld [vmem:[%s13182_s19 + $0xe8] sm:$0xff]  }
 0x1b6   : > { %v3407_v23 = vor.u32 %v3406_v35, %v3403_v4  ;;  %v1241_v30 = vsel %vm13220_vm3, 0, %v1240_v15  ;;  %v1435_v17 = vsel %vm13228_vm4, 0, %v1434_v62  ;;  %v5946_v31 = vshll.u32 %v13807_v37, 16  ;;  %12373 = vmatprep.mubr.bf16.mxu1 %v12657_v56  ;;  %v5859_v11 = vld [vmem:[#allocation2 + $0xec] sm:$0x1] }
 0x1b7   : > { %v3421_v49 = vor.u32 %v3420_v0, %v3417_v40  ;;  %v4879_v29 = vshll.u32 %v13849_v33, 16  ;;  %v2046_v34 = vrot.slane %v2044_v25, 7  ;;  %1242 = vst [vmem:[#allocation2 + $0x120] sm:$0x1] %v1241_v30  ;;  %1436 = vst [vmem:[#allocation2 + $0x124] sm:$0x1] %v1435_v17  ;;  %v11807_v6 = vpack.c.bf16 %v1079_v45, %v1079_v45  ;;  %12374 = vmatmul.mubr.bf16.gmra.mxu1 %v12658_v1 }
 0x1b8   : > { %v4890_v50 = vshrl.u32 %v13836_v24, 16  ;;  %v2623_v42 = vld [vmem:[#allocation2 + $0x130] sm:$0xf]  ;;  %v3408_v51 = vrot.slane %v3407_v23, 4  ;;  %v3426_v46 = vrot.slane %v3424_v60, 5  ;;  %v14000_v33 = vrot.slane %v4876_v59, 4 }
 0x1b9   : > { %v3422_v61 = vrot.slane %v3421_v49, 4  ;;  %v2049_v4 = vor.u32 %v2047_v22, %v2046_v34  ;;  %v2050_v12 = vrot.slane %v2046_v34, 4  ;;  %v2626_v15 = vld [vmem:[#allocation2 + $0x134] sm:$0x1]  ;;  %v2028_v62 = vshrl.u32 %v11807_v6, 16 }
 0x1ba   : > { %v2031_v35 = vshll.u32 %v11807_v6, 16  ;;  %v13998_v40 = vld [vmem:[#allocation2 + $0x188] sm:$0xf]  ;;  %v4893_v0 = vshll.u32 %v13836_v24, 16  ;;  %v3413_v25 = vsel %vm13932_vm13, %v3408_v51, %v3412_v13  ;;  %v5852_v23 = vld [vmem:[#allocation2 + $0xb4] sm:$0x1] }
 0x1bb   : > { %v3427_v45 = vsel %vm13932_vm13, %v3422_v61, %v3426_v46  ;;  %v6813_v60 = vld [vmem:[#allocation2 + $0xb8] sm:$0xe]  ;;  %v2624_v22 = vsel %vm13252_vm6, %v2049_v4, %v2623_v42  ;;  %v2627_v49 = vsel %vm13220_vm3, %v2050_v12, %v2626_v15  ;;  %v2030_v59 = vrot.slane %v2028_v62, 7  ;;  %v14011_v17 = vld [vmem:[#allocation2 + $0x180] sm:$0xf] }
 0x1bc   : > { %v11444_v30 = vcombine.low %v3413_v25, %v3427_v45  ;;  %v5853_v24 = vld [vmem:[#allocation2 + $0xbc] sm:$0x1]  ;;  %v4881_v34 = vrot.slane %v4879_v29, 5  ;;  %v4892_v6 = vrot.slane %v4890_v50, 4  ;;  %2625 = vst [vmem:[#allocation2 + $0x130] sm:$0xf] %v2624_v22  ;;  %v11607_v13 = vcombine.low %v14011_v17, %v13998_v40 }
 0x1bd   : > { %2628 = vst [vmem:[#allocation2 + $0x134] sm:$0x1] %v2627_v49  ;;  %v11348_v56 = vrot.slane %v6812_v53, 9  ;;  %v14015_v1 = vld [vmem:[#allocation2 + $0x38] sm:$0xf]  ;;  %v2033_v61 = vor.u32 %v2031_v35, %v2030_v59  ;;  %v2034_v46 = vrot.slane %v2030_v59, 4 }
 0x1be   : > { %v14017_v51 = vld [vmem:[#allocation2 + $0x40] sm:$0xf]  ;;  %v5854_v42 = vld [vmem:[#allocation2 + $0xc4] sm:$0x1]  ;;  %7532 = vrot.lane.b32.xlu1 %v11444_v30, %s13026_s13  ;;  %v7054_v4 = vrot.slane %v5852_v23, 5  ;;  %v11349_v12 = vrot.slane %v6813_v60, 9  ;;  %8402 = vrot.lane.b32.xlu0 %v11607_v13, %s13025_s8 }
 0x1bf   : > { %v6814_v15 = vld [vmem:[#allocation2 + $0xc0] sm:$0xe]  ;;  %v14020_v29 = vld [vmem:[#allocation2 + $0x30] sm:$0xf]  ;;  %v4895_v50 = vrot.slane %v4893_v0, 5  ;;  %v7058_v53 = vrot.slane %v5853_v24, 5  ;;  %v11495_v23 = vcombine.low %v14015_v1, %v14017_v51 }
 0x1c0   : > { %v2611_v62 = vld [vmem:[#allocation2 + $0x120] sm:$0xf]  ;;  %v2614_v25 = vld [vmem:[#allocation2 + $0x124] sm:$0x1]  ;;  %v7055_v35 = vsel %vm13599_vm9, %v11348_v56, %v7054_v4  ;;  %v5855_v0 = vld [vmem:[#allocation2 + $0xcc] sm:$0x1]  ;;  %v4882_v56 = vor.u32 %v4881_v34, %v14000_v33 }
 0x1c1   : > { %v2612_v45 = vsel %vm13252_vm6, %v2033_v61, %v2611_v62  ;;  %v2615_v22 = vsel %vm13220_vm3, %v2034_v46, %v2614_v25  ;;  %v6815_v60 = vld [vmem:[#allocation2 + $0xc8] sm:$0xe]  ;;  %v14031_v49 = vld [vmem:[#allocation2 + $0x38] sm:$0xf]  ;;  %v14035_v30 = vrot.slane %v5932_v27, 5  ;;  %v14039_v59 = vrot.slane %v5943_v43, 4 }
 0x1c2   : > { %2613 = vst [vmem:[#allocation2 + $0x120] sm:$0xf] %v2612_v45  ;;  %2616 = vst [vmem:[#allocation2 + $0x124] sm:$0x1] %v2615_v22  ;;  %v7059_v24 = vsel %vm13599_vm9, %v11349_v12, %v7058_v53  ;;  %v11590_v13 = vcombine.low %v14020_v29, %v14031_v49  ;;  %7890 = vrot.lane.b32.xlu1 %v11495_v23, %s13024_s30  ;;  %v11350_v44 = vrot.slane %v6814_v15, 9  ;;  %v7062_v27 = vrot.slane %v5854_v42, 5 }
 0x1c3   : > { %v11660_v61 = vcombine.low %v7055_v35, %v7059_v24  ;;  %v12661_v46 = vld [vmem:[%s13182_s19 + $0xf0] sm:$0xff]   ;;  %v12662_v4 = vld [vmem:[%s13182_s19 + $0xf8] sm:$0xff]   ;;  %v4896_v62 = vor.u32 %v4895_v50, %v4892_v6  ;;  %v6377_v43 = vshrl.u32 %v13878_v14, 16  ;;  %v11351_v25 = vrot.slane %v6815_v60, 9  ;;  %v14078_v24 = vld [vmem:[#allocation2 + $0x180] sm:$0xf] }
 0x1c4   : > { %v7066_v45 = vrot.slane %v5855_v0, 5  ;;  %8368 = vrot.lane.b32.xlu0 %v11590_v13, %s13025_s8  ;;  %v14053_v12 = vrot.slane %v5946_v31, 5  ;;  %v6380_v33 = vshll.u32 %v13878_v14, 16  ;;  %v6391_v34 = vshrl.u32 %v13871_v58, 16  ;;  %12377 = vmatprep.mubr.bf16.mxu1 %v12661_v46  ;;  %v14069_v35 = vld [vmem:[#allocation2 + $0x178] sm:$0xf] }
 0x1c5   : > { %12401 = vmatprep.mubr.msk.bf16.mxu0 %vm8684_vm10, %v11660_v61  ;;  %v7063_v6 = vsel %vm13599_vm9, %v11350_v44, %v7062_v27  ;;  %v6394_v42 = vshll.u32 %v13871_v58, 16  ;;  %v5985_v15 = vshrl.u32 %v13976_v57, 16  ;;  %v5988_v50 = vshll.u32 %v13976_v57, 16  ;;  %12378 = vmatmul.mubr.bf16.gmra.mxu1 %v12662_v4  ;;  %v12663_v23 = vld [vmem:[%s13198_s23 + $0x38] sm:$0xff]   ;;  %v14087_v44 = vld [vmem:[#allocation2 + $0x170] sm:$0xf] }
 0x1c6   : > { %v7067_v37 = vsel %vm13599_vm9, %v11351_v25, %v7066_v45  ;;  %v14065_v31 = vrot.slane %v4882_v56, 4  ;;  %v5999_v14 = vshrl.u32 %v13967_v3, 16  ;;  %v6002_v53 = vshll.u32 %v13967_v3, 16  ;;  %v14089_v27 = vld [vmem:[#allocation2 + $0x178] sm:$0xf]  ;;  %9447 = vmatpush1.bf16.msra.mxu1 %v12663_v23 }
 0x1c7   : > { %v11661_v22 = vcombine.low %v7063_v6, %v7067_v37  ;;  %v14072_v0 = vrot.slane %v4896_v62, 4  ;;  %v14074_v58 = vrot.slane %v6377_v43, 4  ;;  %v6433_v57 = vshrl.u32 %v14011_v17, 16  ;;  %v5857_v46 = vld [vmem:[#allocation2 + $0xdc] sm:$0x1] }
 0x1c8   : > { %18378 = vst [vmem:[#allocation26_spill] sm:$0xff] %v14065_v31  ;;  %v6436_v60 = vshll.u32 %v14011_v17, 16  ;;  %v14080_v13 = vrot.slane %v6380_v33, 5  ;;  %v6447_v56 = vshrl.u32 %v13998_v40, 16  ;;  %v4512_v3 = vshrl.u32 %v14015_v1, 16 }
 0x1c9   : > { %18379 = vst [vmem:[#allocation27_spill] sm:$0xff] %v14072_v0  ;;  %12402 = vmatmul.mubr.msk.bf16.gmra.mxu0 %vm8684_vm10, %v11661_v22  ;;  %v11511_v61 = vcombine.low %v14069_v35, %v14078_v24  ;;  %v6817_v4 = vld [vmem:[#allocation2 + $0xd8] sm:$0xe]  ;;  %v3852_v17 = vld [vmem:[#allocation2 + $0x20] sm:$0xe]  ;;  %v14091_v62 = vrot.slane %v6391_v34, 4 }
 0x1ca   : > { %v14093_v43 = vrot.slane %v6394_v42, 5  ;;  %v14095_v25 = vrot.slane %v5985_v15, 4  ;;  %v14097_v45 = vrot.slane %v5988_v50, 5  ;;  %v6816_v33 = vld [vmem:[#allocation2 + $0xd0] sm:$0xe]  ;;  %v18380_v22 = vmov 0  }
 0x1cb   : > { %v14099_v6 = vld [vmem:[#allocation2 + $0x24] sm:$0x1]  ;;  %v3853_v37 = vld [vmem:[#allocation2 + $0x28] sm:$0xe]  ;;  %9448 = vmatprep.subr.bf16.mxu1 %v18380_v22  ;;  %v14102_v41 = vrot.slane %v5999_v14, 4  ;;  %v14104_v52 = vrot.slane %v6002_v53, 5  ;;  %7922 = vrot.lane.b32.xlu1 %v11511_v61, %s13024_s30  ;;  %v11606_v14 = vcombine.low %v14087_v44, %v14089_v27 }
 0x1cc   : > { %v4515_v23 = vshll.u32 %v14015_v1, 16  ;;  %v4526_v34 = vshrl.u32 %v14017_v51, 16  ;;  %v5856_v42 = vld [vmem:[#allocation2 + $0xd4] sm:$0x1]  ;;  %v14109_v15 = vld [vmem:[#allocation2 + $0x2c] sm:$0x1] }
 0x1cd   : > { %v14111_v50 = vrot.slane %v6433_v57, 4  ;;  %v14113_v0 = vrot.slane %v6436_v60, 5  ;;  %v6819_v53 = vld [vmem:[#allocation2 + $0xe8] sm:$0xe]  ;;  %v14118_v26 = vrot.slane %v6447_v56, 4  ;;  %v14120_v1 = vrot.slane %v4512_v3, 4  ;;  %8400 = vrot.lane.b32.xlu0 %v11606_v14, %s13025_s8 }
 0x1ce   : > { %v11352_v5 = vrot.slane %v6816_v33, 9  ;;  %v6818_v47 = vld [vmem:[#allocation2 + $0xe0] sm:$0xe]  ;;  %v1279_v57 = vld [vmem:[#allocation2 + $0x1a8] sm:$0x1]  ;;  %v7070_v60 = vrot.slane %v5856_v42, 5 }
 0x1cf   : > { %18381 = vst [vmem:[#allocation28_spill] sm:$0xff] %v14111_v50  ;;  %18382 = vst [vmem:[#allocation29_spill] sm:$0xff] %v14113_v0  ;;  %v11353_v39 = vrot.slane %v6817_v4, 9  ;;  %v7074_v31 = vrot.slane %v5857_v46, 5  ;;  %v11208_v10 = vrot.slane %v3852_v17, 9  ;;  %v14124_v7 = vrot.slane %v4515_v23, 5  ;;  %v12359_v17 = vpop.f32.mrf.mxu1 }
 0x1d0   : > { %18383 = vst [vmem:[#allocation30_spill] sm:$0xff] %v14118_v26  ;;  %v14126_v56 = vrot.slane %v4526_v34, 4  ;;  %v4061_v3 = vrot.slane %v14099_v6, 5  ;;  %v11209_v19 = vrot.slane %v3853_v37, 9  ;;  %v12664_v61 = vld [vmem:[%s13198_s23 + $0x30] sm:$0xff]   ;;  %v7071_v33 = vsel %vm13599_vm9, %v11352_v5, %v7070_v60 }
 0x1d1   : > { %v7075_v14 = vsel %vm13599_vm9, %v11353_v39, %v7074_v31  ;;  %v4065_v4 = vrot.slane %v14109_v15, 5  ;;  %v11354_v46 = vrot.slane %v6818_v47, 9  ;;  %v1473_v42 = vld [vmem:[#allocation2 + $0x1ac] sm:$0x1]  ;;  %v7078_v8 = vrot.slane %v5858_v2, 5  ;;  %9449 = vmatpush1.bf16.msra.mxu1 %v12664_v61 }
 0x1d2   : > { %v11662_v23 = vcombine.low %v7071_v33, %v7075_v14  ;;  %v4062_v34 = vsel %vm13599_vm9, %v11208_v10, %v4061_v3  ;;  %v11355_v55 = vrot.slane %v6819_v53, 9  ;;  %v7082_v26 = vrot.slane %v5859_v11, 5  ;;  %v14140_v5 = vld [vmem:[%s13159_s21] ss:$0 sm:$0xff]  ;;  %9450 = vmatprep.subr.bf16.mxu1 %v18380_v22  ;;  %v1273_v11 = vld [vmem:[#allocation2 + $0x198] sm:$0x1]  ;;  %v955_v33 = vpop.f32.mrf.mxu1 }
 0x1d3   : > { %v4066_v37 = vsel %vm13599_vm9, %v11209_v19, %v4065_v4  ;;  %v964_v39 = vadd.f32 %v14140_v5, %v12359_v17  ;;  %v1280_v47 = vsel %vm13220_vm3, 0, %v1279_v57  ;;  %v7079_v2 = vsel %vm13599_vm9, %v11354_v46, %v7078_v8  ;;  %v12760_v57 = vld [vmem:[#allocation2 + $0x14] sm:$0x1]  ;;  %v1467_v8 = vld [vmem:[#allocation2 + $0x19c] sm:$0x1] }
 0x1d4   : > { %12405 = vmatprep.mubr.msk.bf16.mxu0 %vm8684_vm10, %v11662_v23  ;;  %v11462_v31 = vcombine.low %v4062_v34, %v4066_v37  ;;  %1281 = vst [vmem:[#allocation2 + $0x1a8] sm:$0x1] %v1280_v47  ;;  %v1474_v10 = vsel %vm13228_vm4, 0, %v1473_v42  ;;  %v5907_v19 = vor.u32 %v13882_v48, %v13880_v16  ;;  %v7083_v53 = vsel %vm13599_vm9, %v11355_v55, %v7082_v26  ;;  %v3884_v14 = vld [vmem:[#allocation2 + $0x160] sm:$0xe]  ;;  %v12665_v37 = vld [vmem:[%s13198_s23 + $0x28] sm:$0xff]  }
 0x1d5   : > { %v1092_v61 = vmax.f32 %v964_v39, 0.0  ;;  %1475 = vst [vmem:[#allocation2 + $0x1ac] sm:$0x1] %v1474_v10  ;;  %v5910_v60 = vshll.u32 %v12760_v57, 16  ;;  %v5921_v3 = vor.u32 %v13886_v63, %v13884_v21  ;;  %v11663_v4 = vcombine.low %v7079_v2, %v7083_v53  ;;  %v12761_v16 = vld [vmem:[#allocation2 + $0x1c] sm:$0x1]  ;;  %9451 = vmatpush1.bf16.msra.mxu1 %v12665_v37 }
 0x1d6   : > { %7664 = vrot.lane.b32.xlu1 %v11462_v31, %s13025_s8  ;;  %v5908_v46 = vrot.slane %v5907_v19, 4  ;;  %v5924_v48 = vshll.u32 %v12761_v16, 16  ;;  %v956_v17 = vadd.f32 %v14140_v5, %v955_v33  ;;  %v14159_v55 = vld [vmem:[#allocation2 + $0x164] sm:$0x1]  ;;  %v14161_v26 = vld [vmem:[#allocation2 + $0x16c] sm:$0x1]  ;;  %9452 = vmatprep.subr.bf16.mxu1 %v18380_v22 }
 0x1d7   : > { %v11820_v42 = vpack.c.bf16 %v1092_v61, %v1092_v61  ;;  %v5912_v23 = vrot.slane %v5910_v60, 5  ;;  %v5922_v34 = vrot.slane %v5921_v3, 4  ;;  %v1274_v21 = vsel %vm13220_vm3, 0, %v1273_v11  ;;  %v3885_v63 = vld [vmem:[#allocation2 + $0x168] sm:$0xe]  ;;  %12406 = vmatmul.mubr.msk.bf16.gmra.mxu0 %vm8684_vm10, %v11663_v4 }
 0x1d8   : > { %v5926_v39 = vrot.slane %v5924_v48, 5  ;;  %v1090_v47 = vmax.f32 %v956_v17, 0.0  ;;  %1275 = vst [vmem:[#allocation2 + $0x198] sm:$0x1] %v1274_v21  ;;  %v1468_v31 = vsel %vm13228_vm4, 0, %v1467_v8  ;;  %v11240_v2 = vrot.slane %v3884_v14, 9  ;;  %v12360_v8 = vpop.f32.mrf.mxu1 }
 0x1d9   : > { %v2132_v10 = vshrl.u32 %v11820_v42, 16  ;;  %v2135_v19 = vshll.u32 %v11820_v42, 16  ;;  %v5913_v53 = vsel %vm13932_vm13, %v5908_v46, %v5912_v23  ;;  %1469 = vst [vmem:[#allocation2 + $0x19c] sm:$0x1] %v1468_v31  ;;  %v4189_v61 = vrot.slane %v14159_v55, 5  ;;  %v12666_v21 = vld [vmem:[%s13198_s23 + $0x20] sm:$0xff]  }
 0x1da   : > { %v1282_v11 = vld [vmem:[#allocation2 + $0x1b0] sm:$0x1]  ;;  %v5927_v57 = vsel %vm13932_vm13, %v5922_v34, %v5926_v39  ;;  %v11818_v60 = vpack.c.bf16 %v1090_v47, %v1090_v47  ;;  %v11241_v3 = vrot.slane %v3885_v63, 9  ;;  %v4193_v33 = vrot.slane %v14161_v26, 5  ;;  %v1476_v14 = vld [vmem:[#allocation2 + $0x1b4] sm:$0x1]  ;;  %9453 = vmatpush1.bf16.msra.mxu1 %v12666_v21 }
 0x1db   : > { %v2134_v4 = vrot.slane %v2132_v10, 7  ;;  %v2689_v16 = vld [vmem:[#allocation2 + $0x1a8] sm:$0xf]  ;;  %v11620_v46 = vcombine.low %v5913_v53, %v5927_v57  ;;  %v4190_v48 = vsel %vm13599_vm9, %v11240_v2, %v4189_v61  ;;  %v967_v17 = vadd.f32 %v14140_v5, %v12360_v8  ;;  %v4369_v42 = vld [vmem:[#allocation2 + $0x3c] sm:$0x1]  ;;  %9454 = vmatprep.subr.bf16.mxu1 %v18380_v22 }
 0x1dc   : > { %v5329_v23 = vld [vmem:[#allocation2 + $0x38] sm:$0xe]  ;;  %v2692_v34 = vld [vmem:[#allocation2 + $0x1ac] sm:$0x1]  ;;  %v2116_v37 = vshrl.u32 %v11818_v60, 16  ;;  %v2119_v63 = vshll.u32 %v11818_v60, 16  ;;  %v4194_v39 = vsel %vm13599_vm9, %v11241_v3, %v4193_v33 }
 0x1dd   : > { %v1283_v47 = vsel %vm13220_vm3, 0, %v1282_v11  ;;  %v4370_v31 = vld [vmem:[#allocation2 + $0x44] sm:$0x1]  ;;  %v2137_v10 = vor.u32 %v2135_v19, %v2134_v4  ;;  %v2138_v53 = vrot.slane %v2134_v4, 4  ;;  %8524 = vrot.lane.b32.xlu0 %v11620_v46, %s13024_s30  ;;  %v11478_v2 = vcombine.low %v4190_v48, %v4194_v39  ;;  %v5330_v57 = vld [vmem:[#allocation2 + $0x40] sm:$0xe] }
 0x1de   : > { %v1093_v61 = vmax.f32 %v967_v17, 0.0  ;;  %1284 = vst [vmem:[#allocation2 + $0x1b0] sm:$0x1] %v1283_v47  ;;  %v1276_v8 = vld [vmem:[#allocation2 + $0x1a0] sm:$0x1]  ;;  %v18384_v0 = vshll.u32 %v14017_v51, 16 }
 0x1df   : > { %v2118_v33 = vrot.slane %v2116_v37, 7  ;;  %v1477_v19 = vsel %vm13228_vm4, 0, %v1476_v14  ;;  %v1470_v11 = vld [vmem:[#allocation2 + $0x1a4] sm:$0x1]  ;;  %v2690_v4 = vsel %vm13252_vm6, %v2137_v10, %v2689_v16  ;;  %v2693_v46 = vsel %vm13220_vm3, %v2138_v53, %v2692_v34  ;;  %v2677_v48 = vld [vmem:[#allocation2 + $0x198] sm:$0xf]  ;;  %7696 = vrot.lane.b32.xlu1 %v11478_v2, %s13025_s8  ;;  %v958_v16 = vpop.f32.mrf.mxu1 }
 0x1e0   : > { %v14189_v3 = vrot.slane %v18384_v0, 5  ;;  %1478 = vst [vmem:[#allocation2 + $0x1b4] sm:$0x1] %v1477_v19  ;;  %v11821_v51 = vpack.c.bf16 %v1093_v61, %v1093_v61  ;;  %v11274_v0 = vrot.slane %v5329_v23, 9  ;;  %v5860_v17 = vld [vmem:[#allocation2 + $0x104] sm:$0x1]  ;;  %v959_v53 = vadd.f32 %v14140_v5, %v958_v16 }
 0x1e1   : > { %v6821_v21 = vld [vmem:[#allocation2 + $0x108] sm:$0xe]  ;;  %2691 = vst [vmem:[#allocation2 + $0x1a8] sm:$0xf] %v2690_v4  ;;  %2694 = vst [vmem:[#allocation2 + $0x1ac] sm:$0x1] %v2693_v46  ;;  %v2121_v14 = vor.u32 %v2119_v63, %v2118_v33 }
 0x1e2   : > { %v2122_v37 = vrot.slane %v2118_v33, 4  ;;  %v2680_v39 = vld [vmem:[#allocation2 + $0x19c] sm:$0x1]  ;;  %v5541_v47 = vrot.slane %v4369_v42, 5  ;;  %v11275_v60 = vrot.slane %v5330_v57, 9  ;;  %v2140_v10 = vshrl.u32 %v11821_v51, 16 }
 0x1e3   : > { %v2143_v50 = vshll.u32 %v11821_v51, 16  ;;  %v5545_v34 = vrot.slane %v4370_v31, 5  ;;  %v6820_v2 = vld [vmem:[#allocation2 + $0x100] sm:$0xe]  ;;  %v12668_v19 = vld [vmem:[%s13198_s23 + $0x18] sm:$0xff]   ;;  %v2678_v23 = vsel %vm13252_vm6, %v2121_v14, %v2677_v48  ;;  %v1277_v42 = vsel %vm13220_vm3, 0, %v1276_v8 }
 0x1e4   : > { %v2681_v61 = vsel %vm13220_vm3, %v2122_v37, %v2680_v39  ;;  %v5542_v63 = vsel %vm13599_vm9, %v11274_v0, %v5541_v47  ;;  %v5861_v57 = vld [vmem:[#allocation2 + $0x10c] sm:$0x1]  ;;  %2679 = vst [vmem:[#allocation2 + $0x198] sm:$0xf] %v2678_v23  ;;  %v2142_v31 = vrot.slane %v2140_v10, 7  ;;  %v1091_v4 = vmax.f32 %v959_v53, 0.0  ;;  %9455 = vmatpush1.bf16.msra.mxu1 %v12668_v19 }
 0x1e5   : > { %2682 = vst [vmem:[#allocation2 + $0x19c] sm:$0x1] %v2681_v61  ;;  %v5546_v33 = vsel %vm13599_vm9, %v11275_v60, %v5545_v34  ;;  %1278 = vst [vmem:[#allocation2 + $0x1a0] sm:$0x1] %v1277_v42  ;;  %v1471_v46 = vsel %vm13228_vm4, 0, %v1470_v11  ;;  %v11356_v0 = vrot.slane %v6820_v2, 9  ;;  %9456 = vmatprep.subr.bf16.mxu1 %v18380_v22 }
 0x1e6   : > { %v2695_v48 = vld [vmem:[#allocation2 + $0x1b0] sm:$0xf]  ;;  %v11559_v51 = vcombine.low %v5542_v63, %v5546_v33  ;;  %1472 = vst [vmem:[#allocation2 + $0x1a4] sm:$0x1] %v1471_v46  ;;  %v7086_v14 = vrot.slane %v5860_v17, 5  ;;  %v11357_v37 = vrot.slane %v6821_v21, 9  ;;  %v2145_v8 = vor.u32 %v2143_v50, %v2142_v31 }
 0x1e7   : > { %v2146_v39 = vrot.slane %v2142_v31, 4  ;;  %v11819_v47 = vpack.c.bf16 %v1091_v4, %v1091_v4  ;;  %v7090_v16 = vrot.slane %v5861_v57, 5  ;;  %v5862_v10 = vld [vmem:[#allocation2 + $0x114] sm:$0x1]  ;;  %v18385_v60 = vshll.u32 %v13998_v40, 16 }
 0x1e8   : > { %v5957_v11 = vshrl.u32 %v14020_v29, 16  ;;  %v5960_v53 = vshll.u32 %v14020_v29, 16  ;;  %v2698_v19 = vld [vmem:[#allocation2 + $0x1b4] sm:$0x1]  ;;  %8146 = vrot.lane.b32.xlu0 %v11559_v51, %s13026_s13  ;;  %v7087_v17 = vsel %vm13599_vm9, %v11356_v0, %v7086_v14  ;;  %v14223_v21 = vld [vmem:[#allocation2 + $0x28] sm:$0xf]  ;;  %v2696_v50 = vsel %vm13252_vm6, %v2145_v8, %v2695_v48 }
 0x1e9   : > { %v14216_v34 = vrot.slane %v18385_v60, 5  ;;  %v2699_v40 = vsel %vm13220_vm3, %v2146_v39, %v2698_v19  ;;  %v2124_v2 = vshrl.u32 %v11819_v47, 16  ;;  %v2127_v23 = vshll.u32 %v11819_v47, 16  ;;  %v6822_v61 = vld [vmem:[#allocation2 + $0x110] sm:$0xe] }
 0x1ea   : > { %v6823_v63 = vld [vmem:[#allocation2 + $0x118] sm:$0xe]  ;;  %v4532_v29 = vor.u32 %v14189_v3, %v14126_v56  ;;  %v5971_v42 = vshrl.u32 %v14031_v49, 16  ;;  %v5974_v57 = vshll.u32 %v14031_v49, 16  ;;  %2697 = vst [vmem:[#allocation2 + $0x1b0] sm:$0xf] %v2696_v50  ;;  %v7091_v31 = vsel %vm13599_vm9, %v11357_v37, %v7090_v16  ;;  %v12363_v3 = vpop.f32.mrf.mxu1 }
 0x1eb   : > { %2700 = vst [vmem:[#allocation2 + $0x1b4] sm:$0x1] %v2699_v40  ;;  %v14235_v33 = vld [vmem:[#allocation2 + $0x30] sm:$0xf]  ;;  %v5863_v4 = vld [vmem:[#allocation2 + $0x11c] sm:$0x1]  ;;  %v18386_v46 = vor.u32 %v14124_v7, %v14120_v1  ;;  %v11664_v0 = vcombine.low %v7087_v17, %v7091_v31 }
 0x1ec   : > { %v2126_v51 = vrot.slane %v2124_v2, 7  ;;  %v11494_v56 = vcombine.low %v14223_v21, %v14235_v33  ;;  %v1291_v49 = vld [vmem:[#allocation2 + $0x1c8] sm:$0x1]  ;;  %v1485_v14 = vld [vmem:[#allocation2 + $0x1cc] sm:$0x1]  ;;  %v14246_v37 = vrot.slane %v5957_v11, 4 }
 0x1ed   : > { %v14240_v48 = vrot.slane %v18386_v46, 4  ;;  %v14244_v8 = vld [vmem:[#allocation2 + $0x154] sm:$0x1]  ;;  %v2683_v39 = vld [vmem:[#allocation2 + $0x1a0] sm:$0xf]  ;;  %v11358_v47 = vrot.slane %v6822_v61, 9  ;;  %12409 = vmatprep.mubr.msk.bf16.mxu0 %vm8684_vm10, %v11664_v0  ;;  %v980_v61 = vadd.f32 %v14140_v5, %v12363_v3 }
 0x1ee   : > { %v7094_v16 = vrot.slane %v5862_v10, 5  ;;  %v11359_v60 = vrot.slane %v6823_v63, 9  ;;  %v14248_v7 = vrot.slane %v5960_v53, 5  ;;  %v2129_v1 = vor.u32 %v2127_v23, %v2126_v51  ;;  %v2686_v17 = vld [vmem:[#allocation2 + $0x1a4] sm:$0x1]  ;;  %7888 = vrot.lane.b32.xlu1 %v11494_v56, %s13024_s30  ;;  %v12670_v40 = vld [vmem:[%s13198_s23 + $0x10] sm:$0xff]  }
 0x1ef   : > { %18387 = vst [vmem:[#allocation31_spill] sm:$0xff] %v14240_v48  ;;  %v2130_v19 = vrot.slane %v2126_v51, 4  ;;  %v7098_v50 = vrot.slane %v5863_v4, 5  ;;  %v14253_v2 = vrot.slane %v4532_v29, 4  ;;  %v1292_v10 = vsel %vm13220_vm3, 0, %v1291_v49  ;;  %v971_v4 = vpop.f32.mrf.mxu1  ;;  %9457 = vmatpush1.bf16.msra.mxu1 %v12670_v40 }
 0x1f0   : > { %v7095_v11 = vsel %vm13599_vm9, %v11358_v47, %v7094_v16  ;;  %v14260_v53 = vld [vmem:[#allocation2 + $0x15c] sm:$0x1]  ;;  %v14262_v23 = vrot.slane %v5971_v42, 4  ;;  %v2684_v63 = vsel %vm13252_vm6, %v2129_v1, %v2683_v39  ;;  %1293 = vst [vmem:[#allocation2 + $0x1c8] sm:$0x1] %v1292_v10  ;;  %v1096_v0 = vmax.f32 %v980_v61, 0.0  ;;  %9458 = vmatprep.subr.bf16.mxu1 %v18380_v22 }
 0x1f1   : > { %18388 = vst [vmem:[#allocation32_spill] sm:$0xff] %v14253_v2  ;;  %v2687_v31 = vsel %vm13220_vm3, %v2130_v19, %v2686_v17  ;;  %v7099_v29 = vsel %vm13599_vm9, %v11359_v60, %v7098_v50  ;;  %v1285_v46 = vld [vmem:[#allocation2 + $0x1b8] sm:$0x1]  ;;  %2685 = vst [vmem:[#allocation2 + $0x1a0] sm:$0xf] %v2684_v63  ;;  %v1486_v42 = vsel %vm13228_vm4, 0, %v1485_v14  ;;  %v972_v14 = vadd.f32 %v14140_v5, %v971_v4 }
 0x1f2   : > { %2688 = vst [vmem:[#allocation2 + $0x1a4] sm:$0x1] %v2687_v31  ;;  %v11665_v51 = vcombine.low %v7095_v11, %v7099_v29  ;;  %v6358_v56 = vshll.u32 %v14244_v8, 16  ;;  %v1479_v3 = vld [vmem:[#allocation2 + $0x1bc] sm:$0x1]  ;;  %v14274_v49 = vrot.slane %v5974_v57, 5  ;;  %v11824_v60 = vpack.c.bf16 %v1096_v0, %v1096_v0 }
 0x1f3   : > { %v4960_v39 = vshrl.u32 %v14069_v35, 16  ;;  %v4963_v47 = vshll.u32 %v14069_v35, 16  ;;  %1487 = vst [vmem:[#allocation2 + $0x1cc] sm:$0x1] %v1486_v42  ;;  %v6372_v16 = vshll.u32 %v14260_v53, 16  ;;  %v1286_v19 = vsel %vm13220_vm3, 0, %v1285_v46 }
 0x1f4   : > { %18389 = vst [vmem:[#allocation33_spill] sm:$0xff] %v14274_v49  ;;  %12410 = vmatmul.mubr.msk.bf16.gmra.mxu0 %vm8684_vm10, %v11665_v51  ;;  %v6360_v1 = vrot.slane %v6358_v56, 5  ;;  %v4974_v57 = vshrl.u32 %v14078_v24, 16  ;;  %v4977_v17 = vshll.u32 %v14078_v24, 16  ;;  %1287 = vst [vmem:[#allocation2 + $0x1b8] sm:$0x1] %v1286_v19 }
 0x1f5   : > { %v6374_v50 = vrot.slane %v6372_v16, 5  ;;  %v1480_v35 = vsel %vm13228_vm4, 0, %v1479_v3  ;;  %v2164_v40 = vshrl.u32 %v11824_v60, 16  ;;  %v2167_v11 = vshll.u32 %v11824_v60, 16  ;;  %v14290_v5 = vld [vmem:[#allocation2 + $0x168] sm:$0xf] }
 0x1f6   : > { %v6361_v61 = vsel %vm13932_vm13, %v13809_v38, %v6360_v1  ;;  %v1094_v10 = vmax.f32 %v972_v14, 0.0  ;;  %1481 = vst [vmem:[#allocation2 + $0x1bc] sm:$0x1] %v1480_v35  ;;  %v14292_v63 = vld [vmem:[#allocation2 + $0x170] sm:$0xf]  ;;  %v12673_v31 = vld [vmem:[%s13198_s23 + $0x8] sm:$0xff]  }
 0x1f7   : > { %v14295_v29 = vrot.slane %v4960_v39, 4  ;;  %v6375_v46 = vsel %vm13932_vm13, %v13805_v18, %v6374_v50  ;;  %v14302_v51 = vld [vmem:[#allocation2 + $0x17c] sm:$0x1]  ;;  %v5361_v38 = vld [vmem:[#allocation2 + $0x178] sm:$0xe]  ;;  %v2166_v42 = vrot.slane %v2164_v40, 7  ;;  %9459 = vmatpush1.bf16.msra.mxu1 %v12673_v31  ;;  %v11510_v50 = vcombine.low %v14290_v5, %v14292_v63 }
 0x1f8   : > { %v11636_v56 = vcombine.low %v6361_v61, %v6375_v46  ;;  %v11822_v3 = vpack.c.bf16 %v1094_v10, %v1094_v10  ;;  %v14305_v16 = vld [vmem:[#allocation2 + $0x184] sm:$0x1]  ;;  %v5362_v39 = vld [vmem:[#allocation2 + $0x180] sm:$0xe]  ;;  %v14307_v1 = vrot.slane %v4963_v47, 5  ;;  %v14309_v14 = vrot.slane %v4974_v57, 4  ;;  %9460 = vmatprep.subr.bf16.mxu1 %v18380_v22 }
 0x1f9   : > { %v6824_v60 = vld [vmem:[#allocation2 + $0x120] sm:$0xe]  ;;  %v14311_v19 = vrot.slane %v4977_v17, 5  ;;  %v2713_v18 = vld [vmem:[#allocation2 + $0x1c8] sm:$0xf]  ;;  %v2169_v35 = vor.u32 %v2167_v11, %v2166_v42  ;;  %v2170_v40 = vrot.slane %v2166_v42, 4  ;;  %7920 = vrot.lane.b32.xlu1 %v11510_v50, %s13024_s30 }
 0x1fa   : > { %v2716_v61 = vld [vmem:[#allocation2 + $0x1cc] sm:$0x1]  ;;  %8556 = vrot.lane.b32.xlu0 %v11636_v56, %s13024_s30  ;;  %v2148_v10 = vshrl.u32 %v11822_v3, 16  ;;  %v2151_v46 = vshll.u32 %v11822_v3, 16  ;;  %v11306_v0 = vrot.slane %v5361_v38, 9  ;;  %v5669_v24 = vrot.slane %v14302_v51, 5 }
 0x1fb   : > { %v5865_v31 = vld [vmem:[#allocation2 + $0x12c] sm:$0x1]  ;;  %v5864_v4 = vld [vmem:[#allocation2 + $0x124] sm:$0x1]  ;;  %v2714_v11 = vsel %vm13252_vm6, %v2169_v35, %v2713_v18  ;;  %v2717_v42 = vsel %vm13220_vm3, %v2170_v40, %v2716_v61  ;;  %v2701_v3 = vld [vmem:[#allocation2 + $0x1b8] sm:$0xf] }
 0x1fc   : > { %v2150_v56 = vrot.slane %v2148_v10, 7  ;;  %v6825_v47 = vld [vmem:[#allocation2 + $0x128] sm:$0xe]  ;;  %2715 = vst [vmem:[#allocation2 + $0x1c8] sm:$0xf] %v2714_v11  ;;  %v11307_v17 = vrot.slane %v5362_v39, 9  ;;  %v5670_v40 = vsel %vm13599_vm9, %v11306_v0, %v5669_v24 }
 0x1fd   : > { %2718 = vst [vmem:[#allocation2 + $0x1cc] sm:$0x1] %v2717_v42  ;;  %v2704_v50 = vld [vmem:[#allocation2 + $0x1bc] sm:$0x1]  ;;  %v5673_v38 = vrot.slane %v14305_v16, 5  ;;  %v11360_v36 = vrot.slane %v6824_v60, 9 }
 0x1fe   : > { %v12674_v2 = vld [vmem:[%s13198_s23] sm:$0xff]   ;;  %v2153_v18 = vor.u32 %v2151_v46, %v2150_v56  ;;  %v2154_v35 = vrot.slane %v2150_v56, 4  ;;  %v7102_v61 = vrot.slane %v5864_v4, 5  ;;  %v2823_v10 = vld [vmem:[#allocation2 + $0x10] sm:$0xf]  ;;  %v11361_v11 = vrot.slane %v6825_v47, 9 }
 0x1ff   : > { %v5674_v57 = vsel %vm13599_vm9, %v11307_v17, %v5673_v38  ;;  %v7106_v42 = vrot.slane %v5865_v31, 5  ;;  %v2824_v49 = vld [vmem:[#allocation2 + $0x18] sm:$0xf]  ;;  %9461 = vmatpush1.bf16.msra.mxu1 %v12674_v2  ;;  %v5867_v4 = vld [vmem:[#allocation2 + $0x13c] sm:$0x1]  ;;  %v7118_v31 = vrot.slane %v14244_v8, 5 }
 0x200   : > { %v2702_v39 = vsel %vm13252_vm6, %v2153_v18, %v2701_v3  ;;  %v2705_v60 = vsel %vm13220_vm3, %v2154_v35, %v2704_v50  ;;  %v11575_v46 = vcombine.low %v5670_v40, %v5674_v57  ;;  %v7103_v24 = vsel %vm13599_vm9, %v11360_v36, %v7102_v61  ;;  %v6826_v0 = vld [vmem:[#allocation2 + $0x130] sm:$0xe]  ;;  %9462 = vmatprep.subr.bf16.mxu1 %v18380_v22  ;;  %v5866_v3 = vld [vmem:[#allocation2 + $0x134] sm:$0x1]  ;;  %v12676_v50 = vld [vmem:[%s13198_s23 + $0x78] sm:$0xff]  }
 0x201   : > { %v6828_v56 = vld [vmem:[#allocation2 + $0x150] sm:$0xe]  ;;  %2703 = vst [vmem:[#allocation2 + $0x1b8] sm:$0xf] %v2702_v39  ;;  %2706 = vst [vmem:[#allocation2 + $0x1bc] sm:$0x1] %v2705_v60  ;;  %v7107_v2 = vsel %vm13599_vm9, %v11361_v11, %v7106_v42 }
 0x202   : > { %v2981_v47 = vshrl.u32 %v2823_v10, 16  ;;  %v2984_v17 = vshll.u32 %v2823_v10, 16  ;;  %8178 = vrot.lane.b32.xlu0 %v11575_v46, %s13026_s13  ;;  %v11666_v57 = vcombine.low %v7103_v24, %v7107_v2  ;;  %v2995_v36 = vshrl.u32 %v2824_v49, 16  ;;  %v12762_v18 = vld [vmem:[#allocation2 + $0x1c] sm:$0x1] }
 0x203   : > { %v2998_v38 = vshll.u32 %v2824_v49, 16  ;;  %v3004_v35 = vshll.u32 %v12762_v18, 16  ;;  %v6827_v40 = vld [vmem:[#allocation2 + $0x138] sm:$0xe]  ;;  %v12763_v8 = vld [vmem:[#allocation2 + $0x14] sm:$0x1]  ;;  %9463 = vmatpush2.bf16.msra.mxu1 %v12676_v50 }
 0x204   : > { %v2983_v61 = vrot.slane %v2981_v47, 4  ;;  %v2986_v48 = vrot.slane %v2984_v17, 5  ;;  %v2990_v39 = vshll.u32 %v12763_v8, 16  ;;  %v11362_v60 = vrot.slane %v6826_v0, 9  ;;  %12413 = vmatprep.mubr.msk.bf16.mxu0 %vm8684_vm10, %v11666_v57  ;;  %9464 = vmatprep.subr.bf16.mxu1 %v18380_v22  ;;  %v5327_v47 = vld [vmem:[#allocation2 + $0x28] sm:$0xe] }
 0x205   : > { %v7122_v11 = vrot.slane %v14260_v53, 5  ;;  %v2997_v10 = vrot.slane %v2995_v36, 4  ;;  %v3000_v42 = vrot.slane %v2998_v38, 5  ;;  %v7110_v46 = vrot.slane %v5866_v3, 5  ;;  %v14352_v8 = vld [vmem:[#allocation2 + $0x2c] sm:$0x1] }
 0x206   : > { %v2987_v49 = vor.u32 %v2986_v48, %v2983_v61  ;;  %v11363_v24 = vrot.slane %v6827_v40, 9  ;;  %v7114_v2 = vrot.slane %v5867_v4, 5  ;;  %v11364_v18 = vrot.slane %v6828_v56, 9  ;;  %18390 = vst [vmem:[#allocation34_spill] sm:$0xff] %v14352_v8  ;;  %v5328_v53 = vld [vmem:[#allocation2 + $0x30] sm:$0xe] }
 0x207   : > { %v3001_v17 = vor.u32 %v3000_v42, %v2997_v10  ;;  %v3006_v32 = vrot.slane %v3004_v35, 5  ;;  %v7111_v0 = vsel %vm13599_vm9, %v11362_v60, %v7110_v46  ;;  %v11365_v50 = vrot.slane %v6829_v54, 9  ;;  %v14358_v4 = vld [vmem:[#allocation2 + $0x34] sm:$0x1]  ;;  %v2855_v56 = vld [vmem:[#allocation2 + $0x150] sm:$0xf] }
 0x208   : > { %v2988_v57 = vrot.slane %v2987_v49, 4  ;;  %v2992_v36 = vrot.slane %v2990_v39, 5  ;;  %v7115_v3 = vsel %vm13599_vm9, %v11363_v24, %v7114_v2  ;;  %v7119_v48 = vsel %vm13599_vm9, %v11364_v18, %v7118_v31  ;;  %18391 = vst [vmem:[#allocation35_spill] sm:$0xff] %v14358_v4  ;;  %v2856_v61 = vld [vmem:[#allocation2 + $0x158] sm:$0xf] }
 0x209   : > { %v3002_v38 = vrot.slane %v3001_v17, 4  ;;  %v11667_v35 = vcombine.low %v7111_v0, %v7115_v3  ;;  %v7123_v40 = vsel %vm13599_vm9, %v11365_v50, %v7122_v11  ;;  %v11272_v54 = vrot.slane %v5327_v47, 9  ;;  %v14369_v2 = vld [vmem:[#allocation2 + $0x16c] sm:$0x1]  ;;  %v12764_v47 = vld [vmem:[#allocation2 + $0x154] sm:$0x1] }
 0x20a   : > { %v2993_v60 = vsel %vm13932_vm13, %v2988_v57, %v2992_v36  ;;  %v11668_v39 = vcombine.low %v7119_v48, %v7123_v40  ;;  %v5533_v10 = vrot.slane %v14352_v8, 5  ;;  %v11273_v42 = vrot.slane %v5328_v53, 9  ;;  %18392 = vst [vmem:[#allocation36_spill] sm:$0xff] %v14369_v2  ;;  %v14374_v50 = vld [vmem:[#allocation2 + $0x174] sm:$0x1] }
 0x20b   : > { %v3007_v31 = vsel %vm13932_vm13, %v3002_v38, %v3006_v32  ;;  %12414 = vmatmul.mubr.msk.bf16.gmra.mxu0 %vm8684_vm10, %v11667_v35  ;;  %v5537_v46 = vrot.slane %v14358_v4, 5  ;;  %v3429_v49 = vshrl.u32 %v2855_v56, 16  ;;  %v3432_v24 = vshll.u32 %v2855_v56, 16  ;;  %18393 = vst [vmem:[#allocation37_spill] sm:$0xff] %v14374_v50  ;;  %v5359_v32 = vld [vmem:[#allocation2 + $0x168] sm:$0xe] }
 0x20c   : > { %v11429_v11 = vcombine.low %v2993_v60, %v3007_v31  ;;  %12417 = vmatprep.mubr.msk.bf16.mxu0 %vm8684_vm10, %v11668_v39  ;;  %v5534_v18 = vsel %vm13599_vm9, %v11272_v54, %v5533_v10  ;;  %v3438_v17 = vshll.u32 %v12764_v47, 16  ;;  %v3443_v0 = vshrl.u32 %v2856_v61, 16  ;;  %v5360_v53 = vld [vmem:[#allocation2 + $0x170] sm:$0xe]  ;;  %v14378_v56 = vld [vmem:[#allocation2 + $0x34] sm:$0x1] }
 0x20d   : > { %v5538_v57 = vsel %vm13599_vm9, %v11273_v42, %v5537_v46  ;;  %v3431_v36 = vrot.slane %v3429_v49, 4  ;;  %v3434_v3 = vrot.slane %v3432_v24, 5  ;;  %v3446_v48 = vshll.u32 %v2856_v61, 16  ;;  %v14380_v38 = vld [vmem:[#allocation2 + $0x3c] sm:$0x1]  ;;  %v12677_v35 = vld [vmem:[%s13198_s23 + $0x70] sm:$0xff]  }
 0x20e   : > { %18394 = vst [vmem:[#allocation38_spill] sm:$0xff] %v14380_v38  ;;  %v18395_v40 = vshrl.u32 %v14223_v21, 16  ;;  %7502 = vrot.lane.b32.xlu1 %v11429_v11, %s13026_s13  ;;  %v11558_v60 = vcombine.low %v5534_v18, %v5538_v57  ;;  %v3445_v39 = vrot.slane %v3443_v0, 4  ;;  %v12765_v10 = vld [vmem:[#allocation2 + $0x15c] sm:$0x1]  ;;  %v18396_v42 = vshll.u32 %v14223_v21, 16  ;;  %9465 = vmatpush2.bf16.msra.mxu1 %v12677_v35 }
 0x20f   : > { %v3452_v31 = vshll.u32 %v12765_v10, 16  ;;  %v3854_v47 = vld [vmem:[#allocation2 + $0x30] sm:$0xe]  ;;  %v3435_v61 = vor.u32 %v3434_v3, %v3431_v36  ;;  %v3440_v49 = vrot.slane %v3438_v17, 5  ;;  %v3448_v24 = vrot.slane %v3446_v48, 5  ;;  %9466 = vmatprep.subr.bf16.mxu1 %v18380_v22  ;;  %v12678_v48 = vld [vmem:[%s13198_s23 + $0x68] sm:$0xff]  }
 0x210   : > { %v14385_v54 = vrot.slane %v18395_v40, 4  ;;  %v14390_v46 = vrot.slane %v18396_v42, 5  ;;  %v3855_v4 = vld [vmem:[#allocation2 + $0x38] sm:$0xe]  ;;  %v14392_v8 = vld [vmem:[#allocation2 + $0x164] sm:$0x1]  ;;  %8144 = vrot.lane.b32.xlu0 %v11558_v60, %s13026_s13 }
 0x211   : > { %v3454_v11 = vrot.slane %v3452_v31, 5  ;;  %v11304_v18 = vrot.slane %v5359_v32, 9  ;;  %v5661_v0 = vrot.slane %v14369_v2, 5  ;;  %v11305_v57 = vrot.slane %v5360_v53, 9  ;;  %v6830_v40 = vld [vmem:[#allocation2 + $0x160] sm:$0xe] }
 0x212   : > { %v3436_v21 = vrot.slane %v3435_v61, 4  ;;  %v3449_v10 = vor.u32 %v3448_v24, %v3445_v39  ;;  %v5665_v17 = vrot.slane %v14374_v50, 5  ;;  %v11210_v36 = vrot.slane %v3854_v47, 9  ;;  %v14398_v3 = vld [vmem:[#allocation2 + $0x16c] sm:$0x1]  ;;  %9467 = vmatpush2.bf16.msra.mxu1 %v12678_v48 }
 0x213   : > { %v5662_v35 = vsel %vm13599_vm9, %v11304_v18, %v5661_v0  ;;  %v4069_v60 = vrot.slane %v14378_v56, 5  ;;  %v11211_v32 = vrot.slane %v3855_v4, 9  ;;  %v4073_v31 = vrot.slane %v14380_v38, 5  ;;  %v6831_v53 = vld [vmem:[#allocation2 + $0x168] sm:$0xe]  ;;  %9468 = vmatprep.subr.bf16.mxu1 %v18380_v22 }
 0x214   : > { %v3441_v42 = vsel %vm13932_vm13, %v3436_v21, %v3440_v49  ;;  %v3450_v61 = vrot.slane %v3449_v10, 4  ;;  %v5666_v39 = vsel %vm13599_vm9, %v11305_v57, %v5665_v17  ;;  %v11366_v47 = vrot.slane %v6830_v40, 9  ;;  %v14409_v24 = vld [vmem:[#allocation2 + $0x174] sm:$0x1]  ;;  %v6832_v50 = vld [vmem:[#allocation2 + $0x170] sm:$0xe] }
 0x215   : > { %v11574_v2 = vcombine.low %v5662_v35, %v5666_v39  ;;  %v4070_v18 = vsel %vm13599_vm9, %v11210_v36, %v4069_v60  ;;  %v4074_v4 = vsel %vm13599_vm9, %v11211_v32, %v4073_v31  ;;  %v7126_v0 = vrot.slane %v14392_v8, 5  ;;  %v14416_v38 = vld [vmem:[#allocation2 + $0x17c] sm:$0x1]  ;;  %v6833_v49 = vld [vmem:[#allocation2 + $0x178] sm:$0xe] }
 0x216   : > { %v3455_v57 = vsel %vm13932_vm13, %v3450_v61, %v3454_v11  ;;  %v11463_v40 = vcombine.low %v4070_v18, %v4074_v4  ;;  %v11367_v21 = vrot.slane %v6831_v53, 9  ;;  %v7130_v10 = vrot.slane %v14398_v3, 5  ;;  %v3886_v60 = vld [vmem:[#allocation2 + $0x170] sm:$0xe]  ;;  %v14431_v61 = vld [vmem:[#allocation2 + $0x174] sm:$0x1] }
 0x217   : > { %v11445_v17 = vcombine.low %v3441_v42, %v3455_v57  ;;  %8176 = vrot.lane.b32.xlu0 %v11574_v2, %s13026_s13  ;;  %v7127_v36 = vsel %vm13599_vm9, %v11366_v47, %v7126_v0  ;;  %v11368_v48 = vrot.slane %v6832_v50, 9  ;;  %v7134_v35 = vrot.slane %v14409_v24, 5  ;;  %v12680_v42 = vld [vmem:[%s13198_s23 + $0x60] sm:$0xff]   ;;  %v14439_v4 = vld [vmem:[#allocation2 + $0x17c] sm:$0x1] }
 0x218   : > { %v7131_v32 = vsel %vm13599_vm9, %v11367_v21, %v7130_v10  ;;  %v11369_v31 = vrot.slane %v6833_v49, 9  ;;  %v7138_v11 = vrot.slane %v14416_v38, 5  ;;  %v5935_v53 = vor.u32 %v14035_v30, %v13972_v28  ;;  %v12766_v39 = vld [vmem:[#allocation2 + $0x24] sm:$0x1]  ;;  %v3887_v0 = vld [vmem:[#allocation2 + $0x178] sm:$0xe]  ;;  %9469 = vmatpush2.bf16.msra.mxu1 %v12680_v42 }
 0x219   : > { %7534 = vrot.lane.b32.xlu1 %v11445_v17, %s13026_s13  ;;  %v11669_v2 = vcombine.low %v7127_v36, %v7131_v32  ;;  %v7135_v50 = vsel %vm13599_vm9, %v11368_v48, %v7134_v35  ;;  %v5938_v47 = vshll.u32 %v12766_v39, 16  ;;  %v5949_v18 = vor.u32 %v14053_v12, %v14039_v59  ;;  %v12767_v49 = vld [vmem:[#allocation2 + $0x2c] sm:$0x1]  ;;  %9470 = vmatprep.subr.bf16.mxu1 %v18380_v22  ;;  %v2826_v39 = vld [vmem:[#allocation2 + $0x28] sm:$0xf] }
 0x21a   : > { %v7139_v28 = vsel %vm13599_vm9, %v11369_v31, %v7138_v11  ;;  %v5936_v30 = vrot.slane %v5935_v53, 4  ;;  %v5952_v57 = vshll.u32 %v12767_v49, 16  ;;  %v11242_v21 = vrot.slane %v3886_v60, 9  ;;  %v12684_v31 = vld [vmem:[%s13198_s23 + $0x58] sm:$0xff]  }
 0x21b   : > { %12418 = vmatmul.mubr.msk.bf16.gmra.mxu0 %vm8684_vm10, %v11669_v2  ;;  %v11670_v10 = vcombine.low %v7135_v50, %v7139_v28  ;;  %v5940_v17 = vrot.slane %v5938_v47, 5  ;;  %v5950_v36 = vrot.slane %v5949_v18, 4  ;;  %v4197_v48 = vrot.slane %v14431_v61, 5  ;;  %v2825_v2 = vld [vmem:[#allocation2 + $0x20] sm:$0xf] }
 0x21c   : > { %v5954_v59 = vrot.slane %v5952_v57, 5  ;;  %v11243_v12 = vrot.slane %v3887_v0, 9  ;;  %v4201_v35 = vrot.slane %v14439_v4, 5  ;;  %v6383_v32 = vor.u32 %v14080_v13, %v14074_v58  ;;  %9471 = vmatpush2.bf16.msra.mxu1 %v12684_v31  ;;  %v6834_v57 = vld [vmem:[#allocation2 + $0x180] sm:$0xe] }
 0x21d   : > { %7666 = vrot.lane.b32.xlu1 %v11463_v40, %s13025_s8  ;;  %12421 = vmatprep.mubr.msk.bf16.mxu0 %vm8684_vm10, %v11670_v10  ;;  %v5941_v60 = vsel %vm13932_vm13, %v5936_v30, %v5940_v17  ;;  %v4198_v11 = vsel %vm13599_vm9, %v11242_v21, %v4197_v48  ;;  %v6386_v53 = vshll.u32 %v14392_v8, 16  ;;  %v6397_v42 = vor.u32 %v14093_v43, %v14091_v62  ;;  %v14464_v8 = vld [vmem:[#allocation2 + $0x184] sm:$0x1] }
 0x21e   : > { %v5955_v58 = vsel %vm13932_vm13, %v5950_v36, %v5954_v59  ;;  %v4202_v13 = vsel %vm13599_vm9, %v11243_v12, %v4201_v35  ;;  %v6384_v40 = vrot.slane %v6383_v32, 4  ;;  %v6400_v50 = vshll.u32 %v14398_v3, 16  ;;  %9472 = vmatprep.subr.bf16.mxu1 %v18380_v22  ;;  %v6835_v36 = vld [vmem:[#allocation2 + $0x188] sm:$0xe]  ;;  %v14475_v35 = vld [vmem:[#allocation2 + $0x18c] sm:$0x1] }
 0x21f   : > { %v11621_v47 = vcombine.low %v5941_v60, %v5955_v58  ;;  %v11479_v18 = vcombine.low %v4198_v11, %v4202_v13  ;;  %v6388_v0 = vrot.slane %v6386_v53, 5  ;;  %v6398_v28 = vrot.slane %v6397_v42, 4  ;;  %v12685_v53 = vld [vmem:[%s13198_s23 + $0x50] sm:$0xff]  }
 0x220   : > { %v6402_v62 = vrot.slane %v6400_v50, 5  ;;  %v3009_v43 = vshrl.u32 %v2825_v2, 16  ;;  %v3012_v30 = vshll.u32 %v2825_v2, 16  ;;  %v3018_v49 = vshll.u32 %v14099_v6, 16  ;;  %9473 = vmatpush2.bf16.msra.mxu1 %v12685_v53 }
 0x221   : > { %8526 = vrot.lane.b32.xlu0 %v11621_v47, %s13024_s30  ;;  %7698 = vrot.lane.b32.xlu1 %v11479_v18, %s13025_s8  ;;  %v6389_v3 = vsel %vm13932_vm13, %v6384_v40, %v6388_v0  ;;  %v3023_v21 = vshrl.u32 %v2826_v39, 16  ;;  %v3026_v10 = vshll.u32 %v2826_v39, 16  ;;  %v3032_v17 = vshll.u32 %v14109_v15, 16  ;;  %v12768_v39 = vld [vmem:[#allocation2 + $0x44] sm:$0x1] }
 0x222   : > { %v6403_v48 = vsel %vm13932_vm13, %v6398_v28, %v6402_v62  ;;  %v3011_v59 = vrot.slane %v3009_v43, 4  ;;  %v3014_v12 = vrot.slane %v3012_v30, 5  ;;  %v3020_v6 = vrot.slane %v3018_v49, 5  ;;  %v12769_v62 = vld [vmem:[#allocation2 + $0x4c] sm:$0x1]  ;;  %9474 = vmatprep.subr.bf16.mxu1 %v18380_v22 }
 0x223   : > { %v11637_v32 = vcombine.low %v6389_v3, %v6403_v48  ;;  %v3025_v31 = vrot.slane %v3023_v21, 4  ;;  %v3028_v60 = vrot.slane %v3026_v10, 5  ;;  %v3034_v11 = vrot.slane %v3032_v17, 5  ;;  %v2857_v30 = vld [vmem:[#allocation2 + $0x160] sm:$0xf]  ;;  %v12687_v21 = vld [vmem:[%s13198_s23 + $0x48] sm:$0xff]  }
 0x224   : > { %v3015_v42 = vor.u32 %v3014_v12, %v3011_v59  ;;  %v11370_v2 = vrot.slane %v6834_v57, 9  ;;  %v7142_v58 = vrot.slane %v14464_v8, 5  ;;  %v11371_v13 = vrot.slane %v6835_v36, 9  ;;  %v2858_v3 = vld [vmem:[#allocation2 + $0x168] sm:$0xf]  ;;  %9475 = vmatpush2.bf16.msra.mxu1 %v12687_v21 }
 0x225   : > { %8558 = vrot.lane.b32.xlu0 %v11637_v32, %s13024_s30  ;;  %v3029_v15 = vor.u32 %v3028_v60, %v3025_v31  ;;  %v7146_v40 = vrot.slane %v14475_v35, 5  ;;  %v5991_v50 = vor.u32 %v14097_v45, %v14095_v25  ;;  %v5994_v47 = vshll.u32 %v12768_v39, 16  ;;  %9476 = vmatprep.subr.bf16.mxu1 %v18380_v22  ;;  %v18398_v39 = vld [vmem:[#allocation29_spill] sm:$0xff] }
 0x226   : > { %v3016_v18 = vrot.slane %v3015_v42, 4  ;;  %v7143_v0 = vsel %vm13599_vm9, %v11370_v2, %v7142_v58  ;;  %v6005_v28 = vor.u32 %v14104_v52, %v14102_v41  ;;  %v6008_v43 = vshll.u32 %v12769_v62, 16  ;;  %v6836_v58 = vld [vmem:[#allocation2 + $0x1a0] sm:$0xe]  ;;  %v18399_v62 = vld [vmem:[#allocation30_spill] sm:$0xff] }
 0x227   : > { %v3030_v49 = vrot.slane %v3029_v15, 4  ;;  %v7147_v25 = vsel %vm13599_vm9, %v11371_v13, %v7146_v40  ;;  %v5992_v45 = vrot.slane %v5991_v50, 4  ;;  %v5996_v57 = vrot.slane %v5994_v47, 5  ;;  %v18397_v50 = vld [vmem:[#allocation28_spill] sm:$0xff] }
 0x228   : > { %v3021_v10 = vsel %vm13932_vm13, %v3016_v18, %v3020_v6  ;;  %v11671_v17 = vcombine.low %v7143_v0, %v7147_v25  ;;  %v6006_v36 = vrot.slane %v6005_v28, 4  ;;  %v6010_v48 = vrot.slane %v6008_v43, 5  ;;  %v5877_v18 = vld [vmem:[#allocation2 + $0x1ac] sm:$0x1] }
 0x229   : > { %v3035_v52 = vsel %vm13932_vm13, %v3030_v49, %v3034_v11  ;;  %v5997_v41 = vsel %vm13932_vm13, %v5992_v45, %v5996_v57  ;;  %v3457_v59 = vshrl.u32 %v2857_v30, 16  ;;  %v3460_v12 = vshll.u32 %v2857_v30, 16  ;;  %v5876_v30 = vld [vmem:[#allocation2 + $0x1a4] sm:$0x1]  ;;  %v6837_v49 = vld [vmem:[#allocation2 + $0x1a8] sm:$0xe] }
 0x22a   : > { %v4501_v32 = vshll.u32 %v14235_v33, 16  ;;  %v11430_v31 = vcombine.low %v3021_v10, %v3035_v52  ;;  %12422 = vmatmul.mubr.msk.bf16.gmra.mxu0 %vm8684_vm10, %v11671_v17  ;;  %v6011_v6 = vsel %vm13932_vm13, %v6006_v36, %v6010_v48  ;;  %v3471_v60 = vshrl.u32 %v2858_v3, 16 }
 0x22b   : > { %v11623_v53 = vcombine.low %v5997_v41, %v6011_v6  ;;  %v3459_v42 = vrot.slane %v3457_v59, 4  ;;  %v3462_v11 = vrot.slane %v3460_v12, 5  ;;  %v3474_v2 = vshll.u32 %v2858_v3, 16 }
 0x22c   : > { %7504 = vrot.lane.b32.xlu1 %v11430_v31, %s13026_s13  ;;  %v3466_v13 = vshll.u32 %v14159_v55, 16  ;;  %v3473_v15 = vrot.slane %v3471_v60, 4  ;;  %v3480_v40 = vshll.u32 %v14161_v26, 16  ;;  %v6439_v47 = vor.u32 %v18398_v39, %v18397_v50 }
 0x22d   : > { %8530 = vrot.lane.b32.xlu0 %v11623_v53, %s13024_s30  ;;  %v3463_v0 = vor.u32 %v3462_v11, %v3459_v42  ;;  %v3476_v22 = vrot.slane %v3474_v2, 5  ;;  %v6442_v28 = vshll.u32 %v14464_v8, 16  ;;  %v6453_v43 = vor.u32 %v14216_v34, %v18399_v62  ;;  %v6839_v42 = vld [vmem:[#allocation2 + $0x1b8] sm:$0xe]  ;;  %v12688_v11 = vld [vmem:[%s13198_s23 + $0x40] sm:$0xff]   ;;  %s17144_s23 = scalar_lea.vmem %s18285_s4, %s13167_s20 }
 0x22e   : > { %v3482_v25 = vrot.slane %v3480_v40, 5  ;;  %v6440_v55 = vrot.slane %v6439_v47, 4  ;;  %v6456_v45 = vshll.u32 %v14475_v35, 16  ;;  %v11372_v26 = vrot.slane %v6836_v58, 9  ;;  %v5878_v35 = vld [vmem:[#allocation2 + $0x1b4] sm:$0x1]  ;;  %9477 = vmatpush2.bf16.msra.mxu1 %v12688_v11 }
 0x22f   : > { %v3464_v57 = vrot.slane %v3463_v0, 4  ;;  %v3477_v3 = vor.u32 %v3476_v22, %v3473_v15  ;;  %v6444_v21 = vrot.slane %v6442_v28, 5  ;;  %v6454_v10 = vrot.slane %v6453_v43, 4  ;;  %v5879_v15 = vld [vmem:[#allocation2 + $0x1bc] sm:$0x1] }
 0x230   : > { %v6458_v17 = vrot.slane %v6456_v45, 5  ;;  %v7150_v36 = vrot.slane %v5876_v30, 5  ;;  %v11373_v48 = vrot.slane %v6837_v49, 9  ;;  %v7154_v52 = vrot.slane %v5877_v18, 5  ;;  %v14541_v22 = vld [vmem:[#allocation2 + $0x68] sm:$0xf] }
 0x231   : > { %v18400_v8 = vshrl.u32 %v14235_v33, 16  ;;  %v3468_v34 = vrot.slane %v3466_v13, 5  ;;  %v3478_v59 = vrot.slane %v3477_v3, 4  ;;  %v6445_v12 = vsel %vm13932_vm13, %v6440_v55, %v6444_v21  ;;  %v6838_v33 = vld [vmem:[#allocation2 + $0x1b0] sm:$0xe] }
 0x232   : > { %v14518_v31 = vrot.slane %v4501_v32, 5  ;;  %v6459_v6 = vsel %vm13932_vm13, %v6454_v10, %v6458_v17  ;;  %v7151_v60 = vsel %vm13599_vm9, %v11372_v26, %v7150_v36  ;;  %v7155_v53 = vsel %vm13599_vm9, %v11373_v48, %v7154_v52  ;;  %v14556_v55 = vld [vmem:[#allocation2 + $0x70] sm:$0xf]  ;;  %v14569_v21 = vld [vmem:[#allocation2 + $0x60] sm:$0xf] }
 0x233   : > { %v14514_v41 = vrot.slane %v18400_v8, 4  ;;  %v3469_v2 = vsel %vm13932_vm13, %v3464_v57, %v3468_v34  ;;  %v3483_v58 = vsel %vm13932_vm13, %v3478_v59, %v3482_v25  ;;  %v11639_v32 = vcombine.low %v6445_v12, %v6459_v6  ;;  %v14571_v10 = vld [vmem:[#allocation2 + $0x54] sm:$0x1]  ;;  %v3856_v17 = vld [vmem:[#allocation2 + $0x50] sm:$0xe] }
 0x234   : > { %v11672_v13 = vcombine.low %v7151_v60, %v7155_v53  ;;  %v4980_v40 = vor.u32 %v14311_v19, %v14309_v14  ;;  %v18401_v50 = vshrl.u32 %v14087_v44, 16  ;;  %v4932_v47 = vshrl.u32 %v14290_v5, 16  ;;  %v3857_v48 = vld [vmem:[#allocation2 + $0x58] sm:$0xe]  ;;  %v14583_v59 = vld [vmem:[#allocation2 + $0x68] sm:$0xf] }
 0x235   : > { %v11446_v18 = vcombine.low %v3469_v2, %v3483_v58  ;;  %v4935_v0 = vshll.u32 %v14290_v5, 16  ;;  %8562 = vrot.lane.b32.xlu0 %v11639_v32, %s13024_s30  ;;  %v11374_v28 = vrot.slane %v6838_v33, 9  ;;  %v7158_v62 = vrot.slane %v5878_v35, 5  ;;  %v14585_v12 = vld [vmem:[#allocation2 + $0x3c] sm:$0x1] }
 0x236   : > { %v14535_v39 = vrot.slane %v18401_v50, 4  ;;  %12425 = vmatprep.mubr.msk.bf16.mxu0 %vm8684_vm10, %v11672_v13  ;;  %v11375_v43 = vrot.slane %v6839_v42, 9  ;;  %v18402_v14 = vshll.u32 %v14087_v44, 16  ;;  %v18403_v30 = vshrl.u32 %v14089_v27, 16  ;;  %v14588_v35 = vld [vmem:[#allocation2 + $0x44] sm:$0x1] }
 0x237   : > { %v18404_v25 = vshll.u32 %v14089_v27, 16  ;;  %7536 = vrot.lane.b32.xlu1 %v11446_v18, %s13026_s13  ;;  %v7162_v45 = vrot.slane %v5879_v15, 5  ;;  %v18405_v26 = vor.u32 %v14307_v1, %v14295_v29  ;;  %v4490_v44 = vor.u32 %v14390_v46, %v14385_v54  ;;  %v14579_v46 = vld [vmem:[#allocation2 + $0x5c] sm:$0x1]  ;;  %v14594_v53 = vld [vmem:[#allocation2 + $0x194] sm:$0x1] }
 0x238   : > { %v14545_v19 = vrot.slane %v18402_v14, 5  ;;  %v14549_v49 = vrot.slane %v18403_v30, 4  ;;  %v4504_v3 = vor.u32 %v14518_v31, %v14514_v41  ;;  %v7159_v27 = vsel %vm13599_vm9, %v11374_v28, %v7158_v62  ;;  %v3888_v33 = vld [vmem:[#allocation2 + $0x190] sm:$0xe]  ;;  %v14601_v32 = vld [vmem:[#allocation2 + $0x19c] sm:$0x1] }
 0x239   : > { %v14553_v5 = vrot.slane %v18404_v25, 5  ;;  %v14561_v57 = vrot.slane %v18405_v26, 4  ;;  %v4946_v36 = vshrl.u32 %v14292_v63, 16  ;;  %v4949_v29 = vshll.u32 %v14292_v63, 16  ;;  %v14611_v62 = vld [vmem:[#allocation2 + $0x1a0] sm:$0xf] }
 0x23a   : > { %v11497_v1 = vcombine.low %v14541_v22, %v14556_v55  ;;  %v7163_v54 = vsel %vm13599_vm9, %v11375_v43, %v7162_v45  ;;  %v14581_v52 = vrot.slane %v4980_v40, 4  ;;  %v4934_v8 = vrot.slane %v4932_v47, 4  ;;  %v3889_v47 = vld [vmem:[#allocation2 + $0x198] sm:$0xe]  ;;  %v14613_v43 = vld [vmem:[#allocation2 + $0x1a8] sm:$0xf] }
 0x23b   : > { %v4937_v41 = vrot.slane %v4935_v0, 5  ;;  %v11673_v34 = vcombine.low %v7159_v27, %v7163_v54  ;;  %v11592_v6 = vcombine.low %v14569_v21, %v14583_v59  ;;  %v11212_v60 = vrot.slane %v3856_v17, 9  ;;  %v18409_v54 = vld [vmem:[#allocation33_spill] sm:$0xff]  ;;  %v18418_v31 = vld [vmem:[#allocation38_spill] sm:$0xff] }
 0x23c   : > { %18406 = vst [vmem:[#allocation28_spill] sm:$0xff] %v14581_v52  ;;  %7894 = vrot.lane.b32.xlu1 %v11497_v1, %s13024_s30  ;;  %v14596_v42 = vrot.slane %v4490_v44, 4  ;;  %v4077_v11 = vrot.slane %v14571_v10, 5  ;;  %v11213_v2 = vrot.slane %v3857_v48, 9  ;;  %v4081_v58 = vrot.slane %v14579_v46, 5 }
 0x23d   : > { %12426 = vmatmul.mubr.msk.bf16.gmra.mxu0 %vm8684_vm10, %v11673_v34  ;;  %v14603_v13 = vrot.slane %v4504_v3, 4  ;;  %v4948_v15 = vrot.slane %v4946_v36, 4  ;;  %v4951_v40 = vrot.slane %v4949_v29, 5  ;;  %v4568_v50 = vshrl.u32 %v14541_v22, 16  ;;  %8372 = vrot.lane.b32.xlu0 %v11592_v6, %s13025_s8 }
 0x23e   : > { %18407 = vst [vmem:[#allocation29_spill] sm:$0xff] %v14596_v42  ;;  %v4938_v18 = vor.u32 %v4937_v41, %v4934_v8  ;;  %v4078_v0 = vsel %vm13599_vm9, %v11212_v60, %v4077_v11  ;;  %v4082_v28 = vsel %vm13599_vm9, %v11213_v2, %v4081_v58  ;;  %v11244_v14 = vrot.slane %v3888_v33, 9  ;;  %v14636_v2 = vld [vmem:[#allocation2 + $0x6c] sm:$0x1] }
 0x23f   : > { %18408 = vst [vmem:[#allocation30_spill] sm:$0xff] %v14603_v13  ;;  %v4571_v25 = vshll.u32 %v14541_v22, 16  ;;  %v11464_v45 = vcombine.low %v4078_v0, %v4082_v28  ;;  %v11608_v26 = vcombine.low %v14611_v62, %v14613_v43  ;;  %v4205_v44 = vrot.slane %v14594_v53, 5  ;;  %v12772_v22 = vld [vmem:[#allocation2 + $0x34] sm:$0x1]  ;;  %18410 = vst [vmem:[#allocation33_spill] sm:$0xff] %v14636_v2 }
 0x240   : > { %v11245_v3 = vrot.slane %v3889_v47, 9  ;;  %v4209_v27 = vrot.slane %v14601_v32, 5  ;;  %v5963_v17 = vor.u32 %v14248_v7, %v14246_v37  ;;  %v4952_v36 = vor.u32 %v4951_v40, %v4948_v15  ;;  %v12773_v37 = vld [vmem:[#allocation2 + $0x3c] sm:$0x1]  ;;  %v14643_v47 = vld [vmem:[#allocation2 + $0x60] sm:$0xf] }
 0x241   : > { %v14623_v29 = vrot.slane %v4568_v50, 4  ;;  %7668 = vrot.lane.b32.xlu1 %v11464_v45, %s13025_s8  ;;  %8404 = vrot.lane.b32.xlu0 %v11608_v26, %s13025_s8  ;;  %v5966_v1 = vshll.u32 %v12772_v22, 16  ;;  %v5977_v48 = vor.u32 %v18409_v54, %v14262_v23  ;;  %v4206_v8 = vsel %vm13599_vm9, %v11244_v14, %v4205_v44  ;;  %v14641_v50 = vld [vmem:[#allocation2 + $0x58] sm:$0xf]  ;;  %v5333_v0 = vld [vmem:[#allocation2 + $0x68] sm:$0xe] }
 0x242   : > { %v4210_v41 = vsel %vm13599_vm9, %v11245_v3, %v4209_v27  ;;  %v5964_v34 = vrot.slane %v5963_v17, 4  ;;  %v5980_v7 = vshll.u32 %v12773_v37, 16  ;;  %v14633_v6 = vrot.slane %v4571_v25, 5  ;;  %v2827_v28 = vld [vmem:[#allocation2 + $0x30] sm:$0xf] }
 0x243   : > { %v4582_v60 = vshrl.u32 %v14556_v55, 16  ;;  %v11480_v33 = vcombine.low %v4206_v8, %v4210_v41  ;;  %v5968_v11 = vrot.slane %v5966_v1, 5  ;;  %v14638_v58 = vrot.slane %v4938_v18, 4  ;;  %v14657_v54 = vld [vmem:[#allocation2 + $0x74] sm:$0x1] }
 0x244   : > { %v4585_v23 = vshll.u32 %v14556_v55, 16  ;;  %v5978_v15 = vrot.slane %v5977_v48, 4  ;;  %v5982_v40 = vrot.slane %v5980_v7, 5  ;;  %v14645_v14 = vrot.slane %v4952_v36, 4  ;;  %v5334_v55 = vld [vmem:[#allocation2 + $0x70] sm:$0xe] }
 0x245   : > { %18411 = vst [vmem:[#allocation39_spill] sm:$0xff] %v14638_v58  ;;  %7700 = vrot.lane.b32.xlu1 %v11480_v33, %s13025_s8  ;;  %v5969_v18 = vsel %vm13932_vm13, %v5964_v34, %v5968_v11  ;;  %18417 = vst [vmem:[#allocation41_spill] sm:$0xff] %v14657_v54  ;;  %v4574_v48 = vor.u32 %v14633_v6, %v14623_v29  ;;  %v14661_v8 = vrot.slane %v4582_v60, 4  ;;  %v2828_v37 = vld [vmem:[#allocation2 + $0x38] sm:$0xf]  ;;  %v11278_v33 = vrot.slane %v5333_v0, 9 }
 0x246   : > { %18412 = vst [vmem:[#allocation40_spill] sm:$0xff] %v14645_v14  ;;  %v5983_v36 = vsel %vm13932_vm13, %v5978_v15, %v5982_v40  ;;  %v11496_v34 = vcombine.low %v14641_v50, %v14643_v47  ;;  %v14665_v7 = vrot.slane %v4585_v23, 5  ;;  %v5557_v11 = vrot.slane %v14636_v2, 5  ;;  %v14966_v2 = vld [vmem:[#allocation2 + $0x84] sm:$0x1] }
 0x247   : > { %v11622_v41 = vcombine.low %v5969_v18, %v5983_v36  ;;  %v11279_v1 = vrot.slane %v5334_v55, 9  ;;  %v5561_v29 = vrot.slane %v14657_v54, 5  ;;  %v3037_v6 = vshrl.u32 %v2827_v28, 16  ;;  %v14983_v13 = vld [vmem:[#allocation2 + $0x8c] sm:$0x1] }
 0x248   : > { %v3040_v60 = vshll.u32 %v2827_v28, 16  ;;  %v5558_v23 = vsel %vm13599_vm9, %v11278_v33, %v5557_v11  ;;  %v3046_v0 = vshll.u32 %v14378_v56, 16  ;;  %v3051_v18 = vshrl.u32 %v2828_v37, 16 }
 0x249   : > { %8528 = vrot.lane.b32.xlu0 %v11622_v41, %s13024_s30  ;;  %7892 = vrot.lane.b32.xlu1 %v11496_v34, %s13024_s30  ;;  %v5562_v36 = vsel %vm13599_vm9, %v11279_v1, %v5561_v29  ;;  %v3039_v41 = vrot.slane %v3037_v6, 4  ;;  %v2859_v34 = vld [vmem:[#allocation2 + $0x170] sm:$0xf]  ;;  %v3054_v28 = vshll.u32 %v2828_v37, 16  ;;  %v3060_v63 = vshll.u32 %v18418_v31, 16 }
 0x24a   : > { %v3042_v17 = vrot.slane %v3040_v60, 5  ;;  %v11561_v3 = vcombine.low %v5558_v23, %v5562_v36  ;;  %v3048_v26 = vrot.slane %v3046_v0, 5  ;;  %v3053_v25 = vrot.slane %v3051_v18, 4  ;;  %v2860_v0 = vld [vmem:[#allocation2 + $0x178] sm:$0xf] }
 0x24b   : > { %v6411_v33 = vor.u32 %v14545_v19, %v14535_v39  ;;  %v6414_v56 = vshll.u32 %v14409_v24, 16  ;;  %v3056_v11 = vrot.slane %v3054_v28, 5  ;;  %v6425_v1 = vor.u32 %v14553_v5, %v14549_v49  ;;  %v5331_v5 = vld [vmem:[#allocation2 + $0x58] sm:$0xe]  ;;  %v14696_v28 = vld [vmem:[#allocation2 + $0x64] sm:$0x1] }
 0x24c   : > { %v3043_v30 = vor.u32 %v3042_v17, %v3039_v41  ;;  %v6428_v29 = vshll.u32 %v14416_v38, 16  ;;  %v3485_v6 = vshrl.u32 %v2859_v34, 16  ;;  %v3062_v23 = vrot.slane %v3060_v63, 5  ;;  %v14692_v38 = vld [vmem:[#allocation2 + $0x5c] sm:$0x1]  ;;  %18420 = vst [vmem:[#allocation42_spill] sm:$0xff] %v14696_v28 }
 0x24d   : > { %8150 = vrot.lane.b32.xlu0 %v11561_v3, %s13026_s13  ;;  %v6412_v37 = vrot.slane %v6411_v33, 4  ;;  %v6416_v17 = vrot.slane %v6414_v56, 5  ;;  %v3057_v31 = vor.u32 %v3056_v11, %v3053_v25  ;;  %v6426_v18 = vrot.slane %v6425_v1, 4  ;;  %18419 = vst [vmem:[#allocation38_spill] sm:$0xff] %v14692_v38  ;;  %v5332_v33 = vld [vmem:[#allocation2 + $0x60] sm:$0xe] }
 0x24e   : > { %v3044_v60 = vrot.slane %v3043_v30, 4  ;;  %v6430_v36 = vrot.slane %v6428_v29, 5  ;;  %v3487_v39 = vrot.slane %v3485_v6, 4  ;;  %v3488_v3 = vshll.u32 %v2859_v34, 16  ;;  %v14701_v1 = vld [vmem:[#allocation2 + $0x64] sm:$0x1] }
 0x24f   : > { %v6417_v19 = vsel %vm13932_vm13, %v6412_v37, %v6416_v17  ;;  %v3494_v49 = vshll.u32 %v14431_v61, 16  ;;  %v3058_v63 = vrot.slane %v3057_v31, 4  ;;  %v3499_v25 = vshrl.u32 %v2860_v0, 16  ;;  %v3858_v37 = vld [vmem:[#allocation2 + $0x60] sm:$0xe] }
 0x250   : > { %v3049_v24 = vsel %vm13932_vm13, %v3044_v60, %v3048_v26  ;;  %v6431_v30 = vsel %vm13932_vm13, %v6426_v18, %v6430_v36  ;;  %v3502_v41 = vshll.u32 %v2860_v0, 16  ;;  %v14698_v56 = vrot.slane %v4574_v48, 4  ;;  %v14707_v18 = vld [vmem:[#allocation2 + $0x6c] sm:$0x1]  ;;  %v3859_v36 = vld [vmem:[#allocation2 + $0x68] sm:$0xe] }
 0x251   : > { %v11638_v26 = vcombine.low %v6417_v19, %v6431_v30  ;;  %v3490_v11 = vrot.slane %v3488_v3, 5  ;;  %v3508_v34 = vshll.u32 %v14439_v4, 16  ;;  %v6461_v61 = vshrl.u32 %v14611_v62, 16 }
 0x252   : > { %18421 = vst [vmem:[#allocation43_spill] sm:$0xff] %v14698_v56  ;;  %v3063_v29 = vsel %vm13932_vm13, %v3058_v63, %v3062_v23  ;;  %v3501_v6 = vrot.slane %v3499_v25, 4  ;;  %v3504_v60 = vrot.slane %v3502_v41, 5  ;;  %v3496_v48 = vrot.slane %v3494_v49, 5  ;;  %v14713_v41 = vld [vmem:[#allocation2 + $0x19c] sm:$0x1] }
 0x253   : > { %v11431_v17 = vcombine.low %v3049_v24, %v3063_v29  ;;  %8560 = vrot.lane.b32.xlu0 %v11638_v26, %s13024_s30  ;;  %v3491_v0 = vor.u32 %v3490_v11, %v3487_v39  ;;  %v3510_v31 = vrot.slane %v3508_v34, 5  ;;  %v11276_v19 = vrot.slane %v5331_v5, 9  ;;  %18422 = vst [vmem:[#allocation44_spill] sm:$0xff] %v14713_v41  ;;  %v2829_v39 = vld [vmem:[#allocation2 + $0x50] sm:$0xf] }
 0x254   : > { %v3505_v4 = vor.u32 %v3504_v60, %v3501_v6  ;;  %v5549_v3 = vrot.slane %v14692_v38, 5  ;;  %v11277_v30 = vrot.slane %v5332_v33, 9  ;;  %v5553_v63 = vrot.slane %v14696_v28, 5  ;;  %v5363_v34 = vld [vmem:[#allocation2 + $0x198] sm:$0xe] }
 0x255   : > { %7506 = vrot.lane.b32.xlu1 %v11431_v17, %s13026_s13  ;;  %v3492_v23 = vrot.slane %v3491_v0, 4  ;;  %v11214_v25 = vrot.slane %v3858_v37, 9  ;;  %v4085_v24 = vrot.slane %v14701_v1, 5  ;;  %v11215_v11 = vrot.slane %v3859_v36, 9  ;;  %v14724_v37 = vld [vmem:[#allocation2 + $0x1a4] sm:$0x1] }
 0x256   : > { %v3506_v49 = vrot.slane %v3505_v4, 4  ;;  %v5550_v26 = vsel %vm13599_vm9, %v11276_v19, %v5549_v3  ;;  %v4089_v5 = vrot.slane %v14707_v18, 5  ;;  %v6464_v33 = vshll.u32 %v14611_v62, 16  ;;  %18423 = vst [vmem:[#allocation45_spill] sm:$0xff] %v14724_v37  ;;  %v5364_v17 = vld [vmem:[#allocation2 + $0x1a0] sm:$0xe] }
 0x257   : > { %v6475_v29 = vshrl.u32 %v14613_v43, 16  ;;  %v3497_v6 = vsel %vm13932_vm13, %v3492_v23, %v3496_v48  ;;  %v5554_v60 = vsel %vm13599_vm9, %v11277_v30, %v5553_v63  ;;  %v6478_v0 = vshll.u32 %v14613_v43, 16  ;;  %v2830_v19 = vld [vmem:[#allocation2 + $0x58] sm:$0xf] }
 0x258   : > { %v3511_v36 = vsel %vm13932_vm13, %v3506_v49, %v3510_v31  ;;  %v11560_v4 = vcombine.low %v5550_v26, %v5554_v60  ;;  %v4086_v62 = vsel %vm13599_vm9, %v11214_v25, %v4085_v24  ;;  %v4090_v48 = vsel %vm13599_vm9, %v11215_v11, %v4089_v5 }
 0x259   : > { %v11447_v3 = vcombine.low %v3497_v6, %v3511_v36  ;;  %v11308_v23 = vrot.slane %v5363_v34, 9  ;;  %v5677_v30 = vrot.slane %v14713_v41, 5  ;;  %v11309_v63 = vrot.slane %v5364_v17, 9 }
 0x25a   : > { %8148 = vrot.lane.b32.xlu0 %v11560_v4, %s13026_s13  ;;  %v5681_v43 = vrot.slane %v14724_v37, 5  ;;  %v3065_v55 = vshrl.u32 %v2829_v39, 16  ;;  %v3068_v40 = vshll.u32 %v2829_v39, 16  ;;  %v3074_v25 = vshll.u32 %v14571_v10, 16  ;;  %v14747_v10 = vld [vmem:[#allocation2 + $0x70] sm:$0xf] }
 0x25b   : > { %7538 = vrot.lane.b32.xlu1 %v11447_v3, %s13026_s13  ;;  %v5678_v31 = vsel %vm13599_vm9, %v11308_v23, %v5677_v30  ;;  %v3079_v24 = vshrl.u32 %v2830_v19, 16  ;;  %v3082_v49 = vshll.u32 %v2830_v19, 16  ;;  %v3088_v34 = vshll.u32 %v14579_v46, 16  ;;  %v14749_v19 = vld [vmem:[#allocation2 + $0x78] sm:$0xf] }
 0x25c   : > { %v5682_v26 = vsel %vm13599_vm9, %v11309_v63, %v5681_v43  ;;  %v3067_v11 = vrot.slane %v3065_v55, 4  ;;  %v3070_v5 = vrot.slane %v3068_v40, 5  ;;  %v11465_v6 = vcombine.low %v4086_v62, %v4090_v48  ;;  %v18424_v63 = vld [vmem:[#allocation12_spill] sm:$0xff] }
 0x25d   : > { %v11576_v60 = vcombine.low %v5678_v31, %v5682_v26  ;;  %v3081_v17 = vrot.slane %v3079_v24, 4  ;;  %v3084_v39 = vrot.slane %v3082_v49, 5  ;;  %v14743_v36 = vrot.slane %v6461_v61, 4  ;;  %v2861_v61 = vld [vmem:[#allocation2 + $0x190] sm:$0xf]  ;;  %v18426_v26 = vld [vmem:[#allocation13_spill] sm:$0xff] }
 0x25e   : > { %v14745_v4 = vrot.slane %v6464_v33, 5  ;;  %v3071_v3 = vor.u32 %v3070_v5, %v3067_v11  ;;  %v3076_v23 = vrot.slane %v3074_v25, 5  ;;  %v14751_v30 = vrot.slane %v6475_v29, 4  ;;  %v2862_v25 = vld [vmem:[#allocation2 + $0x198] sm:$0xf] }
 0x25f   : > { %v4540_v40 = vshrl.u32 %v14641_v50, 16  ;;  %7670 = vrot.lane.b32.xlu1 %v11465_v6, %s13025_s8  ;;  %8180 = vrot.lane.b32.xlu0 %v11576_v60, %s13026_s13  ;;  %v3085_v46 = vor.u32 %v3084_v39, %v3081_v17  ;;  %v3090_v55 = vrot.slane %v3088_v34, 5  ;;  %v4543_v33 = vshll.u32 %v14641_v50, 16  ;;  %v18428_v50 = vld [vmem:[#allocation20_spill] sm:$0xff]  ;;  %v14770_v39 = vpop.permute.xlu0 %8396 }
 0x260   : > { %v4554_v62 = vshrl.u32 %v14643_v47, 16  ;;  %v3072_v48 = vrot.slane %v3071_v3, 4  ;;  %v18425_v43 = vshll.u32 %v18424_v63, 16  ;;  %v4557_v29 = vshll.u32 %v14643_v47, 16  ;;  %18429 = vst [vmem:[#allocation12_spill] sm:$0xff] %v14770_v39  ;;  %v18430_v3 = vld [vmem:[#allocation21_spill] sm:$0xff] }
 0x261   : > { %v3086_v24 = vrot.slane %v3085_v46, 4  ;;  %v11593_v49 = vcombine.low %v14747_v10, %v14749_v19  ;;  %v18427_v11 = vshll.u32 %v18426_v26, 16  ;;  %v3513_v60 = vshrl.u32 %v2861_v61, 16 }
 0x262   : > { %v4467_v31 = vrot.slane %v18425_v43, 5  ;;  %v3077_v34 = vsel %vm13932_vm13, %v3072_v48, %v3076_v23  ;;  %v3516_v17 = vshll.u32 %v2861_v61, 16  ;;  %v3522_v63 = vshll.u32 %v14594_v53, 16  ;;  %v14785_v53 = vld [vmem:[#allocation2 + $0x90] sm:$0xf] }
 0x263   : > { %v4481_v5 = vrot.slane %v18427_v11, 5  ;;  %v3091_v47 = vsel %vm13932_vm13, %v3086_v24, %v3090_v55  ;;  %8374 = vrot.lane.b32.xlu0 %v11593_v49, %s13025_s8  ;;  %v3527_v23 = vshrl.u32 %v2862_v25, 16  ;;  %v6480_v61 = vrot.slane %v6478_v0, 5 }
 0x264   : > { %v4468_v6 = vsel %vm13932_vm13, %v18428_v50, %v4467_v31  ;;  %v11432_v48 = vcombine.low %v3077_v34, %v3091_v47  ;;  %v3515_v31 = vrot.slane %v3513_v60, 4  ;;  %v3518_v26 = vrot.slane %v3516_v17, 5  ;;  %v14787_v17 = vld [vmem:[#allocation2 + $0x98] sm:$0xf] }
 0x265   : > { %v4482_v46 = vsel %vm13932_vm13, %v18430_v3, %v4481_v5  ;;  %v3529_v11 = vrot.slane %v3527_v23, 4  ;;  %v3530_v50 = vshll.u32 %v2862_v25, 16  ;;  %v3536_v15 = vshll.u32 %v14601_v32, 16 }
 0x266   : > { %v14779_v43 = vcombine.low %v4468_v6, %v4482_v46  ;;  %v4588_v55 = vor.u32 %v14665_v7, %v14661_v8  ;;  %v4542_v24 = vrot.slane %v4540_v40, 4  ;;  %v4545_v49 = vrot.slane %v4543_v33, 5  ;;  %7508 = vrot.lane.b32.xlu1 %v11432_v48, %s13026_s13  ;;  %v14795_v40 = vpop.permute.xlu0 %8142 }
 0x267   : > { %v3519_v5 = vor.u32 %v3518_v26, %v3515_v31  ;;  %v4556_v34 = vrot.slane %v4554_v62, 4  ;;  %v4559_v6 = vrot.slane %v4557_v29, 5  ;;  %v3524_v47 = vrot.slane %v3522_v63, 5  ;;  %v18431_v29 = vld [vmem:[#allocation14_spill] sm:$0xff]  ;;  %v18435_v31 = vld [vmem:[#allocation15_spill] sm:$0xff] }
 0x268   : > { %v3532_v60 = vrot.slane %v3530_v50, 5  ;;  %v6030_v0 = vshll.u32 %v14583_v59, 16  ;;  %v6467_v32 = vor.u32 %v14745_v4, %v14743_v36  ;;  %v11595_v8 = vcombine.low %v14785_v53, %v14787_v17  ;;  %v18437_v50 = vld [vmem:[#allocation22_spill] sm:$0xff] }
 0x269   : > { %v3520_v25 = vrot.slane %v3519_v5, 4  ;;  %v6481_v7 = vor.u32 %v6480_v61, %v14751_v30  ;;  %v3538_v62 = vrot.slane %v3536_v15, 5  ;;  %v18432_v3 = vshll.u32 %v18431_v29, 16 }
 0x26a   : > { %v3533_v33 = vor.u32 %v3532_v60, %v3529_v11  ;;  %v18433_v63 = vshrl.u32 %v14569_v21, 16  ;;  %v18434_v48 = vshll.u32 %v14569_v21, 16  ;;  %v4546_v4 = vor.u32 %v4545_v49, %v4542_v24  ;;  %8378 = vrot.lane.b32.xlu0 %v11595_v8, %s13025_s8  ;;  %v14819_v49 = vpop.permute.xlu1 %7886  ;;  %v18441_v8 = vld [vmem:[#allocation23_spill] sm:$0xff] }
 0x26b   : > { %v4915_v46 = vrot.slane %v18432_v3, 5  ;;  %v18436_v30 = vshll.u32 %v18435_v31, 16  ;;  %v4560_v61 = vor.u32 %v4559_v6, %v4556_v34  ;;  %v3525_v15 = vsel %vm13932_vm13, %v3520_v25, %v3524_v47  ;;  %18440 = vst [vmem:[#allocation20_spill] sm:$0xff] %v14819_v49 }
 0x26c   : > { %v14801_v23 = vrot.slane %v18433_v63, 4  ;;  %v14805_v36 = vrot.slane %v18434_v48, 5  ;;  %v3534_v11 = vrot.slane %v3533_v33, 4  ;;  %v14815_v60 = vrot.slane %v4588_v55, 4  ;;  %v14832_v55 = vld [vmem:[#allocation2 + $0x80] sm:$0xf] }
 0x26d   : > { %v4929_v26 = vrot.slane %v18436_v30, 5  ;;  %v4916_v5 = vsel %vm13932_vm13, %v18437_v50, %v4915_v46  ;;  %v18439_v21 = vshrl.u32 %v14583_v59, 16  ;;  %v6032_v24 = vrot.slane %v6030_v0, 5  ;;  %v14834_v59 = vld [vmem:[#allocation2 + $0x88] sm:$0xf]  ;;  %v18446_v30 = vld [vmem:[#allocation16_spill] sm:$0xff] }
 0x26e   : > { %18438 = vst [vmem:[#allocation13_spill] sm:$0xff] %v14815_v60  ;;  %v14824_v6 = vrot.slane %v6467_v32, 4  ;;  %v14826_v47 = vrot.slane %v6481_v7, 4  ;;  %v3539_v25 = vsel %vm13932_vm13, %v3534_v11, %v3538_v62  ;;  %v14836_v0 = vld [vmem:[#allocation2 + $0x74] sm:$0x1]  ;;  %v14838_v3 = vrot.slane %v4546_v4, 4  ;;  %v14851_v4 = vpop.permute.xlu0 %8174 }
 0x26f   : > { %v6029_v29 = vrot.slane %v18439_v21, 4  ;;  %v4930_v34 = vsel %vm13932_vm13, %v18441_v8, %v4929_v26  ;;  %v11448_v63 = vcombine.low %v3525_v15, %v3539_v25  ;;  %v14842_v7 = vld [vmem:[#allocation2 + $0x88] sm:$0xf]  ;;  %v14844_v48 = vld [vmem:[#allocation2 + $0x90] sm:$0xf]  ;;  %v14846_v31 = vrot.slane %v4560_v61, 4  ;;  %v14867_v15 = vpop.permute.xlu1 %7918 }
 0x270   : > { %18442 = vst [vmem:[#allocation21_spill] sm:$0xff] %v14824_v6  ;;  %18443 = vst [vmem:[#allocation14_spill] sm:$0xff] %v14826_v47  ;;  %v14830_v33 = vcombine.low %v4916_v5, %v4930_v34  ;;  %v3860_v62 = vld [vmem:[#allocation2 + $0x70] sm:$0xe]  ;;  %v6041_v11 = vshrl.u32 %v14747_v10, 16  ;;  %v6044_v21 = vshll.u32 %v14747_v10, 16  ;;  %v11594_v61 = vcombine.low %v14832_v55, %v14834_v59 }
 0x271   : > { %18444 = vst [vmem:[#allocation15_spill] sm:$0xff] %v14838_v3  ;;  %18445 = vst [vmem:[#allocation22_spill] sm:$0xff] %v14846_v31  ;;  %v3861_v50 = vld [vmem:[#allocation2 + $0x78] sm:$0xe]  ;;  %7540 = vrot.lane.b32.xlu1 %v11448_v63, %s13026_s13  ;;  %v14859_v8 = vld [vmem:[#allocation2 + $0x7c] sm:$0x1]  ;;  %v11499_v26 = vcombine.low %v14842_v7, %v14844_v48 }
 0x272   : > { %v6055_v34 = vshrl.u32 %v14749_v19, 16  ;;  %v6058_v25 = vshll.u32 %v14749_v19, 16  ;;  %v18447_v5 = vshll.u32 %v18446_v30, 16  ;;  %18448 = vst [vmem:[#allocation23_spill] sm:$0xff] %v14867_v15  ;;  %8376 = vrot.lane.b32.xlu0 %v11594_v61, %s13025_s8  ;;  %v18449_v10 = vld [vmem:[#allocation17_spill] sm:$0xff]  ;;  %v11216_v39 = vrot.slane %v3860_v62, 9  ;;  %v14887_v15 = vpop.permute.xlu0 %8140 }
 0x273   : > { %v18450_v63 = vshll.u32 %v18449_v10, 16  ;;  %v4093_v47 = vrot.slane %v14836_v0, 5  ;;  %v11217_v6 = vrot.slane %v3861_v50, 9  ;;  %v14873_v37 = vrot.slane %v6041_v11, 4  ;;  %v18451_v19 = vld [vmem:[#allocation24_spill] sm:$0xff]  ;;  %v18452_v61 = vld [vmem:[#allocation25_spill] sm:$0xff] }
 0x274   : > { %v4439_v32 = vrot.slane %v18447_v5, 5  ;;  %v4097_v30 = vrot.slane %v14859_v8, 5  ;;  %v6019_v5 = vor.u32 %v14805_v36, %v14801_v23  ;;  %v12774_v11 = vld [vmem:[#allocation2 + $0x64] sm:$0x1]  ;;  %v12775_v36 = vld [vmem:[#allocation2 + $0x6c] sm:$0x1] }
 0x275   : > { %v4453_v46 = vrot.slane %v18450_v63, 5  ;;  %7898 = vrot.lane.b32.xlu1 %v11499_v26, %s13024_s30  ;;  %v4094_v50 = vsel %vm13599_vm9, %v11216_v39, %v4093_v47  ;;  %v6022_v10 = vshll.u32 %v12774_v11, 16  ;;  %v6033_v63 = vor.u32 %v6032_v24, %v6029_v29  ;;  %v18455_v47 = vld [vmem:[#allocation19_spill] sm:$0xff]  ;;  %v14900_v11 = vpop.permute.xlu1 %7660 }
 0x276   : > { %v4440_v41 = vsel %vm13932_vm13, %v18451_v19, %v4439_v32  ;;  %v4098_v19 = vsel %vm13599_vm9, %v11217_v6, %v4097_v30  ;;  %v6020_v23 = vrot.slane %v6019_v5, 4  ;;  %v6036_v26 = vshll.u32 %v12775_v36, 16 }
 0x277   : > { %v4454_v62 = vsel %vm13932_vm13, %v18452_v61, %v4453_v46  ;;  %v11466_v31 = vcombine.low %v4094_v50, %v4098_v19  ;;  %v6024_v3 = vrot.slane %v6022_v10, 5  ;;  %v6034_v28 = vrot.slane %v6033_v63, 4  ;;  %v18453_v46 = vld [vmem:[#allocation18_spill] sm:$0xff]  ;;  %v14910_v10 = vld [vmem:[#allocation2 + $0x78] sm:$0xf] }
 0x278   : > { %v14889_v32 = vcombine.low %v4440_v41, %v4454_v62  ;;  %v18454_v61 = vshll.u32 %v18453_v46, 16  ;;  %v14895_v39 = vrot.slane %v6044_v21, 5  ;;  %v6097_v29 = vshrl.u32 %v14785_v53, 16  ;;  %v18457_v50 = vld [vmem:[#allocation26_spill] sm:$0xff]  ;;  %v14912_v63 = vld [vmem:[#allocation2 + $0x80] sm:$0xf] }
 0x279   : > { %v6038_v24 = vrot.slane %v6036_v26, 5  ;;  %v18456_v41 = vshll.u32 %v18455_v47, 16  ;;  %v6100_v6 = vshll.u32 %v14785_v53, 16  ;;  %v6111_v30 = vshrl.u32 %v14787_v17, 16  ;;  %7672 = vrot.lane.b32.xlu1 %v11466_v31, %s13025_s8  ;;  %v18458_v26 = vld [vmem:[#allocation27_spill] sm:$0xff]  ;;  %18463 = vst [vmem:[#allocation18_spill] sm:$0xff] %v14966_v2 }
 0x27a   : > { %v4887_v38 = vrot.slane %v18454_v61, 5  ;;  %v6025_v5 = vsel %vm13932_vm13, %v6020_v23, %v6024_v3  ;;  %v14914_v19 = vrot.slane %v6055_v34, 4  ;;  %v14916_v36 = vrot.slane %v6058_v25, 5  ;;  %v14923_v3 = vld [vmem:[#allocation2 + $0x8c] sm:$0x1] }
 0x27b   : > { %v4901_v62 = vrot.slane %v18456_v41, 5  ;;  %v6039_v53 = vsel %vm13932_vm13, %v6034_v28, %v6038_v24  ;;  %18459 = vst [vmem:[#allocation16_spill] sm:$0xff] %v14923_v3  ;;  %v5337_v23 = vld [vmem:[#allocation2 + $0x88] sm:$0xe]  ;;  %v4627_v46 = vshll.u32 %v14842_v7, 16  ;;  %v14934_v28 = vsel %vm8684_vm10, %v14779_v43, %v14795_v40 }
 0x27c   : > { %v4888_v21 = vsel %vm13932_vm13, %v18457_v50, %v4887_v38  ;;  %v4624_v38 = vshrl.u32 %v14842_v7, 16  ;;  %v11624_v61 = vcombine.low %v6025_v5, %v6039_v53  ;;  %v14929_v34 = vld [vmem:[#allocation2 + $0x94] sm:$0x1]  ;;  %v5338_v25 = vld [vmem:[#allocation2 + $0x90] sm:$0xe]  ;;  %v14936_v24 = vrot.slane %v6097_v29, 4 }
 0x27d   : > { %v4902_v31 = vsel %vm13932_vm13, %v18458_v26, %v4901_v62  ;;  %18460 = vst [vmem:[#allocation17_spill] sm:$0xff] %v14929_v34  ;;  %v6114_v41 = vshll.u32 %v14787_v17, 16  ;;  %v14939_v62 = vpop.permute.xlu0 %8172  ;;  %v11498_v7 = vcombine.low %v14910_v10, %v14912_v63  ;;  %v2831_v5 = vld [vmem:[#allocation2 + $0x60] sm:$0xf]  ;;  %v14943_v50 = vrot.slane %v6100_v6, 5 }
 0x27e   : > { %v14927_v47 = vcombine.low %v4888_v21, %v4902_v31  ;;  %v14945_v21 = vrot.slane %v6111_v30, 4  ;;  %v4638_v53 = vshrl.u32 %v14844_v48, 16  ;;  %8532 = vrot.lane.b32.xlu0 %v11624_v61, %s13024_s30  ;;  %v11282_v43 = vrot.slane %v5337_v23, 9  ;;  %v2832_v40 = vld [vmem:[#allocation2 + $0x68] sm:$0xf]  ;;  %v14957_v30 = vpop.permute.xlu1 %7692 }
 0x27f   : > { %v4641_v29 = vshll.u32 %v14844_v48, 16  ;;  %7896 = vrot.lane.b32.xlu1 %v11498_v7, %s13024_s30  ;;  %v5573_v17 = vrot.slane %v14923_v3, 5  ;;  %v11283_v26 = vrot.slane %v5338_v25, 9  ;;  %v5577_v31 = vrot.slane %v14929_v34, 5  ;;  %18461 = vst [vmem:[#allocation24_spill] sm:$0xff] %v14957_v30 }
 0x280   : > { %v14953_v60 = vrot.slane %v4624_v38, 4  ;;  %v14955_v6 = vrot.slane %v4627_v46, 5  ;;  %v3093_v56 = vshrl.u32 %v2831_v5, 16  ;;  %v3096_v54 = vshll.u32 %v2831_v5, 16  ;;  %v14959_v61 = vld [vmem:[#allocation2 + $0x7c] sm:$0x1] }
 0x281   : > { %18462 = vst [vmem:[#allocation25_spill] sm:$0xff] %v14959_v61  ;;  %v5574_v48 = vsel %vm13599_vm9, %v11282_v43, %v5573_v17  ;;  %v5578_v23 = vsel %vm13599_vm9, %v11283_v26, %v5577_v31  ;;  %v3102_v25 = vshll.u32 %v14701_v1, 16  ;;  %v3107_v7 = vshrl.u32 %v2832_v40, 16  ;;  %v5335_v38 = vld [vmem:[#allocation2 + $0x78] sm:$0xe]  ;;  %v14972_v22 = vpop.permute.xlu0 %8366 }
 0x282   : > { %v14968_v46 = vrot.slane %v6114_v41, 5  ;;  %v11563_v49 = vcombine.low %v5574_v48, %v5578_v23  ;;  %v3095_v30 = vrot.slane %v3093_v56, 4  ;;  %v3098_v14 = vrot.slane %v3096_v54, 5  ;;  %v5336_v5 = vld [vmem:[#allocation2 + $0x80] sm:$0xe] }
 0x283   : > { %v14970_v58 = vrot.slane %v4638_v53, 4  ;;  %v3109_v43 = vrot.slane %v3107_v7, 4  ;;  %v3110_v17 = vshll.u32 %v2832_v40, 16  ;;  %v3116_v26 = vshll.u32 %v14707_v18, 16  ;;  %v3862_v31 = vld [vmem:[#allocation2 + $0x80] sm:$0xe]  ;;  %v14985_v18 = vpop.permute.xlu1 %8364 }
 0x284   : > { %v14977_v27 = vrot.slane %v4641_v29, 5  ;;  %8154 = vrot.lane.b32.xlu0 %v11563_v49, %s13026_s13  ;;  %v3099_v41 = vor.u32 %v3098_v14, %v3095_v30  ;;  %v11280_v56 = vrot.slane %v5335_v38, 9  ;;  %v14980_v54 = vld [vmem:[#allocation2 + $0x84] sm:$0x1]  ;;  %v3863_v53 = vld [vmem:[#allocation2 + $0x88] sm:$0xe] }
 0x285   : > { %v3104_v48 = vrot.slane %v3102_v25, 5  ;;  %v3112_v23 = vrot.slane %v3110_v17, 5  ;;  %v5565_v7 = vrot.slane %v14959_v61, 5  ;;  %v11281_v40 = vrot.slane %v5336_v5, 9  ;;  %v15405_v34 = vld [vmem:[#allocation2 + $0xcc] sm:$0x1] }
 0x286   : > { %v3100_v42 = vrot.slane %v3099_v41, 4  ;;  %v3118_v1 = vrot.slane %v3116_v26, 5  ;;  %v5569_v29 = vrot.slane %v14966_v2, 5  ;;  %v11218_v44 = vrot.slane %v3862_v31, 9  ;;  %v2833_v41 = vld [vmem:[#allocation2 + $0x70] sm:$0xf] }
 0x287   : > { %v3113_v49 = vor.u32 %v3112_v23, %v3109_v43  ;;  %v5566_v14 = vsel %vm13599_vm9, %v11280_v56, %v5565_v7  ;;  %v4101_v30 = vrot.slane %v14980_v54, 5  ;;  %v11219_v25 = vrot.slane %v3863_v53, 9  ;;  %v14999_v56 = vpop.permute.xlu0 %8398  ;;  %v12776_v7 = vld [vmem:[#allocation2 + $0x74] sm:$0x1] }
 0x288   : > { %v5570_v5 = vsel %vm13599_vm9, %v11281_v40, %v5569_v29  ;;  %v4105_v17 = vrot.slane %v14983_v13, 5  ;;  %v6047_v26 = vor.u32 %v14895_v39, %v14873_v37  ;;  %v3105_v43 = vsel %vm13932_vm13, %v3100_v42, %v3104_v48  ;;  %v12777_v29 = vld [vmem:[#allocation2 + $0x7c] sm:$0x1]  ;;  %v2834_v37 = vld [vmem:[#allocation2 + $0x78] sm:$0xf] }
 0x289   : > { %v3114_v31 = vrot.slane %v3113_v49, 4  ;;  %v11562_v23 = vcombine.low %v5566_v14, %v5570_v5  ;;  %v6050_v53 = vshll.u32 %v12776_v7, 16  ;;  %v4102_v38 = vsel %vm13599_vm9, %v11218_v44, %v4101_v30  ;;  %v15010_v14 = vpop.permute.xlu1 %7884 }
 0x28a   : > { %v6048_v45 = vrot.slane %v6047_v26, 4  ;;  %v6061_v40 = vor.u32 %v14916_v36, %v14914_v19  ;;  %v6064_v52 = vshll.u32 %v12777_v29, 16  ;;  %v4106_v42 = vsel %vm13599_vm9, %v11219_v25, %v4105_v17 }
 0x28b   : > { %v3119_v39 = vsel %vm13932_vm13, %v3114_v31, %v3118_v1  ;;  %8152 = vrot.lane.b32.xlu0 %v11562_v23, %s13026_s13  ;;  %v6052_v48 = vrot.slane %v6050_v53, 5  ;;  %v3121_v49 = vshrl.u32 %v2833_v41, 16  ;;  %v3124_v26 = vshll.u32 %v2833_v41, 16 }
 0x28c   : > { %v11433_v44 = vcombine.low %v3105_v43, %v3119_v39  ;;  %v6062_v30 = vrot.slane %v6061_v40, 4  ;;  %v6066_v5 = vrot.slane %v6064_v52, 5  ;;  %v3130_v7 = vshll.u32 %v14836_v0, 16  ;;  %v15020_v40 = vpop.permute.xlu0 %7500 }
 0x28d   : > { %v6053_v19 = vsel %vm13932_vm13, %v6048_v45, %v6052_v48  ;;  %v3123_v36 = vrot.slane %v3121_v49, 4  ;;  %v3135_v1 = vshrl.u32 %v2834_v37, 16  ;;  %v3126_v17 = vrot.slane %v3124_v26, 5 }
 0x28e   : > { %7510 = vrot.lane.b32.xlu1 %v11433_v44, %s13026_s13  ;;  %v6067_v25 = vsel %vm13932_vm13, %v6062_v30, %v6066_v5  ;;  %v3138_v31 = vshll.u32 %v2834_v37, 16  ;;  %v3144_v23 = vshll.u32 %v14859_v8, 16  ;;  %v6072_v43 = vshll.u32 %v14832_v55, 16  ;;  %v12778_v37 = vld [vmem:[#allocation2 + $0x94] sm:$0x1]  ;;  %v15028_v44 = vpop.permute.xlu1 %7916 }
 0x28f   : > { %v11467_v52 = vcombine.low %v4102_v38, %v4106_v42  ;;  %v11625_v41 = vcombine.low %v6053_v19, %v6067_v25  ;;  %v3137_v53 = vrot.slane %v3135_v1, 4  ;;  %v3127_v45 = vor.u32 %v3126_v17, %v3123_v36  ;;  %v12779_v38 = vld [vmem:[#allocation2 + $0x9c] sm:$0x1]  ;;  %18464 = vst [vmem:[#allocation19_spill] sm:$0xff] %v15028_v44 }
 0x290   : > { %v3132_v29 = vrot.slane %v3130_v7, 5  ;;  %v3140_v0 = vrot.slane %v3138_v31, 5  ;;  %v6103_v39 = vor.u32 %v14943_v50, %v14936_v24  ;;  %v4596_v48 = vshrl.u32 %v14910_v10, 16 }
 0x291   : > { %8534 = vrot.lane.b32.xlu0 %v11625_v41, %s13024_s30  ;;  %v6106_v49 = vshll.u32 %v12778_v37, 16  ;;  %v6117_v8 = vor.u32 %v14968_v46, %v14945_v21  ;;  %v6120_v42 = vshll.u32 %v12779_v38, 16  ;;  %v3128_v30 = vrot.slane %v3127_v45, 4  ;;  %v15053_v37 = vld [vmem:[#allocation2 + $0xb8] sm:$0xf] }
 0x292   : > { %7674 = vrot.lane.b32.xlu1 %v11467_v52, %s13025_s8  ;;  %v3141_v5 = vor.u32 %v3140_v0, %v3137_v53  ;;  %v3146_v26 = vrot.slane %v3144_v23, 5  ;;  %v6104_v19 = vrot.slane %v6103_v39, 4  ;;  %v4599_v24 = vshll.u32 %v14910_v10, 16  ;;  %v15042_v52 = vpop.permute.xlu0 %8370  ;;  %v15051_v39 = vld [vmem:[#allocation2 + $0xb0] sm:$0xf] }
 0x293   : > { %v6108_v50 = vrot.slane %v6106_v49, 5  ;;  %v6118_v36 = vrot.slane %v6117_v8, 4  ;;  %v6122_v7 = vrot.slane %v6120_v42, 5  ;;  %v6083_v1 = vshrl.u32 %v14834_v59, 16  ;;  %18465 = vst [vmem:[#allocation26_spill] sm:$0xff] %v15042_v52  ;;  %v15071_v42 = vpop.permute.xlu1 %7662 }
 0x294   : > { %v6086_v25 = vshll.u32 %v14834_v59, 16  ;;  %v3133_v21 = vsel %vm13932_vm13, %v3128_v30, %v3132_v29  ;;  %v3142_v46 = vrot.slane %v3141_v5, 4  ;;  %v4610_v17 = vshrl.u32 %v14912_v63, 16  ;;  %v15055_v49 = vld [vmem:[#allocation2 + $0xa4] sm:$0x1] }
 0x295   : > { %v4613_v31 = vshll.u32 %v14912_v63, 16  ;;  %v6109_v23 = vsel %vm13932_vm13, %v6104_v19, %v6108_v50  ;;  %v6123_v10 = vsel %vm13932_vm13, %v6118_v36, %v6122_v7  ;;  %v4644_v41 = vor.u32 %v14977_v27, %v14970_v58  ;;  %v15057_v8 = vld [vmem:[#allocation2 + $0xac] sm:$0x1]  ;;  %v3864_v30 = vld [vmem:[#allocation2 + $0xa0] sm:$0xe] }
 0x296   : > { %v3147_v59 = vsel %vm13932_vm13, %v3142_v46, %v3146_v26  ;;  %v11627_v53 = vcombine.low %v6109_v23, %v6123_v10  ;;  %v8945_v63 = vsel %vm8684_vm10, %v14889_v32, %v14887_v15  ;;  %v4598_v45 = vrot.slane %v4596_v48, 4  ;;  %v18782_v20 = vld [vmem:[#allocation19_spill] sm:$0xff] }
 0x297   : > { %v4601_v29 = vrot.slane %v4599_v24, 5  ;;  %v11434_v0 = vcombine.low %v3133_v21, %v3147_v59  ;;  %v15062_v58 = vsel %vm8684_vm10, %v14830_v33, %v14851_v4  ;;  %v18466_v27 = vor.u32 %v14955_v6, %v14953_v60  ;;  %v3865_v33 = vld [vmem:[#allocation2 + $0xa8] sm:$0xe]  ;;  %v15082_v6 = vld [vmem:[#allocation2 + $0xb8] sm:$0xf]  ;;  %v15091_v21 = vpop.permute.xlu0 %8402 }
 0x298   : > { %v18468_v32 = vshrl.u32 %v14832_v55, 16  ;;  %v6074_v38 = vrot.slane %v6072_v43, 5  ;;  %8538 = vrot.lane.b32.xlu0 %v11627_v53, %s13024_s30  ;;  %v6085_v5 = vrot.slane %v6083_v1, 4  ;;  %v6088_v26 = vrot.slane %v6086_v25, 5  ;;  %v15084_v43 = vld [vmem:[#allocation2 + $0xc0] sm:$0xf] }
 0x299   : > { %v15067_v15 = vrot.slane %v18466_v27, 4  ;;  %v4612_v19 = vrot.slane %v4610_v17, 4  ;;  %v4615_v24 = vrot.slane %v4613_v31, 5  ;;  %7512 = vrot.lane.b32.xlu1 %v11434_v0, %s13026_s13  ;;  %v15075_v4 = vrot.slane %v4644_v41, 4  ;;  %18470 = vst [vmem:[#allocation47_spill] sm:$0xff] %v15091_v21 }
 0x29a   : > { %v6071_v48 = vrot.slane %v18468_v32, 4  ;;  %v15079_v60 = vsel %vm8781_vm14, %v8945_v63, %v14985_v18  ;;  %v11596_v50 = vcombine.low %v15051_v39, %v15053_v37  ;;  %v4602_v36 = vor.u32 %v4601_v29, %v4598_v45  ;;  %v12780_v31 = vld [vmem:[#allocation2 + $0x84] sm:$0x1]  ;;  %v12781_v53 = vld [vmem:[#allocation2 + $0x8c] sm:$0x1]  ;;  %v15099_v29 = vpop.permute.xlu1 %7694 }
 0x29b   : > { %18467 = vst [vmem:[#allocation27_spill] sm:$0xff] %v15067_v15  ;;  %18469 = vst [vmem:[#allocation46_spill] sm:$0xff] %v15075_v4  ;;  %v11501_v7 = vcombine.low %v15082_v6, %v15084_v43  ;;  %v11220_v1 = vrot.slane %v3864_v30, 9  ;;  %v4109_v25 = vrot.slane %v15055_v49, 5  ;;  %v11221_v18 = vrot.slane %v3865_v33, 9 }
 0x29c   : > { %8380 = vrot.lane.b32.xlu0 %v11596_v50, %s13025_s8  ;;  %v4113_v46 = vrot.slane %v15057_v8, 5  ;;  %v6075_v17 = vor.u32 %v6074_v38, %v6071_v48  ;;  %v6078_v23 = vshll.u32 %v12780_v31, 16  ;;  %v4616_v10 = vor.u32 %v4615_v24, %v4612_v19  ;;  %18471 = vst [vmem:[#allocation48_spill] sm:$0xff] %v15099_v29  ;;  %v12782_v48 = vld [vmem:[#allocation2] sm:$0xf] }
 0x29d   : > { %7902 = vrot.lane.b32.xlu1 %v11501_v7, %s13024_s30  ;;  %v4110_v41 = vsel %vm13599_vm9, %v11220_v1, %v4109_v25  ;;  %v6089_v59 = vor.u32 %v6088_v26, %v6085_v5  ;;  %v6092_v63 = vshll.u32 %v12781_v53, 16  ;;  %v12783_v38 = vld [vmem:[#allocation2 + $0x8] sm:$0xf]  ;;  %v15105_v5 = vld [vmem:[#allocation2 + $0xbc] sm:$0x1]  ;;  %v15112_v7 = vsel %vm8684_vm10, %v14927_v47, %v14939_v62 }
 0x29e   : > { %v4114_v0 = vsel %vm13599_vm9, %v11221_v18, %v4113_v46  ;;  %v6076_v27 = vrot.slane %v6075_v17, 4  ;;  %v6080_v32 = vrot.slane %v6078_v23, 5  ;;  %v11396_v30 = vcombine.low %v12782_v48, %v12783_v38  ;;  %v15103_v50 = vld [vmem:[#allocation2 + $0xa8] sm:$0xf]  ;;  %18472 = vst [vmem:[#allocation49_spill] sm:$0xff] %v15105_v5  ;;  %18474 = vst [vmem:[#allocation51_spill] sm:$0xff] %v15112_v7 }
 0x29f   : > { %v11468_v19 = vcombine.low %v4110_v41, %v4114_v0  ;;  %v6090_v24 = vrot.slane %v6089_v59, 4  ;;  %v6094_v33 = vrot.slane %v6092_v63, 5  ;;  %v15107_v26 = vld [vmem:[#allocation2 + $0xc4] sm:$0x1]  ;;  %v15114_v1 = vrot.slane %v4602_v36, 4 }
 0x2a0   : > { %18473 = vst [vmem:[#allocation50_spill] sm:$0xff] %v15107_v26  ;;  %v15119_v25 = vsel %vm8781_vm14, %v14934_v28, %v14972_v22  ;;  %v6081_v18 = vsel %vm13932_vm13, %v6076_v27, %v6080_v32  ;;  %v5341_v46 = vld [vmem:[#allocation2 + $0xb8] sm:$0xe]  ;;  %v5342_v17 = vld [vmem:[#allocation2 + $0xc0] sm:$0xe]  ;;  %v15123_v31 = vrot.slane %v4616_v10, 4  ;;  %v8687_v47 = vsel %vm8684_vm10, %v11396_v30, %v15020_v40  ;;  %v15133_v22 = vpop.permute.xlu0 %8368  ;;  %v15146_v30 = vpop.permute.xlu1 %7532 }
 0x2a1   : > { %18475 = vst [vmem:[#allocation52_spill] sm:$0xff] %v15114_v1  ;;  %7676 = vrot.lane.b32.xlu1 %v11468_v19, %s13025_s8  ;;  %v6095_v62 = vsel %vm13932_vm13, %v6090_v24, %v6094_v33  ;;  %v15131_v36 = vld [vmem:[#allocation2 + $0xb0] sm:$0xf]  ;;  %v2835_v28 = vld [vmem:[#allocation2 + $0x80] sm:$0xf]  ;;  %v4680_v10 = vshrl.u32 %v15082_v6, 16  ;;  %v15143_v48 = vsel %vm8781_vm14, %v8687_v47, %v14900_v11 }
 0x2a2   : > { %18476 = vst [vmem:[#allocation53_spill] sm:$0xff] %v15123_v31  ;;  %v11626_v59 = vcombine.low %v6081_v18, %v6095_v62  ;;  %v11500_v53 = vcombine.low %v15103_v50, %v15131_v36  ;;  %v2836_v63 = vld [vmem:[#allocation2 + $0x88] sm:$0xf]  ;;  %v11286_v40 = vrot.slane %v5341_v46, 9  ;;  %v5589_v0 = vrot.slane %v15105_v5, 5 }
 0x2a3   : > { %v11287_v27 = vrot.slane %v5342_v17, 9  ;;  %v5593_v32 = vrot.slane %v15107_v26, 5  ;;  %v4683_v38 = vshll.u32 %v15082_v6, 16  ;;  %v3149_v19 = vshrl.u32 %v2835_v28, 16  ;;  %v15149_v33 = vld [vmem:[#allocation2 + $0xac] sm:$0x1] }
 0x2a4   : > { %8536 = vrot.lane.b32.xlu0 %v11626_v59, %s13024_s30  ;;  %v3152_v24 = vshll.u32 %v2835_v28, 16  ;;  %18477 = vst [vmem:[#allocation54_spill] sm:$0xff] %v15149_v33  ;;  %v5590_v18 = vsel %vm13599_vm9, %v11286_v40, %v5589_v0  ;;  %v3158_v11 = vshll.u32 %v14980_v54, 16  ;;  %v3163_v17 = vshrl.u32 %v2836_v63, 16  ;;  %v15157_v6 = vld [vmem:[#allocation2 + $0xb4] sm:$0x1] }
 0x2a5   : > { %7900 = vrot.lane.b32.xlu1 %v11500_v53, %s13024_s30  ;;  %v5594_v46 = vsel %vm13599_vm9, %v11287_v27, %v5593_v32  ;;  %18478 = vst [vmem:[#allocation55_spill] sm:$0xff] %v15157_v6  ;;  %v5339_v47 = vld [vmem:[#allocation2 + $0xa8] sm:$0xe]  ;;  %v5340_v62 = vld [vmem:[#allocation2 + $0xb0] sm:$0xe]  ;;  %v4694_v59 = vshrl.u32 %v15084_v43, 16  ;;  %v15165_v32 = vpop.permute.xlu0 %8400 }
 0x2a6   : > { %v11565_v28 = vcombine.low %v5590_v18, %v5594_v46  ;;  %v3151_v41 = vrot.slane %v3149_v19, 4  ;;  %v3154_v23 = vrot.slane %v3152_v24, 5  ;;  %v15160_v45 = vld [vmem:[#allocation2 + $0xb4] sm:$0x1]  ;;  %v15162_v53 = vrot.slane %v4680_v10, 4  ;;  %18479 = vst [vmem:[#allocation56_spill] sm:$0xff] %v15165_v32 }
 0x2a7   : > { %v3165_v40 = vrot.slane %v3163_v17, 4  ;;  %v3166_v0 = vshll.u32 %v2836_v63, 16  ;;  %v3172_v27 = vshll.u32 %v14983_v13, 16  ;;  %v15167_v54 = vld [vmem:[#allocation2 + $0xbc] sm:$0x1]  ;;  %v15169_v55 = vrot.slane %v4683_v38, 5  ;;  %v15174_v13 = vpop.permute.xlu1 %7890 }
 0x2a8   : > { %v4697_v21 = vshll.u32 %v15084_v43, 16  ;;  %8158 = vrot.lane.b32.xlu0 %v11565_v28, %s13026_s13  ;;  %v3155_v19 = vor.u32 %v3154_v23, %v3151_v41  ;;  %v11284_v24 = vrot.slane %v5339_v47, 9  ;;  %v3866_v18 = vld [vmem:[#allocation2 + $0xb0] sm:$0xe]  ;;  %v3160_v46 = vrot.slane %v3158_v11, 5  ;;  %18480 = vst [vmem:[#allocation57_spill] sm:$0xff] %v15174_v13 }
 0x2a9   : > { %v3168_v10 = vrot.slane %v3166_v0, 5  ;;  %v5581_v17 = vrot.slane %v15149_v33, 5  ;;  %v11285_v63 = vrot.slane %v5340_v62, 9  ;;  %v3867_v29 = vld [vmem:[#allocation2 + $0xb8] sm:$0xe]  ;;  %v4652_v32 = vshrl.u32 %v15103_v50, 16 }
 0x2aa   : > { %v3156_v44 = vrot.slane %v3155_v19, 4  ;;  %v3174_v38 = vrot.slane %v3172_v27, 5  ;;  %v5585_v7 = vrot.slane %v15157_v6, 5  ;;  %v11222_v41 = vrot.slane %v3866_v18, 9  ;;  %v15192_v18 = vld [vmem:[#allocation2 + $0x140] sm:$0xf] }
 0x2ab   : > { %v3169_v43 = vor.u32 %v3168_v10, %v3165_v40  ;;  %v5582_v23 = vsel %vm13599_vm9, %v11284_v24, %v5581_v17  ;;  %v4117_v11 = vrot.slane %v15160_v45, 5  ;;  %v15181_v47 = vrot.slane %v4694_v59, 4  ;;  %v8525_v10 = vpop.permute.xlu0 %8524  ;;  %v12785_v59 = vld [vmem:[#allocation2 + $0x148] sm:$0xf]  ;;  %v2839_v5 = vld [vmem:[#allocation2 + $0xb0] sm:$0xf] }
 0x2ac   : > { %v5586_v62 = vsel %vm13599_vm9, %v11285_v63, %v5585_v7  ;;  %v11223_v28 = vrot.slane %v3867_v29, 9  ;;  %v4121_v0 = vrot.slane %v15167_v54, 5  ;;  %v15186_v31 = vrot.slane %v4697_v21, 5  ;;  %v15197_v21 = vld [vmem:[#allocation2 + $0xc0] sm:$0xf] }
 0x2ad   : > { %v3161_v27 = vsel %vm13932_vm13, %v3156_v44, %v3160_v46  ;;  %v3170_v40 = vrot.slane %v3169_v43, 4  ;;  %v11564_v19 = vcombine.low %v5582_v23, %v5586_v62  ;;  %v4686_v24 = vor.u32 %v15169_v55, %v15162_v53  ;;  %v2837_v63 = vld [vmem:[#allocation2 + $0xa0] sm:$0xf]  ;;  %v15206_v53 = vld [vmem:[#allocation2 + $0xc8] sm:$0xf]  ;;  %v15208_v43 = vpop.permute.xlu1 %7922 }
 0x2ae   : > { %v11412_v17 = vcombine.low %v15192_v18, %v12785_v59  ;;  %v6125_v29 = vshrl.u32 %v15051_v39, 16  ;;  %v4655_v7 = vshll.u32 %v15103_v50, 16  ;;  %v15199_v1 = vrot.slane %v4652_v32, 4  ;;  %v2838_v46 = vld [vmem:[#allocation2 + $0xa8] sm:$0xf]  ;;  %18481 = vst [vmem:[#allocation58_spill] sm:$0xff] %v15208_v43 }
 0x2af   : > { %v3175_v44 = vsel %vm13932_vm13, %v3170_v40, %v3174_v38  ;;  %8156 = vrot.lane.b32.xlu0 %v11564_v19, %s13026_s13  ;;  %v4118_v55 = vsel %vm13599_vm9, %v11222_v41, %v4117_v11  ;;  %v4122_v23 = vsel %vm13599_vm9, %v11223_v28, %v4121_v0  ;;  %v11597_v32 = vcombine.low %v15197_v21, %v15206_v53  ;;  %v18511_v13 = vld [vmem:[#allocation36_spill] sm:$0xff] }
 0x2b0   : > { %v11435_v50 = vcombine.low %v3161_v27, %v3175_v44  ;;  %v9104_v38 = vsel %vm8846_vm15, %v15079_v60, %v8525_v10  ;;  %v8848_v41 = vsel %vm8846_vm15, %v15143_v48, %v15010_v14  ;;  %v3177_v11 = vshrl.u32 %v2837_v63, 16 }
 0x2b1   : > { %9478 = vmatprep.mubr.bf16.mxu1 %v9104_v38  ;;  %v3180_v62 = vshll.u32 %v2837_v63, 16  ;;  %v3186_v40 = vshll.u32 %v15055_v49, 16  ;;  %v3191_v27 = vshrl.u32 %v2838_v46, 16  ;;  %v3194_v28 = vshll.u32 %v2838_v46, 16 }
 0x2b2   : > { %7514 = vrot.lane.b32.xlu1 %v11435_v50, %s13026_s13  ;;  %9479 = vmatmul.mubr.bf16.vlgmr.msra.gmra.mxu1 %v8848_v41  ;;  %v3200_v0 = vshll.u32 %v15057_v8, 16  ;;  %v18482_v19 = vshll.u32 %v14585_v12, 16  ;;  %v4657_v60 = vrot.slane %v4655_v7, 5  ;;  %v3179_v10 = vrot.slane %v3177_v11, 4  ;;  %v18484_v50 = vld [vmem:[#allocation31_spill] sm:$0xff]  ;;  %v18485_v41 = vld [vmem:[#allocation32_spill] sm:$0xff]  ;;  %v15235_v11 = vpop.permute.xlu1 %7664 }
 0x2b3   : > { %8382 = vrot.lane.b32.xlu0 %v11597_v32, %s13025_s8  ;;  %v3182_v59 = vrot.slane %v3180_v62, 5  ;;  %v18483_v14 = vshll.u32 %v14588_v35, 16  ;;  %v11469_v63 = vcombine.low %v4118_v55, %v4122_v23  ;;  %v3193_v49 = vrot.slane %v3191_v27, 4  ;;  %v15240_v62 = vpop.permute.xlu0 %8146  ;;  %v15242_v27 = vld [vmem:[#allocation2 + $0xe0] sm:$0xf] }
 0x2b4   : > { %v4523_v18 = vrot.slane %v18482_v19, 5  ;;  %v3196_v44 = vrot.slane %v3194_v28, 5  ;;  %v4666_v8 = vshrl.u32 %v15131_v36, 16  ;;  %v3188_v12 = vrot.slane %v3186_v40, 5  ;;  %v15244_v28 = vld [vmem:[#allocation2 + $0xe8] sm:$0xf] }
 0x2b5   : > { %v4537_v48 = vrot.slane %v18483_v14, 5  ;;  %v3183_v38 = vor.u32 %v3182_v59, %v3179_v10  ;;  %v4669_v32 = vshll.u32 %v15131_v36, 16  ;;  %v3202_v55 = vrot.slane %v3200_v0, 5 }
 0x2b6   : > { %v4524_v46 = vsel %vm13932_vm13, %v18484_v50, %v4523_v18  ;;  %7678 = vrot.lane.b32.xlu1 %v11469_v63, %s13025_s8  ;;  %v3197_v35 = vor.u32 %v3196_v44, %v3193_v49  ;;  %v6128_v40 = vshll.u32 %v15051_v39, 16  ;;  %v6139_v19 = vshrl.u32 %v15053_v37, 16 }
 0x2b7   : > { %v4538_v7 = vsel %vm13932_vm13, %v18485_v41, %v4537_v48  ;;  %v3184_v18 = vrot.slane %v3183_v38, 4  ;;  %v11599_v36 = vcombine.low %v15242_v27, %v15244_v28  ;;  %v15253_v0 = vsel %vm8781_vm14, %v15062_v58, %v14999_v56  ;;  %v15285_v38 = vpop.permute.xlu1 %7696 }
 0x2b8   : > { %v15238_v23 = vcombine.low %v4524_v46, %v4538_v7  ;;  %18486 = vst [vmem:[#allocation31_spill] sm:$0xff] %v15253_v0  ;;  %v4700_v10 = vor.u32 %v15186_v31, %v15181_v47  ;;  %v6142_v59 = vshll.u32 %v15053_v37, 16  ;;  %v3198_v14 = vrot.slane %v3197_v35, 4  ;;  %v15274_v47 = vld [vmem:[#allocation2 + $0xd0] sm:$0xf]  ;;  %18490 = vst [vmem:[#allocation61_spill] sm:$0xff] %v15285_v38  ;;  %v15289_v7 = vpop.permute.xlu0 %8556 }
 0x2b9   : > { %v15258_v48 = vrot.slane %v4686_v24, 4  ;;  %v15262_v39 = vsel %vm8684_vm10, %v11412_v17, %v15146_v30  ;;  %v6127_v63 = vrot.slane %v6125_v29, 4  ;;  %v3189_v49 = vsel %vm13932_vm13, %v3184_v18, %v3188_v12  ;;  %8386 = vrot.lane.b32.xlu0 %v11599_v36, %s13025_s8  ;;  %v15276_v24 = vld [vmem:[#allocation2 + $0xd8] sm:$0xf]  ;;  %v15278_v30 = vld [vmem:[#allocation2 + $0xc4] sm:$0x1] }
 0x2ba   : > { %18488 = vst [vmem:[#allocation59_spill] sm:$0xff] %v15262_v39  ;;  %v4658_v56 = vor.u32 %v4657_v60, %v15199_v1  ;;  %v15268_v58 = vrot.slane %v4666_v8, 4  ;;  %v15270_v31 = vrot.slane %v4669_v32, 5  ;;  %v3203_v37 = vsel %vm13932_vm13, %v3198_v14, %v3202_v55  ;;  %v3868_v17 = vld [vmem:[#allocation2 + $0xc0] sm:$0xe]  ;;  %18491 = vst [vmem:[#allocation62_spill] sm:$0xff] %v15289_v7 }
 0x2bb   : > { %18487 = vst [vmem:[#allocation32_spill] sm:$0xff] %v15258_v48  ;;  %v6130_v29 = vrot.slane %v6128_v40, 5  ;;  %v6141_v44 = vrot.slane %v6139_v19, 4  ;;  %v6153_v50 = vshrl.u32 %v15197_v21, 16  ;;  %v11436_v46 = vcombine.low %v3189_v49, %v3203_v37  ;;  %v15281_v1 = vld [vmem:[#allocation2 + $0xcc] sm:$0x1] }
 0x2bc   : > { %v15283_v60 = vrot.slane %v4700_v10, 4  ;;  %v6144_v8 = vrot.slane %v6142_v59, 5  ;;  %v6156_v12 = vshll.u32 %v15197_v21, 16  ;;  %v6167_v41 = vshrl.u32 %v15206_v53, 16  ;;  %v3869_v32 = vld [vmem:[#allocation2 + $0xc8] sm:$0xe] }
 0x2bd   : > { %v6170_v55 = vshll.u32 %v15206_v53, 16  ;;  %7516 = vrot.lane.b32.xlu1 %v11436_v46, %s13026_s13  ;;  %v4321_v40 = vld [vmem:[#allocation2 + $0xd8] sm:$0xf]  ;;  %v11598_v19 = vcombine.low %v15274_v47, %v15276_v24  ;;  %v11224_v18 = vrot.slane %v3868_v17, 9  ;;  %v15296_v36 = vrot.slane %v4658_v56, 4 }
 0x2be   : > { %18489 = vst [vmem:[#allocation60_spill] sm:$0xff] %v15283_v60  ;;  %v4322_v59 = vld [vmem:[#allocation2 + $0xe0] sm:$0xf]  ;;  %v4125_v14 = vrot.slane %v15278_v30, 5  ;;  %v15302_v49 = vrot.slane %v6153_v50, 4  ;;  %v11225_v37 = vrot.slane %v3869_v32, 9 }
 0x2bf   : > { %18492 = vst [vmem:[#allocation63_spill] sm:$0xff] %v15296_v36  ;;  %v11503_v53 = vcombine.low %v4321_v40, %v4322_v59  ;;  %8384 = vrot.lane.b32.xlu0 %v11598_v19, %s13025_s8  ;;  %v4129_v46 = vrot.slane %v15281_v1, 5  ;;  %v15306_v35 = vrot.slane %v6156_v12, 5  ;;  %v15308_v56 = vrot.slane %v6167_v41, 4  ;;  %v15322_v41 = vpop.permute.xlu1 %7888  ;;  %v18497_v0 = vld [vmem:[#allocation28_spill] sm:$0xff] }
 0x2c0   : > { %v4126_v17 = vsel %vm13599_vm9, %v11224_v18, %v4125_v14  ;;  %v18493_v10 = vshll.u32 %v14302_v51, 16  ;;  %v15314_v43 = vrot.slane %v6170_v55, 5  ;;  %v6209_v50 = vshrl.u32 %v15242_v27, 16  ;;  %18495 = vst [vmem:[#allocation64_spill] sm:$0xff] %v15322_v41  ;;  %v15328_v55 = vpop.permute.xlu0 %8178  ;;  %v12787_v7 = vld [vmem:[#allocation2 + $0xbc] sm:$0x1] }
 0x2c1   : > { %7906 = vrot.lane.b32.xlu1 %v11503_v53, %s13024_s30  ;;  %v4130_v32 = vsel %vm13599_vm9, %v11225_v37, %v4129_v46  ;;  %v18494_v12 = vshll.u32 %v14305_v16, 16  ;;  %v6212_v38 = vshll.u32 %v15242_v27, 16  ;;  %v4736_v18 = vshrl.u32 %v4321_v40, 16  ;;  %18496 = vst [vmem:[#allocation65_spill] sm:$0xff] %v15328_v55  ;;  %v12786_v16 = vld [vmem:[#allocation2 + $0xb4] sm:$0x1] }
 0x2c2   : > { %v4971_v21 = vrot.slane %v18493_v10, 5  ;;  %v6131_v10 = vor.u32 %v6130_v29, %v6127_v63  ;;  %v4739_v14 = vshll.u32 %v4321_v40, 16  ;;  %v11470_v53 = vcombine.low %v4126_v17, %v4130_v32  ;;  %v15338_v29 = vld [vmem:[#allocation2 + $0xc8] sm:$0xf] }
 0x2c3   : > { %v4985_v19 = vrot.slane %v18494_v12, 5  ;;  %v6134_v46 = vshll.u32 %v12786_v16, 16  ;;  %v6145_v27 = vor.u32 %v6144_v8, %v6141_v44  ;;  %v6148_v36 = vshll.u32 %v12787_v7, 16  ;;  %v15365_v16 = vld [vmem:[#allocation2 + $0xe4] sm:$0x1] }
 0x2c4   : > { %v4972_v51 = vsel %vm13932_vm13, %v14561_v57, %v4971_v21  ;;  %v6132_v39 = vrot.slane %v6131_v10, 4  ;;  %v6223_v60 = vshrl.u32 %v15244_v28, 16  ;;  %v6226_v57 = vshll.u32 %v15244_v28, 16  ;;  %v18513_v55 = vld [vmem:[#allocation37_spill] sm:$0xff] }
 0x2c5   : > { %v4986_v37 = vsel %vm13932_vm13, %v18497_v0, %v4985_v19  ;;  %v4750_v21 = vshrl.u32 %v4322_v59, 16  ;;  %7680 = vrot.lane.b32.xlu1 %v11470_v53, %s13025_s8  ;;  %v6136_v63 = vrot.slane %v6134_v46, 5  ;;  %v4753_v40 = vshll.u32 %v4322_v59, 16  ;;  %v15341_v19 = vld [vmem:[#allocation2 + $0xd0] sm:$0xf]  ;;  %v15355_v59 = vpop.permute.xlu1 %7920 }
 0x2c6   : > { %v15333_v12 = vcombine.low %v4972_v51, %v4986_v37  ;;  %v6181_v0 = vshrl.u32 %v15274_v47, 16  ;;  %v6146_v17 = vrot.slane %v6145_v27, 4  ;;  %v6150_v32 = vrot.slane %v6148_v36, 5  ;;  %v15351_v51 = vld [vmem:[#allocation2 + $0xdc] sm:$0x1]  ;;  %18500 = vst [vmem:[#allocation67_spill] sm:$0xff] %v15355_v59 }
 0x2c7   : > { %v15343_v44 = vrot.slane %v6209_v50, 4  ;;  %v15345_v8 = vrot.slane %v6212_v38, 5  ;;  %v15347_v7 = vrot.slane %v4736_v18, 4  ;;  %v6137_v28 = vsel %vm13932_vm13, %v6132_v39, %v6136_v63  ;;  %18499 = vst [vmem:[#allocation66_spill] sm:$0xff] %v15351_v51  ;;  %v18501_v53 = vld [vmem:[#allocation34_spill] sm:$0xff]  ;;  %v15363_v18 = vpop.permute.xlu0 %8144  ;;  %v18504_v63 = vld [vmem:[#allocation35_spill] sm:$0xff] }
 0x2c8   : > { %18498 = vst [vmem:[#allocation28_spill] sm:$0xff] %v15333_v12  ;;  %v15353_v10 = vrot.slane %v4739_v14, 5  ;;  %v6151_v36 = vsel %vm13932_vm13, %v6146_v17, %v6150_v32  ;;  %v11502_v50 = vcombine.low %v15338_v29, %v15341_v19  ;;  %v18502_v38 = vshll.u32 %v18501_v53, 16  ;;  %18503 = vst [vmem:[#allocation34_spill] sm:$0xff] %v15365_v16  ;;  %v5345_v39 = vld [vmem:[#allocation2 + $0xd8] sm:$0xe] }
 0x2c9   : > { %v15367_v46 = vrot.slane %v6223_v60, 4  ;;  %v15369_v14 = vrot.slane %v6226_v57, 5  ;;  %v11628_v27 = vcombine.low %v6137_v28, %v6151_v36  ;;  %v18505_v59 = vshll.u32 %v18504_v63, 16  ;;  %v5346_v17 = vld [vmem:[#allocation2 + $0xe0] sm:$0xe]  ;;  %v7503_v4 = vpop.permute.xlu1 %7502 }
 0x2ca   : > { %v4495_v37 = vrot.slane %v18502_v38, 5  ;;  %v15373_v32 = vrot.slane %v4750_v21, 4  ;;  %v15375_v26 = vrot.slane %v4753_v40, 5  ;;  %v15377_v53 = vrot.slane %v6181_v0, 4  ;;  %7904 = vrot.lane.b32.xlu1 %v11502_v50, %s13024_s30  ;;  %v18506_v38 = vld [vmem:[#allocation29_spill] sm:$0xff] }
 0x2cb   : > { %v4509_v48 = vrot.slane %v18505_v59, 5  ;;  %v6184_v57 = vshll.u32 %v15274_v47, 16  ;;  %v6195_v28 = vshrl.u32 %v15276_v24, 16  ;;  %8540 = vrot.lane.b32.xlu0 %v11628_v27, %s13024_s30  ;;  %v18507_v59 = vld [vmem:[#allocation30_spill] sm:$0xff]  ;;  %v11290_v40 = vrot.slane %v5345_v39, 9  ;;  %v15399_v36 = vpop.permute.xlu0 %8176  ;;  %18509 = vst [vmem:[#allocation29_spill] sm:$0xff] %v15405_v34 }
 0x2cc   : > { %v4496_v60 = vsel %vm13932_vm13, %v18506_v38, %v4495_v37  ;;  %v2840_v0 = vld [vmem:[#allocation2 + $0xb8] sm:$0xf]  ;;  %v5605_v37 = vrot.slane %v15351_v51, 5  ;;  %v11291_v63 = vrot.slane %v5346_v17, 9  ;;  %v5609_v47 = vrot.slane %v15365_v16, 5  ;;  %18508 = vst [vmem:[#allocation35_spill] sm:$0xff] %v15399_v36 }
 0x2cd   : > { %v4510_v21 = vsel %vm13932_vm13, %v18507_v59, %v4509_v48  ;;  %v3205_v38 = vshrl.u32 %v2839_v5, 16  ;;  %v3208_v2 = vshll.u32 %v2839_v5, 16  ;;  %v3214_v27 = vshll.u32 %v15160_v45, 16  ;;  %v5343_v45 = vld [vmem:[#allocation2 + $0xc8] sm:$0xe] }
 0x2ce   : > { %v15391_v50 = vcombine.low %v4496_v60, %v4510_v21  ;;  %v5606_v48 = vsel %vm13599_vm9, %v11290_v40, %v5605_v37  ;;  %v3219_v39 = vshrl.u32 %v2840_v0, 16  ;;  %v3222_v59 = vshll.u32 %v2840_v0, 16  ;;  %v15408_v37 = vld [vmem:[#allocation2 + $0xd4] sm:$0x1] }
 0x2cf   : > { %v5610_v17 = vsel %vm13599_vm9, %v11291_v63, %v5609_v47  ;;  %v3207_v21 = vrot.slane %v3205_v38, 4  ;;  %v3210_v5 = vrot.slane %v3208_v2, 5  ;;  %v3228_v40 = vshll.u32 %v15167_v54, 16  ;;  %18510 = vst [vmem:[#allocation30_spill] sm:$0xff] %v15408_v37  ;;  %v5344_v47 = vld [vmem:[#allocation2 + $0xd0] sm:$0xe] }
 0x2d0   : > { %v11567_v61 = vcombine.low %v5606_v48, %v5610_v17  ;;  %v3221_v15 = vrot.slane %v3219_v39, 4  ;;  %v3224_v3 = vrot.slane %v3222_v59, 5  ;;  %v3216_v36 = vrot.slane %v3214_v27, 5  ;;  %v12788_v2 = vld [vmem:[#allocation2 + $0x10] sm:$0xf] }
 0x2d1   : > { %v3211_v0 = vor.u32 %v3210_v5, %v3207_v21  ;;  %v18512_v12 = vshll.u32 %v18511_v13, 16  ;;  %v18514_v52 = vshll.u32 %v18513_v55, 16  ;;  %v12789_v38 = vld [vmem:[#allocation2 + $0x18] sm:$0xf]  ;;  %v3230_v39 = vrot.slane %v3228_v40, 5 }
 0x2d2   : > { %v11397_v41 = vcombine.low %v12788_v2, %v12789_v38  ;;  %8162 = vrot.lane.b32.xlu0 %v11567_v61, %s13026_s13  ;;  %v3225_v48 = vor.u32 %v3224_v3, %v3221_v15  ;;  %v11288_v59 = vrot.slane %v5343_v45, 9  ;;  %v18515_v17 = vld [vmem:[#allocation39_spill] sm:$0xff]  ;;  %v18516_v21 = vld [vmem:[#allocation40_spill] sm:$0xff]  ;;  %v11289_v3 = vrot.slane %v5344_v47, 9  ;;  %v8527_v45 = vpop.permute.xlu0 %8526 }
 0x2d3   : > { %v4943_v60 = vrot.slane %v18512_v12, 5  ;;  %v4957_v63 = vrot.slane %v18514_v52, 5  ;;  %v3212_v54 = vrot.slane %v3211_v0, 4  ;;  %v5597_v52 = vrot.slane %v15405_v34, 5  ;;  %v3870_v55 = vld [vmem:[#allocation2 + $0xd0] sm:$0xe]  ;;  %v15422_v12 = vpop.permute.xlu1 %7534 }
 0x2d4   : > { %v3226_v5 = vrot.slane %v3225_v48, 4  ;;  %v5601_v61 = vrot.slane %v15408_v37, 5  ;;  %v15427_v15 = vld [vmem:[#allocation2 + $0xd4] sm:$0x1]  ;;  %v15429_v40 = vrot.slane %v6184_v57, 5  ;;  %v8690_v47 = vsel %vm8684_vm10, %v11397_v41, %v7503_v4 }
 0x2d5   : > { %v4944_v27 = vsel %vm13932_vm13, %v18515_v17, %v4943_v60  ;;  %v4958_v13 = vsel %vm13932_vm13, %v18516_v21, %v4957_v63  ;;  %v15431_v60 = vrot.slane %v6195_v28, 4  ;;  %v3217_v0 = vsel %vm13932_vm13, %v3212_v54, %v3216_v36  ;;  %v15437_v38 = vld [vmem:[#allocation2 + $0xdc] sm:$0x1]  ;;  %v3871_v48 = vld [vmem:[#allocation2 + $0xd8] sm:$0xe] }
 0x2d6   : > { %v15424_v2 = vcombine.low %v4944_v27, %v4958_v13  ;;  %v5598_v63 = vsel %vm13599_vm9, %v11288_v59, %v5597_v52  ;;  %v3231_v17 = vsel %vm13932_vm13, %v3226_v5, %v3230_v39  ;;  %v5602_v57 = vsel %vm13599_vm9, %v11289_v3, %v5601_v61  ;;  %v12790_v41 = vld [vmem:[#allocation2 + $0xc4] sm:$0x1]  ;;  %v12791_v5 = vld [vmem:[#allocation2 + $0xcc] sm:$0x1] }
 0x2d7   : > { %v11226_v27 = vrot.slane %v3870_v55, 9  ;;  %v4708_v28 = vshrl.u32 %v15338_v29, 16  ;;  %v4711_v21 = vshll.u32 %v15338_v29, 16  ;;  %v11437_v36 = vcombine.low %v3217_v0, %v3231_v17  ;;  %v2841_v0 = vld [vmem:[#allocation2 + $0xc0] sm:$0xf] }
 0x2d8   : > { %18517 = vst [vmem:[#allocation36_spill] sm:$0xff] %v15424_v2  ;;  %v11566_v54 = vcombine.low %v5598_v63, %v5602_v57  ;;  %v4133_v59 = vrot.slane %v15427_v15, 5  ;;  %v11227_v13 = vrot.slane %v3871_v48, 9  ;;  %v4137_v52 = vrot.slane %v15437_v38, 5  ;;  %v15456_v63 = vpop.permute.xlu1 %7666 }
 0x2d9   : > { %v6159_v4 = vor.u32 %v15306_v35, %v15302_v49  ;;  %7518 = vrot.lane.b32.xlu1 %v11437_v36, %s13026_s13  ;;  %v6162_v39 = vshll.u32 %v12790_v41, 16  ;;  %v6173_v55 = vor.u32 %v15314_v43, %v15308_v56  ;;  %v6176_v3 = vshll.u32 %v12791_v5, 16  ;;  %v2842_v43 = vld [vmem:[#allocation2 + $0xc8] sm:$0xf]  ;;  %v15464_v56 = vpop.permute.xlu0 %8558 }
 0x2da   : > { %8160 = vrot.lane.b32.xlu0 %v11566_v54, %s13026_s13  ;;  %v9107_v61 = vsel %vm8846_vm15, %v15119_v25, %v8527_v45  ;;  %v4134_v35 = vsel %vm13599_vm9, %v11226_v27, %v4133_v59  ;;  %v4138_v49 = vsel %vm13599_vm9, %v11227_v13, %v4137_v52  ;;  %v8785_v17 = vsel %vm8781_vm14, %v8690_v47, %v15071_v42  ;;  %v18519_v54 = vld [vmem:[#allocation20_spill] sm:$0xff] }
 0x2db   : > { %v6160_v48 = vrot.slane %v6159_v4, 4  ;;  %9486 = vmatprep.mubr.bf16.mxu1 %v9107_v61  ;;  %18518 = vst [vmem:[#allocation37_spill] sm:$0xff] %v15464_v56  ;;  %v11471_v57 = vcombine.low %v4134_v35, %v4138_v49  ;;  %v6164_v36 = vrot.slane %v6162_v39, 5  ;;  %v6174_v25 = vrot.slane %v6173_v55, 4  ;;  %v15738_v56 = vld [vmem:[#allocation2 + $0x128] sm:$0xf] }
 0x2dc   : > { %v6178_v45 = vrot.slane %v6176_v3, 5  ;;  %v8851_v41 = vsel %vm8846_vm15, %v8785_v17, %v18519_v54  ;;  %v3233_v5 = vshrl.u32 %v2841_v0, 16  ;;  %v3236_v27 = vshll.u32 %v2841_v0, 16  ;;  %v15476_v49 = vpop.permute.xlu1 %7698 }
 0x2dd   : > { %v3242_v59 = vshll.u32 %v15278_v30, 16  ;;  %7682 = vrot.lane.b32.xlu1 %v11471_v57, %s13025_s8  ;;  %v6165_v13 = vsel %vm13932_vm13, %v6160_v48, %v6164_v36  ;;  %9487 = vmatmul.mubr.bf16.gmra.mxu1 %v8851_v41  ;;  %v3247_v47 = vshrl.u32 %v2842_v43, 16  ;;  %v3250_v52 = vshll.u32 %v2842_v43, 16  ;;  %18520 = vst [vmem:[#allocation39_spill] sm:$0xff] %v15476_v49  ;;  %v12792_v57 = vld [vmem:[#allocation2 + $0xe4] sm:$0x1] }
 0x2de   : > { %v6179_v42 = vsel %vm13932_vm13, %v6174_v25, %v6178_v45  ;;  %v4722_v4 = vshrl.u32 %v15341_v19, 16  ;;  %v3235_v55 = vrot.slane %v3233_v5, 4  ;;  %v3238_v3 = vrot.slane %v3236_v27, 5  ;;  %v15483_v25 = vpop.permute.xlu0 %8530 }
 0x2df   : > { %v11629_v39 = vcombine.low %v6165_v13, %v6179_v42  ;;  %v3244_v61 = vrot.slane %v3242_v59, 5  ;;  %v3249_v0 = vrot.slane %v3247_v47, 4  ;;  %v3252_v35 = vrot.slane %v3250_v52, 5 }
 0x2e0   : > { %v3256_v30 = vshll.u32 %v15281_v1, 16  ;;  %v3239_v48 = vor.u32 %v3238_v3, %v3235_v55  ;;  %v6215_v17 = vor.u32 %v15345_v8, %v15343_v44  ;;  %v6218_v43 = vshll.u32 %v12792_v57, 16  ;;  %v12793_v1 = vld [vmem:[#allocation2 + $0xec] sm:$0x1] }
 0x2e1   : > { %8542 = vrot.lane.b32.xlu0 %v11629_v39, %s13024_s30  ;;  %v6229_v36 = vor.u32 %v15369_v14, %v15367_v46  ;;  %v4725_v45 = vshll.u32 %v15341_v19, 16  ;;  %v3253_v54 = vor.u32 %v3252_v35, %v3249_v0  ;;  %v6232_v5 = vshll.u32 %v12793_v1, 16  ;;  %v15508_v35 = vpop.permute.xlu1 %7504 }
 0x2e2   : > { %v3258_v41 = vrot.slane %v3256_v30, 5  ;;  %v3240_v27 = vrot.slane %v3239_v48, 4  ;;  %v6216_v59 = vrot.slane %v6215_v17, 4  ;;  %v6220_v13 = vrot.slane %v6218_v43, 5  ;;  %v15512_v48 = vpop.permute.xlu0 %8562 }
 0x2e3   : > { %v6230_v42 = vrot.slane %v6229_v36, 4  ;;  %v6187_v44 = vor.u32 %v15429_v40, %v15377_v53  ;;  %v18521_v8 = vshll.u32 %v15276_v24, 16  ;;  %v3254_v52 = vrot.slane %v3253_v54, 4  ;;  %v3872_v40 = vld [vmem:[#allocation2 + $0xf0] sm:$0xe]  ;;  %18524 = vst [vmem:[#allocation20_spill] sm:$0xff] %v15512_v48 }
 0x2e4   : > { %v6234_v46 = vrot.slane %v6232_v5, 5  ;;  %v4710_v14 = vrot.slane %v4708_v28, 4  ;;  %v4713_v19 = vrot.slane %v4711_v21, 5  ;;  %v3245_v39 = vsel %vm13932_vm13, %v3240_v27, %v3244_v61  ;;  %v15526_v36 = vld [vmem:[#allocation2 + $0x108] sm:$0xf] }
 0x2e5   : > { %v6200_v47 = vrot.slane %v18521_v8, 5  ;;  %v6221_v55 = vsel %vm13932_vm13, %v6216_v59, %v6220_v13  ;;  %v4724_v3 = vrot.slane %v4722_v4, 4  ;;  %v4727_v0 = vrot.slane %v4725_v45, 5  ;;  %v15510_v4 = vld [vmem:[#allocation2 + $0xf4] sm:$0x1] }
 0x2e6   : > { %v3259_v24 = vsel %vm13932_vm13, %v3254_v52, %v3258_v41  ;;  %v6235_v53 = vsel %vm13932_vm13, %v6230_v42, %v6234_v46  ;;  %v18522_v28 = vor.u32 %v15270_v31, %v15268_v58  ;;  %v15518_v57 = vsel %vm8684_vm10, %v15238_v23, %v15240_v62  ;;  %v15528_v45 = vld [vmem:[#allocation2 + $0x110] sm:$0xf]  ;;  %v15530_v54 = vld [vmem:[#allocation2 + $0xfc] sm:$0x1]  ;;  %v3873_v41 = vld [vmem:[#allocation2 + $0xf8] sm:$0xe] }
 0x2e7   : > { %v11438_v61 = vcombine.low %v3245_v39, %v3259_v24  ;;  %v11631_v30 = vcombine.low %v6221_v55, %v6235_v53  ;;  %v18525_v58 = vor.u32 %v15353_v10, %v15347_v7  ;;  %v6201_v43 = vor.u32 %v6200_v47, %v15431_v60  ;;  %v15539_v7 = vld [vmem:[#allocation2 + $0x100] sm:$0xf]  ;;  %v15543_v13 = vld [vmem:[#allocation2 + $0x108] sm:$0xf]  ;;  %v4389_v47 = vld [vmem:[#allocation2 + $0x10c] sm:$0x1] }
 0x2e8   : > { %v15505_v29 = vrot.slane %v18522_v28, 4  ;;  %v18527_v1 = vor.u32 %v15375_v26, %v15373_v32  ;;  %v6188_v23 = vrot.slane %v6187_v44, 4  ;;  %v4714_v62 = vor.u32 %v4713_v19, %v4710_v14  ;;  %v12794_v46 = vld [vmem:[#allocation2 + $0xd4] sm:$0x1]  ;;  %v12795_v14 = vld [vmem:[#allocation2 + $0xdc] sm:$0x1]  ;;  %v15560_v28 = vpop.permute.xlu1 %7536 }
 0x2e9   : > { %v15523_v31 = vrot.slane %v18525_v58, 4  ;;  %7520 = vrot.lane.b32.xlu1 %v11438_v61, %s13026_s13  ;;  %8546 = vrot.lane.b32.xlu0 %v11631_v30, %s13024_s30  ;;  %v11228_v10 = vrot.slane %v3872_v40, 9  ;;  %v4728_v60 = vor.u32 %v4727_v0, %v4724_v3  ;;  %v3270_v27 = vshll.u32 %v15427_v15, 16  ;;  %v15553_v39 = vld [vmem:[#allocation2 + $0xf8] sm:$0xf]  ;;  %18530 = vst [vmem:[#allocation71_spill] sm:$0xff] %v15560_v28  ;;  %v15565_v30 = vpop.permute.xlu0 %8372 }
 0x2ea   : > { %18523 = vst [vmem:[#allocation40_spill] sm:$0xff] %v15505_v29  ;;  %v15535_v5 = vrot.slane %v18527_v1, 4  ;;  %v3284_v59 = vshll.u32 %v15437_v38, 16  ;;  %v4141_v26 = vrot.slane %v15510_v4, 5  ;;  %v11505_v32 = vcombine.low %v15526_v36, %v15528_v45  ;;  %v4324_v55 = vld [vmem:[#allocation2 + $0x100] sm:$0xf] }
 0x2eb   : > { %18526 = vst [vmem:[#allocation68_spill] sm:$0xff] %v15523_v31  ;;  %v11600_v42 = vcombine.low %v15539_v7, %v15543_v13  ;;  %v11229_v44 = vrot.slane %v3873_v41, 9  ;;  %v4145_v8 = vrot.slane %v15530_v54, 5  ;;  %v6202_v52 = vrot.slane %v6201_v43, 4  ;;  %v4390_v3 = vld [vmem:[#allocation2 + $0x114] sm:$0x1] }
 0x2ec   : > { %18528 = vst [vmem:[#allocation69_spill] sm:$0xff] %v15535_v5  ;;  %v4142_v15 = vsel %vm13599_vm9, %v11228_v10, %v4141_v26  ;;  %v6190_v38 = vshll.u32 %v12794_v46, 16  ;;  %v6204_v19 = vshll.u32 %v12795_v14, 16  ;;  %v5349_v0 = vld [vmem:[#allocation2 + $0x108] sm:$0xe]  ;;  %v15555_v24 = vrot.slane %v4714_v62, 4 }
 0x2ed   : > { %7910 = vrot.lane.b32.xlu1 %v11505_v32, %s13024_s30  ;;  %8388 = vrot.lane.b32.xlu0 %v11600_v42, %s13025_s8  ;;  %v4146_v61 = vsel %vm13599_vm9, %v11229_v44, %v4145_v8  ;;  %v5350_v58 = vld [vmem:[#allocation2 + $0x110] sm:$0xe]  ;;  %v15567_v43 = vrot.slane %v4728_v60, 4  ;;  %v15572_v41 = vsel %vm8684_vm10, %v15391_v50, %v15363_v18  ;;  %v15574_v26 = vrot.slane %v3270_v27, 5  ;;  %v2844_v8 = vld [vmem:[#allocation2 + $0xd8] sm:$0xf] }
 0x2ee   : > { %18529 = vst [vmem:[#allocation70_spill] sm:$0xff] %v15555_v24  ;;  %v6192_v1 = vrot.slane %v6190_v38, 5  ;;  %v6206_v62 = vrot.slane %v6204_v19, 5  ;;  %v2843_v10 = vld [vmem:[#allocation2 + $0xd0] sm:$0xf]  ;;  %v15576_v32 = vrot.slane %v3284_v59, 5  ;;  %v11472_v42 = vcombine.low %v4142_v15, %v4146_v61 }
 0x2ef   : > { %18531 = vst [vmem:[#allocation72_spill] sm:$0xff] %v15567_v43  ;;  %v11504_v44 = vcombine.low %v15553_v39, %v4324_v55  ;;  %v4387_v46 = vld [vmem:[#allocation2 + $0xfc] sm:$0x1]  ;;  %v11294_v18 = vrot.slane %v5349_v0, 9  ;;  %v5621_v50 = vrot.slane %v4389_v47, 5  ;;  %v11295_v59 = vrot.slane %v5350_v58, 9  ;;  %v15588_v0 = vpop.permute.xlu1 %7894  ;;  %v15593_v58 = vpop.permute.xlu0 %8404 }
 0x2f0   : > { %v6193_v60 = vsel %vm13932_vm13, %v6188_v23, %v6192_v1  ;;  %v6207_v14 = vsel %vm13932_vm13, %v6202_v52, %v6206_v62  ;;  %v4388_v38 = vld [vmem:[#allocation2 + $0x104] sm:$0x1]  ;;  %v5347_v19 = vld [vmem:[#allocation2 + $0xf8] sm:$0xe]  ;;  %v5348_v40 = vld [vmem:[#allocation2 + $0x100] sm:$0xe] }
 0x2f1   : > { %7684 = vrot.lane.b32.xlu1 %v11472_v42, %s13025_s8  ;;  %v11630_v27 = vcombine.low %v6193_v60, %v6207_v14  ;;  %v5625_v15 = vrot.slane %v4390_v3, 5  ;;  %v3261_v61 = vshrl.u32 %v2843_v10, 16  ;;  %v15584_v55 = vld [vmem:[#allocation2 + $0x104] sm:$0x1]  ;;  %v5622_v53 = vsel %vm13599_vm9, %v11294_v18, %v5621_v50  ;;  %v3874_v52 = vld [vmem:[#allocation2 + $0x100] sm:$0xe] }
 0x2f2   : > { %v3264_v23 = vshll.u32 %v2843_v10, 16  ;;  %v3275_v1 = vshrl.u32 %v2844_v8, 16  ;;  %v3278_v17 = vshll.u32 %v2844_v8, 16  ;;  %18532 = vst [vmem:[#allocation73_spill] sm:$0xff] %v15593_v58  ;;  %v11292_v3 = vrot.slane %v5347_v19, 9  ;;  %v18558_v28 = vld [vmem:[#allocation42_spill] sm:$0xff] }
 0x2f3   : > { %8544 = vrot.lane.b32.xlu0 %v11630_v27, %s13024_s30  ;;  %v5626_v47 = vsel %vm13599_vm9, %v11295_v59, %v5625_v15  ;;  %v3263_v62 = vrot.slane %v3261_v61, 4  ;;  %v5613_v42 = vrot.slane %v4387_v46, 5  ;;  %v3875_v60 = vld [vmem:[#allocation2 + $0x108] sm:$0xe]  ;;  %v15595_v50 = vld [vmem:[#allocation2 + $0x10c] sm:$0x1] }
 0x2f4   : > { %v11569_v14 = vcombine.low %v5622_v53, %v5626_v47  ;;  %v3266_v21 = vrot.slane %v3264_v23, 5  ;;  %v3277_v18 = vrot.slane %v3275_v1, 4  ;;  %v3280_v10 = vrot.slane %v3278_v17, 5  ;;  %v12796_v23 = vld [vmem:[#allocation2 + $0x20] sm:$0xf] }
 0x2f5   : > { %7908 = vrot.lane.b32.xlu1 %v11504_v44, %s13024_s30  ;;  %v5614_v8 = vsel %vm13599_vm9, %v11292_v3, %v5613_v42  ;;  %v11293_v27 = vrot.slane %v5348_v40, 9  ;;  %v5617_v49 = vrot.slane %v4388_v38, 5  ;;  %v11230_v59 = vrot.slane %v3874_v52, 9  ;;  %v12797_v1 = vld [vmem:[#allocation2 + $0x28] sm:$0xf]  ;;  %v15612_v42 = vpop.permute.xlu1 %7668 }
 0x2f6   : > { %v3267_v15 = vor.u32 %v3266_v21, %v3263_v62  ;;  %v3281_v61 = vor.u32 %v3280_v10, %v3277_v18  ;;  %v4149_v19 = vrot.slane %v15584_v55, 5  ;;  %v11231_v46 = vrot.slane %v3875_v60, 9  ;;  %v15616_v18 = vld [vmem:[#allocation2 + $0x110] sm:$0xf]  ;;  %v1288_v40 = vld [vmem:[#allocation2 + $0x1c0] sm:$0x1] }
 0x2f7   : > { %v11398_v17 = vcombine.low %v12796_v23, %v12797_v1  ;;  %8166 = vrot.lane.b32.xlu0 %v11569_v14, %s13026_s13  ;;  %v5618_v44 = vsel %vm13599_vm9, %v11293_v27, %v5617_v49  ;;  %v4153_v47 = vrot.slane %v15595_v50, 5  ;;  %v4792_v3 = vshrl.u32 %v15526_v36, 16  ;;  %v8529_v14 = vpop.permute.xlu0 %8528  ;;  %v1294_v10 = vld [vmem:[#allocation2 + $0x1d0] sm:$0x1]  ;;  %v15628_v1 = vld [vmem:[#allocation2 + $0x118] sm:$0xf] }
 0x2f8   : > { %v3268_v38 = vrot.slane %v3267_v15, 4  ;;  %v3282_v21 = vrot.slane %v3281_v61, 4  ;;  %v4150_v52 = vsel %vm13599_vm9, %v11230_v59, %v4149_v19  ;;  %v11568_v60 = vcombine.low %v5614_v8, %v5618_v44  ;;  %v1488_v59 = vld [vmem:[#allocation2 + $0x1d4] sm:$0x1]  ;;  %v2845_v61 = vld [vmem:[#allocation2 + $0xf0] sm:$0xf]  ;;  %v12364_v44 = vpop.f32.mrf.mxu1 }
 0x2f9   : > { %v8693_v62 = vsel %vm8684_vm10, %v11398_v17, %v15508_v35  ;;  %v4154_v49 = vsel %vm13599_vm9, %v11231_v46, %v4153_v47  ;;  %v9044_v17 = vsel %vm8781_vm14, %v15572_v41, %v15133_v22  ;;  %v11601_v47 = vcombine.low %v15616_v18, %v15628_v1  ;;  %v1482_v19 = vld [vmem:[#allocation2 + $0x1c4] sm:$0x1]  ;;  %v12802_v58 = vld [vmem:[#allocation2 + $0x38] sm:$0xf] }
 0x2fa   : > { %v3273_v35 = vsel %vm13932_vm13, %v3268_v38, %v15574_v26  ;;  %v3287_v8 = vsel %vm13932_vm13, %v3282_v21, %v15576_v32  ;;  %v11473_v23 = vcombine.low %v4150_v52, %v4154_v49  ;;  %v2846_v26 = vld [vmem:[#allocation2 + $0xf8] sm:$0xf]  ;;  %v9110_v32 = vsel %vm8846_vm15, %v9044_v17, %v8529_v14  ;;  %v15639_v21 = vld [vmem:[%s13159_s21] ss:$0 sm:$0xff] }
 0x2fb   : > { %v11439_v46 = vcombine.low %v3273_v35, %v3287_v8  ;;  %8164 = vrot.lane.b32.xlu0 %v11568_v60, %s13026_s13  ;;  %v8787_v38 = vsel %vm8781_vm14, %v8693_v62, %v15235_v11  ;;  %v983_v52 = vadd.f32 %v15639_v21, %v12364_v44  ;;  %9494 = vmatprep.mubr.bf16.mxu1 %v9110_v32  ;;  %v18533_v60 = vld [vmem:[#allocation64_spill] sm:$0xff]  ;;  %v1295_v49 = vsel %vm13220_vm3, 0, %v1294_v10 }
 0x2fc   : > { %v8854_v22 = vsel %vm8846_vm15, %v8787_v38, %v18533_v60  ;;  %v1489_v8 = vsel %vm13228_vm4, 0, %v1488_v59  ;;  %v3289_v14 = vshrl.u32 %v2845_v61, 16  ;;  %1296 = vst [vmem:[#allocation2 + $0x1d0] sm:$0x1] %v1295_v49  ;;  %v3292_v11 = vshll.u32 %v2845_v61, 16  ;;  %v18537_v60 = vld [vmem:[#allocation26_spill] sm:$0xff]  ;;  %v974_v61 = vpop.f32.mrf.mxu1 }
 0x2fd   : > { %7522 = vrot.lane.b32.xlu1 %v11439_v46, %s13026_s13  ;;  %9495 = vmatmul.mubr.bf16.gmra.mxu1 %v8854_v22  ;;  %v1097_v17 = vmax.f32 %v983_v52, 0.0  ;;  %1490 = vst [vmem:[#allocation2 + $0x1d4] sm:$0x1] %v1489_v8  ;;  %v3298_v62 = vshll.u32 %v15510_v4, 16  ;;  %v3303_v44 = vshrl.u32 %v2846_v26, 16  ;;  %v15650_v46 = vpop.permute.xlu1 %7700  ;;  %v3306_v38 = vshll.u32 %v2846_v26, 16 }
 0x2fe   : > { %18536 = vst [vmem:[#allocation64_spill] sm:$0xff] %v15650_v46  ;;  %v3291_v32 = vrot.slane %v3289_v14, 4  ;;  %v3312_v10 = vshll.u32 %v15530_v54, 16  ;;  %v9046_v59 = vsel %vm8781_vm14, %v15518_v57, %v18537_v60  ;;  %v3294_v52 = vrot.slane %v3292_v11, 5  ;;  %v18538_v26 = vld [vmem:[#allocation33_spill] sm:$0xff]  ;;  %v18542_v60 = vld [vmem:[#allocation43_spill] sm:$0xff] }
 0x2ff   : > { %8390 = vrot.lane.b32.xlu0 %v11601_v47, %s13025_s8  ;;  %v11825_v22 = vpack.c.bf16 %v1097_v17, %v1097_v17  ;;  %v3300_v49 = vrot.slane %v3298_v62, 5  ;;  %v3305_v8 = vrot.slane %v3303_v44, 4  ;;  %v3308_v4 = vrot.slane %v3306_v38, 5  ;;  %v18540_v17 = vld [vmem:[#allocation41_spill] sm:$0xff] }
 0x300   : > { %v3314_v53 = vrot.slane %v3312_v10, 5  ;;  %v9113_v47 = vsel %vm8846_vm15, %v9046_v59, %v15483_v25  ;;  %v18539_v14 = vshll.u32 %v18538_v26, 16  ;;  %v3295_v57 = vor.u32 %v3294_v52, %v3291_v32  ;;  %v18543_v26 = vld [vmem:[#allocation13_spill] sm:$0xff] }
 0x301   : > { %7686 = vrot.lane.b32.xlu1 %v11473_v23, %s13025_s8  ;;  %v2172_v15 = vshrl.u32 %v11825_v22, 16  ;;  %v2175_v27 = vshll.u32 %v11825_v22, 16  ;;  %9502 = vmatprep.mubr.bf16.mxu1 %v9113_v47  ;;  %v18541_v11 = vshll.u32 %v18540_v17, 16  ;;  %v3309_v44 = vor.u32 %v3308_v4, %v3305_v8  ;;  %v18544_v52 = vld [vmem:[#allocation65_spill] sm:$0xff]  ;;  %v18545_v8 = vld [vmem:[#allocation28_spill] sm:$0xff]  ;;  %v15680_v47 = vpop.permute.xlu1 %7892 }
 0x302   : > { %v4579_v54 = vrot.slane %v18539_v14, 5  ;;  %v975_v38 = vadd.f32 %v15639_v21, %v974_v61  ;;  %v1289_v25 = vsel %vm13220_vm3, 0, %v1288_v40  ;;  %v3296_v59 = vrot.slane %v3295_v57, 4 }
 0x303   : > { %v4593_v62 = vrot.slane %v18541_v11, 5  ;;  %v2174_v10 = vrot.slane %v2172_v15, 7  ;;  %1290 = vst [vmem:[#allocation2 + $0x1c0] sm:$0x1] %v1289_v25  ;;  %v1483_v22 = vsel %vm13228_vm4, 0, %v1482_v19  ;;  %v15678_v4 = vsel %vm8684_vm10, %v18545_v8, %v18544_v52 }
 0x304   : > { %v4580_v23 = vsel %vm13932_vm13, %v18542_v60, %v4579_v54  ;;  %18546 = vst [vmem:[#allocation9_spill] sm:$0xff] %v15678_v4  ;;  %v2719_v61 = vld [vmem:[#allocation2 + $0x1d0] sm:$0xf]  ;;  %v2722_v14 = vld [vmem:[#allocation2 + $0x1d4] sm:$0x1]  ;;  %v3310_v40 = vrot.slane %v3309_v44, 4  ;;  %v3301_v19 = vsel %vm13932_vm13, %v3296_v59, %v3300_v49 }
 0x305   : > { %v4594_v32 = vsel %vm13932_vm13, %v18543_v26, %v4593_v62  ;;  %v1095_v54 = vmax.f32 %v975_v38, 0.0  ;;  %1484 = vst [vmem:[#allocation2 + $0x1c4] sm:$0x1] %v1483_v22  ;;  %v6237_v57 = vshrl.u32 %v15539_v7, 16  ;;  %v2177_v17 = vor.u32 %v2175_v27, %v2174_v10  ;;  %v15706_v22 = vld [vmem:[#allocation2 + $0x138] sm:$0xf] }
 0x306   : > { %v15682_v15 = vcombine.low %v4580_v23, %v4594_v32  ;;  %v2178_v11 = vrot.slane %v2174_v10, 4  ;;  %v6240_v62 = vshll.u32 %v15539_v7, 16  ;;  %v6251_v60 = vshrl.u32 %v15543_v13, 16  ;;  %v15696_v32 = vld [vmem:[#allocation2 + $0x130] sm:$0xf] }
 0x307   : > { %v3315_v25 = vsel %vm13932_vm13, %v3310_v40, %v3314_v53  ;;  %v11823_v26 = vpack.c.bf16 %v1095_v54, %v1095_v54  ;;  %v6254_v44 = vshll.u32 %v15543_v13, 16  ;;  %v2720_v38 = vsel %vm13252_vm6, %v2177_v17, %v2719_v61 }
 0x308   : > { %v2723_v27 = vsel %vm13220_vm3, %v2178_v11, %v2722_v14  ;;  %v11440_v10 = vcombine.low %v3301_v19, %v3315_v25  ;;  %v15700_v7 = vrot.slane %v4792_v3, 4  ;;  %v18549_v49 = vshll.u32 %v15526_v36, 16  ;;  %2721 = vst [vmem:[#allocation2 + $0x1d0] sm:$0xf] %v2720_v38  ;;  %v15717_v3 = vld [vmem:[#allocation2 + $0x128] sm:$0xf]  ;;  %v7507_v25 = vpop.permute.xlu1 %7506 }
 0x309   : > { %2724 = vst [vmem:[#allocation2 + $0x1d4] sm:$0x1] %v2723_v27  ;;  %v2156_v13 = vshrl.u32 %v11823_v26, 16  ;;  %v2159_v53 = vshll.u32 %v11823_v26, 16  ;;  %v18551_v52 = vshrl.u32 %v15528_v45, 16  ;;  %v6265_v61 = vshrl.u32 %v15616_v18, 16 }
 0x30a   : > { %18548 = vst [vmem:[#allocation10_spill] sm:$0xff] %v15700_v7  ;;  %v15704_v59 = vrot.slane %v18549_v49, 5  ;;  %v6268_v14 = vshll.u32 %v15616_v18, 16  ;;  %7524 = vrot.lane.b32.xlu1 %v11440_v10, %s13026_s13  ;;  %v11603_v36 = vcombine.low %v15696_v32, %v15706_v22  ;;  %v18553_v40 = vshll.u32 %v15528_v45, 16  ;;  %v4330_v26 = vld [vmem:[#allocation2 + $0x130] sm:$0xf] }
 0x30b   : > { %v15710_v8 = vrot.slane %v18551_v52, 4  ;;  %v15723_v17 = vrot.slane %v6237_v57, 4  ;;  %v15725_v11 = vrot.slane %v6240_v62, 5  ;;  %v2158_v19 = vrot.slane %v2156_v13, 7  ;;  %v15727_v38 = vld [vmem:[#allocation2 + $0x150] sm:$0xf] }
 0x30c   : > { %18550 = vst [vmem:[#allocation26_spill] sm:$0xff] %v15704_v59  ;;  %v15721_v54 = vrot.slane %v18553_v40, 5  ;;  %v15729_v18 = vld [vmem:[#allocation2 + $0x158] sm:$0xf]  ;;  %v6253_v10 = vrot.slane %v6251_v60, 4  ;;  %v6256_v49 = vrot.slane %v6254_v44, 5  ;;  %8394 = vrot.lane.b32.xlu0 %v11603_v36, %s13025_s8  ;;  %v11507_v46 = vcombine.low %v15717_v3, %v4330_v26 }
 0x30d   : > { %18552 = vst [vmem:[#allocation33_spill] sm:$0xff] %v15710_v8  ;;  %v2707_v52 = vld [vmem:[#allocation2 + $0x1c0] sm:$0xf]  ;;  %v2710_v45 = vld [vmem:[#allocation2 + $0x1c4] sm:$0x1]  ;;  %v2161_v48 = vor.u32 %v2159_v53, %v2158_v19  ;;  %v2162_v4 = vrot.slane %v2158_v19, 4 }
 0x30e   : > { %18554 = vst [vmem:[#allocation41_spill] sm:$0xff] %v15721_v54  ;;  %v12801_v40 = vld [vmem:[#allocation2 + $0x30] sm:$0xf]  ;;  %v15734_v62 = vld [vmem:[#allocation2 + $0x120] sm:$0xf]  ;;  %v15742_v60 = vrot.slane %v6265_v61, 4  ;;  %7914 = vrot.lane.b32.xlu1 %v11507_v46, %s13024_s30 }
 0x30f   : > { %v11399_v57 = vcombine.low %v12801_v40, %v12802_v58  ;;  %v15740_v27 = vld [vmem:[#allocation2 + $0x114] sm:$0x1]  ;;  %v15744_v44 = vrot.slane %v6268_v14, 5  ;;  %v6279_v58 = vshrl.u32 %v15628_v1, 16  ;;  %v3876_v40 = vld [vmem:[#allocation2 + $0x110] sm:$0xe]  ;;  %v2708_v53 = vsel %vm13252_vm6, %v2161_v48, %v2707_v52 }
 0x310   : > { %v6282_v54 = vshll.u32 %v15628_v1, 16  ;;  %v2711_v19 = vsel %vm13220_vm3, %v2162_v4, %v2710_v45  ;;  %v6321_v26 = vshrl.u32 %v15696_v32, 16  ;;  %v15755_v61 = vld [vmem:[#allocation2 + $0x11c] sm:$0x1]  ;;  %v3877_v14 = vld [vmem:[#allocation2 + $0x118] sm:$0xe]  ;;  %v11602_v48 = vcombine.low %v15734_v62, %v15738_v56 }
 0x311   : > { %v8696_v36 = vsel %vm8684_vm10, %v11399_v57, %v7507_v25  ;;  %2709 = vst [vmem:[#allocation2 + $0x1c0] sm:$0xf] %v2708_v53  ;;  %2712 = vst [vmem:[#allocation2 + $0x1c4] sm:$0x1] %v2711_v19  ;;  %v6324_v25 = vshll.u32 %v15696_v32, 16  ;;  %v6335_v57 = vshrl.u32 %v15706_v22, 16 }
 0x312   : > { %v6338_v1 = vshll.u32 %v15706_v22, 16  ;;  %v6293_v4 = vshrl.u32 %v15734_v62, 16  ;;  %v6296_v52 = vshll.u32 %v15734_v62, 16  ;;  %v8789_v46 = vsel %vm8781_vm14, %v8696_v36, %v15456_v63  ;;  %8392 = vrot.lane.b32.xlu0 %v11602_v48, %s13025_s8  ;;  %v18555_v53 = vld [vmem:[#allocation57_spill] sm:$0xff]  ;;  %v18556_v8 = vld [vmem:[#allocation38_spill] sm:$0xff] }
 0x313   : > { %v11232_v45 = vrot.slane %v3876_v40, 9  ;;  %v8857_v32 = vsel %vm8846_vm15, %v8789_v46, %v18555_v53  ;;  %v4157_v19 = vrot.slane %v15740_v27, 5  ;;  %v11233_v13 = vrot.slane %v3877_v14, 9  ;;  %v12803_v36 = vld [vmem:[#allocation2 + $0x104] sm:$0x1] }
 0x314   : > { %v4161_v22 = vrot.slane %v15755_v61, 5  ;;  %9503 = vmatmul.mubr.bf16.gmra.mxu1 %v8857_v32  ;;  %v18557_v59 = vshll.u32 %v18556_v8, 16  ;;  %v18559_v62 = vshll.u32 %v18558_v28, 16  ;;  %v6243_v63 = vor.u32 %v15725_v11, %v15723_v17  ;;  %v12804_v53 = vld [vmem:[#allocation2 + $0x10c] sm:$0x1]  ;;  %v18560_v8 = vld [vmem:[#allocation15_spill] sm:$0xff] }
 0x315   : > { %v6246_v40 = vshll.u32 %v12803_v36, 16  ;;  %v4158_v48 = vsel %vm13599_vm9, %v11232_v45, %v4157_v19  ;;  %v6257_v46 = vor.u32 %v6256_v49, %v6253_v10  ;;  %v6260_v32 = vshll.u32 %v12804_v53, 16  ;;  %v4327_v10 = vld [vmem:[#allocation2 + $0x118] sm:$0xf]  ;;  %v4328_v49 = vld [vmem:[#allocation2 + $0x120] sm:$0xf] }
 0x316   : > { %v4551_v7 = vrot.slane %v18557_v59, 5  ;;  %v4565_v43 = vrot.slane %v18559_v62, 5  ;;  %v4162_v14 = vsel %vm13599_vm9, %v11233_v13, %v4161_v22  ;;  %v18561_v59 = vld [vmem:[#allocation22_spill] sm:$0xff]  ;;  %v6244_v11 = vrot.slane %v6243_v63, 4  ;;  %v15787_v62 = vpop.permute.xlu0 %8150  ;;  %v15801_v63 = vld [vmem:[#allocation2 + $0x198] sm:$0xf] }
 0x317   : > { %v11474_v24 = vcombine.low %v4158_v48, %v4162_v14  ;;  %v6248_v45 = vrot.slane %v6246_v40, 5  ;;  %v6258_v19 = vrot.slane %v6257_v46, 4  ;;  %v6262_v13 = vrot.slane %v6260_v32, 5  ;;  %v4393_v46 = vld [vmem:[#allocation2 + $0x12c] sm:$0x1] }
 0x318   : > { %v4552_v28 = vsel %vm13932_vm13, %v18560_v8, %v4551_v7  ;;  %v4566_v17 = vsel %vm13932_vm13, %v18561_v59, %v4565_v43  ;;  %v15791_v22 = vrot.slane %v6279_v58, 4  ;;  %v15793_v48 = vrot.slane %v6282_v54, 5  ;;  %v15797_v7 = vpop.permute.xlu1 %7538  ;;  %v4394_v59 = vld [vmem:[#allocation2 + $0x134] sm:$0x1] }
 0x319   : > { %v15789_v36 = vcombine.low %v4552_v28, %v4566_v17  ;;  %v15795_v14 = vrot.slane %v6321_v26, 4  ;;  %18562 = vst [vmem:[#allocation43_spill] sm:$0xff] %v15797_v7  ;;  %v6307_v43 = vshrl.u32 %v15738_v56, 16  ;;  %7688 = vrot.lane.b32.xlu1 %v11474_v24, %s13025_s8  ;;  %v15803_v53 = vrot.slane %v6324_v25, 5  ;;  %v15811_v26 = vld [vmem:[#allocation2 + $0x1a0] sm:$0xf] }
 0x31a   : > { %v15805_v40 = vrot.slane %v6335_v57, 4  ;;  %v6249_v58 = vsel %vm13932_vm13, %v6244_v11, %v6248_v45  ;;  %v6263_v54 = vsel %vm13932_vm13, %v6258_v19, %v6262_v13  ;;  %v15813_v32 = vrot.slane %v6338_v1, 5  ;;  %v5353_v25 = vld [vmem:[#allocation2 + $0x128] sm:$0xe]  ;;  %v5354_v19 = vld [vmem:[#allocation2 + $0x130] sm:$0xe] }
 0x31b   : > { %v6310_v8 = vshll.u32 %v15738_v56, 16  ;;  %v11632_v24 = vcombine.low %v6249_v58, %v6263_v54  ;;  %v11506_v28 = vcombine.low %v4327_v10, %v4328_v49  ;;  %v15816_v17 = vrot.slane %v6293_v4, 4  ;;  %v18563_v56 = vld [vmem:[#allocation44_spill] sm:$0xff]  ;;  %v15830_v58 = vpop.permute.xlu0 %8560 }
 0x31c   : > { %v15818_v57 = vrot.slane %v6296_v52, 5  ;;  %v4988_v11 = vshrl.u32 %v15801_v63, 16  ;;  %v4991_v45 = vshll.u32 %v15801_v63, 16  ;;  %v15822_v13 = vrot.slane %v6307_v43, 4  ;;  %v2847_v52 = vld [vmem:[#allocation2 + $0x100] sm:$0xf]  ;;  %v15832_v5 = vpop.permute.xlu1 %7670 }
 0x31d   : > { %8548 = vrot.lane.b32.xlu0 %v11632_v24, %s13024_s30  ;;  %7912 = vrot.lane.b32.xlu1 %v11506_v28, %s13024_s30  ;;  %v18564_v1 = vshll.u32 %v18563_v56, 16  ;;  %v5002_v49 = vshrl.u32 %v15811_v26, 16  ;;  %v5005_v4 = vshll.u32 %v15811_v26, 16  ;;  %18565 = vst [vmem:[#allocation13_spill] sm:$0xff] %v15830_v58  ;;  %v11298_v37 = vrot.slane %v5353_v25, 9  ;;  %v18566_v28 = vld [vmem:[#allocation45_spill] sm:$0xff] }
 0x31e   : > { %v4990_v54 = vrot.slane %v4988_v11, 4  ;;  %v4993_v7 = vrot.slane %v4991_v45, 5  ;;  %v5637_v34 = vrot.slane %v4393_v46, 5  ;;  %v2848_v43 = vld [vmem:[#allocation2 + $0x108] sm:$0xf]  ;;  %v18567_v16 = vshll.u32 %v18566_v28, 16 }
 0x31f   : > { %v4999_v10 = vrot.slane %v18564_v1, 5  ;;  %v5004_v24 = vrot.slane %v5002_v49, 4  ;;  %v5007_v31 = vrot.slane %v5005_v4, 5  ;;  %v11299_v1 = vrot.slane %v5354_v19, 9  ;;  %v4391_v28 = vld [vmem:[#allocation2 + $0x11c] sm:$0x1] }
 0x320   : > { %v5013_v56 = vrot.slane %v18567_v16, 5  ;;  %v4994_v51 = vor.u32 %v4993_v7, %v4990_v54  ;;  %v5638_v29 = vsel %vm13599_vm9, %v11298_v37, %v5637_v34  ;;  %v5641_v6 = vrot.slane %v4394_v59, 5  ;;  %v5351_v34 = vld [vmem:[#allocation2 + $0x118] sm:$0xe]  ;;  %v8149_v37 = vpop.permute.xlu0 %8148 }
 0x321   : > { %v3317_v33 = vshrl.u32 %v2847_v52, 16  ;;  %v5008_v58 = vor.u32 %v5007_v31, %v5004_v24  ;;  %v3320_v11 = vshll.u32 %v2847_v52, 16  ;;  %v3326_v25 = vshll.u32 %v15584_v55, 16  ;;  %v5352_v52 = vld [vmem:[#allocation2 + $0x120] sm:$0xe]  ;;  %v7509_v24 = vpop.permute.xlu1 %7508 }
 0x322   : > { %v3331_v46 = vshrl.u32 %v2848_v43, 16  ;;  %v4995_v45 = vrot.slane %v4994_v51, 4  ;;  %v5642_v49 = vsel %vm13599_vm9, %v11299_v1, %v5641_v6  ;;  %v3334_v2 = vshll.u32 %v2848_v43, 16  ;;  %v12805_v6 = vld [vmem:[#allocation2 + $0x50] sm:$0xf] }
 0x323   : > { %v3319_v4 = vrot.slane %v3317_v33, 4  ;;  %v15841_v16 = vrot.slane %v6310_v8, 5  ;;  %v5009_v7 = vrot.slane %v5008_v58, 4  ;;  %v11571_v19 = vcombine.low %v5638_v29, %v5642_v49  ;;  %v12806_v43 = vld [vmem:[#allocation2 + $0x58] sm:$0xf] }
 0x324   : > { %v3322_v54 = vrot.slane %v3320_v11, 5  ;;  %v5000_v31 = vsel %vm13932_vm13, %v4995_v45, %v4999_v10  ;;  %v3333_v59 = vrot.slane %v3331_v46, 4  ;;  %v3336_v55 = vrot.slane %v3334_v2, 5  ;;  %v4392_v1 = vld [vmem:[#allocation2 + $0x124] sm:$0x1] }
 0x325   : > { %v3340_v51 = vshll.u32 %v15595_v50, 16  ;;  %v5014_v33 = vsel %vm13932_vm13, %v5009_v7, %v5013_v56  ;;  %v11400_v8 = vcombine.low %v12805_v6, %v12806_v43  ;;  %8170 = vrot.lane.b32.xlu0 %v11571_v19, %s13026_s13  ;;  %v3328_v58 = vrot.slane %v3326_v25, 5  ;;  %v3878_v11 = vld [vmem:[#allocation2 + $0x120] sm:$0xe]  ;;  %v15851_v50 = vld [vmem:[#allocation2 + $0x124] sm:$0x1] }
 0x326   : > { %v3323_v29 = vor.u32 %v3322_v54, %v3319_v4  ;;  %v15849_v49 = vcombine.low %v5000_v31, %v5014_v33  ;;  %v3337_v10 = vor.u32 %v3336_v55, %v3333_v59  ;;  %v11296_v46 = vrot.slane %v5351_v34, 9  ;;  %v3879_v45 = vld [vmem:[#allocation2 + $0x128] sm:$0xe]  ;;  %v15857_v19 = vld [vmem:[#allocation2 + $0x12c] sm:$0x1] }
 0x327   : > { %v3342_v2 = vrot.slane %v3340_v51, 5  ;;  %v15855_v56 = vsel %vm8684_vm10, %v15789_v36, %v8149_v37  ;;  %v5629_v6 = vrot.slane %v4391_v28, 5  ;;  %v11297_v43 = vrot.slane %v5352_v52, 9  ;;  %v1303_v59 = vld [vmem:[#allocation2 + $0x1f8] sm:$0x1]  ;;  %v12367_v28 = vpop.f32.mrf.mxu1 }
 0x328   : > { %18568 = vst [vmem:[#allocation65_spill] sm:$0xff] %v15849_v49  ;;  %v3324_v7 = vrot.slane %v3323_v29, 4  ;;  %v15860_v25 = vsel %vm8684_vm10, %v11400_v8, %v7509_v24  ;;  %v3338_v4 = vrot.slane %v3337_v10, 4  ;;  %v5633_v54 = vrot.slane %v4392_v1, 5  ;;  %v1497_v51 = vld [vmem:[#allocation2 + $0x1fc] sm:$0x1] }
 0x329   : > { %v11234_v31 = vrot.slane %v3878_v11, 9  ;;  %v5630_v55 = vsel %vm13599_vm9, %v11296_v46, %v5629_v6  ;;  %v4165_v36 = vrot.slane %v15851_v50, 5  ;;  %v11235_v37 = vrot.slane %v3879_v45, 9  ;;  %v1297_v10 = vld [vmem:[#allocation2 + $0x1e8] sm:$0x1] }
 0x32a   : > { %v3329_v34 = vsel %vm13932_vm13, %v3324_v7, %v3328_v58  ;;  %v3343_v52 = vsel %vm13932_vm13, %v3338_v4, %v3342_v2  ;;  %v5634_v33 = vsel %vm13599_vm9, %v11297_v43, %v5633_v54  ;;  %v4169_v8 = vrot.slane %v15857_v19, 5  ;;  %v1491_v6 = vld [vmem:[#allocation2 + $0x1ec] sm:$0x1]  ;;  %v12807_v4 = vld [vmem:[#allocation2 + $0x114] sm:$0x1] }
 0x32b   : > { %v996_v24 = vadd.f32 %v15639_v21, %v12367_v28  ;;  %v11441_v29 = vcombine.low %v3329_v34, %v3343_v52  ;;  %v11570_v58 = vcombine.low %v5630_v55, %v5634_v33  ;;  %v4166_v1 = vsel %vm13599_vm9, %v11234_v31, %v4165_v36  ;;  %v987_v55 = vpop.f32.mrf.mxu1  ;;  %v2849_v36 = vld [vmem:[#allocation2 + $0x110] sm:$0xf] }
 0x32c   : > { %v1304_v11 = vsel %vm13220_vm3, 0, %v1303_v59  ;;  %v4170_v46 = vsel %vm13599_vm9, %v11235_v37, %v4169_v8  ;;  %v1498_v45 = vsel %vm13228_vm4, 0, %v1497_v51  ;;  %v6271_v7 = vor.u32 %v15744_v44, %v15742_v60  ;;  %v12808_v59 = vld [vmem:[#allocation2 + $0x11c] sm:$0x1] }
 0x32d   : > { %v1100_v2 = vmax.f32 %v996_v24, 0.0  ;;  %1305 = vst [vmem:[#allocation2 + $0x1f8] sm:$0x1] %v1304_v11  ;;  %7526 = vrot.lane.b32.xlu1 %v11441_v29, %s13026_s13  ;;  %8168 = vrot.lane.b32.xlu0 %v11570_v58, %s13026_s13  ;;  %v11475_v43 = vcombine.low %v4166_v1, %v4170_v46  ;;  %1499 = vst [vmem:[#allocation2 + $0x1fc] sm:$0x1] %v1498_v45  ;;  %v6274_v54 = vshll.u32 %v12807_v4, 16  ;;  %v15892_v24 = vpop.permute.xlu0 %8180 }
 0x32e   : > { %v6285_v31 = vor.u32 %v15793_v48, %v15791_v22  ;;  %v6288_v34 = vshll.u32 %v12808_v59, 16  ;;  %v6272_v28 = vrot.slane %v6271_v7, 4  ;;  %v988_v60 = vadd.f32 %v15639_v21, %v987_v55  ;;  %18569 = vst [vmem:[#allocation28_spill] sm:$0xff] %v15892_v24  ;;  %v2850_v58 = vld [vmem:[#allocation2 + $0x118] sm:$0xf] }
 0x32f   : > { %v11828_v37 = vpack.c.bf16 %v1100_v2, %v1100_v2  ;;  %v1298_v44 = vsel %vm13220_vm3, 0, %v1297_v10  ;;  %v6276_v51 = vrot.slane %v6274_v54, 5  ;;  %v1492_v8 = vsel %vm13228_vm4, 0, %v1491_v6  ;;  %v1306_v54 = vld [vmem:[#allocation2 + $0x200] sm:$0x1] }
 0x330   : > { %v6286_v52 = vrot.slane %v6285_v31, 4  ;;  %v6290_v33 = vrot.slane %v6288_v34, 5  ;;  %1299 = vst [vmem:[#allocation2 + $0x1e8] sm:$0x1] %v1298_v44  ;;  %v1098_v29 = vmax.f32 %v988_v60, 0.0  ;;  %v3345_v1 = vshrl.u32 %v2849_v36, 16 }
 0x331   : > { %v2196_v22 = vshrl.u32 %v11828_v37, 16  ;;  %v2199_v48 = vshll.u32 %v11828_v37, 16  ;;  %1493 = vst [vmem:[#allocation2 + $0x1ec] sm:$0x1] %v1492_v8  ;;  %7690 = vrot.lane.b32.xlu1 %v11475_v43, %s13025_s8  ;;  %v6277_v11 = vsel %vm13932_vm13, %v6272_v28, %v6276_v51  ;;  %v3348_v46 = vshll.u32 %v2849_v36, 16  ;;  %v12368_v8 = vpop.f32.mrf.mxu1 }
 0x332   : > { %v6291_v10 = vsel %vm13932_vm13, %v6286_v52, %v6290_v33  ;;  %v3354_v2 = vshll.u32 %v15740_v27, 16  ;;  %v11826_v6 = vpack.c.bf16 %v1098_v29, %v1098_v29  ;;  %v3347_v4 = vrot.slane %v3345_v1, 4  ;;  %v15902_v29 = vpop.permute.xlu0 %8374 }
 0x333   : > { %v2198_v45 = vrot.slane %v2196_v22, 7  ;;  %v11633_v7 = vcombine.low %v6277_v11, %v6291_v10  ;;  %v3350_v59 = vrot.slane %v3348_v46, 5  ;;  %v3359_v55 = vshrl.u32 %v2850_v58, 16  ;;  %v1500_v22 = vld [vmem:[#allocation2 + $0x204] sm:$0x1] }
 0x334   : > { %v2737_v31 = vld [vmem:[#allocation2 + $0x1f8] sm:$0xf]  ;;  %v3356_v34 = vrot.slane %v3354_v2, 5  ;;  %v3362_v37 = vshll.u32 %v2850_v58, 16  ;;  %v2740_v44 = vld [vmem:[#allocation2 + $0x1fc] sm:$0x1]  ;;  %v999_v10 = vadd.f32 %v15639_v21, %v12368_v8 }
 0x335   : > { %v2201_v43 = vor.u32 %v2199_v48, %v2198_v45  ;;  %v2202_v60 = vrot.slane %v2198_v45, 4  ;;  %8550 = vrot.lane.b32.xlu0 %v11633_v7, %s13024_s30  ;;  %v2180_v28 = vshrl.u32 %v11826_v6, 16  ;;  %v2183_v51 = vshll.u32 %v11826_v6, 16  ;;  %v12810_v8 = vld [vmem:[#allocation2 + $0x13c] sm:$0x1] }
 0x336   : > { %v3351_v36 = vor.u32 %v3350_v59, %v3347_v4  ;;  %v3361_v52 = vrot.slane %v3359_v55, 4  ;;  %v3364_v27 = vrot.slane %v3362_v37, 5  ;;  %v3368_v33 = vshll.u32 %v15755_v61, 16 }
 0x337   : > { %v2738_v1 = vsel %vm13252_vm6, %v2201_v43, %v2737_v31  ;;  %v2741_v48 = vsel %vm13220_vm3, %v2202_v60, %v2740_v44  ;;  %v2182_v58 = vrot.slane %v2180_v28, 7  ;;  %v2725_v11 = vld [vmem:[#allocation2 + $0x1e8] sm:$0xf]  ;;  %v1307_v7 = vsel %vm13220_vm3, 0, %v1306_v54  ;;  %v12809_v60 = vld [vmem:[#allocation2 + $0x134] sm:$0x1] }
 0x338   : > { %2739 = vst [vmem:[#allocation2 + $0x1f8] sm:$0xf] %v2738_v1  ;;  %2742 = vst [vmem:[#allocation2 + $0x1fc] sm:$0x1] %v2741_v48  ;;  %v2728_v46 = vld [vmem:[#allocation2 + $0x1ec] sm:$0x1]  ;;  %v3365_v45 = vor.u32 %v3364_v27, %v3361_v52  ;;  %v6327_v43 = vor.u32 %v15803_v53, %v15795_v14  ;;  %v15925_v48 = vpop.permute.xlu0 %8378 }
 0x339   : > { %v3352_v2 = vrot.slane %v3351_v36, 4  ;;  %v3370_v61 = vrot.slane %v3368_v33, 5  ;;  %v2185_v6 = vor.u32 %v2183_v51, %v2182_v58  ;;  %v2186_v4 = vrot.slane %v2182_v58, 4  ;;  %1308 = vst [vmem:[#allocation2 + $0x200] sm:$0x1] %v1307_v7 }
 0x33a   : > { %v1101_v59 = vmax.f32 %v999_v10, 0.0  ;;  %v1501_v31 = vsel %vm13228_vm4, 0, %v1500_v22  ;;  %v3366_v37 = vrot.slane %v3365_v45, 4  ;;  %v6330_v44 = vshll.u32 %v12809_v60, 16  ;;  %v1300_v52 = vld [vmem:[#allocation2 + $0x1f0] sm:$0x1] }
 0x33b   : > { %v3357_v55 = vsel %vm13932_vm13, %v3352_v2, %v3356_v34  ;;  %1502 = vst [vmem:[#allocation2 + $0x204] sm:$0x1] %v1501_v31  ;;  %v2726_v54 = vsel %vm13252_vm6, %v2185_v6, %v2725_v11  ;;  %v2729_v28 = vsel %vm13220_vm3, %v2186_v4, %v2728_v46  ;;  %v6341_v36 = vor.u32 %v15813_v32, %v15805_v40  ;;  %v1494_v27 = vld [vmem:[#allocation2 + $0x1f4] sm:$0x1]  ;;  %v6841_v34 = vld [vmem:[#allocation2 + $0x1c8] sm:$0xe]  ;;  %v990_v40 = vpop.f32.mrf.mxu1 }
 0x33c   : > { %v11829_v51 = vpack.c.bf16 %v1101_v59, %v1101_v59  ;;  %2727 = vst [vmem:[#allocation2 + $0x1e8] sm:$0xf] %v2726_v54  ;;  %2730 = vst [vmem:[#allocation2 + $0x1ec] sm:$0x1] %v2729_v28  ;;  %v3371_v14 = vsel %vm13932_vm13, %v3366_v37, %v3370_v61  ;;  %v6328_v53 = vrot.slane %v6327_v43, 4  ;;  %v6332_v33 = vrot.slane %v6330_v44, 5 }
 0x33d   : > { %v6344_v22 = vshll.u32 %v12810_v8, 16  ;;  %v6840_v1 = vld [vmem:[#allocation2 + $0x1c0] sm:$0xe]  ;;  %v11442_v58 = vcombine.low %v3357_v55, %v3371_v14  ;;  %v6342_v46 = vrot.slane %v6341_v36, 4  ;;  %v15927_v32 = vld [vmem:[#allocation2 + $0x1c4] sm:$0x1]  ;;  %v991_v61 = vadd.f32 %v15639_v21, %v990_v40  ;;  %v12371_v8 = vpop.f32.mrf.mxu1 }
 0x33e   : > { %v2204_v11 = vshrl.u32 %v11829_v51, 16  ;;  %v2207_v10 = vshll.u32 %v11829_v51, 16  ;;  %v6333_v2 = vsel %vm13932_vm13, %v6328_v53, %v6332_v33  ;;  %v1301_v7 = vsel %vm13220_vm3, 0, %v1300_v52  ;;  %v15934_v6 = vld [vmem:[#allocation2 + $0x1cc] sm:$0x1] }
 0x33f   : > { %v6346_v45 = vrot.slane %v6344_v22, 5  ;;  %v1315_v4 = vld [vmem:[#allocation2 + $0x218] sm:$0x1]  ;;  %7528 = vrot.lane.b32.xlu1 %v11442_v58, %s13026_s13  ;;  %1302 = vst [vmem:[#allocation2 + $0x1f0] sm:$0x1] %v1301_v7  ;;  %v1495_v31 = vsel %vm13228_vm4, 0, %v1494_v27  ;;  %v11512_v55 = vcombine.low %v15801_v63, %v15811_v26 }
 0x340   : > { %v2206_v59 = vrot.slane %v2204_v11, 7  ;;  %v11376_v37 = vrot.slane %v6840_v1, 9  ;;  %v1509_v43 = vld [vmem:[#allocation2 + $0x21c] sm:$0x1]  ;;  %v2743_v60 = vld [vmem:[#allocation2 + $0x200] sm:$0xf]  ;;  %v1012_v1 = vadd.f32 %v15639_v21, %v12371_v8 }
 0x341   : > { %v6347_v44 = vsel %vm13932_vm13, %v6342_v46, %v6346_v45  ;;  %v1099_v54 = vmax.f32 %v991_v61, 0.0  ;;  %1496 = vst [vmem:[#allocation2 + $0x1f4] sm:$0x1] %v1495_v31  ;;  %v7166_v28 = vrot.slane %v15927_v32, 5  ;;  %v11377_v51 = vrot.slane %v6841_v34, 9  ;;  %v15964_v31 = vpop.permute.xlu1 %7540 }
 0x342   : > { %v5883_v36 = vld [vmem:[#allocation2 + $0x1dc] sm:$0x1]  ;;  %v2209_v52 = vor.u32 %v2207_v10, %v2206_v59  ;;  %v2210_v14 = vrot.slane %v2206_v59, 4  ;;  %v2746_v53 = vld [vmem:[#allocation2 + $0x204] sm:$0x1]  ;;  %v11635_v33 = vcombine.low %v6333_v2, %v6347_v44  ;;  %v7170_v27 = vrot.slane %v15934_v6, 5  ;;  %v15952_v10 = vpop.permute.xlu0 %8376 }
 0x343   : > { %v6843_v63 = vld [vmem:[#allocation2 + $0x1d8] sm:$0xe]  ;;  %v11827_v26 = vpack.c.bf16 %v1099_v54, %v1099_v54  ;;  %v7167_v22 = vsel %vm13599_vm9, %v11376_v37, %v7166_v28  ;;  %v1316_v58 = vsel %vm13220_vm3, 0, %v1315_v4  ;;  %v15950_v11 = vld [vmem:[#allocation2 + $0x1d4] sm:$0x1]  ;;  %7924 = vrot.lane.b32.xlu1 %v11512_v55, %s13024_s30  ;;  %v1510_v45 = vsel %vm13228_vm4, 0, %v1509_v43 }
 0x344   : > { %v6842_v34 = vld [vmem:[#allocation2 + $0x1d0] sm:$0xe]  ;;  %v2744_v46 = vsel %vm13252_vm6, %v2209_v52, %v2743_v60  ;;  %v2747_v40 = vsel %vm13220_vm3, %v2210_v14, %v2746_v53  ;;  %8554 = vrot.lane.b32.xlu0 %v11635_v33, %s13024_s30  ;;  %v7171_v2 = vsel %vm13599_vm9, %v11377_v51, %v7170_v27  ;;  %1317 = vst [vmem:[#allocation2 + $0x218] sm:$0x1] %v1316_v58  ;;  %v1104_v59 = vmax.f32 %v1012_v1, 0.0 }
 0x345   : > { %2745 = vst [vmem:[#allocation2 + $0x200] sm:$0xf] %v2744_v46  ;;  %2748 = vst [vmem:[#allocation2 + $0x204] sm:$0x1] %v2747_v40  ;;  %v2188_v61 = vshrl.u32 %v11827_v26, 16  ;;  %v2191_v7 = vshll.u32 %v11827_v26, 16  ;;  %v11674_v4 = vcombine.low %v7167_v22, %v7171_v2  ;;  %v6299_v43 = vor.u32 %v15818_v57, %v15816_v17  ;;  %v1003_v17 = vpop.f32.mrf.mxu1 }
 0x346   : > { %1511 = vst [vmem:[#allocation2 + $0x21c] sm:$0x1] %v1510_v45  ;;  %18570 = vst [vmem:[#allocation11_spill] sm:$0xff] %v15964_v31  ;;  %v11378_v37 = vrot.slane %v6842_v34, 9  ;;  %v7174_v60 = vrot.slane %v15950_v11, 5  ;;  %v11379_v55 = vrot.slane %v6843_v63, 9  ;;  %v11832_v28 = vpack.c.bf16 %v1104_v59, %v1104_v59  ;;  %v8533_v57 = vpop.permute.xlu0 %8532 }
 0x347   : > { %v7178_v44 = vrot.slane %v5883_v36, 5  ;;  %v2190_v54 = vrot.slane %v2188_v61, 7  ;;  %12429 = vmatprep.mubr.msk.bf16.mxu0 %vm8684_vm10, %v11674_v4  ;;  %v12811_v51 = vld [vmem:[#allocation2 + $0x124] sm:$0x1]  ;;  %v2731_v14 = vld [vmem:[#allocation2 + $0x1f0] sm:$0xf]  ;;  %v6313_v36 = vor.u32 %v15841_v16, %v15822_v13 }
 0x348   : > { %v6302_v52 = vshll.u32 %v12811_v51, 16  ;;  %v2734_v53 = vld [vmem:[#allocation2 + $0x1f4] sm:$0x1]  ;;  %v7175_v33 = vsel %vm13599_vm9, %v11378_v37, %v7174_v60  ;;  %v12812_v8 = vld [vmem:[#allocation2 + $0x12c] sm:$0x1]  ;;  %v2228_v1 = vshrl.u32 %v11832_v28, 16 }
 0x349   : > { %v7179_v27 = vsel %vm13599_vm9, %v11379_v55, %v7178_v44  ;;  %v6316_v63 = vshll.u32 %v12812_v8, 16  ;;  %v2193_v26 = vor.u32 %v2191_v7, %v2190_v54  ;;  %v2194_v22 = vrot.slane %v2190_v54, 4  ;;  %v1309_v16 = vld [vmem:[#allocation2 + $0x208] sm:$0x1]  ;;  %v1503_v59 = vld [vmem:[#allocation2 + $0x20c] sm:$0x1]  ;;  %v15980_v7 = vpop.permute.xlu1 %7898 }
 0x34a   : > { %v2231_v58 = vshll.u32 %v11832_v28, 16  ;;  %v11675_v34 = vcombine.low %v7175_v33, %v7179_v27  ;;  %v6300_v46 = vrot.slane %v6299_v43, 4  ;;  %v6304_v40 = vrot.slane %v6302_v52, 5  ;;  %v2851_v43 = vld [vmem:[#allocation2 + $0x120] sm:$0xf] }
 0x34b   : > { %v6314_v2 = vrot.slane %v6313_v36, 4  ;;  %v2732_v45 = vsel %vm13252_vm6, %v2193_v26, %v2731_v14  ;;  %v2735_v61 = vsel %vm13220_vm3, %v2194_v22, %v2734_v53  ;;  %v2230_v4 = vrot.slane %v2228_v1, 7  ;;  %v2761_v37 = vld [vmem:[#allocation2 + $0x218] sm:$0xf]  ;;  %v2852_v33 = vld [vmem:[#allocation2 + $0x128] sm:$0xf] }
 0x34c   : > { %v6318_v13 = vrot.slane %v6316_v63, 5  ;;  %2733 = vst [vmem:[#allocation2 + $0x1f0] sm:$0xf] %v2732_v45  ;;  %2736 = vst [vmem:[#allocation2 + $0x1f4] sm:$0x1] %v2735_v61  ;;  %12430 = vmatmul.mubr.msk.bf16.gmra.mxu0 %vm8684_vm10, %v11675_v34  ;;  %v6305_v55 = vsel %vm13932_vm13, %v6300_v46, %v6304_v40  ;;  %v9048_v44 = vsel %vm8781_vm14, %v15855_v56, %v15565_v30  ;;  %v1504_v36 = vsel %vm13228_vm4, 0, %v1503_v59 }
 0x34d   : > { %v2764_v60 = vld [vmem:[#allocation2 + $0x21c] sm:$0x1]  ;;  %v8791_v54 = vsel %vm8781_vm14, %v15860_v25, %v15612_v42  ;;  %v1004_v28 = vadd.f32 %v15639_v21, %v1003_v17  ;;  %v2233_v51 = vor.u32 %v2231_v58, %v2230_v4  ;;  %v2234_v52 = vrot.slane %v2230_v4, 4  ;;  %1505 = vst [vmem:[#allocation2 + $0x20c] sm:$0x1] %v1504_v36  ;;  %v16013_v45 = vpop.permute.xlu1 %7672  ;;  %v18576_v36 = vld [vmem:[#allocation46_spill] sm:$0xff] }
 0x34e   : > { %v6319_v14 = vsel %vm13932_vm13, %v6314_v2, %v6318_v13  ;;  %v9116_v53 = vsel %vm8846_vm15, %v9048_v44, %v8533_v57  ;;  %v8860_v30 = vsel %vm8846_vm15, %v8791_v54, %v15680_v47  ;;  %v1310_v42 = vsel %vm13220_vm3, 0, %v1309_v16  ;;  %v18571_v57 = vld [vmem:[#allocation16_spill] sm:$0xff] }
 0x34f   : > { %v11634_v27 = vcombine.low %v6305_v55, %v6319_v14  ;;  %9510 = vmatprep.mubr.bf16.mxu1 %v9116_v53  ;;  %v1102_v56 = vmax.f32 %v1004_v28, 0.0  ;;  %v2762_v21 = vsel %vm13252_vm6, %v2233_v51, %v2761_v37  ;;  %v2765_v25 = vsel %vm13220_vm3, %v2234_v52, %v2764_v60  ;;  %1311 = vst [vmem:[#allocation2 + $0x208] sm:$0x1] %v1310_v42  ;;  %v16010_v40 = vld [vmem:[#allocation2 + $0xf8] sm:$0xf]  ;;  %v18574_v28 = vld [vmem:[#allocation17_spill] sm:$0xff] }
 0x350   : > { %9511 = vmatmul.mubr.bf16.gmra.mxu1 %v8860_v30  ;;  %v3373_v8 = vshrl.u32 %v2851_v43, 16  ;;  %2763 = vst [vmem:[#allocation2 + $0x218] sm:$0xf] %v2762_v21  ;;  %2766 = vst [vmem:[#allocation2 + $0x21c] sm:$0x1] %v2765_v25  ;;  %v3376_v63 = vshll.u32 %v2851_v43, 16 }
 0x351   : > { %8552 = vrot.lane.b32.xlu0 %v11634_v27, %s13024_s30  ;;  %v11830_v47 = vpack.c.bf16 %v1102_v56, %v1102_v56  ;;  %v3382_v26 = vshll.u32 %v15851_v50, 16  ;;  %v3387_v22 = vshrl.u32 %v2852_v33, 16  ;;  %v3390_v58 = vshll.u32 %v2852_v33, 16  ;;  %v2863_v16 = vld [vmem:[#allocation2 + $0x1a0] sm:$0xf]  ;;  %v18573_v60 = vld [vmem:[#allocation27_spill] sm:$0xff] }
 0x352   : > { %v3375_v1 = vrot.slane %v3373_v8, 4  ;;  %v3396_v17 = vshll.u32 %v15857_v19, 16  ;;  %v18572_v34 = vshll.u32 %v18571_v57, 16  ;;  %v4767_v2 = vshll.u32 %v16010_v40, 16  ;;  %v12814_v14 = vld [vmem:[#allocation2 + $0x1a4] sm:$0x1]  ;;  %v16030_v57 = vpop.permute.xlu1 %7896 }
 0x353   : > { %v2212_v61 = vshrl.u32 %v11830_v47, 16  ;;  %v2215_v4 = vshll.u32 %v11830_v47, 16  ;;  %v3378_v13 = vrot.slane %v3376_v63, 5  ;;  %v3384_v59 = vrot.slane %v3382_v26, 5  ;;  %v12815_v33 = vld [vmem:[#allocation2 + $0x1ac] sm:$0x1] }
 0x354   : > { %v4635_v46 = vrot.slane %v18572_v34, 5  ;;  %v3389_v50 = vrot.slane %v3387_v22, 4  ;;  %v3392_v37 = vrot.slane %v3390_v58, 5  ;;  %v3398_v54 = vrot.slane %v3396_v17, 5  ;;  %v16023_v47 = vld [vmem:[#allocation2 + $0x100] sm:$0xf]  ;;  %v16028_v58 = vpop.permute.xlu0 %8154 }
 0x355   : > { %v2214_v55 = vrot.slane %v2212_v61, 7  ;;  %v3379_v44 = vor.u32 %v3378_v13, %v3375_v1  ;;  %v18575_v43 = vshll.u32 %v18574_v28, 16  ;;  %v6470_v53 = vshll.u32 %v12814_v14, 16  ;;  %v2752_v26 = vld [vmem:[#allocation2 + $0x20c] sm:$0x1] }
 0x356   : > { %v4636_v19 = vsel %vm13932_vm13, %v18573_v60, %v4635_v46  ;;  %v3393_v52 = vor.u32 %v3392_v37, %v3389_v50  ;;  %v6484_v27 = vshll.u32 %v12815_v33, 16  ;;  %v3541_v30 = vshrl.u32 %v2863_v16, 16  ;;  %v2749_v21 = vld [vmem:[#allocation2 + $0x208] sm:$0xf]  ;;  %v5372_v49 = vld [vmem:[#allocation2 + $0x1f0] sm:$0xe] }
 0x357   : > { %v4649_v51 = vrot.slane %v18575_v43, 5  ;;  %v2217_v56 = vor.u32 %v2215_v4, %v2214_v55  ;;  %v2218_v42 = vrot.slane %v2214_v55, 4  ;;  %v3380_v25 = vrot.slane %v3379_v44, 4  ;;  %v2864_v13 = vld [vmem:[#allocation2 + $0x1a8] sm:$0xf] }
 0x358   : > { %v4778_v63 = vshrl.u32 %v16023_v47, 16  ;;  %v3394_v22 = vrot.slane %v3393_v52, 4  ;;  %v6472_v17 = vrot.slane %v6470_v53, 5  ;;  %v6486_v4 = vrot.slane %v6484_v27, 5  ;;  %v18577_v60 = vld [vmem:[#allocation21_spill] sm:$0xff] }
 0x359   : > { %v4650_v8 = vsel %vm13932_vm13, %v18576_v36, %v4649_v51  ;;  %v2750_v34 = vsel %vm13252_vm6, %v2217_v56, %v2749_v21  ;;  %v2753_v46 = vsel %vm13220_vm3, %v2218_v42, %v2752_v26  ;;  %v3385_v61 = vsel %vm13932_vm13, %v3380_v25, %v3384_v59  ;;  %v16044_v55 = vld [vmem:[#allocation2 + $0x1a4] sm:$0x1]  ;;  %v16046_v44 = vld [vmem:[#allocation2 + $0x1ac] sm:$0x1]  ;;  %v5365_v33 = vld [vmem:[#allocation2 + $0x1a8] sm:$0xe] }
 0x35a   : > { %v16026_v1 = vcombine.low %v4636_v19, %v4650_v8  ;;  %2751 = vst [vmem:[#allocation2 + $0x208] sm:$0xf] %v2750_v34  ;;  %2754 = vst [vmem:[#allocation2 + $0x20c] sm:$0x1] %v2753_v46  ;;  %v3399_v37 = vsel %vm13932_vm13, %v3394_v22, %v3398_v54  ;;  %v6473_v19 = vsel %vm13932_vm13, %v18577_v60, %v6472_v17  ;;  %v3543_v28 = vrot.slane %v3541_v30, 4  ;;  %v18578_v59 = vld [vmem:[#allocation14_spill] sm:$0xff] }
 0x35b   : > { %v11443_v43 = vcombine.low %v3385_v61, %v3399_v37  ;;  %v6487_v51 = vsel %vm13932_vm13, %v18578_v59, %v6486_v4  ;;  %v3544_v52 = vshll.u32 %v2863_v16, 16  ;;  %v3550_v14 = vshll.u32 %v16044_v55, 16  ;;  %v4405_v53 = vld [vmem:[#allocation2 + $0x1ac] sm:$0x1]  ;;  %v4406_v21 = vld [vmem:[#allocation2 + $0x1b4] sm:$0x1] }
 0x35c   : > { %v11640_v54 = vcombine.low %v6473_v19, %v6487_v51  ;;  %v3555_v27 = vshrl.u32 %v2864_v13, 16  ;;  %v3558_v56 = vshll.u32 %v2864_v13, 16  ;;  %v3564_v42 = vshll.u32 %v16046_v44, 16  ;;  %v18579_v36 = vld [vmem:[#allocation25_spill] sm:$0xff]  ;;  %v18581_v22 = vld [vmem:[#allocation18_spill] sm:$0xff]  ;;  %v16059_v13 = vpop.permute.xlu0 %8152  ;;  %v7511_v19 = vpop.permute.xlu1 %7510  ;;  %v18583_v59 = vld [vmem:[#allocation52_spill] sm:$0xff] }
 0x35d   : > { %7530 = vrot.lane.b32.xlu1 %v11443_v43, %s13026_s13  ;;  %v3546_v25 = vrot.slane %v3544_v52, 5  ;;  %v3552_v30 = vrot.slane %v3550_v14, 5  ;;  %v18580_v8 = vshll.u32 %v18579_v36, 16  ;;  %v18582_v17 = vshll.u32 %v18581_v22, 16  ;;  %v5366_v34 = vld [vmem:[#allocation2 + $0x1b0] sm:$0xe] }
 0x35e   : > { %8564 = vrot.lane.b32.xlu0 %v11640_v54, %s13024_s30  ;;  %v3557_v46 = vrot.slane %v3555_v27, 4  ;;  %v3560_v61 = vrot.slane %v3558_v56, 5  ;;  %v3566_v4 = vrot.slane %v3564_v42, 5  ;;  %v11310_v37 = vrot.slane %v5365_v33, 9  ;;  %v3890_v60 = vld [vmem:[#allocation2 + $0x1a0] sm:$0xe] }
 0x35f   : > { %v4607_v26 = vrot.slane %v18580_v8, 5  ;;  %v4621_v16 = vrot.slane %v18582_v17, 5  ;;  %v3547_v43 = vor.u32 %v3546_v25, %v3543_v28  ;;  %v18584_v52 = vld [vmem:[#allocation53_spill] sm:$0xff]  ;;  %v5685_v36 = vrot.slane %v4405_v53, 5 }
 0x360   : > { %v3891_v8 = vld [vmem:[#allocation2 + $0x1a8] sm:$0xe]  ;;  %v3561_v54 = vor.u32 %v3560_v61, %v3557_v46  ;;  %v11311_v56 = vrot.slane %v5366_v34, 9  ;;  %v5689_v42 = vrot.slane %v4406_v21, 5  ;;  %v8960_v33 = vsel %vm8684_vm10, %v15682_v15, %v15787_v62  ;;  %v5815_v61 = vld [vmem:[#allocation2 + $0x1b8] sm:$0xf] }
 0x361   : > { %v4608_v51 = vsel %vm13932_vm13, %v18583_v59, %v4607_v26  ;;  %v4622_v14 = vsel %vm13932_vm13, %v18584_v52, %v4621_v16  ;;  %v3548_v22 = vrot.slane %v3547_v43, 4  ;;  %v5686_v28 = vsel %vm13599_vm9, %v11310_v37, %v5685_v36  ;;  %v5814_v26 = vld [vmem:[#allocation2 + $0x1b0] sm:$0xf]  ;;  %v12817_v34 = vld [vmem:[#allocation2 + $0x60] sm:$0xf] }
 0x362   : > { %v11530_v27 = vcombine.low %v4608_v51, %v4622_v14  ;;  %v11246_v25 = vrot.slane %v3890_v60, 9  ;;  %v3562_v17 = vrot.slane %v3561_v54, 4  ;;  %v5690_v16 = vsel %vm13599_vm9, %v11311_v56, %v5689_v42  ;;  %v12818_v21 = vld [vmem:[#allocation2 + $0x68] sm:$0xf]  ;;  %v8535_v51 = vpop.permute.xlu0 %8534 }
 0x363   : > { %v4213_v53 = vrot.slane %v16044_v55, 5  ;;  %v11247_v46 = vrot.slane %v3891_v8, 9  ;;  %v11401_v59 = vcombine.low %v12817_v34, %v12818_v21  ;;  %v3553_v15 = vsel %vm13932_vm13, %v3548_v22, %v3552_v30  ;;  %v16083_v8 = vpop.permute.xlu1 %7674  ;;  %v1512_v34 = vld [vmem:[#allocation2 + $0x224] sm:$0x1]  ;;  %v16112_v21 = vld [vmem:[#allocation2 + $0x128] sm:$0xf] }
 0x364   : > { %v11577_v62 = vcombine.low %v5686_v28, %v5690_v16  ;;  %v4217_v43 = vrot.slane %v16046_v44, 5  ;;  %v9050_v37 = vsel %vm8781_vm14, %v8960_v33, %v15902_v29  ;;  %v3567_v60 = vsel %vm13932_vm13, %v3562_v17, %v3566_v4 }
 0x365   : > { %v6489_v52 = vshrl.u32 %v5814_v26, 16  ;;  %v6492_v55 = vshll.u32 %v5814_v26, 16  ;;  %v8702_v14 = vsel %vm8684_vm10, %v11401_v59, %v7511_v19  ;;  %v11449_v36 = vcombine.low %v3553_v15, %v3567_v60  ;;  %v16119_v59 = vld [vmem:[#allocation2 + $0x70] sm:$0xf]  ;;  %v16121_v15 = vld [vmem:[#allocation2 + $0x78] sm:$0xf]  ;;  %v12372_v60 = vpop.f32.mrf.mxu1 }
 0x366   : > { %8182 = vrot.lane.b32.xlu0 %v11577_v62, %s13026_s13  ;;  %v6503_v30 = vshrl.u32 %v5815_v61, 16  ;;  %v6506_v54 = vshll.u32 %v5815_v61, 16  ;;  %v4214_v44 = vsel %vm13599_vm9, %v11246_v25, %v4213_v53  ;;  %v4218_v29 = vsel %vm13599_vm9, %v11247_v46, %v4217_v43  ;;  %v16106_v46 = vld [vmem:[#allocation2 + $0x1a8] sm:$0xf]  ;;  %v12822_v43 = vld [vmem:[#allocation2 + $0x1b4] sm:$0x1] }
 0x367   : > { %v6491_v56 = vrot.slane %v6489_v52, 4  ;;  %v6494_v4 = vrot.slane %v6492_v55, 5  ;;  %7542 = vrot.lane.b32.xlu1 %v11449_v36, %s13026_s13  ;;  %v11609_v19 = vcombine.low %v5814_v26, %v5815_v61  ;;  %v9119_v22 = vsel %vm8846_vm15, %v9050_v37, %v8535_v51  ;;  %v2865_v51 = vld [vmem:[#allocation2 + $0x1b0] sm:$0xf]  ;;  %v7513_v52 = vpop.permute.xlu1 %7512  ;;  %v12823_v36 = vld [vmem:[#allocation2 + $0x1bc] sm:$0x1] }
 0x368   : > { %v6505_v42 = vrot.slane %v6503_v30, 4  ;;  %v6508_v33 = vrot.slane %v6506_v54, 5  ;;  %v18585_v28 = vshrl.u32 %v15553_v39, 16  ;;  %v16098_v16 = vrot.slane %v4767_v2, 5  ;;  %9518 = vmatprep.mubr.bf16.mxu1 %v9119_v22  ;;  %v1318_v2 = vld [vmem:[#allocation2 + $0x220] sm:$0x1] }
 0x369   : > { %v16102_v25 = vrot.slane %v4778_v63, 4  ;;  %v8793_v53 = vsel %vm8781_vm14, %v8702_v14, %v15832_v5  ;;  %v11481_v61 = vcombine.low %v4214_v44, %v4218_v29  ;;  %v6495_v40 = vor.u32 %v6494_v4, %v6491_v56  ;;  %v2866_v54 = vld [vmem:[#allocation2 + $0x1b8] sm:$0xf]  ;;  %v16130_v29 = vld [vmem:[%s13159_s21] ss:$0 sm:$0xff] }
 0x36a   : > { %v16094_v17 = vrot.slane %v18585_v28, 4  ;;  %18587 = vst [vmem:[#allocation38_spill] sm:$0xff] %v16098_v16  ;;  %8406 = vrot.lane.b32.xlu0 %v11609_v19, %s13025_s8  ;;  %v8863_v39 = vsel %vm8846_vm15, %v8793_v53, %v15588_v0  ;;  %v16117_v5 = vsel %vm8684_vm10, %v11530_v27, %v16059_v13  ;;  %v11402_v62 = vcombine.low %v16119_v59, %v16121_v15  ;;  %v4342_v0 = vld [vmem:[#allocation2 + $0x1b0] sm:$0xf]  ;;  %v16127_v27 = vpop.permute.xlu0 %8538  ;;  %v16137_v53 = vld [vmem:[#allocation2 + $0x1b4] sm:$0x1] }
 0x36b   : > { %18588 = vst [vmem:[#allocation42_spill] sm:$0xff] %v16102_v25  ;;  %9519 = vmatmul.mubr.bf16.gmra.mxu1 %v8863_v39  ;;  %v6498_v37 = vshll.u32 %v12822_v43, 16  ;;  %7702 = vrot.lane.b32.xlu1 %v11481_v61, %s13025_s8  ;;  %v11513_v13 = vcombine.low %v16106_v46, %v4342_v0  ;;  %v6496_v55 = vrot.slane %v6495_v40, 4  ;;  %v6509_v14 = vor.u32 %v6508_v33, %v6505_v42  ;;  %v1006_v43 = vpop.f32.mrf.mxu1  ;;  %v3892_v15 = vld [vmem:[#allocation2 + $0x1b0] sm:$0xe] }
 0x36c   : > { %18586 = vst [vmem:[#allocation57_spill] sm:$0xff] %v16094_v17  ;;  %v6512_v30 = vshll.u32 %v12823_v36, 16  ;;  %v1015_v56 = vadd.f32 %v16130_v29, %v12372_v60  ;;  %v1319_v4 = vsel %vm13220_vm3, 0, %v1318_v2  ;;  %v1513_v19 = vsel %vm13228_vm4, 0, %v1512_v34  ;;  %v1312_v2 = vld [vmem:[#allocation2 + $0x210] sm:$0x1] }
 0x36d   : > { %v6500_v44 = vrot.slane %v6498_v37, 5  ;;  %v6510_v22 = vrot.slane %v6509_v14, 4  ;;  %1320 = vst [vmem:[#allocation2 + $0x220] sm:$0x1] %v1319_v4  ;;  %1514 = vst [vmem:[#allocation2 + $0x224] sm:$0x1] %v1513_v19 }
 0x36e   : > { %v6514_v28 = vrot.slane %v6512_v30, 5  ;;  %v3569_v42 = vshrl.u32 %v2865_v51, 16  ;;  %v3572_v33 = vshll.u32 %v2865_v51, 16  ;;  %v1105_v39 = vmax.f32 %v1015_v56, 0.0  ;;  %v1506_v36 = vld [vmem:[#allocation2 + $0x214] sm:$0x1]  ;;  %v16147_v56 = vpop.permute.xlu1 %7902 }
 0x36f   : > { %v6501_v61 = vsel %vm13932_vm13, %v6496_v55, %v6500_v44  ;;  %v3578_v40 = vshll.u32 %v16137_v53, 16  ;;  %v3583_v0 = vshrl.u32 %v2866_v54, 16  ;;  %7926 = vrot.lane.b32.xlu1 %v11513_v13, %s13024_s30  ;;  %v3586_v14 = vshll.u32 %v2866_v54, 16  ;;  %v16145_v4 = vld [vmem:[#allocation2 + $0x1bc] sm:$0x1]  ;;  %v16150_v13 = vpop.permute.xlu0 %8380 }
 0x370   : > { %v6515_v34 = vsel %vm13932_vm13, %v6510_v22, %v6514_v28  ;;  %v3571_v37 = vrot.slane %v3569_v42, 4  ;;  %v3574_v60 = vrot.slane %v3572_v33, 5  ;;  %v11833_v51 = vpack.c.bf16 %v1105_v39, %v1105_v39  ;;  %v4407_v28 = vld [vmem:[#allocation2 + $0x1bc] sm:$0x1]  ;;  %v5367_v42 = vld [vmem:[#allocation2 + $0x1b8] sm:$0xe] }
 0x371   : > { %v11641_v30 = vcombine.low %v6501_v61, %v6515_v34  ;;  %v3580_v55 = vrot.slane %v3578_v40, 5  ;;  %v3585_v44 = vrot.slane %v3583_v0, 4  ;;  %v3588_v63 = vrot.slane %v3586_v14, 5  ;;  %v4408_v40 = vld [vmem:[#allocation2 + $0x1c4] sm:$0x1] }
 0x372   : > { %v3575_v19 = vor.u32 %v3574_v60, %v3571_v37  ;;  %v3592_v26 = vshll.u32 %v16145_v4, 16  ;;  %v1007_v22 = vadd.f32 %v16130_v29, %v1006_v43  ;;  %v2236_v54 = vshrl.u32 %v11833_v51, 16  ;;  %v5368_v43 = vld [vmem:[#allocation2 + $0x1c0] sm:$0xe] }
 0x373   : > { %8566 = vrot.lane.b32.xlu0 %v11641_v30, %s13024_s30  ;;  %v2239_v33 = vshll.u32 %v11833_v51, 16  ;;  %v1313_v61 = vsel %vm13220_vm3, 0, %v1312_v2  ;;  %v1507_v39 = vsel %vm13228_vm4, 0, %v1506_v36  ;;  %v3589_v34 = vor.u32 %v3588_v63, %v3585_v44 }
 0x374   : > { %v3576_v0 = vrot.slane %v3575_v19, 4  ;;  %v3594_v37 = vrot.slane %v3592_v26, 5  ;;  %v1103_v60 = vmax.f32 %v1007_v22, 0.0  ;;  %1314 = vst [vmem:[#allocation2 + $0x210] sm:$0x1] %v1313_v61  ;;  %v8705_v14 = vsel %vm8684_vm10, %v11402_v62, %v7513_v52 }
 0x375   : > { %1508 = vst [vmem:[#allocation2 + $0x214] sm:$0x1] %v1507_v39  ;;  %v2238_v30 = vrot.slane %v2236_v54, 7  ;;  %v11312_v51 = vrot.slane %v5367_v42, 9  ;;  %v9052_v2 = vsel %vm8781_vm14, %v16117_v5, %v15952_v10  ;;  %v2767_v36 = vld [vmem:[#allocation2 + $0x220] sm:$0xf]  ;;  %v16169_v54 = vpop.permute.xlu1 %7676 }
 0x376   : > { %v2770_v50 = vld [vmem:[#allocation2 + $0x224] sm:$0x1]  ;;  %v3581_v26 = vsel %vm13932_vm13, %v3576_v0, %v3580_v55  ;;  %v3590_v63 = vrot.slane %v3589_v34, 4  ;;  %v11831_v44 = vpack.c.bf16 %v1103_v60, %v1103_v60  ;;  %v5693_v19 = vrot.slane %v4407_v28, 5  ;;  %v3893_v5 = vld [vmem:[#allocation2 + $0x1b8] sm:$0xe]  ;;  %v8537_v55 = vpop.permute.xlu0 %8536 }
 0x377   : > { %v2241_v22 = vor.u32 %v2239_v33, %v2238_v30  ;;  %v2242_v61 = vrot.slane %v2238_v30, 4  ;;  %v11313_v39 = vrot.slane %v5368_v43, 9  ;;  %v5697_v59 = vrot.slane %v4408_v40, 5  ;;  %v5816_v34 = vld [vmem:[#allocation2 + $0x1c0] sm:$0xf] }
 0x378   : > { %v3595_v62 = vsel %vm13932_vm13, %v3590_v63, %v3594_v37  ;;  %v2220_v52 = vshrl.u32 %v11831_v44, 16  ;;  %v2223_v42 = vshll.u32 %v11831_v44, 16  ;;  %v5694_v10 = vsel %vm13599_vm9, %v11312_v51, %v5693_v19  ;;  %v5817_v51 = vld [vmem:[#allocation2 + $0x1c8] sm:$0xf] }
 0x379   : > { %v2768_v28 = vsel %vm13252_vm6, %v2241_v22, %v2767_v36  ;;  %v2771_v33 = vsel %vm13220_vm3, %v2242_v61, %v2770_v50  ;;  %v11450_v40 = vcombine.low %v3581_v26, %v3595_v62  ;;  %v5698_v0 = vsel %vm13599_vm9, %v11313_v39, %v5697_v59 }
 0x37a   : > { %2769 = vst [vmem:[#allocation2 + $0x220] sm:$0xf] %v2768_v28  ;;  %2772 = vst [vmem:[#allocation2 + $0x224] sm:$0x1] %v2771_v33  ;;  %v2222_v37 = vrot.slane %v2220_v52, 7  ;;  %v11578_v60 = vcombine.low %v5694_v10, %v5698_v0  ;;  %v11248_v43 = vrot.slane %v3892_v15, 9  ;;  %v9122_v26 = vsel %vm8846_vm15, %v9052_v2, %v8537_v55  ;;  %v16194_v52 = vpop.permute.xlu1 %7900 }
 0x37b   : > { %v4221_v30 = vrot.slane %v16137_v53, 5  ;;  %7544 = vrot.lane.b32.xlu1 %v11450_v40, %s13026_s13  ;;  %v2755_v63 = vld [vmem:[#allocation2 + $0x210] sm:$0xf]  ;;  %v11249_v44 = vrot.slane %v3893_v5, 9  ;;  %v4225_v50 = vrot.slane %v16145_v4, 5  ;;  %v8795_v19 = vsel %vm8781_vm14, %v8705_v14, %v16013_v45  ;;  %9526 = vmatprep.mubr.bf16.mxu1 %v9122_v26 }
 0x37c   : > { %v2758_v36 = vld [vmem:[#allocation2 + $0x214] sm:$0x1]  ;;  %v2225_v22 = vor.u32 %v2223_v42, %v2222_v37  ;;  %v2226_v61 = vrot.slane %v2222_v37, 4  ;;  %8184 = vrot.lane.b32.xlu0 %v11578_v60, %s13026_s13  ;;  %v6517_v39 = vshrl.u32 %v5816_v34, 16  ;;  %v6520_v15 = vshll.u32 %v5816_v34, 16  ;;  %v18598_v26 = vld [vmem:[#allocation50_spill] sm:$0xff] }
 0x37d   : > { %v4222_v53 = vsel %vm13599_vm9, %v11248_v43, %v4221_v30  ;;  %v4226_v59 = vsel %vm13599_vm9, %v11249_v44, %v4225_v50  ;;  %v6531_v62 = vshrl.u32 %v5817_v51, 16  ;;  %v6534_v4 = vshll.u32 %v5817_v51, 16  ;;  %v16207_v33 = vld [vmem:[#allocation2 + $0x130] sm:$0xf]  ;;  %v6845_v30 = vld [vmem:[#allocation2 + $0x1f8] sm:$0xe] }
 0x37e   : > { %v2756_v2 = vsel %vm13252_vm6, %v2225_v22, %v2755_v63  ;;  %v2759_v45 = vsel %vm13220_vm3, %v2226_v61, %v2758_v36  ;;  %v11482_v14 = vcombine.low %v4222_v53, %v4226_v59  ;;  %v11610_v42 = vcombine.low %v5816_v34, %v5817_v51  ;;  %v16213_v34 = vld [vmem:[#allocation2 + $0x1b8] sm:$0xf]  ;;  %v18596_v36 = vld [vmem:[#allocation49_spill] sm:$0xff]  ;;  %v16232_v53 = vld [vmem:[#allocation2 + $0x1f4] sm:$0x1] }
 0x37f   : > { %v18589_v10 = vcombine.low %v15727_v38, %v15729_v18  ;;  %v18591_v55 = vshll.u32 %v16023_v47, 16  ;;  %v4862_v40 = vshrl.u32 %v16207_v33, 16  ;;  %v8966_v0 = vsel %vm8684_vm10, %v16026_v1, %v16028_v58  ;;  %2757 = vst [vmem:[#allocation2 + $0x210] sm:$0xf] %v2756_v2  ;;  %2760 = vst [vmem:[#allocation2 + $0x214] sm:$0x1] %v2759_v45 }
 0x380   : > { %v16215_v38 = vld [vmem:[#allocation2 + $0x1c0] sm:$0xf]  ;;  %v18593_v18 = vld [vmem:[#allocation35_spill] sm:$0xff]  ;;  %7704 = vrot.lane.b32.xlu1 %v11482_v14, %s13025_s8  ;;  %v6519_v60 = vrot.slane %v6517_v39, 4  ;;  %v6522_v43 = vrot.slane %v6520_v15, 5  ;;  %8408 = vrot.lane.b32.xlu0 %v11610_v42, %s13025_s8  ;;  %v8866_v1 = vsel %vm8846_vm15, %v8795_v19, %v16030_v57  ;;  %v6533_v51 = vrot.slane %v6531_v62, 4 }
 0x381   : > { %v16201_v5 = vsel %vm8684_vm10, %v18589_v10, %v15422_v12  ;;  %v16205_v28 = vrot.slane %v18591_v55, 5  ;;  %v16217_v12 = vld [vmem:[#allocation2 + $0x1fc] sm:$0x1]  ;;  %v6844_v58 = vld [vmem:[#allocation2 + $0x1f0] sm:$0xe]  ;;  %v6536_v63 = vrot.slane %v6534_v4, 5  ;;  %9527 = vmatmul.mubr.bf16.gmra.mxu1 %v8866_v1  ;;  %v11514_v19 = vcombine.low %v16213_v34, %v16215_v38  ;;  %v16257_v10 = vpop.permute.xlu0 %8158 }
 0x382   : > { %18590 = vst [vmem:[#allocation15_spill] sm:$0xff] %v16201_v5  ;;  %v18594_v47 = vld [vmem:[#allocation36_spill] sm:$0xff]  ;;  %v18597_v44 = vshll.u32 %v18596_v36, 16  ;;  %v18599_v22 = vshll.u32 %v18598_v26, 16  ;;  %v18600_v39 = vshrl.u32 %v15717_v3, 16  ;;  %v18602_v15 = vshll.u32 %v16112_v21, 16 }
 0x383   : > { %18592 = vst [vmem:[#allocation22_spill] sm:$0xff] %v16205_v28  ;;  %v16222_v37 = vsel %vm8684_vm10, %v18594_v47, %v18593_v18  ;;  %v9054_v62 = vsel %vm8781_vm14, %v8966_v0, %v15925_v48  ;;  %v18604_v2 = vld [vmem:[#allocation32_spill] sm:$0xff]  ;;  %v11380_v21 = vrot.slane %v6844_v58, 9  ;;  %v7182_v48 = vrot.slane %v16232_v53, 5  ;;  %v7515_v0 = vpop.permute.xlu1 %7514  ;;  %v12827_v1 = vld [vmem:[#allocation2 + $0x88] sm:$0xf] }
 0x384   : > { %18595 = vst [vmem:[#allocation44_spill] sm:$0xff] %v16222_v37  ;;  %v4691_v50 = vrot.slane %v18597_v44, 5  ;;  %v4705_v61 = vrot.slane %v18599_v22, 5  ;;  %v16236_v59 = vrot.slane %v18600_v39, 4  ;;  %v16240_v57 = vrot.slane %v18602_v15, 5  ;;  %v18605_v3 = vld [vmem:[#allocation60_spill] sm:$0xff]  ;;  %7928 = vrot.lane.b32.xlu1 %v11514_v19, %s13024_s30 }
 0x385   : > { %v9125_v4 = vsel %vm8846_vm15, %v9054_v62, %v16127_v27  ;;  %v11381_v55 = vrot.slane %v6845_v30, 9  ;;  %v7186_v27 = vrot.slane %v16217_v12, 5  ;;  %v2867_v18 = vld [vmem:[#allocation2 + $0x1c0] sm:$0xf]  ;;  %v6523_v44 = vor.u32 %v6522_v43, %v6519_v60  ;;  %v16262_v26 = vld [vmem:[#allocation2 + $0x204] sm:$0x1] }
 0x386   : > { %18601 = vst [vmem:[#allocation45_spill] sm:$0xff] %v16236_v59  ;;  %18603 = vst [vmem:[#allocation16_spill] sm:$0xff] %v16240_v57  ;;  %v4692_v45 = vsel %vm13932_vm13, %v18604_v2, %v4691_v50  ;;  %v4706_v14 = vsel %vm13932_vm13, %v18605_v3, %v4705_v61  ;;  %9534 = vmatprep.mubr.bf16.mxu1 %v9125_v4  ;;  %v12826_v47 = vld [vmem:[#allocation2 + $0x80] sm:$0xf]  ;;  %v6526_v58 = vshll.u32 %v15927_v32, 16  ;;  %v6540_v15 = vshll.u32 %v15934_v6, 16 }
 0x387   : > { %v16255_v42 = vcombine.low %v4692_v45, %v4706_v14  ;;  %v11403_v36 = vcombine.low %v12826_v47, %v12827_v1  ;;  %v6537_v50 = vor.u32 %v6536_v63, %v6533_v51  ;;  %v6846_v22 = vld [vmem:[#allocation2 + $0x200] sm:$0xe]  ;;  %v7183_v39 = vsel %vm13599_vm9, %v11380_v21, %v7182_v48  ;;  %v16270_v19 = vld [vmem:[#allocation2 + $0x20c] sm:$0x1]  ;;  %v6847_v62 = vld [vmem:[#allocation2 + $0x208] sm:$0xe] }
 0x388   : > { %v7187_v30 = vsel %vm13599_vm9, %v11381_v55, %v7186_v27  ;;  %v6524_v43 = vrot.slane %v6523_v44, 4  ;;  %v6528_v51 = vrot.slane %v6526_v58, 5  ;;  %v6542_v4 = vrot.slane %v6540_v15, 5  ;;  %v2868_v3 = vld [vmem:[#allocation2 + $0x1c8] sm:$0xf]  ;;  %v16287_v44 = vpop.permute.xlu0 %8156 }
 0x389   : > { %v11676_v60 = vcombine.low %v7183_v39, %v7187_v30  ;;  %v8708_v32 = vsel %vm8684_vm10, %v11403_v36, %v7515_v0  ;;  %v6538_v63 = vrot.slane %v6537_v50, 4  ;;  %v11382_v2 = vrot.slane %v6846_v22, 9  ;;  %v16278_v48 = vld [vmem:[#allocation2 + $0x1c4] sm:$0x1]  ;;  %v16284_v47 = vld [vmem:[#allocation2 + $0x1cc] sm:$0x1] }
 0x38a   : > { %v7190_v45 = vrot.slane %v16262_v26, 5  ;;  %v6529_v14 = vsel %vm13932_vm13, %v6524_v43, %v6528_v51  ;;  %v11383_v6 = vrot.slane %v6847_v62, 9  ;;  %v7194_v21 = vrot.slane %v16270_v19, 5  ;;  %v4409_v30 = vld [vmem:[#allocation2 + $0x1cc] sm:$0x1] }
 0x38b   : > { %12433 = vmatprep.mubr.msk.bf16.mxu0 %vm8684_vm10, %v11676_v60  ;;  %v3597_v55 = vshrl.u32 %v2867_v18, 16  ;;  %v6543_v27 = vsel %vm13932_vm13, %v6538_v63, %v6542_v4  ;;  %v3600_v1 = vshll.u32 %v2867_v18, 16  ;;  %v3606_v36 = vshll.u32 %v16278_v48, 16  ;;  %v5369_v15 = vld [vmem:[#allocation2 + $0x1c8] sm:$0xe] }
 0x38c   : > { %v7191_v0 = vsel %vm13599_vm9, %v11382_v2, %v7190_v45  ;;  %v11642_v58 = vcombine.low %v6529_v14, %v6543_v27  ;;  %v7195_v50 = vsel %vm13599_vm9, %v11383_v6, %v7194_v21  ;;  %v3611_v39 = vshrl.u32 %v2868_v3, 16  ;;  %v5370_v63 = vld [vmem:[#allocation2 + $0x1d0] sm:$0xe]  ;;  %v4410_v21 = vld [vmem:[#allocation2 + $0x1d4] sm:$0x1] }
 0x38d   : > { %v3599_v22 = vrot.slane %v3597_v55, 4  ;;  %v11677_v62 = vcombine.low %v7191_v0, %v7195_v50  ;;  %v3602_v60 = vrot.slane %v3600_v1, 5  ;;  %v3608_v43 = vrot.slane %v3606_v36, 5  ;;  %v18606_v2 = vld [vmem:[#allocation54_spill] sm:$0xff]  ;;  %v18608_v27 = vld [vmem:[#allocation55_spill] sm:$0xff] }
 0x38e   : > { %v3614_v51 = vshll.u32 %v2868_v3, 16  ;;  %8568 = vrot.lane.b32.xlu0 %v11642_v58, %s13024_s30  ;;  %v3613_v18 = vrot.slane %v3611_v39, 4  ;;  %v3620_v4 = vshll.u32 %v16284_v47, 16  ;;  %v18607_v45 = vshll.u32 %v18606_v2, 16  ;;  %v3894_v3 = vld [vmem:[#allocation2 + $0x1c0] sm:$0xe] }
 0x38f   : > { %v18609_v61 = vshll.u32 %v18608_v27, 16  ;;  %12434 = vmatmul.mubr.msk.bf16.gmra.mxu0 %vm8684_vm10, %v11677_v62  ;;  %v3603_v55 = vor.u32 %v3602_v60, %v3599_v22  ;;  %v11314_v1 = vrot.slane %v5369_v15, 9  ;;  %v5701_v36 = vrot.slane %v4409_v30, 5  ;;  %v18611_v50 = vld [vmem:[#allocation63_spill] sm:$0xff]  ;;  %v18612_v2 = vld [vmem:[#allocation40_spill] sm:$0xff]  ;;  %v16308_v30 = vpop.permute.xlu0 %8382 }
 0x390   : > { %v4663_v14 = vrot.slane %v18607_v45, 5  ;;  %v3616_v0 = vrot.slane %v3614_v51, 5  ;;  %v16300_v58 = vrot.slane %v4862_v40, 4  ;;  %v11315_v45 = vrot.slane %v5370_v63, 9  ;;  %v3895_v15 = vld [vmem:[#allocation2 + $0x1c8] sm:$0xe]  ;;  %v16316_v63 = vpop.permute.xlu1 %7678 }
 0x391   : > { %v4677_v6 = vrot.slane %v18609_v61, 5  ;;  %v3604_v27 = vrot.slane %v3603_v55, 4  ;;  %v3622_v22 = vrot.slane %v3620_v4, 5  ;;  %v5702_v40 = vsel %vm13599_vm9, %v11314_v1, %v5701_v36  ;;  %v5818_v55 = vld [vmem:[#allocation2 + $0x1d0] sm:$0xf] }
 0x392   : > { %18610 = vst [vmem:[#allocation27_spill] sm:$0xff] %v16300_v58  ;;  %v4664_v39 = vsel %vm13932_vm13, %v18611_v50, %v4663_v14  ;;  %v3617_v62 = vor.u32 %v3616_v0, %v3613_v18  ;;  %v5705_v51 = vrot.slane %v4410_v21, 5  ;;  %v8797_v37 = vsel %vm8781_vm14, %v8708_v32, %v16083_v8  ;;  %v5819_v21 = vld [vmem:[#allocation2 + $0x1d8] sm:$0xf]  ;;  %v4345_v57 = vld [vmem:[#allocation2 + $0x1c8] sm:$0xf] }
 0x393   : > { %v4678_v61 = vsel %vm13932_vm13, %v18612_v2, %v4677_v6  ;;  %v11250_v14 = vrot.slane %v3894_v3, 9  ;;  %v3609_v50 = vsel %vm13932_vm13, %v3604_v27, %v3608_v43  ;;  %v8869_v18 = vsel %vm8846_vm15, %v8797_v37, %v15980_v7  ;;  %v12828_v36 = vld [vmem:[#allocation2 + $0x118] sm:$0xf]  ;;  %v16367_v59 = vld [vmem:[#allocation2 + $0xa8] sm:$0xf] }
 0x394   : > { %v11532_v60 = vcombine.low %v4664_v39, %v4678_v61  ;;  %v3618_v6 = vrot.slane %v3617_v62, 4  ;;  %v4229_v4 = vrot.slane %v16278_v48, 5  ;;  %v18613_v0 = vshll.u32 %v16207_v33, 16  ;;  %9535 = vmatmul.mubr.bf16.gmra.mxu1 %v8869_v18  ;;  %v16330_v48 = vld [vmem:[#allocation2 + $0x120] sm:$0xf] }
 0x395   : > { %v5706_v8 = vsel %vm13599_vm9, %v11315_v45, %v5705_v51  ;;  %v11251_v32 = vrot.slane %v3895_v15, 9  ;;  %v4233_v43 = vrot.slane %v16284_v47, 5  ;;  %v4820_v3 = vshrl.u32 %v12828_v36, 16  ;;  %v12375_v45 = vpop.f32.mrf.mxu1  ;;  %v16346_v18 = vld [vmem:[#allocation2 + $0x170] sm:$0xf] }
 0x396   : > { %v16323_v1 = vrot.slane %v18613_v0, 5  ;;  %v4823_v39 = vshll.u32 %v12828_v36, 16  ;;  %v3623_v7 = vsel %vm13932_vm13, %v3618_v6, %v3622_v22  ;;  %v11579_v37 = vcombine.low %v5702_v40, %v5706_v8  ;;  %v16338_v22 = vpop.permute.xlu0 %8386  ;;  %v16340_v40 = vld [vmem:[#allocation2 + $0x160] sm:$0xf]  ;;  %v16342_v6 = vld [vmem:[#allocation2 + $0x168] sm:$0xf] }
 0x397   : > { %v11451_v2 = vcombine.low %v3609_v50, %v3623_v7  ;;  %v6545_v61 = vshrl.u32 %v5818_v55, 16  ;;  %v6548_v27 = vshll.u32 %v5818_v55, 16  ;;  %v4230_v47 = vsel %vm13599_vm9, %v11250_v14, %v4229_v4  ;;  %18615 = vst [vmem:[#allocation46_spill] sm:$0xff] %v16338_v22  ;;  %v16348_v0 = vld [vmem:[#allocation2 + $0x178] sm:$0xf]  ;;  %v16354_v7 = vpop.permute.xlu1 %7516 }
 0x398   : > { %18614 = vst [vmem:[#allocation17_spill] sm:$0xff] %v16323_v1  ;;  %8186 = vrot.lane.b32.xlu0 %v11579_v37, %s13026_s13  ;;  %v4234_v62 = vsel %vm13599_vm9, %v11251_v32, %v4233_v43  ;;  %v6559_v15 = vshrl.u32 %v5819_v21, 16  ;;  %v6562_v51 = vshll.u32 %v5819_v21, 16  ;;  %18616 = vst [vmem:[#allocation21_spill] sm:$0xff] %v16348_v0  ;;  %v1327_v32 = vld [vmem:[#allocation2 + $0x248] sm:$0x1]  ;;  %v11611_v50 = vcombine.low %v5818_v55, %v5819_v21 }
 0x399   : > { %7546 = vrot.lane.b32.xlu1 %v11451_v2, %s13026_s13  ;;  %v6547_v4 = vrot.slane %v6545_v61, 4  ;;  %v6550_v8 = vrot.slane %v6548_v27, 5  ;;  %v1521_v43 = vld [vmem:[#allocation2 + $0x24c] sm:$0x1]  ;;  %v16356_v5 = vrot.slane %v4820_v3, 4  ;;  %v16358_v1 = vrot.slane %v4823_v39, 5  ;;  %v1019_v2 = vpop.f32.mrf.mxu1 }
 0x39a   : > { %v6561_v37 = vrot.slane %v6559_v15, 4  ;;  %v6564_v33 = vrot.slane %v6562_v51, 5  ;;  %v11483_v58 = vcombine.low %v4230_v47, %v4234_v62  ;;  %v1028_v14 = vadd.f32 %v16130_v29, %v12375_v45  ;;  %v1321_v61 = vld [vmem:[#allocation2 + $0x238] sm:$0x1]  ;;  %v16365_v36 = vld [vmem:[#allocation2 + $0xa0] sm:$0xf] }
 0x39b   : > { %18617 = vst [vmem:[#allocation14_spill] sm:$0xff] %v16356_v5  ;;  %18618 = vst [vmem:[#allocation25_spill] sm:$0xff] %v16358_v1  ;;  %v16363_v27 = vsel %vm8684_vm10, %v11532_v60, %v16287_v44  ;;  %v4346_v21 = vld [vmem:[#allocation2 + $0x1d0] sm:$0xf]  ;;  %v1328_v3 = vsel %vm13220_vm3, 0, %v1327_v32  ;;  %v1522_v39 = vsel %vm13228_vm4, 0, %v1521_v43  ;;  %v6551_v47 = vor.u32 %v6550_v8, %v6547_v4  ;;  %v16381_v43 = vpop.permute.xlu0 %8384  ;;  %v12376_v4 = vpop.f32.mrf.mxu1 }
 0x39c   : > { %8410 = vrot.lane.b32.xlu0 %v11611_v50, %s13025_s8  ;;  %v1515_v45 = vld [vmem:[#allocation2 + $0x23c] sm:$0x1]  ;;  %v11515_v44 = vcombine.low %v4345_v57, %v4346_v21  ;;  %v1108_v60 = vmax.f32 %v1028_v14, 0.0  ;;  %1329 = vst [vmem:[#allocation2 + $0x248] sm:$0x1] %v1328_v3  ;;  %v6554_v62 = vshll.u32 %v15950_v11, 16  ;;  %v6565_v51 = vor.u32 %v6564_v33, %v6561_v37  ;;  %v16385_v11 = vpop.permute.xlu1 %7906 }
 0x39d   : > { %7706 = vrot.lane.b32.xlu1 %v11483_v58, %s13025_s8  ;;  %1523 = vst [vmem:[#allocation2 + $0x24c] sm:$0x1] %v1522_v39  ;;  %v2869_v15 = vld [vmem:[#allocation2 + $0x1e0] sm:$0xf]  ;;  %v12836_v50 = vld [vmem:[#allocation2 + $0x1dc] sm:$0x1]  ;;  %v1020_v1 = vadd.f32 %v16130_v29, %v1019_v2  ;;  %v18656_v23 = vcombine.low %v16340_v40, %v16342_v6 }
 0x39e   : > { %v6568_v55 = vshll.u32 %v12836_v50, 16  ;;  %v1322_v32 = vsel %vm13220_vm3, 0, %v1321_v61  ;;  %v11836_v5 = vpack.c.bf16 %v1108_v60, %v1108_v60  ;;  %v6552_v58 = vrot.slane %v6551_v47, 4  ;;  %18619 = vst [vmem:[#allocation18_spill] sm:$0xff] %v16385_v11  ;;  %v2870_v2 = vld [vmem:[#allocation2 + $0x1e8] sm:$0xf] }
 0x39f   : > { %v6556_v57 = vrot.slane %v6554_v62, 5  ;;  %1323 = vst [vmem:[#allocation2 + $0x238] sm:$0x1] %v1322_v32  ;;  %v1516_v14 = vsel %vm13228_vm4, 0, %v1515_v45  ;;  %v6566_v33 = vrot.slane %v6565_v51, 4  ;;  %v1106_v37 = vmax.f32 %v1020_v1, 0.0 }
 0x3a0   : > { %v6570_v8 = vrot.slane %v6568_v55, 5  ;;  %1517 = vst [vmem:[#allocation2 + $0x23c] sm:$0x1] %v1516_v14  ;;  %v3625_v21 = vshrl.u32 %v2869_v15, 16  ;;  %v2260_v61 = vshrl.u32 %v11836_v5, 16  ;;  %v2263_v3 = vshll.u32 %v11836_v5, 16  ;;  %v16407_v17 = vpop.permute.xlu1 %7680 }
 0x3a1   : > { %7930 = vrot.lane.b32.xlu1 %v11515_v44, %s13024_s30  ;;  %v6557_v39 = vsel %vm13932_vm13, %v6552_v58, %v6556_v57  ;;  %v16390_v60 = vld [vmem:[#allocation2 + $0x1e4] sm:$0x1]  ;;  %v3628_v47 = vshll.u32 %v2869_v15, 16  ;;  %v11834_v62 = vpack.c.bf16 %v1106_v37, %v1106_v37  ;;  %v3639_v14 = vshrl.u32 %v2870_v2, 16  ;;  %v1022_v44 = vpop.f32.mrf.mxu1  ;;  %v1330_v57 = vld [vmem:[#allocation2 + $0x250] sm:$0x1] }
 0x3a2   : > { %v6571_v45 = vsel %vm13932_vm13, %v6566_v33, %v6570_v8  ;;  %v3627_v51 = vrot.slane %v3625_v21, 4  ;;  %v3634_v1 = vshll.u32 %v16390_v60, 16  ;;  %v2262_v55 = vrot.slane %v2260_v61, 7  ;;  %v16399_v33 = vpop.permute.xlu0 %8540  ;;  %v16402_v21 = vld [vmem:[#allocation2 + $0x1ec] sm:$0x1]  ;;  %18620 = vst [vmem:[#allocation52_spill] sm:$0xff] %v16407_v17 }
 0x3a3   : > { %v11643_v50 = vcombine.low %v6557_v39, %v6571_v45  ;;  %v3630_v32 = vrot.slane %v3628_v47, 5  ;;  %v2785_v11 = vld [vmem:[#allocation2 + $0x248] sm:$0xf]  ;;  %v2244_v28 = vshrl.u32 %v11834_v62, 16  ;;  %v2247_v25 = vshll.u32 %v11834_v62, 16 }
 0x3a4   : > { %v2788_v5 = vld [vmem:[#allocation2 + $0x24c] sm:$0x1]  ;;  %v1031_v58 = vadd.f32 %v16130_v29, %v12376_v4  ;;  %v16397_v15 = vadd.f32 %v16130_v29, %v1022_v44  ;;  %v2265_v8 = vor.u32 %v2263_v3, %v2262_v55  ;;  %v2266_v37 = vrot.slane %v2262_v55, 4  ;;  %v1524_v47 = vld [vmem:[#allocation2 + $0x254] sm:$0x1] }
 0x3a5   : > { %8570 = vrot.lane.b32.xlu0 %v11643_v50, %s13024_s30  ;;  %v3631_v61 = vor.u32 %v3630_v32, %v3627_v51  ;;  %v16404_v39 = vrot.slane %v3634_v1, 5  ;;  %v2246_v45 = vrot.slane %v2244_v28, 7  ;;  %v3641_v62 = vrot.slane %v3639_v14, 4  ;;  %v4411_v44 = vld [vmem:[#allocation2 + $0x1ec] sm:$0x1] }
 0x3a6   : > { %v3642_v16 = vshll.u32 %v2870_v2, 16  ;;  %v3648_v4 = vshll.u32 %v16402_v21, 16  ;;  %v5371_v22 = vld [vmem:[#allocation2 + $0x1e8] sm:$0xe]  ;;  %v2786_v3 = vsel %vm13252_vm6, %v2265_v8, %v2785_v11  ;;  %v2789_v55 = vsel %vm13220_vm3, %v2266_v37, %v2788_v5  ;;  %v2773_v50 = vld [vmem:[#allocation2 + $0x238] sm:$0xf] }
 0x3a7   : > { %v2776_v51 = vld [vmem:[#allocation2 + $0x23c] sm:$0x1]  ;;  %v3632_v1 = vrot.slane %v3631_v61, 4  ;;  %v1109_v32 = vmax.f32 %v1031_v58, 0.0  ;;  %2787 = vst [vmem:[#allocation2 + $0x248] sm:$0xf] %v2786_v3  ;;  %v2249_v28 = vor.u32 %v2247_v25, %v2246_v45  ;;  %v16424_v3 = vpop.permute.xlu0 %8162 }
 0x3a8   : > { %2790 = vst [vmem:[#allocation2 + $0x24c] sm:$0x1] %v2789_v55  ;;  %v2250_v2 = vrot.slane %v2246_v45, 4  ;;  %v3644_v14 = vrot.slane %v3642_v16, 5  ;;  %v3650_v31 = vrot.slane %v3648_v4, 5  ;;  %v1331_v11 = vsel %vm13220_vm3, 0, %v1330_v57 }
 0x3a9   : > { %v3637_v24 = vsel %vm13932_vm13, %v3632_v1, %v16404_v39  ;;  %v1525_v5 = vsel %vm13228_vm4, 0, %v1524_v47  ;;  %v11837_v8 = vpack.c.bf16 %v1109_v32, %v1109_v32  ;;  %v4412_v37 = vld [vmem:[#allocation2 + $0x1f4] sm:$0x1]  ;;  %v1324_v58 = vld [vmem:[#allocation2 + $0x240] sm:$0x1]  ;;  %v2774_v25 = vsel %vm13252_vm6, %v2249_v28, %v2773_v50 }
 0x3aa   : > { %v2777_v16 = vsel %vm13220_vm3, %v2250_v2, %v2776_v51  ;;  %v3645_v61 = vor.u32 %v3644_v14, %v3641_v62  ;;  %1332 = vst [vmem:[#allocation2 + $0x250] sm:$0x1] %v1331_v11  ;;  %1526 = vst [vmem:[#allocation2 + $0x254] sm:$0x1] %v1525_v5  ;;  %v11316_v45 = vrot.slane %v5371_v22, 9  ;;  %v5709_v55 = vrot.slane %v4411_v44, 5  ;;  %v16429_v51 = vpop.permute.xlu1 %7904 }
 0x3ab   : > { %v1518_v39 = vld [vmem:[#allocation2 + $0x244] sm:$0x1]  ;;  %v3896_v4 = vld [vmem:[#allocation2 + $0x1e0] sm:$0xe]  ;;  %2775 = vst [vmem:[#allocation2 + $0x238] sm:$0xf] %v2774_v25 }
 0x3ac   : > { %2778 = vst [vmem:[#allocation2 + $0x23c] sm:$0x1] %v2777_v16  ;;  %v2268_v57 = vshrl.u32 %v11837_v8, 16  ;;  %v2271_v47 = vshll.u32 %v11837_v8, 16  ;;  %v11317_v1 = vrot.slane %v5372_v49, 9  ;;  %v3646_v32 = vrot.slane %v3645_v61, 4 }
 0x3ad   : > { %v5713_v17 = vrot.slane %v4412_v37, 5  ;;  %v1107_v50 = vmax.f32 %v16397_v15, 0.0  ;;  %v1325_v62 = vsel %vm13220_vm3, 0, %v1324_v58  ;;  %18621 = vst [vmem:[#allocation53_spill] sm:$0xff] %v16429_v51  ;;  %v5710_v28 = vsel %vm13599_vm9, %v11316_v45, %v5709_v55  ;;  %v3897_v14 = vld [vmem:[#allocation2 + $0x1e8] sm:$0xe] }
 0x3ae   : > { %v2270_v22 = vrot.slane %v2268_v57, 7  ;;  %1326 = vst [vmem:[#allocation2 + $0x240] sm:$0x1] %v1325_v62  ;;  %v1519_v2 = vsel %vm13228_vm4, 0, %v1518_v39  ;;  %v11252_v44 = vrot.slane %v3896_v4, 9  ;;  %v3651_v49 = vsel %vm13932_vm13, %v3646_v32, %v3650_v31  ;;  %v18664_v40 = vld [vmem:[#allocation52_spill] sm:$0xff] }
 0x3af   : > { %v5714_v15 = vsel %vm13599_vm9, %v11317_v1, %v5713_v17  ;;  %1520 = vst [vmem:[#allocation2 + $0x244] sm:$0x1] %v1519_v2  ;;  %v11835_v11 = vpack.c.bf16 %v1107_v50, %v1107_v50  ;;  %v4237_v5 = vrot.slane %v16390_v60, 5  ;;  %v6848_v8 = vld [vmem:[#allocation2 + $0x210] sm:$0xe]  ;;  %v11452_v25 = vcombine.low %v3637_v24, %v3651_v49  ;;  %v12379_v1 = vpop.f32.mrf.mxu1  ;;  %v16450_v50 = vpop.permute.xlu0 %8160 }
 0x3b0   : > { %v16440_v37 = vld [vmem:[#allocation2 + $0x1f0] sm:$0xf]  ;;  %v16442_v58 = vld [vmem:[#allocation2 + $0x1f8] sm:$0xf]  ;;  %v2273_v16 = vor.u32 %v2271_v47, %v2270_v22  ;;  %v2274_v61 = vrot.slane %v2270_v22, 4  ;;  %v11580_v45 = vcombine.low %v5710_v28, %v5714_v15  ;;  %v11253_v55 = vrot.slane %v3897_v14, 9 }
 0x3b1   : > { %v16444_v39 = vld [vmem:[#allocation2 + $0x214] sm:$0x1]  ;;  %v16446_v4 = vld [vmem:[#allocation2 + $0x21c] sm:$0x1]  ;;  %v2252_v31 = vshrl.u32 %v11835_v11, 16  ;;  %v2255_v57 = vshll.u32 %v11835_v11, 16  ;;  %v4238_v17 = vsel %vm13599_vm9, %v11252_v44, %v4237_v5  ;;  %7548 = vrot.lane.b32.xlu1 %v11452_v25, %s13026_s13  ;;  %v1044_v28 = vadd.f32 %v16130_v29, %v12379_v1  ;;  %v16463_v25 = vpop.permute.xlu1 %7518  ;;  %v1035_v0 = vpop.f32.mrf.mxu1 }
 0x3b2   : > { %18622 = vst [vmem:[#allocation35_spill] sm:$0xff] %v16444_v39  ;;  %v6849_v60 = vld [vmem:[#allocation2 + $0x218] sm:$0xe]  ;;  %v1339_v32 = vld [vmem:[#allocation2 + $0x268] sm:$0x1]  ;;  %8188 = vrot.lane.b32.xlu0 %v11580_v45, %s13026_s13  ;;  %v4241_v62 = vrot.slane %v16402_v21, 5  ;;  %v11612_v2 = vcombine.low %v16440_v37, %v16442_v58 }
 0x3b3   : > { %v2791_v24 = vld [vmem:[#allocation2 + $0x250] sm:$0xf]  ;;  %v2794_v47 = vld [vmem:[#allocation2 + $0x254] sm:$0x1]  ;;  %v11384_v22 = vrot.slane %v6848_v8, 9  ;;  %v2254_v49 = vrot.slane %v2252_v31, 7 }
 0x3b4   : > { %v2792_v14 = vsel %vm13252_vm6, %v2273_v16, %v2791_v24  ;;  %v2795_v44 = vsel %vm13220_vm3, %v2274_v61, %v2794_v47  ;;  %v7198_v15 = vrot.slane %v16444_v39, 5  ;;  %v1533_v11 = vld [vmem:[#allocation2 + $0x26c] sm:$0x1]  ;;  %v6851_v5 = vld [vmem:[#allocation2 + $0x228] sm:$0xe]  ;;  %v4242_v21 = vsel %vm13599_vm9, %v11253_v55, %v4241_v62 }
 0x3b5   : > { %2793 = vst [vmem:[#allocation2 + $0x250] sm:$0xf] %v2792_v14  ;;  %2796 = vst [vmem:[#allocation2 + $0x254] sm:$0x1] %v2795_v44  ;;  %v11385_v8 = vrot.slane %v6849_v60, 9  ;;  %v7202_v45 = vrot.slane %v16446_v4, 5  ;;  %v2257_v24 = vor.u32 %v2255_v57, %v2254_v49  ;;  %v11484_v31 = vcombine.low %v4238_v17, %v4242_v21 }
 0x3b6   : > { %v1112_v1 = vmax.f32 %v1044_v28, 0.0  ;;  %v6850_v16 = vld [vmem:[#allocation2 + $0x220] sm:$0xe]  ;;  %v2258_v51 = vrot.slane %v2254_v49, 4  ;;  %v7199_v47 = vsel %vm13599_vm9, %v11384_v22, %v7198_v15  ;;  %v16470_v39 = vld [vmem:[#allocation2 + $0x224] sm:$0x1]  ;;  %8412 = vrot.lane.b32.xlu0 %v11612_v2, %s13025_s8  ;;  %v16486_v15 = vpop.f32.mrf.mxu1 }
 0x3b7   : > { %v2779_v61 = vld [vmem:[#allocation2 + $0x240] sm:$0xf]  ;;  %18623 = vst [vmem:[#allocation36_spill] sm:$0xff] %v16470_v39  ;;  %v2782_v14 = vld [vmem:[#allocation2 + $0x244] sm:$0x1]  ;;  %v7203_v44 = vsel %vm13599_vm9, %v11385_v8, %v7202_v45  ;;  %v1340_v55 = vsel %vm13220_vm3, 0, %v1339_v32  ;;  %7708 = vrot.lane.b32.xlu1 %v11484_v31, %s13025_s8  ;;  %v16484_v32 = vpop.permute.xlu0 %8542  ;;  %v18626_v31 = vcombine.low %v16365_v36, %v16367_v59  ;;  %v9056_v59 = vsel %vm8781_vm14, %v16363_v27, %v16150_v13 }
 0x3b8   : > { %v1534_v60 = vsel %vm13228_vm4, 0, %v1533_v11  ;;  %v11840_v57 = vpack.c.bf16 %v1112_v1, %v1112_v1  ;;  %v5891_v62 = vld [vmem:[#allocation2 + $0x22c] sm:$0x1]  ;;  %v2780_v17 = vsel %vm13252_vm6, %v2257_v24, %v2779_v61  ;;  %v2783_v22 = vsel %vm13220_vm3, %v2258_v51, %v2782_v14  ;;  %1341 = vst [vmem:[#allocation2 + $0x268] sm:$0x1] %v1340_v55  ;;  %v16496_v61 = vpop.permute.xlu1 %7682 }
 0x3b9   : > { %v11678_v28 = vcombine.low %v7199_v47, %v7203_v44  ;;  %1535 = vst [vmem:[#allocation2 + $0x26c] sm:$0x1] %v1534_v60  ;;  %v11386_v49 = vrot.slane %v6850_v16, 9  ;;  %2781 = vst [vmem:[#allocation2 + $0x240] sm:$0xf] %v2780_v17  ;;  %v7206_v21 = vrot.slane %v16470_v39, 5  ;;  %v8711_v47 = vsel %vm8684_vm10, %v18626_v31, %v16354_v7  ;;  %v16513_v7 = vpop.f32.mrf.mxu1 }
 0x3ba   : > { %2784 = vst [vmem:[#allocation2 + $0x244] sm:$0x1] %v2783_v22  ;;  %v2292_v11 = vshrl.u32 %v11840_v57, 16  ;;  %v2295_v2 = vshll.u32 %v11840_v57, 16  ;;  %v11387_v8 = vrot.slane %v6851_v5, 9  ;;  %v18624_v45 = vshrl.u32 %v16330_v48, 16 }
 0x3bb   : > { %v5016_v1 = vshrl.u32 %v16106_v46, 16  ;;  %12437 = vmatprep.mubr.msk.bf16.mxu0 %vm8684_vm10, %v11678_v28  ;;  %v7210_v16 = vrot.slane %v5891_v62, 5  ;;  %v6573_v24 = vshrl.u32 %v16440_v37, 16  ;;  %v7207_v14 = vsel %vm13599_vm9, %v11386_v49, %v7206_v21  ;;  %v1333_v55 = vld [vmem:[#allocation2 + $0x258] sm:$0x1]  ;;  %v16524_v27 = vpop.permute.xlu0 %8546 }
 0x3bc   : > { %v16491_v51 = vrot.slane %v18624_v45, 4  ;;  %v2294_v5 = vrot.slane %v2292_v11, 7  ;;  %v6576_v44 = vshll.u32 %v16440_v37, 16  ;;  %v6587_v57 = vshrl.u32 %v16442_v58, 16  ;;  %v1527_v36 = vld [vmem:[#allocation2 + $0x25c] sm:$0x1] }
 0x3bd   : > { %v7211_v60 = vsel %vm13599_vm9, %v11387_v8, %v7210_v16  ;;  %v6590_v62 = vshll.u32 %v16442_v58, 16  ;;  %v6575_v49 = vrot.slane %v6573_v24, 4  ;;  %v9128_v37 = vsel %vm8846_vm15, %v9056_v59, %v16399_v33  ;;  %v16522_v8 = vld [vmem:[#allocation2 + $0x1e8] sm:$0xf]  ;;  %v4348_v13 = vld [vmem:[#allocation2 + $0x1f0] sm:$0xf] }
 0x3be   : > { %18625 = vst [vmem:[#allocation49_spill] sm:$0xff] %v16491_v51  ;;  %v2297_v17 = vor.u32 %v2295_v2, %v2294_v5  ;;  %v2298_v22 = vrot.slane %v2294_v5, 4  ;;  %v11679_v28 = vcombine.low %v7207_v14, %v7211_v60  ;;  %v8799_v11 = vsel %vm8781_vm14, %v8711_v47, %v16169_v54  ;;  %v16526_v2 = vpop.f32.mrf.mxu1  ;;  %9542 = vmatprep.mubr.bf16.mxu1 %v9128_v37  ;;  %v16539_v14 = vpop.permute.xlu1 %7520  ;;  %v18630_v59 = vld [vmem:[#allocation66_spill] sm:$0xff]  ;;  %v2872_v37 = vld [vmem:[#allocation2 + $0x1f8] sm:$0xf] }
 0x3bf   : > { %v1036_v21 = vadd.f32 %v16130_v29, %v1035_v0  ;;  %v1334_v58 = vsel %vm13220_vm3, 0, %v1333_v55  ;;  %18627 = vst [vmem:[#allocation50_spill] sm:$0xff] %v16526_v2  ;;  %v2809_v45 = vld [vmem:[#allocation2 + $0x268] sm:$0xf]  ;;  %v6578_v33 = vrot.slane %v6576_v44, 5  ;;  %v8872_v54 = vsel %vm8846_vm15, %v8799_v11, %v16194_v52 }
 0x3c0   : > { %v2812_v16 = vld [vmem:[#allocation2 + $0x26c] sm:$0x1]  ;;  %12438 = vmatmul.mubr.msk.bf16.gmra.mxu0 %vm8684_vm10, %v11679_v28  ;;  %1335 = vst [vmem:[#allocation2 + $0x258] sm:$0x1] %v1334_v58  ;;  %v1528_v29 = vsel %vm13228_vm4, 0, %v1527_v36  ;;  %v11516_v0 = vcombine.low %v16522_v8, %v4348_v13  ;;  %v5019_v24 = vshll.u32 %v16106_v46, 16  ;;  %v2810_v31 = vsel %vm13252_vm6, %v2297_v17, %v2809_v45  ;;  %9543 = vmatmul.mubr.bf16.gmra.mxu1 %v8872_v54  ;;  %v9482_v52 = vpop.f32.mrf.mxu1 }
 0x3c1   : > { %v2813_v47 = vsel %vm13220_vm3, %v2298_v22, %v2812_v16  ;;  %v1110_v5 = vmax.f32 %v1036_v21, 0.0  ;;  %1529 = vst [vmem:[#allocation2 + $0x25c] sm:$0x1] %v1528_v29  ;;  %v18628_v44 = vshll.u32 %v16330_v48, 16  ;;  %2811 = vst [vmem:[#allocation2 + $0x268] sm:$0xf] %v2810_v31  ;;  %v6579_v29 = vor.u32 %v6578_v33, %v6575_v49 }
 0x3c2   : > { %2814 = vst [vmem:[#allocation2 + $0x26c] sm:$0x1] %v2813_v47  ;;  %v6589_v60 = vrot.slane %v6587_v57, 4  ;;  %v6592_v46 = vrot.slane %v6590_v62, 5  ;;  %7932 = vrot.lane.b32.xlu1 %v11516_v0, %s13024_s30  ;;  %v18631_v36 = vshll.u32 %v18630_v59, 16  ;;  %v18632_v58 = vld [vmem:[#allocation34_spill] sm:$0xff]  ;;  %v16570_v59 = vpop.permute.xlu0 %8388  ;;  %v16577_v49 = vpop.f32.mrf.mxu1 }
 0x3c3   : > { %v16543_v55 = vrot.slane %v18628_v44, 5  ;;  %v16548_v22 = vld [vmem:[#allocation2 + $0x190] sm:$0xf]  ;;  %v16550_v28 = vld [vmem:[#allocation2 + $0x198] sm:$0xf]  ;;  %v11838_v21 = vpack.c.bf16 %v1110_v5, %v1110_v5  ;;  %v18633_v57 = vshll.u32 %v18632_v58, 16 }
 0x3c4   : > { %v4747_v17 = vrot.slane %v18631_v36, 5  ;;  %v16554_v11 = vld [vmem:[#allocation2 + $0x1b0] sm:$0xf]  ;;  %v16559_v13 = vrot.slane %v5016_v1, 4  ;;  %v18635_v16 = vld [vmem:[#allocation68_spill] sm:$0xff]  ;;  %v16565_v31 = vrot.slane %v5019_v24, 5 }
 0x3c5   : > { %18629 = vst [vmem:[#allocation32_spill] sm:$0xff] %v16543_v55  ;;  %v4761_v62 = vrot.slane %v18633_v57, 5  ;;  %v2871_v0 = vld [vmem:[#allocation2 + $0x1f0] sm:$0xf]  ;;  %v2276_v47 = vshrl.u32 %v11838_v21, 16  ;;  %v2279_v52 = vshll.u32 %v11838_v21, 16  ;;  %v6593_v57 = vor.u32 %v6592_v46, %v6589_v60 }
 0x3c6   : > { %18634 = vst [vmem:[#allocation60_spill] sm:$0xff] %v16559_v13  ;;  %v4748_v54 = vsel %vm13932_vm13, %v18635_v16, %v4747_v17  ;;  %18636 = vst [vmem:[#allocation54_spill] sm:$0xff] %v16565_v31  ;;  %v18637_v44 = vld [vmem:[#allocation69_spill] sm:$0xff]  ;;  %v6580_v36 = vrot.slane %v6579_v29, 4  ;;  %v6582_v58 = vshll.u32 %v16232_v53, 16  ;;  %v6596_v21 = vshll.u32 %v16217_v12, 16 }
 0x3c7   : > { %v4762_v5 = vsel %vm13932_vm13, %v18637_v44, %v4761_v62  ;;  %18638 = vst [vmem:[#allocation55_spill] sm:$0xff] %v16570_v59  ;;  %v16575_v17 = vld [vmem:[#allocation2 + $0x1f4] sm:$0x1]  ;;  %18639 = vst [vmem:[#allocation63_spill] sm:$0xff] %v16577_v49  ;;  %v2278_v33 = vrot.slane %v2276_v47, 7  ;;  %v3653_v16 = vshrl.u32 %v2871_v0, 16  ;;  %v16580_v62 = vpop.permute.xlu1 %7910  ;;  %v9485_v47 = vpop.f32.mrf.mxu1 }
 0x3c8   : > { %v16572_v1 = vcombine.low %v4748_v54, %v4762_v5  ;;  %v2797_v24 = vld [vmem:[#allocation2 + $0x258] sm:$0xf]  ;;  %v3656_v45 = vshll.u32 %v2871_v0, 16  ;;  %18640 = vst [vmem:[#allocation40_spill] sm:$0xff] %v16580_v62  ;;  %v2800_v44 = vld [vmem:[#allocation2 + $0x25c] sm:$0x1] }
 0x3c9   : > { %v16582_v54 = vld [vmem:[#allocation2 + $0xb0] sm:$0xf]  ;;  %v16584_v29 = vld [vmem:[#allocation2 + $0xb8] sm:$0xf]  ;;  %v6584_v60 = vrot.slane %v6582_v58, 5  ;;  %v6594_v46 = vrot.slane %v6593_v57, 4  ;;  %v2281_v48 = vor.u32 %v2279_v52, %v2278_v33 }
 0x3ca   : > { %v11405_v53 = vcombine.low %v16582_v54, %v16584_v29  ;;  %v3662_v5 = vshll.u32 %v16575_v17, 16  ;;  %v2282_v31 = vrot.slane %v2278_v33, 4  ;;  %v6598_v12 = vrot.slane %v6596_v21, 5  ;;  %v16589_v13 = vld [vmem:[#allocation2 + $0x1fc] sm:$0x1] }
 0x3cb   : > { %v3655_v0 = vrot.slane %v3653_v16, 4  ;;  %v6585_v49 = vsel %vm13932_vm13, %v6580_v36, %v6584_v60  ;;  %v3658_v2 = vrot.slane %v3656_v45, 5  ;;  %v3667_v55 = vshrl.u32 %v2872_v37, 16  ;;  %v5373_v51 = vld [vmem:[#allocation2 + $0x1f8] sm:$0xe]  ;;  %v16599_v16 = vpop.permute.xlu0 %8544  ;;  %v16606_v39 = vpop.permute.xlu1 %7684 }
 0x3cc   : > { %v3664_v62 = vrot.slane %v3662_v5, 5  ;;  %v2798_v58 = vsel %vm13252_vm6, %v2281_v48, %v2797_v24  ;;  %v2801_v57 = vsel %vm13220_vm3, %v2282_v31, %v2800_v44  ;;  %v6599_v52 = vsel %vm13932_vm13, %v6594_v46, %v6598_v12  ;;  %v4413_v21 = vld [vmem:[#allocation2 + $0x1fc] sm:$0x1]  ;;  %v5374_v54 = vld [vmem:[#allocation2 + $0x200] sm:$0xe]  ;;  %v18643_v44 = vld [vmem:[#allocation30_spill] sm:$0xff] }
 0x3cd   : > { %v3670_v33 = vshll.u32 %v2872_v37, 16  ;;  %2799 = vst [vmem:[#allocation2 + $0x258] sm:$0xf] %v2798_v58  ;;  %2802 = vst [vmem:[#allocation2 + $0x25c] sm:$0x1] %v2801_v57  ;;  %v11644_v45 = vcombine.low %v6585_v49, %v6599_v52  ;;  %v3659_v36 = vor.u32 %v3658_v2, %v3655_v0  ;;  %v3669_v29 = vrot.slane %v3667_v55, 4 }
 0x3ce   : > { %v3676_v60 = vshll.u32 %v16589_v13, 16  ;;  %v4414_v5 = vld [vmem:[#allocation2 + $0x204] sm:$0x1]  ;;  %v18644_v59 = vshll.u32 %v18643_v44, 16  ;;  %v11318_v37 = vrot.slane %v5373_v51, 9  ;;  %v5717_v2 = vrot.slane %v4413_v21, 5 }
 0x3cf   : > { %v3672_v48 = vrot.slane %v3670_v33, 5  ;;  %v18641_v24 = vld [vmem:[#allocation29_spill] sm:$0xff]  ;;  %v3898_v12 = vld [vmem:[#allocation2 + $0x1f0] sm:$0xe]  ;;  %8572 = vrot.lane.b32.xlu0 %v11644_v45, %s13024_s30  ;;  %v3660_v58 = vrot.slane %v3659_v36, 4  ;;  %v11319_v55 = vrot.slane %v5374_v54, 9 }
 0x3d0   : > { %v18642_v47 = vshll.u32 %v18641_v24, 16  ;;  %v4733_v46 = vrot.slane %v18644_v59, 5  ;;  %v3678_v49 = vrot.slane %v3676_v60, 5  ;;  %v3899_v0 = vld [vmem:[#allocation2 + $0x1f8] sm:$0xe]  ;;  %v18645_v52 = vld [vmem:[#allocation70_spill] sm:$0xff]  ;;  %v5718_v45 = vsel %vm13599_vm9, %v11318_v37, %v5717_v2 }
 0x3d1   : > { %v3673_v57 = vor.u32 %v3672_v48, %v3669_v29  ;;  %v18646_v24 = vld [vmem:[#allocation72_spill] sm:$0xff]  ;;  %v5721_v51 = vrot.slane %v4414_v5, 5  ;;  %v11254_v21 = vrot.slane %v3898_v12, 9  ;;  %v4245_v60 = vrot.slane %v16575_v17, 5 }
 0x3d2   : > { %v4719_v31 = vrot.slane %v18642_v47, 5  ;;  %v4734_v59 = vsel %vm13932_vm13, %v18646_v24, %v4733_v46  ;;  %v3665_v47 = vsel %vm13932_vm13, %v3660_v58, %v3664_v62  ;;  %v5822_v54 = vld [vmem:[#allocation2 + $0x200] sm:$0xf]  ;;  %v11255_v48 = vrot.slane %v3899_v0, 9  ;;  %v16636_v0 = vpop.permute.xlu1 %7908 }
 0x3d3   : > { %v3674_v36 = vrot.slane %v3673_v57, 4  ;;  %v5722_v29 = vsel %vm13599_vm9, %v11319_v55, %v5721_v51  ;;  %v18647_v5 = vshrl.u32 %v16554_v11, 16  ;;  %v8972_v62 = vsel %vm8684_vm10, %v16255_v42, %v16257_v10 }
 0x3d4   : > { %v4720_v33 = vsel %vm13932_vm13, %v18645_v52, %v4719_v31  ;;  %v5823_v31 = vld [vmem:[#allocation2 + $0x208] sm:$0xf]  ;;  %v16622_v52 = vpop.permute.xlu0 %8166  ;;  %v11581_v37 = vcombine.low %v5718_v45, %v5722_v29  ;;  %v4249_v12 = vrot.slane %v16589_v13, 5  ;;  %v8714_v58 = vsel %vm8684_vm10, %v11405_v53, %v16463_v25 }
 0x3d5   : > { %v11534_v44 = vcombine.low %v4720_v33, %v4734_v59  ;;  %v16626_v46 = vrot.slane %v18647_v5, 4  ;;  %v3679_v17 = vsel %vm13932_vm13, %v3674_v36, %v3678_v49  ;;  %v6601_v2 = vshrl.u32 %v5822_v54, 16  ;;  %v1342_v5 = vld [vmem:[#allocation2 + $0x270] sm:$0x1] }
 0x3d6   : > { %v6604_v55 = vshll.u32 %v5822_v54, 16  ;;  %v9058_v57 = vsel %vm8781_vm14, %v8972_v62, %v16308_v30  ;;  %v11453_v33 = vcombine.low %v3665_v47, %v3679_v17  ;;  %8190 = vrot.lane.b32.xlu0 %v11581_v37, %s13026_s13  ;;  %v4246_v42 = vsel %vm13599_vm9, %v11254_v21, %v4245_v60  ;;  %v16657_v60 = vld [vmem:[#allocation2 + $0x1f8] sm:$0xf]  ;;  %v16666_v62 = vld [vmem:[#allocation2 + $0x1c0] sm:$0xf] }
 0x3d7   : > { %18648 = vst [vmem:[#allocation66_spill] sm:$0xff] %v16626_v46  ;;  %v6615_v10 = vshrl.u32 %v5823_v31, 16  ;;  %v4250_v25 = vsel %vm13599_vm9, %v11255_v48, %v4249_v12  ;;  %v6603_v13 = vrot.slane %v6601_v2, 4  ;;  %v6618_v49 = vshll.u32 %v5823_v31, 16  ;;  %v1536_v17 = vld [vmem:[#allocation2 + $0x274] sm:$0x1] }
 0x3d8   : > { %v6606_v53 = vrot.slane %v6604_v55, 5  ;;  %7550 = vrot.lane.b32.xlu1 %v11453_v33, %s13026_s13  ;;  %v11613_v59 = vcombine.low %v5822_v54, %v5823_v31  ;;  %v9131_v30 = vsel %vm8846_vm15, %v9058_v57, %v16484_v32  ;;  %v8801_v51 = vsel %vm8781_vm14, %v8714_v58, %v16316_v63  ;;  %v16659_v54 = vpop.permute.xlu0 %8164  ;;  %v2873_v2 = vld [vmem:[#allocation2 + $0x200] sm:$0xf]  ;;  %v16674_v55 = vpop.permute.xlu1 %7522  ;;  %v16679_v33 = vld [vmem:[#allocation2 + $0xc8] sm:$0xf] }
 0x3d9   : > { %v6617_v24 = vrot.slane %v6615_v10, 4  ;;  %v18649_v47 = vshll.u32 %v16554_v11, 16  ;;  %v6620_v36 = vrot.slane %v6618_v49, 5  ;;  %9550 = vmatprep.mubr.bf16.mxu1 %v9131_v30  ;;  %v8875_v29 = vsel %vm8846_vm15, %v8801_v51, %v16147_v56  ;;  %v16664_v11 = vld [vmem:[#allocation2 + $0x200] sm:$0xf] }
 0x3da   : > { %v11485_v63 = vcombine.low %v4246_v42, %v4250_v25  ;;  %8414 = vrot.lane.b32.xlu0 %v11613_v59, %s13025_s8  ;;  %9551 = vmatmul.mubr.bf16.gmra.mxu1 %v8875_v29  ;;  %v6607_v31 = vor.u32 %v6606_v53, %v6603_v13  ;;  %v16671_v37 = vsel %vm8684_vm10, %v11534_v44, %v16450_v50  ;;  %v6610_v12 = vshll.u32 %v16262_v26, 16  ;;  %v16677_v57 = vld [vmem:[#allocation2 + $0xc0] sm:$0xf]  ;;  %v2874_v10 = vld [vmem:[#allocation2 + $0x208] sm:$0xf] }
 0x3db   : > { %v16652_v45 = vrot.slane %v18649_v47, 5  ;;  %v6621_v58 = vor.u32 %v6620_v36, %v6617_v24  ;;  %v11517_v50 = vcombine.low %v16657_v60, %v16664_v11  ;;  %v6624_v26 = vshll.u32 %v16270_v19, 16  ;;  %v12845_v53 = vld [vmem:[%s13159_s21] ss:$0 sm:$0xff]  ;;  %v16692_v51 = vld [vmem:[#allocation2 + $0x204] sm:$0x1] }
 0x3dc   : > { %7710 = vrot.lane.b32.xlu1 %v11485_v63, %s13025_s8  ;;  %v6608_v44 = vrot.slane %v6607_v31, 4  ;;  %v6612_v25 = vrot.slane %v6610_v12, 5  ;;  %v1047_v49 = vadd.f32 %v12845_v53, %v16486_v15  ;;  %v1343_v24 = vsel %vm13220_vm3, 0, %v1342_v5  ;;  %v1336_v31 = vld [vmem:[#allocation2 + $0x260] sm:$0x1]  ;;  %v16697_v12 = vpop.permute.xlu0 %8390  ;;  %v16704_v48 = vpop.permute.xlu1 %7686  ;;  %s11777_s21 = sshll.u32 %s13167_s20, 4 }
 0x3dd   : > { %18650 = vst [vmem:[#allocation34_spill] sm:$0xff] %v16652_v45  ;;  %v6622_v13 = vrot.slane %v6621_v58, 4  ;;  %v6626_v59 = vrot.slane %v6624_v26, 5  ;;  %1344 = vst [vmem:[#allocation2 + $0x270] sm:$0x1] %v1343_v24  ;;  %v1537_v30 = vsel %vm13228_vm4, 0, %v1536_v17  ;;  %v1039_v42 = vadd.f32 %v12845_v53, %v16513_v7  ;;  %s428_s18 = scalar_lea.vmem %s18286_s5, %s11777_s21  ;;  %s18004_s21 = scalar_lea.vmem %s18287_s6, %s13167_s20 }
 0x3de   : > { %v3681_v47 = vshrl.u32 %v2873_v2, 16  ;;  %v3684_v36 = vshll.u32 %v2873_v2, 16  ;;  %v6613_v19 = vsel %vm13932_vm13, %v6608_v44, %v6612_v25  ;;  %v1113_v29 = vmax.f32 %v1047_v49, 0.0  ;;  %1538 = vst [vmem:[#allocation2 + $0x274] sm:$0x1] %v1537_v30  ;;  %s11091_s20 = sshll.u32 %s13155_s11, 8 }
 0x3df   : > { %v3690_v63 = vshll.u32 %v16692_v51, 16  ;;  %v3695_v15 = vshrl.u32 %v2874_v10, 16  ;;  %v6627_v5 = vsel %vm13932_vm13, %v6622_v13, %v6626_v59  ;;  %v3698_v26 = vshll.u32 %v2874_v10, 16  ;;  %v1530_v2 = vld [vmem:[#allocation2 + $0x264] sm:$0x1]  ;;  %s18029_s10 = scalar_lea.vmem [#allocation6], %s11091_s20 }
 0x3e0   : > { %7934 = vrot.lane.b32.xlu1 %v11517_v50, %s13024_s30  ;;  %v3683_v58 = vrot.slane %v3681_v47, 4  ;;  %v3686_v17 = vrot.slane %v3684_v36, 5  ;;  %v11645_v24 = vcombine.low %v6613_v19, %v6627_v5  ;;  %v11841_v56 = vpack.c.bf16 %v1113_v29, %v1113_v29  ;;  %v16702_v44 = vld [vmem:[#allocation2 + $0x20c] sm:$0x1]  ;;  %v5375_v13 = vld [vmem:[#allocation2 + $0x208] sm:$0xe]  ;;  %v16713_v45 = vpop.permute.xlu0 %8394 }
 0x3e1   : > { %v3692_v25 = vrot.slane %v3690_v63, 5  ;;  %v3697_v49 = vrot.slane %v3695_v15, 4  ;;  %v4415_v30 = vld [vmem:[#allocation2 + $0x20c] sm:$0x1]  ;;  %v3700_v21 = vrot.slane %v3698_v26, 5  ;;  %v3704_v50 = vshll.u32 %v16702_v44, 16 }
 0x3e2   : > { %v3687_v32 = vor.u32 %v3686_v17, %v3683_v58  ;;  %v5376_v59 = vld [vmem:[#allocation2 + $0x210] sm:$0xe]  ;;  %8574 = vrot.lane.b32.xlu0 %v11645_v24, %s13024_s30  ;;  %v2300_v10 = vshrl.u32 %v11841_v56, 16  ;;  %v2303_v47 = vshll.u32 %v11841_v56, 16  ;;  %v1337_v36 = vsel %vm13220_vm3, 0, %v1336_v31  ;;  %18651 = vst [vmem:[#allocation68_spill] sm:$0xff] %v16713_v45 }
 0x3e3   : > { %v1531_v19 = vsel %vm13228_vm4, 0, %v1530_v2  ;;  %v4416_v29 = vld [vmem:[#allocation2 + $0x214] sm:$0x1]  ;;  %v3701_v15 = vor.u32 %v3700_v21, %v3697_v49  ;;  %v3706_v5 = vrot.slane %v3704_v50, 5  ;;  %v1111_v58 = vmax.f32 %v1039_v42, 0.0  ;;  %s10929_s12 = sshll.u32 %s18029_s10, 4  ;;  %s18230_s12 = int_to_ptr.vmem [resolvable:$true] %s10929_s12 }
 0x3e4   : > { %v3688_v63 = vrot.slane %v3687_v32, 4  ;;  %1338 = vst [vmem:[#allocation2 + $0x260] sm:$0x1] %v1337_v36  ;;  %1532 = vst [vmem:[#allocation2 + $0x264] sm:$0x1] %v1531_v19  ;;  %v2302_v53 = vrot.slane %v2300_v10, 7 }
 0x3e5   : > { %v3900_v7 = vld [vmem:[#allocation2 + $0x200] sm:$0xe]  ;;  %v11320_v17 = vrot.slane %v5375_v13, 9  ;;  %v5725_v26 = vrot.slane %v4415_v30, 5  ;;  %v11321_v24 = vrot.slane %v5376_v59, 9  ;;  %v3702_v31 = vrot.slane %v3701_v15, 4  ;;  %v16719_v13 = vpop.permute.xlu1 %7524 }
 0x3e6   : > { %v2815_v56 = vld [vmem:[#allocation2 + $0x270] sm:$0xf]  ;;  %v2818_v46 = vld [vmem:[#allocation2 + $0x274] sm:$0x1]  ;;  %v3693_v35 = vsel %vm13932_vm13, %v3688_v63, %v3692_v25  ;;  %v11839_v2 = vpack.c.bf16 %v1111_v58, %v1111_v58  ;;  %v5729_v32 = vrot.slane %v4416_v29, 5  ;;  %v2305_v21 = vor.u32 %v2303_v47, %v2302_v53 }
 0x3e7   : > { %v2306_v49 = vrot.slane %v2302_v53, 4  ;;  %v5726_v42 = vsel %vm13599_vm9, %v11320_v17, %v5725_v26  ;;  %v3901_v50 = vld [vmem:[#allocation2 + $0x208] sm:$0xe]  ;;  %v11256_v10 = vrot.slane %v3900_v7, 9  ;;  %v3707_v30 = vsel %vm13932_vm13, %v3702_v31, %v3706_v5  ;;  %v5824_v19 = vld [vmem:[#allocation2 + $0x210] sm:$0xf]  ;;  %v16741_v31 = vpop.permute.xlu0 %8392 }
 0x3e8   : > { %v2284_v59 = vshrl.u32 %v11839_v2, 16  ;;  %v2287_v36 = vshll.u32 %v11839_v2, 16  ;;  %v5730_v25 = vsel %vm13599_vm9, %v11321_v24, %v5729_v32  ;;  %v2816_v47 = vsel %vm13252_vm6, %v2305_v21, %v2815_v56  ;;  %v5825_v17 = vld [vmem:[#allocation2 + $0x218] sm:$0xf] }
 0x3e9   : > { %v2819_v29 = vsel %vm13220_vm3, %v2306_v49, %v2818_v46  ;;  %v11454_v63 = vcombine.low %v3693_v35, %v3707_v30  ;;  %v11582_v15 = vcombine.low %v5726_v42, %v5730_v25  ;;  %2817 = vst [vmem:[#allocation2 + $0x270] sm:$0xf] %v2816_v47  ;;  %v4253_v7 = vrot.slane %v16692_v51, 5  ;;  %v16752_v42 = vpop.permute.xlu1 %7914  ;;  %v16763_v25 = vld [vmem:[#allocation2 + $0x210] sm:$0xf]  ;;  %v18659_v47 = vld [vmem:[#allocation21_spill] sm:$0xff] }
 0x3ea   : > { %2820 = vst [vmem:[#allocation2 + $0x274] sm:$0x1] %v2819_v29  ;;  %v2286_v58 = vrot.slane %v2284_v59, 7  ;;  %v11257_v5 = vrot.slane %v3901_v50, 9  ;;  %v4257_v53 = vrot.slane %v16702_v44, 5  ;;  %v8978_v26 = vsel %vm8684_vm10, %v16572_v1, %v16424_v3  ;;  %18654 = vst [vmem:[#allocation29_spill] sm:$0xff] %v16752_v42 }
 0x3eb   : > { %v18652_v24 = vcombine.low %v16677_v57, %v16679_v33  ;;  %7552 = vrot.lane.b32.xlu1 %v11454_v63, %s13026_s13  ;;  %v2803_v56 = vld [vmem:[#allocation2 + $0x260] sm:$0xf]  ;;  %v2806_v35 = vld [vmem:[#allocation2 + $0x264] sm:$0x1]  ;;  %8192 = vrot.lane.b32.xlu0 %v11582_v15, %s13026_s13  ;;  %v6629_v51 = vshrl.u32 %v5824_v19, 16  ;;  %v6632_v44 = vshll.u32 %v5824_v19, 16  ;;  %v4254_v3 = vsel %vm13599_vm9, %v11256_v10, %v4253_v7 }
 0x3ec   : > { %v2289_v2 = vor.u32 %v2287_v36, %v2286_v58  ;;  %v2290_v32 = vrot.slane %v2286_v58, 4  ;;  %v4258_v1 = vsel %vm13599_vm9, %v11257_v5, %v4257_v53  ;;  %v6643_v33 = vshrl.u32 %v5825_v17, 16  ;;  %v16761_v36 = vld [vmem:[#allocation2 + $0x208] sm:$0xf]  ;;  %v16790_v58 = vld [vmem:[#allocation2 + $0x24c] sm:$0x1] }
 0x3ed   : > { %v8717_v46 = vsel %vm8684_vm10, %v18652_v24, %v16539_v14  ;;  %v16747_v14 = vpop.f32.mrf.mxu1  ;;  %v11486_v57 = vcombine.low %v4254_v3, %v4258_v1  ;;  %v11614_v21 = vcombine.low %v5824_v19, %v5825_v17  ;;  %v9060_v49 = vsel %vm8781_vm14, %v16671_v37, %v16381_v43  ;;  %v18655_v43 = vld [vmem:[#allocation71_spill] sm:$0xff]  ;;  %v12746_v7 = vld [vmem:[%s428_s18 + $0x8] sm:$0xff]   ;;  %v6852_v3 = vld [vmem:[#allocation2 + $0x240] sm:$0xe] }
 0x3ee   : > { %18653 = vst [vmem:[#allocation69_spill] sm:$0xff] %v16747_v14  ;;  %v2804_v50 = vsel %vm13252_vm6, %v2289_v2, %v2803_v56  ;;  %v2807_v10 = vsel %vm13220_vm3, %v2290_v32, %v2806_v35  ;;  %v6646_v30 = vshll.u32 %v5825_v17, 16  ;;  %v9134_v59 = vsel %vm8846_vm15, %v9060_v49, %v16599_v16  ;;  %v18658_v37 = vld [vmem:[#allocation43_spill] sm:$0xff]  ;;  %v18666_v5 = vld [vmem:[#allocation65_spill] sm:$0xff]  ;;  %12449 = vmatprep.subr.bf16.mxu0 %v12746_v7 }
 0x3ef   : > { %v9490_v19 = vpop.f32.mrf.mxu1  ;;  %v16773_v41 = vsel %vm8684_vm10, %v18656_v23, %v18655_v43  ;;  %v18660_v16 = vcombine.low %v16346_v18, %v18659_v47  ;;  %v18662_v63 = vshrl.u32 %v16213_v34, 16  ;;  %2805 = vst [vmem:[#allocation2 + $0x260] sm:$0xf] %v2804_v50  ;;  %2808 = vst [vmem:[#allocation2 + $0x264] sm:$0x1] %v2807_v10  ;;  %7712 = vrot.lane.b32.xlu1 %v11486_v57, %s13025_s8  ;;  %8416 = vrot.lane.b32.xlu0 %v11614_v21, %s13025_s8  ;;  %v18665_v18 = vld [vmem:[#allocation28_spill] sm:$0xff] }
 0x3f0   : > { %18657 = vst [vmem:[#allocation30_spill] sm:$0xff] %v16773_v41  ;;  %v8803_v6 = vsel %vm8781_vm14, %v8717_v46, %v18664_v40  ;;  %v16795_v53 = vsel %vm8684_vm10, %v18666_v5, %v18665_v18  ;;  %v18668_v17 = vld [vmem:[#allocation11_spill] sm:$0xff]  ;;  %v18669_v24 = vcombine.low %v16548_v22, %v16550_v28  ;;  %v18671_v35 = vshll.u32 %v16213_v34, 16  ;;  %9558 = vmatprep.mubr.bf16.mxu1 %v9134_v59  ;;  %v18673_v46 = vld [vmem:[#allocation53_spill] sm:$0xff]  ;;  %v18675_v28 = vld [vmem:[#allocation46_spill] sm:$0xff]  ;;  %v16818_v59 = vpop.permute.xlu0 %8548 }
 0x3f1   : > { %v16780_v29 = vsel %vm8684_vm10, %v18660_v16, %v18658_v37  ;;  %v16784_v15 = vrot.slane %v18662_v63, 4  ;;  %18667 = vst [vmem:[#allocation71_spill] sm:$0xff] %v16795_v53  ;;  %v8878_v32 = vsel %vm8846_vm15, %v8803_v6, %v18673_v46  ;;  %v16810_v1 = vpop.f32.mrf.mxu1  ;;  %v12748_v57 = vld [vmem:[%s428_s18] sm:$0xff]   ;;  %v6631_v21 = vrot.slane %v6629_v51, 4  ;;  %v6853_v10 = vld [vmem:[#allocation2 + $0x248] sm:$0xe]  ;;  %12450 = vmatpush3.bf16.msra.mxu0 %v12746_v7 }
 0x3f2   : > { %18661 = vst [vmem:[#allocation70_spill] sm:$0xff] %v16780_v29  ;;  %v16802_v56 = vsel %vm8684_vm10, %v18669_v24, %v18668_v17  ;;  %v16806_v2 = vrot.slane %v18671_v35, 5  ;;  %18674 = vst [vmem:[#allocation52_spill] sm:$0xff] %v16810_v1  ;;  %v6634_v49 = vrot.slane %v6632_v44, 5  ;;  %9559 = vmatmul.mubr.bf16.gmra.mxu1 %v8878_v32  ;;  %v11518_v22 = vcombine.low %v16761_v36, %v16763_v25  ;;  %v16816_v34 = vld [vmem:[#allocation2 + $0x244] sm:$0x1] }
 0x3f3   : > { %18663 = vst [vmem:[#allocation72_spill] sm:$0xff] %v16784_v15  ;;  %18670 = vst [vmem:[#allocation43_spill] sm:$0xff] %v16802_v56  ;;  %v9062_v50 = vsel %vm8781_vm14, %v8978_v26, %v18675_v28  ;;  %v6645_v19 = vrot.slane %v6643_v33, 4  ;;  %v6648_v43 = vrot.slane %v6646_v30, 5  ;;  %v18676_v51 = vld [vmem:[#allocation10_spill] sm:$0xff]  ;;  %v9493_v47 = vpop.f32.mrf.mxu1  ;;  %v18678_v63 = vld [vmem:[#allocation33_spill] sm:$0xff]  ;;  %v16827_v30 = vpop.permute.xlu1 %7688  ;;  %12451 = vmatprep.subr.bf16.mxu0 %v12748_v57 }
 0x3f4   : > { %18672 = vst [vmem:[#allocation21_spill] sm:$0xff] %v16806_v2  ;;  %v9137_v23 = vsel %vm8846_vm15, %v9062_v50, %v16524_v27  ;;  %v18677_v44 = vld [vmem:[#allocation26_spill] sm:$0xff]  ;;  %7936 = vrot.lane.b32.xlu1 %v11518_v22, %s13024_s30  ;;  %v18679_v40 = vld [vmem:[#allocation41_spill] sm:$0xff]  ;;  %v12847_v18 = vld [vmem:[#allocation2 + $0x114] sm:$0x1]  ;;  %v11388_v33 = vrot.slane %v6852_v3, 9 }
 0x3f5   : > { %v4798_v37 = vor.u32 %v18677_v44, %v18676_v51  ;;  %9566 = vmatprep.mubr.bf16.mxu1 %v9137_v23  ;;  %v12846_v26 = vld [vmem:[#allocation2 + $0x10c] sm:$0x1]  ;;  %v4812_v6 = vor.u32 %v18679_v40, %v18678_v63  ;;  %v4815_v5 = vshll.u32 %v12847_v18, 16  ;;  %v7214_v27 = vrot.slane %v16816_v34, 5  ;;  %v16831_v7 = vld [vmem:[#allocation2 + $0x254] sm:$0x1]  ;;  %12452 = vmatpush3.bf16.msra.mxu0 %v12748_v57 }
 0x3f6   : > { %v4801_v16 = vshll.u32 %v12846_v26, 16  ;;  %v11389_v24 = vrot.slane %v6853_v10, 9  ;;  %v7218_v35 = vrot.slane %v16790_v58, 5  ;;  %v18680_v46 = vshrl.u32 %v16215_v38, 16  ;;  %v18682_v10 = vld [vmem:[#allocation35_spill] sm:$0xff]  ;;  %v18684_v53 = vld [vmem:[#allocation57_spill] sm:$0xff] }
 0x3f7   : > { %v4799_v17 = vrot.slane %v4798_v37, 4  ;;  %v4813_v28 = vrot.slane %v4812_v6, 4  ;;  %v4817_v50 = vrot.slane %v4815_v5, 5  ;;  %v7215_v3 = vsel %vm13599_vm9, %v11388_v33, %v7214_v27  ;;  %v6854_v37 = vld [vmem:[#allocation2 + $0x250] sm:$0xe]  ;;  %v16848_v5 = vpop.permute.xlu0 %8170 }
 0x3f8   : > { %v16835_v32 = vrot.slane %v18680_v46, 4  ;;  %v4803_v22 = vrot.slane %v4801_v16, 5  ;;  %v7219_v23 = vsel %vm13599_vm9, %v11389_v24, %v7218_v35  ;;  %v6635_v51 = vor.u32 %v6634_v49, %v6631_v21  ;;  %v6855_v47 = vld [vmem:[#allocation2 + $0x258] sm:$0xe]  ;;  %v12848_v63 = vld [vmem:[#allocation2 + $0xd0] sm:$0xf] }
 0x3f9   : > { %v6638_v44 = vshll.u32 %v18682_v10, 16  ;;  %v4818_v26 = vsel %vm13932_vm13, %v4813_v28, %v4817_v50  ;;  %v11680_v16 = vcombine.low %v7215_v3, %v7219_v23  ;;  %v12849_v40 = vld [vmem:[#allocation2 + $0xd8] sm:$0xf]  ;;  %v16846_v18 = vld [vmem:[#allocation2 + $0x25c] sm:$0x1]  ;;  %v6649_v27 = vor.u32 %v6648_v43, %v6645_v19  ;;  %v16855_v28 = vpop.permute.xlu1 %7912 }
 0x3fa   : > { %18681 = vst [vmem:[#allocation28_spill] sm:$0xff] %v16835_v32  ;;  %v4804_v38 = vsel %vm13932_vm13, %v4799_v17, %v4803_v22  ;;  %v11407_v6 = vcombine.low %v12848_v63, %v12849_v40  ;;  %v6636_v49 = vrot.slane %v6635_v51, 4  ;;  %v2875_v57 = vld [vmem:[#allocation2 + $0x210] sm:$0xf]  ;;  %v6652_v17 = vshll.u32 %v16446_v4, 16 }
 0x3fb   : > { %v16850_v21 = vcombine.low %v4804_v38, %v4818_v26  ;;  %v6640_v33 = vrot.slane %v6638_v44, 5  ;;  %12441 = vmatprep.mubr.msk.bf16.mxu0 %vm8684_vm10, %v11680_v16  ;;  %v11390_v24 = vrot.slane %v6854_v37, 9  ;;  %v7222_v35 = vrot.slane %v16831_v7, 5  ;;  %v2876_v22 = vld [vmem:[#allocation2 + $0x218] sm:$0xf]  ;;  %v16868_v37 = vpop.f32.mrf.mxu1 }
 0x3fc   : > { %v11391_v46 = vrot.slane %v6855_v47, 9  ;;  %v16859_v50 = vsel %vm8684_vm10, %v11407_v6, %v16674_v55  ;;  %v6650_v19 = vrot.slane %v6649_v27, 4  ;;  %v7226_v43 = vrot.slane %v16846_v18, 5  ;;  %v16866_v51 = vld [vmem:[#allocation2 + $0x214] sm:$0x1]  ;;  %18683 = vst [vmem:[#allocation65_spill] sm:$0xff] %v16868_v37 }
 0x3fd   : > { %v6641_v3 = vsel %vm13932_vm13, %v6636_v49, %v6640_v33  ;;  %v6654_v23 = vrot.slane %v6652_v17, 5  ;;  %v7223_v4 = vsel %vm13599_vm9, %v11390_v24, %v7222_v35  ;;  %v3709_v10 = vshrl.u32 %v2875_v57, 16  ;;  %v5377_v49 = vld [vmem:[#allocation2 + $0x218] sm:$0xe]  ;;  %v16875_v33 = vpop.permute.xlu0 %8168  ;;  %v9498_v27 = vpop.f32.mrf.mxu1  ;;  %v16877_v17 = vld [vmem:[#allocation2 + $0x21c] sm:$0x1] }
 0x3fe   : > { %v3712_v44 = vshll.u32 %v2875_v57, 16  ;;  %v7227_v55 = vsel %vm13599_vm9, %v11391_v46, %v7226_v43  ;;  %v3718_v47 = vshll.u32 %v16866_v51, 16  ;;  %v3723_v38 = vshrl.u32 %v2876_v22, 16  ;;  %v16976_v45 = vld [vmem:[#allocation2 + $0x264] sm:$0x1] }
 0x3ff   : > { %v3726_v26 = vshll.u32 %v2876_v22, 16  ;;  %v6655_v16 = vsel %vm13932_vm13, %v6650_v19, %v6654_v23  ;;  %v11681_v63 = vcombine.low %v7223_v4, %v7227_v55  ;;  %v3711_v40 = vrot.slane %v3709_v10, 4  ;;  %v18685_v19 = vld [vmem:[#allocation38_spill] sm:$0xff]  ;;  %v12850_v4 = vld [vmem:[#allocation2 + $0xfc] sm:$0x1]  ;;  %v16883_v55 = vpop.permute.xlu1 %7526  ;;  %v16885_v27 = vpop.f32.mrf.mxu1 }
 0x400   : > { %v3714_v6 = vrot.slane %v3712_v44, 5  ;;  %v11646_v57 = vcombine.low %v6641_v3, %v6655_v16  ;;  %v3720_v24 = vrot.slane %v3718_v47, 5  ;;  %v3725_v35 = vrot.slane %v3723_v38, 4  ;;  %v4417_v44 = vld [vmem:[#allocation2 + $0x21c] sm:$0x1]  ;;  %18686 = vst [vmem:[#allocation11_spill] sm:$0xff] %v16885_v27 }
 0x401   : > { %v3728_v46 = vrot.slane %v3726_v26, 5  ;;  %12442 = vmatmul.mubr.msk.bf16.gmra.mxu0 %vm8684_vm10, %v11681_v63  ;;  %v3732_v22 = vshll.u32 %v16877_v17, 16  ;;  %v4770_v23 = vor.u32 %v18685_v19, %v18684_v53  ;;  %v4773_v10 = vshll.u32 %v12850_v4, 16  ;;  %v18687_v47 = vld [vmem:[#allocation42_spill] sm:$0xff]  ;;  %v12851_v16 = vld [vmem:[#allocation2 + $0x104] sm:$0x1]  ;;  %v9501_v41 = vpop.f32.mrf.mxu1 }
 0x402   : > { %v3715_v43 = vor.u32 %v3714_v6, %v3711_v40  ;;  %8576 = vrot.lane.b32.xlu0 %v11646_v57, %s13024_s30  ;;  %v18688_v38 = vld [vmem:[#allocation22_spill] sm:$0xff]  ;;  %v4787_v63 = vshll.u32 %v12851_v16, 16  ;;  %v4418_v40 = vld [vmem:[#allocation2 + $0x224] sm:$0x1]  ;;  %v5378_v6 = vld [vmem:[#allocation2 + $0x220] sm:$0xe] }
 0x403   : > { %v3729_v3 = vor.u32 %v3728_v46, %v3725_v35  ;;  %v4784_v26 = vor.u32 %v18688_v38, %v18687_v47  ;;  %v11322_v29 = vrot.slane %v5377_v49, 9  ;;  %v3734_v53 = vrot.slane %v3732_v22, 5  ;;  %v3902_v38 = vld [vmem:[#allocation2 + $0x210] sm:$0xe]  ;;  %v3903_v16 = vld [vmem:[#allocation2 + $0x218] sm:$0xe]  ;;  %v16894_v49 = vpop.permute.xlu0 %8550 }
 0x404   : > { %v3716_v37 = vrot.slane %v3715_v43, 4  ;;  %v4771_v19 = vrot.slane %v4770_v23, 4  ;;  %v4775_v4 = vrot.slane %v4773_v10, 5  ;;  %v4789_v14 = vrot.slane %v4787_v63, 5  ;;  %v16896_v43 = vpop.f32.mrf.mxu1  ;;  %v5826_v63 = vld [vmem:[#allocation2 + $0x220] sm:$0xf] }
 0x405   : > { %v3730_v56 = vrot.slane %v3729_v3, 4  ;;  %v4785_v1 = vrot.slane %v4784_v26, 4  ;;  %v5733_v27 = vrot.slane %v4417_v44, 5  ;;  %v11323_v46 = vrot.slane %v5378_v6, 9  ;;  %18689 = vst [vmem:[#allocation53_spill] sm:$0xff] %v16896_v43  ;;  %v18690_v3 = vld [vmem:[#allocation18_spill] sm:$0xff] }
 0x406   : > { %v3721_v57 = vsel %vm13932_vm13, %v3716_v37, %v3720_v24  ;;  %v4776_v35 = vsel %vm13932_vm13, %v4771_v19, %v4775_v4  ;;  %v5737_v47 = vrot.slane %v4418_v40, 5  ;;  %v8805_v24 = vsel %vm8781_vm14, %v16859_v50, %v16496_v61  ;;  %v16911_v40 = vpop.permute.xlu1 %7690  ;;  %v12852_v61 = vld [vmem:[#allocation2 + $0x1c8] sm:$0xf]  ;;  %v16914_v19 = vld [vmem:[#allocation2 + $0x1d0] sm:$0xf] }
 0x407   : > { %v3735_v41 = vsel %vm13932_vm13, %v3730_v56, %v3734_v53  ;;  %v4790_v22 = vsel %vm13932_vm13, %v4785_v1, %v4789_v14  ;;  %v5734_v37 = vsel %vm13599_vm9, %v11322_v29, %v5733_v27  ;;  %v8881_v26 = vsel %vm8846_vm15, %v8805_v24, %v18690_v3  ;;  %v5827_v56 = vld [vmem:[#allocation2 + $0x228] sm:$0xf]  ;;  %18691 = vst [vmem:[#allocation46_spill] sm:$0xff] %v16911_v40  ;;  %v9506_v14 = vpop.f32.mrf.mxu1  ;;  %v3905_v40 = vld [vmem:[#allocation2 + $0x238] sm:$0xe] }
 0x408   : > { %v11455_v23 = vcombine.low %v3721_v57, %v3735_v41  ;;  %v11536_v10 = vcombine.low %v4776_v35, %v4790_v22  ;;  %v5738_v44 = vsel %vm13599_vm9, %v11323_v46, %v5737_v47  ;;  %9567 = vmatmul.mubr.bf16.gmra.mxu1 %v8881_v26  ;;  %v11258_v29 = vrot.slane %v3902_v38, 9 }
 0x409   : > { %v11583_v1 = vcombine.low %v5734_v37, %v5738_v44  ;;  %v4261_v27 = vrot.slane %v16866_v51, 5  ;;  %v11259_v6 = vrot.slane %v3903_v16, 9  ;;  %v5072_v50 = vshrl.u32 %v12852_v61, 16  ;;  %v16919_v35 = vpop.f32.mrf.mxu1 }
 0x40a   : > { %v5075_v53 = vshll.u32 %v12852_v61, 16  ;;  %v5086_v4 = vshrl.u32 %v16914_v19, 16  ;;  %7554 = vrot.lane.b32.xlu1 %v11455_v23, %s13026_s13  ;;  %v4265_v57 = vrot.slane %v16877_v17, 5  ;;  %18692 = vst [vmem:[#allocation10_spill] sm:$0xff] %v16919_v35  ;;  %v6657_v51 = vshrl.u32 %v5826_v63, 16  ;;  %v16930_v17 = vpop.permute.xlu0 %8554 }
 0x40b   : > { %8194 = vrot.lane.b32.xlu0 %v11583_v1, %s13026_s13  ;;  %v4262_v46 = vsel %vm13599_vm9, %v11258_v29, %v4261_v27  ;;  %v6660_v47 = vshll.u32 %v5826_v63, 16  ;;  %v6671_v38 = vshrl.u32 %v5827_v56, 16  ;;  %v18693_v16 = vshll.u32 %v16666_v62, 16  ;;  %18695 = vst [vmem:[#allocation33_spill] sm:$0xff] %v16930_v17  ;;  %v9509_v23 = vpop.f32.mrf.mxu1  ;;  %v16937_v61 = vld [vmem:[#allocation2 + $0x218] sm:$0xf] }
 0x40c   : > { %v4266_v22 = vsel %vm13599_vm9, %v11259_v6, %v4265_v57  ;;  %v6674_v37 = vshll.u32 %v5827_v56, 16  ;;  %v11615_v24 = vcombine.low %v5826_v63, %v5827_v56  ;;  %v6659_v3 = vrot.slane %v6657_v51, 4  ;;  %18698 = vst [vmem:[#allocation57_spill] sm:$0xff] %v16937_v61  ;;  %v16941_v6 = vpop.permute.xlu1 %7528  ;;  %v2878_v23 = vld [vmem:[#allocation2 + $0x238] sm:$0xf] }
 0x40d   : > { %v16926_v41 = vrot.slane %v18693_v16, 5  ;;  %v11487_v44 = vcombine.low %v4262_v46, %v4266_v22  ;;  %v6662_v26 = vrot.slane %v6660_v47, 5  ;;  %v6673_v14 = vrot.slane %v6671_v38, 4  ;;  %v16939_v16 = vld [vmem:[#allocation2 + $0x220] sm:$0xf] }
 0x40e   : > { %v16932_v1 = vrot.slane %v5072_v50, 4  ;;  %v16934_v29 = vrot.slane %v5075_v53, 5  ;;  %v6676_v27 = vrot.slane %v6674_v37, 5  ;;  %18699 = vst [vmem:[#allocation38_spill] sm:$0xff] %v16939_v16  ;;  %v16943_v63 = vrot.slane %v5086_v4, 4  ;;  %v18701_v53 = vld [vmem:[#allocation36_spill] sm:$0xff] }
 0x40f   : > { %18694 = vst [vmem:[#allocation26_spill] sm:$0xff] %v16926_v41  ;;  %7714 = vrot.lane.b32.xlu1 %v11487_v44, %s13025_s8  ;;  %8418 = vrot.lane.b32.xlu0 %v11615_v24, %s13025_s8  ;;  %v6663_v50 = vor.u32 %v6662_v26, %v6659_v3  ;;  %v6666_v57 = vshll.u32 %v18701_v53, 16  ;;  %v2877_v46 = vld [vmem:[#allocation2 + $0x230] sm:$0xf]  ;;  %v16952_v47 = vsel %vm8684_vm10, %v11536_v10, %v16659_v54  ;;  %v12855_v4 = vld [vmem:[#allocation2 + $0xf8] sm:$0xf] }
 0x410   : > { %18696 = vst [vmem:[#allocation41_spill] sm:$0xff] %v16932_v1  ;;  %18697 = vst [vmem:[#allocation35_spill] sm:$0xff] %v16934_v29  ;;  %v16954_v38 = vld [vmem:[#allocation2 + $0xf0] sm:$0xf]  ;;  %v6677_v37 = vor.u32 %v6676_v27, %v6673_v14  ;;  %v16957_v44 = vld [vmem:[#allocation2 + $0x234] sm:$0x1]  ;;  %v11519_v24 = vcombine.low %v16937_v61, %v16939_v16  ;;  %v16964_v27 = vpop.permute.xlu0 %8552  ;;  %v16970_v32 = vpop.permute.xlu1 %7924 }
 0x411   : > { %18700 = vst [vmem:[#allocation42_spill] sm:$0xff] %v16943_v63  ;;  %v11408_v22 = vcombine.low %v16954_v38, %v12855_v4  ;;  %v6664_v3 = vrot.slane %v6663_v50, 4  ;;  %v6668_v26 = vrot.slane %v6666_v57, 5  ;;  %v12856_v53 = vld [vmem:[#allocation2 + $0x22c] sm:$0x1]  ;;  %v3737_v62 = vshrl.u32 %v2877_v46, 16 }
 0x412   : > { %v6680_v51 = vshll.u32 %v12856_v53, 16  ;;  %v16961_v56 = vld [vmem:[#allocation2 + $0x23c] sm:$0x1]  ;;  %v6678_v10 = vrot.slane %v6677_v37, 4  ;;  %v3740_v35 = vshll.u32 %v2877_v46, 16  ;;  %v3746_v43 = vshll.u32 %v16957_v44, 16 }
 0x413   : > { %v4419_v54 = vld [vmem:[#allocation2 + $0x23c] sm:$0x1]  ;;  %v5379_v38 = vld [vmem:[#allocation2 + $0x238] sm:$0xe]  ;;  %v3904_v14 = vld [vmem:[#allocation2 + $0x230] sm:$0xe]  ;;  %7938 = vrot.lane.b32.xlu1 %v11519_v24, %s13024_s30  ;;  %v6669_v50 = vsel %vm13932_vm13, %v6664_v3, %v6668_v26 }
 0x414   : > { %v6682_v57 = vrot.slane %v6680_v51, 5  ;;  %v3751_v4 = vshrl.u32 %v2878_v23, 16  ;;  %v3754_v53 = vshll.u32 %v2878_v23, 16  ;;  %v4420_v63 = vld [vmem:[#allocation2 + $0x244] sm:$0x1]  ;;  %v3739_v29 = vrot.slane %v3737_v62, 4 }
 0x415   : > { %v3742_v1 = vrot.slane %v3740_v35, 5  ;;  %v3748_v37 = vrot.slane %v3746_v43, 5  ;;  %v3760_v46 = vshll.u32 %v16961_v56, 16  ;;  %v5380_v41 = vld [vmem:[#allocation2 + $0x240] sm:$0xe]  ;;  %v11324_v42 = vrot.slane %v5379_v38, 9 }
 0x416   : > { %v6683_v2 = vsel %vm13932_vm13, %v6678_v10, %v6682_v57  ;;  %v3753_v15 = vrot.slane %v3751_v4, 4  ;;  %v3756_v24 = vrot.slane %v3754_v53, 5  ;;  %v5741_v23 = vrot.slane %v4419_v54, 5  ;;  %v16974_v16 = vld [vmem:[#allocation2 + $0x26c] sm:$0x1] }
 0x417   : > { %v11647_v3 = vcombine.low %v6669_v50, %v6683_v2  ;;  %v3743_v51 = vor.u32 %v3742_v1, %v3739_v29  ;;  %v3762_v26 = vrot.slane %v3760_v46, 5  ;;  %v6856_v35 = vld [vmem:[#allocation2 + $0x260] sm:$0xe]  ;;  %v11325_v62 = vrot.slane %v5380_v41, 9  ;;  %v6857_v29 = vld [vmem:[#allocation2 + $0x268] sm:$0xe]  ;;  %v16984_v50 = vpop.permute.xlu0 %8564 }
 0x418   : > { %v3757_v43 = vor.u32 %v3756_v24, %v3753_v15  ;;  %v5745_v61 = vrot.slane %v4420_v63, 5  ;;  %v11260_v17 = vrot.slane %v3904_v14, 9  ;;  %v5742_v38 = vsel %vm13599_vm9, %v11324_v42, %v5741_v23  ;;  %v16982_v54 = vld [vmem:[#allocation2 + $0x27c] sm:$0x1]  ;;  %18702 = vst [vmem:[#allocation22_spill] sm:$0xff] %v16984_v50  ;;  %v16996_v24 = vpop.permute.xlu1 %7530 }
 0x419   : > { %8578 = vrot.lane.b32.xlu0 %v11647_v3, %s13024_s30  ;;  %v3744_v10 = vrot.slane %v3743_v51, 4  ;;  %v4269_v2 = vrot.slane %v16957_v44, 5  ;;  %v11261_v1 = vrot.slane %v3905_v40, 9  ;;  %v4273_v63 = vrot.slane %v16961_v56, 5  ;;  %v6858_v57 = vld [vmem:[#allocation2 + $0x270] sm:$0xe] }
 0x41a   : > { %v3758_v15 = vrot.slane %v3757_v43, 4  ;;  %v5746_v41 = vsel %vm13599_vm9, %v11325_v62, %v5745_v61  ;;  %v11392_v14 = vrot.slane %v6856_v35, 9  ;;  %v8723_v4 = vsel %vm8684_vm10, %v11408_v22, %v16719_v13  ;;  %v16994_v53 = vld [vmem:[#allocation2 + $0x274] sm:$0x1]  ;;  %v6859_v46 = vld [vmem:[#allocation2 + $0x278] sm:$0xe] }
 0x41b   : > { %v3749_v42 = vsel %vm13932_vm13, %v3744_v10, %v3748_v37  ;;  %v11584_v40 = vcombine.low %v5742_v38, %v5746_v41  ;;  %v7230_v44 = vrot.slane %v16976_v45, 5  ;;  %v4270_v56 = vsel %vm13599_vm9, %v11260_v17, %v4269_v2  ;;  %v5828_v22 = vld [vmem:[#allocation2 + $0x240] sm:$0xf]  ;;  %v5829_v51 = vld [vmem:[#allocation2 + $0x248] sm:$0xf]  ;;  %v17013_v41 = vpop.permute.xlu0 %8182 }
 0x41c   : > { %v3763_v61 = vsel %vm13932_vm13, %v3758_v15, %v3762_v26  ;;  %v11393_v3 = vrot.slane %v6857_v29, 9  ;;  %v7234_v13 = vrot.slane %v16974_v16, 5  ;;  %v4274_v23 = vsel %vm13599_vm9, %v11261_v1, %v4273_v63  ;;  %18703 = vst [vmem:[#allocation18_spill] sm:$0xff] %v17013_v41  ;;  %v17015_v1 = vpop.f32.mrf.mxu1  ;;  %v12862_v50 = vld [vmem:[#allocation2 + $0x11c] sm:$0x1] }
 0x41d   : > { %v11456_v37 = vcombine.low %v3749_v42, %v3763_v61  ;;  %8196 = vrot.lane.b32.xlu0 %v11584_v40, %s13026_s13  ;;  %v7231_v35 = vsel %vm13599_vm9, %v11392_v14, %v7230_v44  ;;  %v11394_v43 = vrot.slane %v6858_v57, 9  ;;  %v7238_v17 = vrot.slane %v16994_v53, 5  ;;  %18704 = vst [vmem:[#allocation36_spill] sm:$0xff] %v17015_v1 }
 0x41e   : > { %v7235_v26 = vsel %vm13599_vm9, %v11393_v3, %v7234_v13  ;;  %v11395_v62 = vrot.slane %v6859_v46, 9  ;;  %v7242_v10 = vrot.slane %v16982_v54, 5  ;;  %v6685_v2 = vshrl.u32 %v5828_v22, 16  ;;  %v17025_v46 = vld [vmem:[#allocation2 + $0x1f0] sm:$0xf] }
 0x41f   : > { %7556 = vrot.lane.b32.xlu1 %v11456_v37, %s13026_s13  ;;  %v11682_v38 = vcombine.low %v7231_v35, %v7235_v26  ;;  %v6688_v29 = vshll.u32 %v5828_v22, 16  ;;  %v6699_v15 = vshrl.u32 %v5829_v51, 16  ;;  %v7239_v63 = vsel %vm13599_vm9, %v11394_v43, %v7238_v17  ;;  %v17029_v37 = vpop.permute.xlu1 %7542  ;;  %v9514_v35 = vpop.f32.mrf.mxu1 }
 0x420   : > { %v7243_v14 = vsel %vm13599_vm9, %v11395_v62, %v7242_v10  ;;  %v6702_v57 = vshll.u32 %v5829_v51, 16  ;;  %v11616_v42 = vcombine.low %v5828_v22, %v5829_v51  ;;  %v18705_v40 = vshll.u32 %v16914_v19, 16  ;;  %18706 = vst [vmem:[#allocation74_spill] sm:$0xff] %v17029_v37  ;;  %v18709_v19 = vld [vmem:[#allocation55_spill] sm:$0xff] }
 0x421   : > { %v5114_v61 = vshrl.u32 %v17025_v46, 16  ;;  %v11488_v3 = vcombine.low %v4270_v56, %v4274_v23  ;;  %12445 = vmatprep.mubr.msk.bf16.mxu0 %vm8684_vm10, %v11682_v38  ;;  %v11683_v13 = vcombine.low %v7239_v63, %v7243_v14  ;;  %v18707_v43 = vshrl.u32 %v16522_v8, 16  ;;  %v17050_v63 = vpop.f32.mrf.mxu1  ;;  %v5382_v37 = vld [vmem:[#allocation2 + $0x250] sm:$0xe] }
 0x422   : > { %v17023_v44 = vrot.slane %v18705_v40, 5  ;;  %8420 = vrot.lane.b32.xlu0 %v11616_v42, %s13025_s8  ;;  %v9064_v51 = vsel %vm8781_vm14, %v16952_v47, %v18709_v19  ;;  %v8807_v56 = vsel %vm8781_vm14, %v8723_v4, %v16606_v39  ;;  %v18710_v23 = vshll.u32 %v16522_v8, 16  ;;  %18712 = vst [vmem:[#allocation76_spill] sm:$0xff] %v17050_v63  ;;  %v17054_v8 = vld [vmem:[#allocation2 + $0x238] sm:$0xf]  ;;  %v18713_v42 = vld [vmem:[#allocation45_spill] sm:$0xff] }
 0x423   : > { %v17033_v26 = vrot.slane %v18707_v43, 4  ;;  %7716 = vrot.lane.b32.xlu1 %v11488_v3, %s13025_s8  ;;  %12446 = vmatmul.mubr.msk.bf16.gmra.mxu0 %vm8684_vm10, %v11683_v13  ;;  %v6687_v62 = vrot.slane %v6685_v2, 4  ;;  %v6690_v10 = vrot.slane %v6688_v29, 5  ;;  %v9140_v38 = vsel %vm8846_vm15, %v9064_v51, %v16818_v59  ;;  %v17056_v4 = vld [vmem:[#allocation2 + $0x240] sm:$0xf]  ;;  %v17066_v43 = vpop.permute.xlu0 %8406  ;;  %v17072_v22 = vpop.permute.xlu1 %7702 }
 0x424   : > { %v17044_v17 = vrot.slane %v18710_v23, 5  ;;  %v6701_v14 = vrot.slane %v6699_v15, 4  ;;  %v6704_v47 = vrot.slane %v6702_v57, 5  ;;  %9574 = vmatprep.mubr.bf16.mxu1 %v9140_v38  ;;  %v8884_v39 = vsel %vm8846_vm15, %v8807_v56, %v16636_v0  ;;  %v18714_v40 = vld [vmem:[#allocation16_spill] sm:$0xff]  ;;  %v12858_v29 = vld [vmem:[#allocation2 + $0x12c] sm:$0x1]  ;;  %v9517_v0 = vpop.f32.mrf.mxu1 }
 0x425   : > { %18708 = vst [vmem:[#allocation75_spill] sm:$0xff] %v17033_v26  ;;  %v4854_v3 = vor.u32 %v18714_v40, %v18713_v42  ;;  %v17060_v2 = vrot.slane %v5114_v61, 4  ;;  %9575 = vmatmul.mubr.bf16.gmra.mxu1 %v8884_v39  ;;  %v11520_v59 = vcombine.low %v17054_v8, %v17056_v4  ;;  %v4857_v15 = vshll.u32 %v12858_v29, 16  ;;  %v18716_v57 = vld [vmem:[#allocation27_spill] sm:$0xff]  ;;  %v18717_v13 = vld [vmem:[#allocation17_spill] sm:$0xff]  ;;  %18718 = vst [vmem:[#allocation16_spill] sm:$0xff] %v17066_v43 }
 0x426   : > { %18711 = vst [vmem:[#allocation55_spill] sm:$0xff] %v17044_v17  ;;  %v4868_v35 = vor.u32 %v18717_v13, %v18716_v57  ;;  %v12859_v23 = vld [vmem:[#allocation2 + $0x134] sm:$0x1]  ;;  %v2879_v38 = vld [vmem:[#allocation2 + $0x240] sm:$0xf]  ;;  %v6691_v40 = vor.u32 %v6690_v10, %v6687_v62  ;;  %v6694_v29 = vshll.u32 %v16816_v34, 16  ;;  %v6705_v0 = vor.u32 %v6704_v47, %v6701_v14 }
 0x427   : > { %18715 = vst [vmem:[#allocation45_spill] sm:$0xff] %v17060_v2  ;;  %v4855_v56 = vrot.slane %v4854_v3, 4  ;;  %v4871_v61 = vshll.u32 %v12859_v23, 16  ;;  %7940 = vrot.lane.b32.xlu1 %v11520_v59, %s13024_s30  ;;  %v4859_v39 = vrot.slane %v4857_v15, 5  ;;  %18719 = vst [vmem:[#allocation27_spill] sm:$0xff] %v17072_v22  ;;  %v6708_v19 = vshll.u32 %v16790_v58, 16 }
 0x428   : > { %v4869_v42 = vrot.slane %v4868_v35, 4  ;;  %v6692_v23 = vrot.slane %v6691_v40, 4  ;;  %v6696_v51 = vrot.slane %v6694_v29, 5  ;;  %v2880_v63 = vld [vmem:[#allocation2 + $0x248] sm:$0xf]  ;;  %v3765_v59 = vshrl.u32 %v2879_v38, 16 }
 0x429   : > { %v4873_v13 = vrot.slane %v4871_v61, 5  ;;  %v4860_v3 = vsel %vm13932_vm13, %v4855_v56, %v4859_v39  ;;  %v6706_v10 = vrot.slane %v6705_v0, 4  ;;  %v6710_v34 = vrot.slane %v6708_v19, 5  ;;  %v17080_v15 = vld [vmem:[#allocation2 + $0x244] sm:$0x1]  ;;  %v17087_v56 = vpop.permute.xlu0 %8566  ;;  %v18722_v43 = vld [vmem:[#allocation14_spill] sm:$0xff] }
 0x42a   : > { %v3768_v35 = vshll.u32 %v2879_v38, 16  ;;  %v6697_v58 = vsel %vm13932_vm13, %v6692_v23, %v6696_v51  ;;  %v3767_v14 = vrot.slane %v3765_v59, 4  ;;  %v3774_v47 = vshll.u32 %v17080_v15, 16  ;;  %18720 = vst [vmem:[#allocation17_spill] sm:$0xff] %v17087_v56  ;;  %v17091_v39 = vld [vmem:[#allocation2 + $0x24c] sm:$0x1]  ;;  %v17094_v59 = vpop.permute.xlu1 %7926 }
 0x42b   : > { %v4874_v62 = vsel %vm13932_vm13, %v4869_v42, %v4873_v13  ;;  %v6711_v61 = vsel %vm13932_vm13, %v6706_v10, %v6710_v34  ;;  %v3779_v19 = vshrl.u32 %v2880_v63, 16  ;;  %v3782_v40 = vshll.u32 %v2880_v63, 16  ;;  %v12860_v29 = vld [vmem:[#allocation2 + $0x100] sm:$0xf]  ;;  %v12861_v38 = vld [vmem:[#allocation2 + $0x108] sm:$0xf] }
 0x42c   : > { %v17082_v57 = vcombine.low %v4860_v3, %v4874_v62  ;;  %v3770_v42 = vrot.slane %v3768_v35, 5  ;;  %v11409_v13 = vcombine.low %v12860_v29, %v12861_v38  ;;  %v11648_v0 = vcombine.low %v6697_v58, %v6711_v61  ;;  %v5381_v23 = vld [vmem:[#allocation2 + $0x248] sm:$0xe]  ;;  %18721 = vst [vmem:[#allocation77_spill] sm:$0xff] %v17094_v59  ;;  %v4421_v22 = vld [vmem:[#allocation2 + $0x24c] sm:$0x1] }
 0x42d   : > { %v3776_v3 = vrot.slane %v3774_v47, 5  ;;  %v3788_v51 = vshll.u32 %v17091_v39, 16  ;;  %v3781_v1 = vrot.slane %v3779_v19, 4  ;;  %v3784_v56 = vrot.slane %v3782_v40, 5  ;;  %v18723_v10 = vld [vmem:[#allocation25_spill] sm:$0xff]  ;;  %v18725_v47 = vld [vmem:[#allocation32_spill] sm:$0xff]  ;;  %v17101_v26 = vpop.permute.xlu0 %8184 }
 0x42e   : > { %v3771_v62 = vor.u32 %v3770_v42, %v3767_v14  ;;  %v4826_v34 = vor.u32 %v18723_v10, %v18722_v43  ;;  %v4422_v35 = vld [vmem:[#allocation2 + $0x254] sm:$0x1]  ;;  %8580 = vrot.lane.b32.xlu0 %v11648_v0, %s13024_s30  ;;  %v4829_v29 = vshll.u32 %v12862_v50, 16  ;;  %v18724_v58 = vld [vmem:[#allocation49_spill] sm:$0xff]  ;;  %v11326_v19 = vrot.slane %v5381_v23, 9  ;;  %18726 = vst [vmem:[#allocation14_spill] sm:$0xff] %v17101_v26  ;;  %v17111_v23 = vpop.permute.xlu1 %7544 }
 0x42f   : > { %v3790_v63 = vrot.slane %v3788_v51, 5  ;;  %v4840_v61 = vor.u32 %v18725_v47, %v18724_v58  ;;  %v12863_v38 = vld [vmem:[#allocation2 + $0x124] sm:$0x1]  ;;  %v3785_v14 = vor.u32 %v3784_v56, %v3781_v1  ;;  %v3906_v40 = vld [vmem:[#allocation2 + $0x240] sm:$0xe]  ;;  %v5749_v17 = vrot.slane %v4421_v22, 5 }
 0x430   : > { %v4843_v41 = vshll.u32 %v12863_v38, 16  ;;  %v3772_v59 = vrot.slane %v3771_v62, 4  ;;  %v4827_v42 = vrot.slane %v4826_v34, 4  ;;  %v4831_v2 = vrot.slane %v4829_v29, 5  ;;  %v3907_v47 = vld [vmem:[#allocation2 + $0x248] sm:$0xe] }
 0x431   : > { %v4841_v43 = vrot.slane %v4840_v61, 4  ;;  %v3786_v0 = vrot.slane %v3785_v14, 4  ;;  %v11327_v51 = vrot.slane %v5382_v37, 9  ;;  %v5753_v58 = vrot.slane %v4422_v35, 5  ;;  %v5830_v22 = vld [vmem:[#allocation2 + $0x250] sm:$0xf] }
 0x432   : > { %v4845_v10 = vrot.slane %v4843_v41, 5  ;;  %v3777_v50 = vsel %vm13932_vm13, %v3772_v59, %v3776_v3  ;;  %v4832_v62 = vsel %vm13932_vm13, %v4827_v42, %v4831_v2  ;;  %v5750_v56 = vsel %vm13599_vm9, %v11326_v19, %v5749_v17  ;;  %v5831_v2 = vld [vmem:[#allocation2 + $0x258] sm:$0xf]  ;;  %v17126_v19 = vpop.f32.mrf.mxu1 }
 0x433   : > { %v11262_v41 = vrot.slane %v3906_v40, 9  ;;  %v3791_v3 = vsel %vm13932_vm13, %v3786_v0, %v3790_v63  ;;  %v5754_v37 = vsel %vm13599_vm9, %v11327_v51, %v5753_v58  ;;  %v4277_v34 = vrot.slane %v17080_v15, 5  ;;  %18727 = vst [vmem:[#allocation25_spill] sm:$0xff] %v17126_v19  ;;  %v3908_v19 = vld [vmem:[#allocation2 + $0x250] sm:$0xe] }
 0x434   : > { %v4846_v1 = vsel %vm13932_vm13, %v4841_v43, %v4845_v10  ;;  %v11457_v35 = vcombine.low %v3777_v50, %v3791_v3  ;;  %v11585_v29 = vcombine.low %v5750_v56, %v5754_v37  ;;  %v11263_v61 = vrot.slane %v3907_v47, 9  ;;  %v9522_v50 = vpop.f32.mrf.mxu1  ;;  %v17159_v37 = vld [vmem:[#allocation2 + $0x248] sm:$0xf] }
 0x435   : > { %v11538_v59 = vcombine.low %v4832_v62, %v4846_v1  ;;  %v4281_v38 = vrot.slane %v17091_v39, 5  ;;  %v8984_v17 = vsel %vm8684_vm10, %v16850_v21, %v16622_v52  ;;  %v8726_v14 = vsel %vm8684_vm10, %v11409_v13, %v16883_v55  ;;  %v17132_v21 = vpop.permute.xlu0 %8408  ;;  %v17138_v62 = vpop.permute.xlu1 %7704  ;;  %v17194_v50 = vld [vmem:[#allocation2 + $0x254] sm:$0x1] }
 0x436   : > { %v4278_v63 = vsel %vm13599_vm9, %v11262_v41, %v4277_v34  ;;  %v6713_v42 = vshrl.u32 %v5830_v22, 16  ;;  %7558 = vrot.lane.b32.xlu1 %v11457_v35, %s13026_s13  ;;  %8198 = vrot.lane.b32.xlu0 %v11585_v29, %s13026_s13  ;;  %v6716_v39 = vshll.u32 %v5830_v22, 16  ;;  %v6727_v40 = vshrl.u32 %v5831_v2, 16  ;;  %18728 = vst [vmem:[#allocation49_spill] sm:$0xff] %v17132_v21  ;;  %18729 = vst [vmem:[#allocation32_spill] sm:$0xff] %v17138_v62  ;;  %v17161_v34 = vpop.f32.mrf.mxu1 }
 0x437   : > { %v4282_v15 = vsel %vm13599_vm9, %v11263_v61, %v4281_v38  ;;  %v6730_v52 = vshll.u32 %v5831_v2, 16  ;;  %v9066_v55 = vsel %vm8781_vm14, %v8984_v17, %v16697_v12  ;;  %v11617_v10 = vcombine.low %v5830_v22, %v5831_v2  ;;  %v17154_v22 = vld [vmem:[#allocation2 + $0x200] sm:$0xf]  ;;  %18732 = vst [vmem:[#allocation78_spill] sm:$0xff] %v17161_v34 }
 0x438   : > { %v11489_v13 = vcombine.low %v4278_v63, %v4282_v15  ;;  %v6715_v43 = vrot.slane %v6713_v42, 4  ;;  %v6718_v0 = vrot.slane %v6716_v39, 5  ;;  %v6729_v51 = vrot.slane %v6727_v40, 4  ;;  %v17186_v15 = vld [vmem:[#allocation2 + $0x250] sm:$0xf]  ;;  %v9525_v39 = vpop.f32.mrf.mxu1 }
 0x439   : > { %v6732_v58 = vrot.slane %v6730_v52, 5  ;;  %v9143_v47 = vsel %vm8846_vm15, %v9066_v55, %v16894_v49  ;;  %v18730_v1 = vshll.u32 %v17025_v46, 16  ;;  %v18731_v56 = vshrl.u32 %v16657_v60, 16  ;;  %v17163_v46 = vpop.f32.mrf.mxu0  ;;  %v17189_v40 = vld [vmem:[%s17144_s23] ss:$0 sm:$0xff] }
 0x43a   : > { %9582 = vmatprep.mubr.bf16.mxu1 %v9143_v47  ;;  %v8809_v49 = vsel %vm8781_vm14, %v8726_v14, %v16704_v48  ;;  %v18733_v2 = vshll.u32 %v16657_v60, 16  ;;  %v18734_v29 = vshrl.u32 %v16664_v11, 16  ;;  %7718 = vrot.lane.b32.xlu1 %v11489_v13, %s13025_s8  ;;  %v18735_v48 = vld [vmem:[#allocation40_spill] sm:$0xff]  ;;  %v2881_v14 = vld [vmem:[#allocation2 + $0x250] sm:$0xf]  ;;  %v17184_v11 = vsel %vm8684_vm10, %v17082_v57, %v16848_v5  ;;  %v17196_v47 = vpop.permute.xlu0 %8568 }
 0x43b   : > { %v17148_v12 = vrot.slane %v18730_v1, 5  ;;  %v17152_v41 = vrot.slane %v18731_v56, 4  ;;  %8422 = vrot.lane.b32.xlu0 %v11617_v10, %s13025_s8  ;;  %v8887_v17 = vsel %vm8846_vm15, %v8809_v49, %v18735_v48  ;;  %v11521_v52 = vcombine.low %v17159_v37, %v17186_v15  ;;  %18736 = vst [vmem:[#allocation40_spill] sm:$0xff] %v17196_v47  ;;  %v2882_v1 = vld [vmem:[#allocation2 + $0x258] sm:$0xf]  ;;  %v18738_v48 = vld [vmem:[#allocation50_spill] sm:$0xff] }
 0x43c   : > { %v17167_v35 = vrot.slane %v18733_v2, 5  ;;  %v17171_v61 = vrot.slane %v18734_v29, 4  ;;  %9583 = vmatmul.mubr.bf16.gmra.mxu1 %v8887_v17  ;;  %v6719_v55 = vor.u32 %v6718_v0, %v6715_v43  ;;  %v6722_v13 = vshll.u32 %v16831_v7, 16  ;;  %v9769_v2 = vpop.f32.mrf.mxu0  ;;  %v12865_v39 = vld [vmem:[#allocation2 + $0x110] sm:$0xf] }
 0x43d   : > { %v6733_v10 = vor.u32 %v6732_v58, %v6729_v51  ;;  %v8987_v5 = vsel %vm8684_vm10, %v11538_v59, %v16875_v33  ;;  %v6736_v57 = vshll.u32 %v16846_v18, 16  ;;  %v3793_v56 = vshrl.u32 %v2881_v14, 16  ;;  %v17203_v51 = vpop.permute.xlu1 %7928  ;;  %v17207_v33 = vld [vmem:[#allocation2 + $0x25c] sm:$0x1]  ;;  %v5383_v60 = vld [vmem:[#allocation2 + $0x258] sm:$0xe] }
 0x43e   : > { %v3796_v49 = vshll.u32 %v2881_v14, 16  ;;  %7942 = vrot.lane.b32.xlu1 %v11521_v52, %s13024_s30  ;;  %v6720_v29 = vrot.slane %v6719_v55, 4  ;;  %v6724_v43 = vrot.slane %v6722_v13, 5  ;;  %v3802_v7 = vshll.u32 %v17194_v50, 16  ;;  %18737 = vst [vmem:[#allocation79_spill] sm:$0xff] %v17203_v51  ;;  %v17218_v3 = vpop.f32.mrf.mxu0 }
 0x43f   : > { %v6734_v0 = vrot.slane %v6733_v10, 4  ;;  %v6738_v58 = vrot.slane %v6736_v57, 5  ;;  %v9481_v17 = vadd.f32 %v17189_v40, %v18738_v48  ;;  %v3795_v18 = vrot.slane %v3793_v56, 4  ;;  %v12866_v14 = vld [vmem:[#allocation2 + $0x118] sm:$0xf] }
 0x440   : > { %v3798_v59 = vrot.slane %v3796_v49, 5  ;;  %v11410_v42 = vcombine.low %v12865_v39, %v12866_v14  ;;  %v6725_v52 = vsel %vm13932_vm13, %v6720_v29, %v6724_v43  ;;  %v3807_v55 = vshrl.u32 %v2882_v1, 16  ;;  %v17211_v10 = vld [vmem:[#allocation2 + $0x25c] sm:$0x1]  ;;  %v17216_v56 = vld [vmem:[#allocation2 + $0x264] sm:$0x1]  ;;  %v17222_v14 = vpop.permute.xlu0 %8186 }
 0x441   : > { %v3810_v13 = vshll.u32 %v2882_v1, 16  ;;  %18739 = vst [vmem:[#allocation50_spill] sm:$0xff] %v17211_v10  ;;  %v6739_v57 = vsel %vm13932_vm13, %v6734_v0, %v6738_v58  ;;  %v3804_v48 = vrot.slane %v3802_v7, 5  ;;  %v3816_v38 = vshll.u32 %v17207_v33, 16  ;;  %18740 = vst [vmem:[#allocation80_spill] sm:$0xff] %v17216_v56  ;;  %v17227_v21 = vpop.permute.xlu1 %7546 }
 0x442   : > { %v3799_v63 = vor.u32 %v3798_v59, %v3795_v18  ;;  %v5384_v49 = vld [vmem:[#allocation2 + $0x260] sm:$0xe]  ;;  %v8729_v29 = vsel %vm8684_vm10, %v11410_v42, %v16941_v6  ;;  %v11649_v43 = vcombine.low %v6725_v52, %v6739_v57  ;;  %v3809_v1 = vrot.slane %v3807_v55, 4  ;;  %18741 = vst [vmem:[#allocation81_spill] sm:$0xff] %v17222_v14  ;;  %18742 = vst [vmem:[#allocation82_spill] sm:$0xff] %v17227_v21  ;;  %v18771_v21 = vld [vmem:[#allocation62_spill] sm:$0xff] }
 0x443   : > { %v3812_v39 = vrot.slane %v3810_v13, 5  ;;  %v9770_v34 = vadd.f32 %v9769_v2, %v9481_v17  ;;  %v11328_v0 = vrot.slane %v5383_v60, 9  ;;  %v5757_v7 = vrot.slane %v17211_v10, 5  ;;  %v18743_v60 = vld [vmem:[#allocation63_spill] sm:$0xff]  ;;  %v2883_v10 = vld [vmem:[#allocation2 + $0x260] sm:$0xf] }
 0x444   : > { %v3800_v51 = vrot.slane %v3799_v63, 4  ;;  %8582 = vrot.lane.b32.xlu0 %v11649_v43, %s13024_s30  ;;  %v3818_v18 = vrot.slane %v3816_v38, 5  ;;  %v11329_v59 = vrot.slane %v5384_v49, 9  ;;  %v5761_v47 = vrot.slane %v17216_v56, 5  ;;  %v3909_v17 = vld [vmem:[#allocation2 + $0x258] sm:$0xe]  ;;  %v9772_v38 = vpop.f32.mrf.mxu0 }
 0x445   : > { %v3813_v58 = vor.u32 %v3812_v39, %v3809_v1  ;;  %v5758_v42 = vsel %vm13599_vm9, %v11328_v0, %v5757_v7  ;;  %v9068_v63 = vsel %vm8781_vm14, %v8987_v5, %v16741_v31  ;;  %v9484_v2 = vadd.f32 %v17189_v40, %v18743_v60  ;;  %v5832_v49 = vld [vmem:[#allocation2 + $0x260] sm:$0xf]  ;;  %v17249_v39 = vpop.permute.xlu0 %8410 }
 0x446   : > { %v3805_v6 = vsel %vm13932_vm13, %v3800_v51, %v3804_v48  ;;  %v5762_v55 = vsel %vm13599_vm9, %v11329_v59, %v5761_v47  ;;  %v9146_v13 = vsel %vm8846_vm15, %v9068_v63, %v16964_v27  ;;  %v8811_v51 = vsel %vm8781_vm14, %v8729_v29, %v16827_v30  ;;  %18744 = vst [vmem:[#allocation63_spill] sm:$0xff] %v17249_v39  ;;  %v18745_v7 = vld [vmem:[#allocation68_spill] sm:$0xff]  ;;  %v2884_v39 = vld [vmem:[#allocation2 + $0x268] sm:$0xf] }
 0x447   : > { %v3814_v52 = vrot.slane %v3813_v58, 4  ;;  %v11586_v57 = vcombine.low %v5758_v42, %v5762_v55  ;;  %9590 = vmatprep.mubr.bf16.mxu1 %v9146_v13  ;;  %v9773_v48 = vadd.f32 %v9772_v38, %v9484_v2  ;;  %v8890_v31 = vsel %vm8846_vm15, %v8811_v51, %v16855_v28  ;;  %v17278_v51 = vpop.f32.mrf.mxu0 }
 0x448   : > { %v11264_v5 = vrot.slane %v3908_v19, 9  ;;  %9591 = vmatmul.mubr.bf16.gmra.mxu1 %v8890_v31  ;;  %v4285_v47 = vrot.slane %v17194_v50, 5  ;;  %v11265_v1 = vrot.slane %v3909_v17, 9  ;;  %v4289_v27 = vrot.slane %v17207_v33, 5  ;;  %v5833_v19 = vld [vmem:[#allocation2 + $0x268] sm:$0xf]  ;;  %v17272_v17 = vpop.f32.mrf.mxu1 }
 0x449   : > { %v3819_v43 = vsel %vm13932_vm13, %v3814_v52, %v3818_v18  ;;  %v10024_v30 = vmax.f32 %v9770_v34, 0.0  ;;  %8200 = vrot.lane.b32.xlu0 %v11586_v57, %s13026_s13  ;;  %v10025_v0 = vmax.f32 %v9773_v48, 0.0  ;;  %v9070_v28 = vsel %vm8781_vm14, %v17184_v11, %v18745_v7  ;;  %v18746_v18 = vld [vmem:[#allocation33_spill] sm:$0xff]  ;;  %v17261_v34 = vpop.permute.xlu1 %7706  ;;  %v17290_v7 = vpop.permute.xlu0 %8570 }
 0x44a   : > { %v11458_v29 = vcombine.low %v3805_v6, %v3819_v43  ;;  %v4286_v58 = vsel %vm13599_vm9, %v11264_v5, %v4285_v47  ;;  %v4290_v50 = vsel %vm13599_vm9, %v11265_v1, %v4289_v27  ;;  %v9149_v33 = vsel %vm8846_vm15, %v9070_v28, %v18746_v18  ;;  %18747 = vst [vmem:[#allocation68_spill] sm:$0xff] %v17261_v34  ;;  %v9530_v47 = vpop.f32.mrf.mxu1  ;;  %v12867_v27 = vld [vmem:[#allocation2 + $0x120] sm:$0xf] }
 0x44b   : > { %v6741_v59 = vshrl.u32 %v5832_v49, 16  ;;  %v18748_v6 = vshll.u32 %v17154_v22, 16  ;;  %v18749_v63 = vshrl.u32 %v16761_v36, 16  ;;  %v10088_v60 = vpack.c.bf16 %v10025_v0, %v10024_v30  ;;  %9598 = vmatprep.mubr.bf16.mxu1 %v9149_v33  ;;  %18750 = vst [vmem:[#allocation33_spill] sm:$0xff] %v17272_v17  ;;  %v12868_v30 = vld [vmem:[#allocation2 + $0x128] sm:$0xf] }
 0x44c   : > { %7560 = vrot.lane.b32.xlu1 %v11458_v29, %s13026_s13  ;;  %v6744_v2 = vshll.u32 %v5832_v49, 16  ;;  %v18751_v38 = vshll.u32 %v16761_v36, 16  ;;  %v6755_v55 = vshrl.u32 %v5833_v19, 16  ;;  %v6758_v13 = vshll.u32 %v5833_v19, 16  ;;  %18754 = vst [vmem:[#allocation83_spill] sm:$0xff] %v17290_v7  ;;  %v18755_v28 = vld [vmem:[#allocation57_spill] sm:$0xff] }
 0x44d   : > { %v17265_v42 = vrot.slane %v18748_v6, 5  ;;  %v17269_v11 = vrot.slane %v18749_v63, 4  ;;  %v11618_v22 = vcombine.low %v5832_v49, %v5833_v19  ;;  %v18752_v57 = vshrl.u32 %v16763_v25, 16  ;;  %12453 = vmatprep.mubr.msk.bf16.mxu0 %vm8684_vm10, %v10088_v60  ;;  %v18758_v33 = vld [vmem:[#allocation54_spill] sm:$0xff]  ;;  %v17298_v6 = vpop.f32.mrf.mxu1  ;;  %v17302_v60 = vld [vmem:[#allocation2 + $0x258] sm:$0xf] }
 0x44e   : > { %v17276_v52 = vrot.slane %v18751_v38, 5  ;;  %v11490_v31 = vcombine.low %v4286_v58, %v4290_v50  ;;  %v6743_v5 = vrot.slane %v6741_v59, 4  ;;  %v6746_v43 = vrot.slane %v6744_v2, 5  ;;  %v18756_v50 = vld [vmem:[#allocation38_spill] sm:$0xff]  ;;  %18759 = vst [vmem:[#allocation57_spill] sm:$0xff] %v17298_v6  ;;  %v18769_v34 = vld [vmem:[#allocation12_spill] sm:$0xff] }
 0x44f   : > { %v17282_v48 = vrot.slane %v18752_v57, 4  ;;  %v18753_v1 = vshll.u32 %v16763_v25, 16  ;;  %v11411_v29 = vcombine.low %v12867_v27, %v12868_v30  ;;  %v6757_v49 = vrot.slane %v6755_v55, 4  ;;  %8424 = vrot.lane.b32.xlu0 %v11618_v22, %s13025_s8  ;;  %v18757_v25 = vld [vmem:[#allocation60_spill] sm:$0xff]  ;;  %v12869_v38 = vld [vmem:[#allocation2 + $0x1ac] sm:$0x1]  ;;  %v17310_v27 = vpop.f32.mrf.mxu0 }
 0x450   : > { %v6760_v0 = vrot.slane %v6758_v13, 5  ;;  %v5184_v19 = vshrl.u32 %v18755_v28, 16  ;;  %7720 = vrot.lane.b32.xlu1 %v11490_v31, %s13025_s8  ;;  %v5022_v59 = vor.u32 %v18758_v33, %v18757_v25  ;;  %v17304_v2 = vld [vmem:[#allocation2 + $0x260] sm:$0xf]  ;;  %v5025_v55 = vshll.u32 %v12869_v38, 16  ;;  %v18760_v13 = vld [vmem:[#allocation66_spill] sm:$0xff]  ;;  %v17308_v31 = vpop.permute.xlu1 %7930  ;;  %v9533_v33 = vpop.f32.mrf.mxu1 }
 0x451   : > { %v17287_v36 = vrot.slane %v18753_v1, 5  ;;  %v8732_v63 = vsel %vm8684_vm10, %v11411_v29, %v16996_v24  ;;  %v18761_v22 = vld [vmem:[#allocation34_spill] sm:$0xff]  ;;  %v12870_v47 = vld [vmem:[#allocation2 + $0x1b4] sm:$0x1]  ;;  %18762 = vst [vmem:[#allocation38_spill] sm:$0xff] %v17308_v31  ;;  %v11522_v30 = vcombine.low %v17302_v60, %v17304_v2  ;;  %v6747_v24 = vor.u32 %v6746_v43, %v6743_v5 }
 0x452   : > { %v5036_v57 = vor.u32 %v18761_v22, %v18760_v13  ;;  %v5039_v1 = vshll.u32 %v12870_v47, 16  ;;  %v5023_v25 = vrot.slane %v5022_v59, 4  ;;  %v6750_v29 = vshll.u32 %v16976_v45, 16  ;;  %v18763_v7 = vld [vmem:[#allocation46_spill] sm:$0xff]  ;;  %v18764_v59 = vld [vmem:[#allocation29_spill] sm:$0xff] }
 0x453   : > { %v5027_v18 = vrot.slane %v5025_v55, 5  ;;  %v6761_v56 = vor.u32 %v6760_v0, %v6757_v49  ;;  %v6748_v13 = vrot.slane %v6747_v24, 4  ;;  %v6764_v47 = vshll.u32 %v16974_v16, 16  ;;  %v17325_v0 = vpop.permute.xlu0 %8188  ;;  %v17327_v55 = vpop.f32.mrf.mxu0  ;;  %v5385_v24 = vld [vmem:[#allocation2 + $0x268] sm:$0xe] }
 0x454   : > { %v5037_v58 = vrot.slane %v5036_v57, 4  ;;  %v5041_v38 = vrot.slane %v5039_v1, 5  ;;  %7944 = vrot.lane.b32.xlu1 %v11522_v30, %s13024_s30  ;;  %v6752_v22 = vrot.slane %v6750_v29, 5  ;;  %v8813_v31 = vsel %vm8781_vm14, %v8732_v63, %v18763_v7  ;;  %18765 = vst [vmem:[#allocation60_spill] sm:$0xff] %v17325_v0  ;;  %v17333_v63 = vld [vmem:[#allocation2 + $0x264] sm:$0x1]  ;;  %v17340_v29 = vpop.permute.xlu1 %7548 }
 0x455   : > { %v5028_v5 = vsel %vm13932_vm13, %v5023_v25, %v5027_v18  ;;  %v6762_v43 = vrot.slane %v6761_v56, 4  ;;  %v8893_v49 = vsel %vm8846_vm15, %v8813_v31, %v18764_v59  ;;  %v6766_v7 = vrot.slane %v6764_v47, 5  ;;  %v17335_v18 = vld [vmem:[#allocation2 + $0x26c] sm:$0x1]  ;;  %18767 = vst [vmem:[#allocation66_spill] sm:$0xff] %v17340_v29  ;;  %v17350_v0 = vpop.f32.mrf.mxu0 }
 0x456   : > { %v5042_v45 = vsel %vm13932_vm13, %v5037_v58, %v5041_v38  ;;  %v6753_v16 = vsel %vm13932_vm13, %v6748_v13, %v6752_v22  ;;  %9599 = vmatmul.mubr.bf16.gmra.mxu1 %v8893_v49  ;;  %v3821_v58 = vshrl.u32 %v2883_v10, 16  ;;  %v3824_v56 = vshll.u32 %v2883_v10, 16  ;;  %v17338_v25 = vld [vmem:[#allocation2 + $0x26c] sm:$0x1]  ;;  %v17346_v47 = vld [vmem:[#allocation2 + $0x274] sm:$0x1] }
 0x457   : > { %v17329_v57 = vcombine.low %v5028_v5, %v5042_v45  ;;  %v3830_v1 = vshll.u32 %v17333_v63, 16  ;;  %v3835_v31 = vshrl.u32 %v2884_v39, 16  ;;  %v3838_v30 = vshll.u32 %v2884_v39, 16  ;;  %18766 = vst [vmem:[#allocation54_spill] sm:$0xff] %v17338_v25  ;;  %18768 = vst [vmem:[#allocation34_spill] sm:$0xff] %v17346_v47 }
 0x458   : > { %v5201_v33 = vshll.u32 %v18756_v50, 16  ;;  %v6767_v38 = vsel %vm13932_vm13, %v6762_v43, %v6766_v7  ;;  %v3823_v13 = vrot.slane %v3821_v58, 4  ;;  %v3844_v22 = vshll.u32 %v17335_v18, 16  ;;  %v3911_v10 = vld [vmem:[#allocation2 + $0x268] sm:$0xe]  ;;  %v18770_v43 = vld [vmem:[#allocation51_spill] sm:$0xff] }
 0x459   : > { %v17348_v5 = vrot.slane %v5184_v19, 4  ;;  %v11650_v45 = vcombine.low %v6753_v16, %v6767_v38  ;;  %v3826_v39 = vrot.slane %v3824_v56, 5  ;;  %v3837_v59 = vrot.slane %v3835_v31, 4  ;;  %v5386_v49 = vld [vmem:[#allocation2 + $0x270] sm:$0xe]  ;;  %v17359_v31 = vpop.permute.xlu0 %8412 }
 0x45a   : > { %v5212_v29 = vshrl.u32 %v17054_v8, 16  ;;  %v3832_v6 = vrot.slane %v3830_v1, 5  ;;  %v3840_v17 = vrot.slane %v3838_v30, 5  ;;  %v9072_v7 = vsel %vm8781_vm14, %v18770_v43, %v18769_v34  ;;  %v3910_v58 = vld [vmem:[#allocation2 + $0x260] sm:$0xe]  ;;  %18772 = vst [vmem:[#allocation46_spill] sm:$0xff] %v17359_v31 }
 0x45b   : > { %8584 = vrot.lane.b32.xlu0 %v11650_v45, %s13024_s30  ;;  %v3827_v14 = vor.u32 %v3826_v39, %v3823_v13  ;;  %v3846_v19 = vrot.slane %v3844_v22, 5  ;;  %v9152_v16 = vsel %vm8846_vm15, %v9072_v7, %v18771_v21  ;;  %v11330_v56 = vrot.slane %v5385_v24, 9  ;;  %v5834_v13 = vld [vmem:[#allocation2 + $0x270] sm:$0xf]  ;;  %v17364_v22 = vpop.permute.xlu1 %7708  ;;  %v17366_v39 = vpop.f32.mrf.mxu0 }
 0x45c   : > { %v3841_v38 = vor.u32 %v3840_v17, %v3837_v59  ;;  %9606 = vmatprep.mubr.bf16.mxu1 %v9152_v16  ;;  %v5765_v1 = vrot.slane %v17338_v25, 5  ;;  %v11331_v30 = vrot.slane %v5386_v49, 9  ;;  %v5769_v62 = vrot.slane %v17346_v47, 5  ;;  %18773 = vst [vmem:[#allocation29_spill] sm:$0xff] %v17364_v22  ;;  %v5835_v49 = vld [vmem:[#allocation2 + $0x278] sm:$0xf] }
 0x45d   : > { %v3828_v26 = vrot.slane %v3827_v14, 4  ;;  %v11266_v34 = vrot.slane %v3910_v58, 9  ;;  %v4293_v43 = vrot.slane %v17333_v63, 5  ;;  %v11267_v45 = vrot.slane %v3911_v10, 9  ;;  %v17373_v14 = vpop.f32.mrf.mxu1 }
 0x45e   : > { %v3842_v21 = vrot.slane %v3841_v38, 4  ;;  %v5766_v17 = vsel %vm13599_vm9, %v11330_v56, %v5765_v1  ;;  %v5770_v24 = vsel %vm13599_vm9, %v11331_v30, %v5769_v62  ;;  %v4297_v59 = vrot.slane %v17335_v18, 5  ;;  %18774 = vst [vmem:[#allocation12_spill] sm:$0xff] %v17373_v14 }
 0x45f   : > { %v18775_v63 = vshll.u32 %v18755_v28, 16  ;;  %v18776_v7 = vshrl.u32 %v18756_v50, 16  ;;  %v3833_v16 = vsel %vm13932_vm13, %v3828_v26, %v3832_v6  ;;  %v11587_v56 = vcombine.low %v5766_v17, %v5770_v24  ;;  %v9538_v30 = vpop.f32.mrf.mxu1  ;;  %v17394_v26 = vpop.f32.mrf.mxu0 }
 0x460   : > { %v17385_v38 = vrot.slane %v5201_v33, 5  ;;  %v3847_v62 = vsel %vm13932_vm13, %v3842_v21, %v3846_v19  ;;  %v6769_v18 = vshrl.u32 %v5834_v13, 16  ;;  %v6772_v1 = vshll.u32 %v5834_v13, 16 }
 0x461   : > { %v17377_v10 = vrot.slane %v18775_v63, 5  ;;  %v17381_v58 = vrot.slane %v18776_v7, 4  ;;  %v5215_v28 = vshll.u32 %v17054_v8, 16  ;;  %v5226_v63 = vshrl.u32 %v17056_v4, 16  ;;  %8202 = vrot.lane.b32.xlu0 %v11587_v56, %s13026_s13  ;;  %v17392_v7 = vpop.permute.xlu0 %8572  ;;  %v17402_v8 = vpop.f32.mrf.mxu1  ;;  %v18779_v56 = vld [vmem:[#allocation24_spill] sm:$0xff] }
 0x462   : > { %v11459_v22 = vcombine.low %v3833_v16, %v3847_v62  ;;  %v6783_v50 = vshrl.u32 %v5835_v49, 16  ;;  %18777 = vst [vmem:[#allocation51_spill] sm:$0xff] %v17392_v7  ;;  %v17396_v6 = vrot.slane %v5212_v29, 4  ;;  %v4294_v33 = vsel %vm13599_vm9, %v11266_v34, %v4293_v43  ;;  %18778 = vst [vmem:[#allocation62_spill] sm:$0xff] %v17402_v8  ;;  %v18780_v62 = vld [vmem:[#allocation59_spill] sm:$0xff]  ;;  %v17408_v29 = vpop.permute.xlu1 %7932 }
 0x463   : > { %v4298_v19 = vsel %vm13599_vm9, %v11267_v45, %v4297_v59  ;;  %v6786_v21 = vshll.u32 %v5835_v49, 16  ;;  %v6771_v17 = vrot.slane %v6769_v18, 4  ;;  %v6774_v24 = vrot.slane %v6772_v1, 5  ;;  %18781 = vst [vmem:[#allocation24_spill] sm:$0xff] %v17408_v29  ;;  %v9541_v59 = vpop.f32.mrf.mxu1  ;;  %v18784_v1 = vld [vmem:[#allocation31_spill] sm:$0xff] }
 0x464   : > { %7562 = vrot.lane.b32.xlu1 %v11459_v22, %s13026_s13  ;;  %v11619_v16 = vcombine.low %v5834_v13, %v5835_v49  ;;  %v8815_v30 = vsel %vm8781_vm14, %v18780_v62, %v18779_v56  ;;  %v5229_v47 = vshll.u32 %v17056_v4, 16  ;;  %v6785_v34 = vrot.slane %v6783_v50, 4  ;;  %v17418_v13 = vld [vmem:[#allocation2 + $0x268] sm:$0xf]  ;;  %v17423_v50 = vpop.f32.mrf.mxu0 }
 0x465   : > { %v6788_v43 = vrot.slane %v6786_v21, 5  ;;  %v8896_v45 = vsel %vm8846_vm15, %v8815_v30, %v18782_v20  ;;  %v17413_v25 = vrot.slane %v5215_v28, 5  ;;  %v17415_v22 = vrot.slane %v5226_v63, 4  ;;  %v18783_v49 = vld [vmem:[#allocation37_spill] sm:$0xff]  ;;  %18785 = vst [vmem:[#allocation59_spill] sm:$0xff] %v17423_v50  ;;  %v18786_v63 = vld [vmem:[#allocation72_spill] sm:$0xff] }
 0x466   : > { %v11491_v18 = vcombine.low %v4294_v33, %v4298_v19  ;;  %8426 = vrot.lane.b32.xlu0 %v11619_v16, %s13025_s8  ;;  %9607 = vmatmul.mubr.bf16.gmra.mxu1 %v8896_v45  ;;  %v9155_v4 = vsel %vm8846_vm15, %v18784_v1, %v18783_v49  ;;  %v5240_v21 = vshrl.u32 %v17159_v37, 16  ;;  %v5243_v56 = vshll.u32 %v17159_v37, 16  ;;  %v17427_v28 = vld [vmem:[#allocation2 + $0x270] sm:$0xf]  ;;  %v18787_v33 = vld [vmem:[#allocation21_spill] sm:$0xff]  ;;  %v18788_v20 = vld [vmem:[#allocation28_spill] sm:$0xff]  ;;  %v17436_v37 = vpop.permute.xlu0 %8190  ;;  %v17440_v14 = vpop.permute.xlu1 %7550 }
 0x467   : > { %9614 = vmatprep.mubr.bf16.mxu1 %v9155_v4  ;;  %v5050_v19 = vor.u32 %v18787_v33, %v18786_v63  ;;  %v12871_v16 = vld [vmem:[#allocation2 + $0x1bc] sm:$0x1]  ;;  %v11523_v30 = vcombine.low %v17418_v13, %v17427_v28  ;;  %v18789_v45 = vld [vmem:[#allocation26_spill] sm:$0xff]  ;;  %v12872_v49 = vld [vmem:[#allocation2 + $0x1c4] sm:$0x1]  ;;  %v6775_v29 = vor.u32 %v6774_v24, %v6771_v17  ;;  %18790 = vst [vmem:[#allocation19_spill] sm:$0xff] %v17436_v37  ;;  %v17442_v50 = vpop.f32.mrf.mxu0 }
 0x468   : > { %v5053_v62 = vshll.u32 %v12871_v16, 16  ;;  %7722 = vrot.lane.b32.xlu1 %v11491_v18, %s13025_s8  ;;  %v5064_v59 = vor.u32 %v18789_v45, %v18788_v20  ;;  %v5067_v1 = vshll.u32 %v12872_v49, 16  ;;  %v6778_v31 = vshll.u32 %v16994_v53, 16  ;;  %18791 = vst [vmem:[#allocation37_spill] sm:$0xff] %v17440_v14  ;;  %v18792_v45 = vld [vmem:[#allocation69_spill] sm:$0xff]  ;;  %v18795_v49 = vld [vmem:[#allocation15_spill] sm:$0xff] }
 0x469   : > { %v5051_v7 = vrot.slane %v5050_v19, 4  ;;  %v6789_v63 = vor.u32 %v6788_v43, %v6785_v34  ;;  %v6776_v8 = vrot.slane %v6775_v29, 4  ;;  %v6792_v18 = vshll.u32 %v16982_v54, 16  ;;  %v18793_v34 = vld [vmem:[#allocation52_spill] sm:$0xff]  ;;  %v18822_v37 = vld [vmem:[#allocation11_spill] sm:$0xff] }
 0x46a   : > { %v5055_v4 = vrot.slane %v5053_v62, 5  ;;  %v5065_v33 = vrot.slane %v5064_v59, 4  ;;  %v5069_v16 = vrot.slane %v5067_v1, 5  ;;  %v6780_v17 = vrot.slane %v6778_v31, 5  ;;  %v18794_v59 = vld [vmem:[#allocation48_spill] sm:$0xff] }
 0x46b   : > { %v6790_v24 = vrot.slane %v6789_v63, 4  ;;  %v9489_v19 = vadd.f32 %v17189_v40, %v18792_v45  ;;  %v5254_v53 = vshrl.u32 %v17186_v15, 16  ;;  %v6794_v54 = vrot.slane %v6792_v18, 5  ;;  %v18796_v63 = vld [vmem:[#allocation23_spill] sm:$0xff]  ;;  %v18798_v18 = vld [vmem:[#allocation44_spill] sm:$0xff]  ;;  %v17470_v45 = vpop.permute.xlu0 %8414 }
 0x46c   : > { %v5056_v20 = vsel %vm13932_vm13, %v5051_v7, %v5055_v4  ;;  %7946 = vrot.lane.b32.xlu1 %v11523_v30, %s13024_s30  ;;  %v5070_v29 = vsel %vm13932_vm13, %v5065_v33, %v5069_v16  ;;  %v9492_v43 = vadd.f32 %v17189_v40, %v18793_v34  ;;  %v6781_v31 = vsel %vm13932_vm13, %v6776_v8, %v6780_v17  ;;  %v18797_v16 = vld [vmem:[#allocation56_spill] sm:$0xff]  ;;  %v17472_v8 = vpop.f32.mrf.mxu0 }
 0x46d   : > { %v17454_v62 = vcombine.low %v5056_v20, %v5070_v29  ;;  %v9778_v7 = vadd.f32 %v17163_v46, %v9489_v19  ;;  %v8817_v1 = vsel %vm8781_vm14, %v18795_v49, %v18794_v59  ;;  %v6795_v30 = vsel %vm13932_vm13, %v6790_v24, %v6794_v54  ;;  %18799 = vst [vmem:[#allocation31_spill] sm:$0xff] %v17470_v45  ;;  %v18800_v24 = vld [vmem:[#allocation13_spill] sm:$0xff]  ;;  %v18801_v29 = vld [vmem:[#allocation64_spill] sm:$0xff]  ;;  %v18802_v54 = vld [vmem:[#allocation43_spill] sm:$0xff] }
 0x46e   : > { %v9781_v4 = vadd.f32 %v17218_v3, %v9492_v43  ;;  %v8899_v33 = vsel %vm8846_vm15, %v8817_v1, %v18796_v63  ;;  %v9076_v20 = vsel %vm8781_vm14, %v18798_v18, %v18797_v16  ;;  %v17474_v46 = vrot.slane %v5229_v47, 5  ;;  %v18803_v49 = vld [vmem:[#allocation41_spill] sm:$0xff]  ;;  %v18804_v1 = vld [vmem:[#allocation35_spill] sm:$0xff]  ;;  %v17484_v16 = vpop.permute.xlu1 %7710 }
 0x46f   : > { %v5257_v17 = vshll.u32 %v17186_v15, 16  ;;  %v11651_v19 = vcombine.low %v6781_v31, %v6795_v30  ;;  %9615 = vmatmul.mubr.bf16.gmra.mxu1 %v8899_v33  ;;  %v9158_v3 = vsel %vm8846_vm15, %v9076_v20, %v18800_v24  ;;  %v8823_v34 = vsel %vm8781_vm14, %v18802_v54, %v18801_v29  ;;  %18805 = vst [vmem:[#allocation72_spill] sm:$0xff] %v17484_v16  ;;  %v12873_v15 = vld [vmem:[#allocation2 + $0x1cc] sm:$0x1]  ;;  %v12874_v18 = vld [vmem:[#allocation2 + $0x1d4] sm:$0x1]  ;;  %v17495_v29 = vpop.f32.mrf.mxu0 }
 0x470   : > { %v10026_v43 = vmax.f32 %v9778_v7, 0.0  ;;  %v10027_v59 = vmax.f32 %v9781_v4, 0.0  ;;  %9622 = vmatprep.mubr.bf16.mxu1 %v9158_v3  ;;  %v5078_v63 = vor.u32 %v18804_v1, %v18803_v49  ;;  %v17486_v47 = vrot.slane %v5240_v21, 4  ;;  %v18806_v30 = vld [vmem:[#allocation42_spill] sm:$0xff]  ;;  %v18807_v1 = vld [vmem:[#allocation61_spill] sm:$0xff] }
 0x471   : > { %8586 = vrot.lane.b32.xlu0 %v11651_v19, %s13024_s30  ;;  %v5081_v31 = vshll.u32 %v12873_v15, 16  ;;  %v5092_v33 = vor.u32 %v17023_v44, %v18806_v30  ;;  %v5095_v20 = vshll.u32 %v12874_v18, 16  ;;  %v17491_v24 = vrot.slane %v5243_v56, 5  ;;  %v18808_v19 = vld [vmem:[#allocation30_spill] sm:$0xff]  ;;  %v12875_v30 = vld [vmem:[#allocation2 + $0x1a0] sm:$0xf] }
 0x472   : > { %v17493_v7 = vrot.slane %v5254_v53, 4  ;;  %v10089_v4 = vpack.c.bf16 %v10027_v59, %v10026_v43  ;;  %v5079_v3 = vrot.slane %v5078_v63, 4  ;;  %v8819_v15 = vsel %vm8781_vm14, %v18808_v19, %v18807_v1  ;;  %v12876_v56 = vld [vmem:[#allocation2 + $0x1a8] sm:$0xf]  ;;  %v17507_v59 = vpop.permute.xlu0 %8574  ;;  %v17524_v14 = vpop.permute.xlu1 %7934  ;;  %s12940_s30 = scalar_lea.vmem %s18230_s12, 4096 }
 0x473   : > { %v5083_v54 = vrot.slane %v5081_v31, 5  ;;  %v5093_v21 = vrot.slane %v5092_v33, 4  ;;  %v5097_v49 = vrot.slane %v5095_v20, 5  ;;  %v17502_v44 = vsel %vm8846_vm15, %v8823_v34, %v16970_v32  ;;  %18809 = vst [vmem:[#allocation21_spill] sm:$0xff] %v17507_v59  ;;  %v18810_v20 = vld [vmem:[#allocation67_spill] sm:$0xff]  ;;  %v18812_v19 = vld [vmem:[#allocation9_spill] sm:$0xff]  ;;  %p12941_p8 = scmp.ne.s32.totalorder %s18230_s12, %s12940_s30 }
 0x474   : > { %v11417_v18 = vcombine.low %v12875_v30, %v12876_v56  ;;  %v5268_v53 = vshrl.u32 %v17302_v60, 16  ;;  %v5271_v43 = vshll.u32 %v17302_v60, 16  ;;  %12454 = vmatmul.mubr.msk.bf16.vlgmr.msra.gmra.mxu0 %vm8684_vm10, %v10089_v4  ;;  %v5282_v63 = vshrl.u32 %v17304_v2, 16  ;;  %v18811_v60 = vld [vmem:[#allocation47_spill] sm:$0xff]  ;;  %18815 = vst [vmem:[#allocation28_spill] sm:$0xff] %v17524_v14 }
 0x475   : > { %v5285_v31 = vshll.u32 %v17304_v2, 16  ;;  %v5084_v33 = vsel %vm13932_vm13, %v5079_v3, %v5083_v54  ;;  %v5098_v32 = vsel %vm13932_vm13, %v5093_v21, %v5097_v49  ;;  %v8902_v1 = vsel %vm8846_vm15, %v8819_v15, %v18810_v20  ;;  %v18813_v30 = vld [vmem:[#allocation75_spill] sm:$0xff]  ;;  %v17526_v2 = vpop.f32.mrf.mxu0  ;;  %v18816_v3 = vld [vmem:[#allocation20_spill] sm:$0xff]  ;;  %v12877_v21 = vld [vmem:[#allocation2 + $0x1ec] sm:$0x1]  ;;  %p12942_p11 = pnand %p12941_p8, %p13120_p9 }
 0x476   : > { %v17515_v34 = vcombine.low %v5084_v33, %v5098_v32  ;;  %v9078_v4 = vsel %vm8781_vm14, %v18812_v19, %v18811_v60  ;;  %v18814_v56 = vld [vmem:[#allocation55_spill] sm:$0xff]  ;;  %v5109_v49 = vshll.u32 %v12877_v21, 16  ;;  %v18817_v33 = vld [vmem:[#allocation45_spill] sm:$0xff]  ;;  %v17532_v59 = vrot.slane %v5257_v17, 5  ;;  %v18818_v60 = vld [vmem:[#allocation74_spill] sm:$0xff] }
 0x477   : > { %v5106_v16 = vor.u32 %v18814_v56, %v18813_v30  ;;  %9623 = vmatmul.mubr.bf16.gmra.mxu1 %v8902_v1  ;;  %v9161_v54 = vsel %vm8846_vm15, %v9078_v4, %v18816_v3  ;;  %v5120_v15 = vor.u32 %v17148_v12, %v18817_v33  ;;  %v12878_v32 = vld [vmem:[#allocation2 + $0x1f4] sm:$0x1]  ;;  %v8750_v19 = vsel %vm8684_vm10, %v11417_v18, %v18818_v60  ;;  %v18819_v56 = vld [vmem:[#allocation65_spill] sm:$0xff]  ;;  %v18821_v33 = vld [vmem:[#allocation70_spill] sm:$0xff]  ;;  %p12943_p0 = pneg %p12942_p11 }
 0x478   : > { %v5123_v20 = vshll.u32 %v12878_v32, 16  ;;  %9630 = vmatprep.mubr.bf16.mxu1 %v9161_v54  ;;  %v9497_v1 = vadd.f32 %v17189_v40, %v18819_v56  ;;  %v17538_v14 = vrot.slane %v5268_v53, 4  ;;  %v5111_v4 = vrot.slane %v5109_v49, 5  ;;  %v18820_v12 = vld [vmem:[#allocation39_spill] sm:$0xff]  ;;  %v17550_v54 = vpop.f32.mrf.mxu0  ;;  %v18824_v60 = vld [vmem:[#allocation53_spill] sm:$0xff] }
 0x479   : > { %v5107_v30 = vrot.slane %v5106_v16, 4  ;;  %v5121_v3 = vrot.slane %v5120_v15, 4  ;;  %v17540_v45 = vrot.slane %v5271_v43, 5  ;;  %v8821_v17 = vsel %vm8781_vm14, %v18821_v33, %v18820_v12  ;;  %v17548_v16 = vpop.permute.xlu0 %8192  ;;  %v18827_v12 = vld [vmem:[#allocation73_spill] sm:$0xff] }
 0x47a   : > { %v5125_v21 = vrot.slane %v5123_v20, 5  ;;  %v9786_v32 = vadd.f32 %v17310_v27, %v9497_v1  ;;  %v9500_v18 = vadd.f32 %v17189_v40, %v18822_v37  ;;  %18823 = vst [vmem:[#allocation26_spill] sm:$0xff] %v17548_v16  ;;  %v17552_v53 = vrot.slane %v5282_v63, 4  ;;  %v17567_v63 = vpop.permute.xlu1 %7552 }
 0x47b   : > { %v17554_v49 = vrot.slane %v5285_v31, 5  ;;  %v5112_v43 = vsel %vm13932_vm13, %v5107_v30, %v5111_v4  ;;  %v9505_v37 = vadd.f32 %v17189_v40, %v18824_v60  ;;  %v5134_v56 = vor.u32 %v17167_v35, %v17152_v41  ;;  %18825 = vst [vmem:[#allocation69_spill] sm:$0xff] %v17567_v63  ;;  %v18826_v31 = vld [vmem:[#allocation58_spill] sm:$0xff]  ;;  %v18828_v30 = vld [vmem:[#allocation71_spill] sm:$0xff]  ;;  %v17576_v41 = vpop.f32.mrf.mxu0 }
 0x47c   : > { %v5126_v15 = vsel %vm13932_vm13, %v5121_v3, %v5125_v21  ;;  %v9789_v27 = vadd.f32 %v17350_v0, %v9500_v18  ;;  %v8905_v1 = vsel %vm8846_vm15, %v8821_v17, %v18826_v31  ;;  %v9080_v4 = vsel %vm8781_vm14, %v18828_v30, %v18827_v12  ;;  %v12879_v3 = vld [vmem:[#allocation2 + $0x1fc] sm:$0x1]  ;;  %v18829_v35 = vld [vmem:[#allocation18_spill] sm:$0xff] }
 0x47d   : > { %v17560_v20 = vcombine.low %v5112_v43, %v5126_v15  ;;  %v5137_v21 = vshll.u32 %v12879_v3, 16  ;;  %v5148_v0 = vor.u32 %v17265_v42, %v17171_v61  ;;  %v10028_v33 = vmax.f32 %v9786_v32, 0.0  ;;  %v12880_v15 = vld [vmem:[#allocation2 + $0x204] sm:$0x1]  ;;  %v18830_v31 = vld [vmem:[#allocation22_spill] sm:$0xff] }
 0x47e   : > { %v10029_v18 = vmax.f32 %v9789_v27, 0.0  ;;  %v5135_v43 = vrot.slane %v5134_v56, 4  ;;  %v5151_v60 = vshll.u32 %v12880_v15, 16  ;;  %v9008_v17 = vsel %vm8684_vm10, %v17329_v57, %v18829_v35  ;;  %v18831_v32 = vld [vmem:[#allocation10_spill] sm:$0xff]  ;;  %v17586_v56 = vpop.permute.xlu0 %8416  ;;  %v18832_v15 = vld [vmem:[#allocation27_spill] sm:$0xff]  ;;  %v18833_v57 = vld [vmem:[#allocation16_spill] sm:$0xff] }
 0x47f   : > { %9631 = vmatmul.mubr.bf16.gmra.mxu1 %v8905_v1  ;;  %v9164_v12 = vsel %vm8846_vm15, %v9080_v4, %v18830_v31  ;;  %v5139_v30 = vrot.slane %v5137_v21, 5  ;;  %v5149_v3 = vrot.slane %v5148_v0, 4  ;;  %v9794_v61 = vadd.f32 %v17278_v51, %v9505_v37  ;;  %v12881_v35 = vld [vmem:[#allocation2 + $0x1b0] sm:$0xf]  ;;  %v12882_v4 = vld [vmem:[#allocation2 + $0x1b8] sm:$0xf] }
 0x480   : > { %9638 = vmatprep.mubr.bf16.mxu1 %v9164_v12  ;;  %v10090_v63 = vpack.c.bf16 %v10029_v18, %v10028_v33  ;;  %v5153_v42 = vrot.slane %v5151_v60, 5  ;;  %v9508_v27 = vadd.f32 %v17189_v40, %v18831_v32  ;;  %v8825_v16 = vsel %vm8781_vm14, %v8750_v19, %v18832_v15  ;;  %v18834_v33 = vld [vmem:[#allocation77_spill] sm:$0xff]  ;;  %v17604_v60 = vpop.permute.xlu1 %7712 }
 0x481   : > { %v9082_v1 = vsel %vm8781_vm14, %v9008_v17, %v18833_v57  ;;  %v11418_v21 = vcombine.low %v12881_v35, %v12882_v4  ;;  %v5140_v0 = vsel %vm13932_vm13, %v5135_v43, %v5139_v30  ;;  %v17596_v51 = vsel %vm8846_vm15, %v8825_v16, %v18834_v33  ;;  %v17606_v17 = vpop.f32.mrf.mxu0  ;;  %v12883_v16 = vld [vmem:[#allocation2 + $0x20c] sm:$0x1] }
 0x482   : > { %v5154_v37 = vsel %vm13932_vm13, %v5149_v3, %v5153_v42  ;;  %v9797_v18 = vadd.f32 %v17327_v55, %v9508_v27  ;;  %12457 = vmatprep.mubr.msk.bf16.mxu0 %vm8684_vm10, %v10090_v63  ;;  %v5162_v19 = vor.u32 %v17276_v52, %v17269_v11  ;;  %v5165_v12 = vshll.u32 %v12883_v16, 16  ;;  %v12884_v42 = vld [vmem:[#allocation2 + $0x214] sm:$0x1]  ;;  %v12886_v16 = vld [vmem:[#allocation2 + $0x224] sm:$0x1] }
 0x483   : > { %v8753_v43 = vsel %vm8684_vm10, %v11418_v21, %v17111_v23  ;;  %v17610_v31 = vcombine.low %v5140_v0, %v5154_v37  ;;  %v5176_v30 = vor.u32 %v17287_v36, %v17282_v48  ;;  %v10030_v55 = vmax.f32 %v9794_v61, 0.0  ;;  %v17618_v21 = vpop.permute.xlu0 %8576  ;;  %v17620_v48 = vpop.f32.mrf.mxu0  ;;  %v18835_v36 = vld [vmem:[#allocation17_spill] sm:$0xff]  ;;  %v18836_v0 = vld [vmem:[#allocation36_spill] sm:$0xff] }
 0x484   : > { %v10031_v3 = vmax.f32 %v9797_v18, 0.0  ;;  %v5163_v63 = vrot.slane %v5162_v19, 4  ;;  %v5179_v32 = vshll.u32 %v12884_v42, 16  ;;  %v5296_v11 = vshrl.u32 %v17418_v13, 16  ;;  %v17634_v18 = vpop.permute.xlu1 %7936 }
 0x485   : > { %v5299_v52 = vshll.u32 %v17418_v13, 16  ;;  %v5167_v27 = vrot.slane %v5165_v12, 5  ;;  %v5177_v15 = vrot.slane %v5176_v30, 4  ;;  %v5310_v23 = vshrl.u32 %v17427_v28, 16  ;;  %v17638_v30 = vpop.f32.mrf.mxu1 }
 0x486   : > { %v5313_v57 = vshll.u32 %v17427_v28, 16  ;;  %v10091_v35 = vpack.c.bf16 %v10031_v3, %v10030_v55  ;;  %v5181_v4 = vrot.slane %v5179_v32, 5  ;;  %v9167_v61 = vsel %vm8846_vm15, %v9082_v1, %v18835_v36 }
 0x487   : > { %9639 = vmatmul.mubr.bf16.gmra.mxu1 %v17502_v44  ;;  %v5168_v13 = vsel %vm13932_vm13, %v5163_v63, %v5167_v27  ;;  %v9513_v33 = vadd.f32 %v17189_v40, %v18836_v0  ;;  %v5190_v28 = vor.u32 %v17377_v10, %v17348_v5  ;;  %v12885_v44 = vld [vmem:[#allocation2 + $0x21c] sm:$0x1]  ;;  %v5204_v1 = vor.u32 %v17385_v38, %v17381_v58  ;;  %v18837_v38 = vld [vmem:[#allocation14_spill] sm:$0xff] }
 0x488   : > { %9646 = vmatprep.mubr.bf16.mxu1 %v9167_v61  ;;  %12458 = vmatmul.mubr.msk.bf16.gmra.mxu0 %vm8684_vm10, %v10091_v35  ;;  %v5182_v37 = vsel %vm13932_vm13, %v5177_v15, %v5181_v4  ;;  %v5193_v19 = vshll.u32 %v12885_v44, 16  ;;  %v5207_v12 = vshll.u32 %v12886_v16, 16  ;;  %v17640_v55 = vrot.slane %v5296_v11, 4  ;;  %v9546_v15 = vpop.f32.mrf.mxu1  ;;  %v17648_v35 = vpop.f32.mrf.mxu0  ;;  %v18838_v4 = vld [vmem:[#allocation76_spill] sm:$0xff] }
 0x489   : > { %v17642_v5 = vrot.slane %v5299_v52, 5  ;;  %v17644_v10 = vcombine.low %v5168_v13, %v5182_v37  ;;  %v5191_v3 = vrot.slane %v5190_v28, 4  ;;  %v17646_v63 = vrot.slane %v5310_v23, 4  ;;  %v18839_v61 = vld [vmem:[#allocation32_spill] sm:$0xff]  ;;  %v18840_v13 = vld [vmem:[#allocation49_spill] sm:$0xff]  ;;  %v17666_v37 = vpop.permute.xlu0 %8194 }
 0x48a   : > { %v5195_v42 = vrot.slane %v5193_v19, 5  ;;  %v5205_v32 = vrot.slane %v5204_v1, 4  ;;  %v5209_v27 = vrot.slane %v5207_v12, 5  ;;  %v17650_v58 = vrot.slane %v5313_v57, 5  ;;  %v18841_v1 = vld [vmem:[#allocation25_spill] sm:$0xff]  ;;  %v18842_v12 = vld [vmem:[#allocation40_spill] sm:$0xff] }
 0x48b   : > { %v9011_v11 = vsel %vm8684_vm10, %v17454_v62, %v18837_v38  ;;  %v9802_v52 = vadd.f32 %v17394_v26, %v9513_v33  ;;  %v9516_v36 = vadd.f32 %v17189_v40, %v18838_v4  ;;  %v8827_v23 = vsel %vm8781_vm14, %v8753_v43, %v18839_v61  ;;  %v17668_v62 = vpop.f32.mrf.mxu1  ;;  %v12887_v26 = vld [vmem:[#allocation2 + $0x1c0] sm:$0xf]  ;;  %v12888_v33 = vld [vmem:[#allocation2 + $0x1c8] sm:$0xf]  ;;  %v17683_v4 = vpop.f32.mrf.mxu0 }
 0x48c   : > { %v9084_v0 = vsel %vm8781_vm14, %v9011_v11, %v18840_v13  ;;  %v5196_v28 = vsel %vm13932_vm13, %v5191_v3, %v5195_v42  ;;  %v5210_v57 = vsel %vm13932_vm13, %v5205_v32, %v5209_v27  ;;  %v11419_v44 = vcombine.low %v12887_v26, %v12888_v33  ;;  %v17677_v42 = vpop.permute.xlu1 %7554  ;;  %v12889_v27 = vld [vmem:[#allocation2 + $0x23c] sm:$0x1]  ;;  %v12890_v13 = vld [vmem:[#allocation2 + $0x244] sm:$0x1]  ;;  %v18844_v33 = vld [vmem:[#allocation82_spill] sm:$0xff] }
 0x48d   : > { %v17670_v19 = vcombine.low %v5196_v28, %v5210_v57  ;;  %v9805_v43 = vadd.f32 %v17442_v50, %v9516_v36  ;;  %v9521_v16 = vadd.f32 %v17189_v40, %v18841_v1  ;;  %v9170_v3 = vsel %vm8846_vm15, %v9084_v0, %v18842_v12  ;;  %v9549_v11 = vpop.f32.mrf.mxu1  ;;  %v18843_v28 = vld [vmem:[#allocation79_spill] sm:$0xff]  ;;  %v18845_v12 = vld [vmem:[#allocation78_spill] sm:$0xff] }
 0x48e   : > { %v5218_v32 = vor.u32 %v17413_v25, %v17396_v6  ;;  %v5221_v15 = vshll.u32 %v12889_v27, 16  ;;  %v5232_v38 = vor.u32 %v17474_v46, %v17415_v22  ;;  %v10032_v50 = vmax.f32 %v9802_v52, 0.0  ;;  %v18846_v52 = vld [vmem:[#allocation81_spill] sm:$0xff]  ;;  %v17704_v27 = vpop.f32.mrf.mxu0 }
 0x48f   : > { %9647 = vmatmul.mubr.bf16.gmra.mxu1 %v17596_v51  ;;  %v10033_v36 = vmax.f32 %v9805_v43, 0.0  ;;  %v9810_v61 = vadd.f32 %v17366_v39, %v9521_v16  ;;  %v5235_v0 = vshll.u32 %v12890_v13, 16  ;;  %v8914_v57 = vsel %vm8846_vm15, %v8827_v23, %v18843_v28  ;;  %v18847_v43 = vld [vmem:[#allocation68_spill] sm:$0xff]  ;;  %v17698_v23 = vpop.permute.xlu0 %8418  ;;  %v12891_v28 = vld [vmem:[#allocation2 + $0x24c] sm:$0x1] }
 0x490   : > { %9654 = vmatprep.mubr.bf16.mxu1 %v9170_v3  ;;  %v5219_v25 = vrot.slane %v5218_v32, 4  ;;  %v5223_v6 = vrot.slane %v5221_v15, 5  ;;  %v5233_v26 = vrot.slane %v5232_v38, 4  ;;  %v8756_v22 = vsel %vm8684_vm10, %v11419_v44, %v18844_v33  ;;  %v18848_v32 = vld [vmem:[#allocation33_spill] sm:$0xff] }
 0x491   : > { %v10092_v46 = vpack.c.bf16 %v10033_v36, %v10032_v50  ;;  %v5237_v1 = vrot.slane %v5235_v0, 5  ;;  %v9524_v51 = vadd.f32 %v17189_v40, %v18845_v12  ;;  %v9014_v39 = vsel %vm8684_vm10, %v17515_v34, %v18846_v52  ;;  %v18849_v34 = vld [vmem:[#allocation59_spill] sm:$0xff]  ;;  %v17712_v36 = vpop.permute.xlu1 %7714 }
 0x492   : > { %v8829_v16 = vsel %vm8781_vm14, %v8756_v22, %v18847_v43  ;;  %v5224_v3 = vsel %vm13932_vm13, %v5219_v25, %v5223_v6  ;;  %v9529_v44 = vadd.f32 %v17189_v40, %v18848_v32  ;;  %v10034_v15 = vmax.f32 %v9810_v61, 0.0  ;;  %v12892_v22 = vld [vmem:[#allocation2 + $0x254] sm:$0x1]  ;;  %v17725_v43 = vpop.f32.mrf.mxu0 }
 0x493   : > { %12461 = vmatprep.mubr.msk.bf16.mxu0 %vm8684_vm10, %v10092_v46  ;;  %v5238_v38 = vsel %vm13932_vm13, %v5233_v26, %v5237_v1  ;;  %v9813_v11 = vadd.f32 %v18849_v34, %v9524_v51  ;;  %v5246_v50 = vor.u32 %v17491_v24, %v17486_v47  ;;  %v5249_v25 = vshll.u32 %v12891_v28, 16  ;;  %v18850_v46 = vld [vmem:[#allocation57_spill] sm:$0xff]  ;;  %v18851_v12 = vld [vmem:[#allocation63_spill] sm:$0xff]  ;;  %v18852_v24 = vld [vmem:[#allocation38_spill] sm:$0xff]  ;;  %v17732_v34 = vpop.permute.xlu0 %8578 }
 0x494   : > { %v17714_v13 = vcombine.low %v5224_v3, %v5238_v38  ;;  %v9818_v0 = vadd.f32 %v17495_v29, %v9529_v44  ;;  %v5260_v61 = vor.u32 %v17532_v59, %v17493_v7  ;;  %v5263_v26 = vshll.u32 %v12892_v22, 16  ;;  %v18853_v3 = vld [vmem:[#allocation60_spill] sm:$0xff]  ;;  %v18854_v59 = vld [vmem:[#allocation83_spill] sm:$0xff] }
 0x495   : > { %v10035_v6 = vmax.f32 %v9813_v11, 0.0  ;;  %v5247_v33 = vrot.slane %v5246_v50, 4  ;;  %v9532_v1 = vadd.f32 %v17189_v40, %v18850_v46  ;;  %v9086_v47 = vsel %vm8781_vm14, %v9014_v39, %v18851_v12  ;;  %v18855_v50 = vld [vmem:[#allocation12_spill] sm:$0xff]  ;;  %v17754_v46 = vpop.f32.mrf.mxu0 }
 0x496   : > { %v8917_v51 = vsel %vm8846_vm15, %v8829_v16, %v18852_v24  ;;  %v5251_v52 = vrot.slane %v5249_v25, 5  ;;  %v5261_v29 = vrot.slane %v5260_v61, 4  ;;  %v9017_v7 = vsel %vm8684_vm10, %v17560_v20, %v18853_v3  ;;  %v18860_v3 = vld [vmem:[#allocation80_spill] sm:$0xff] }
 0x497   : > { %9655 = vmatmul.mubr.bf16.gmra.mxu1 %v8914_v57  ;;  %v9173_v32 = vsel %vm8846_vm15, %v9086_v47, %v18854_v59  ;;  %v10093_v44 = vpack.c.bf16 %v10035_v6, %v10034_v15  ;;  %v5265_v38 = vrot.slane %v5263_v26, 5  ;;  %v10036_v39 = vmax.f32 %v9818_v0, 0.0  ;;  %v18856_v57 = vld [vmem:[#allocation62_spill] sm:$0xff]  ;;  %v17747_v6 = vpop.permute.xlu1 %7938  ;;  %v18859_v47 = vld [vmem:[#allocation51_spill] sm:$0xff] }
 0x498   : > { %9662 = vmatprep.mubr.bf16.mxu1 %v9173_v32  ;;  %v5252_v16 = vsel %vm13932_vm13, %v5247_v33, %v5251_v52  ;;  %v9821_v11 = vadd.f32 %v17550_v54, %v9532_v1  ;;  %v9537_v28 = vadd.f32 %v17189_v40, %v18855_v50  ;;  %v9540_v15 = vadd.f32 %v17189_v40, %v18856_v57  ;;  %v18857_v0 = vld [vmem:[#allocation50_spill] sm:$0xff]  ;;  %v17777_v50 = vpop.f32.mrf.mxu0 }
 0x499   : > { %12462 = vmatmul.mubr.msk.bf16.gmra.mxu0 %vm8684_vm10, %v10093_v44  ;;  %v5266_v20 = vsel %vm13932_vm13, %v5261_v29, %v5265_v38  ;;  %v5274_v25 = vor.u32 %v17540_v45, %v17538_v14  ;;  %v5277_v61 = vshll.u32 %v18857_v0, 16  ;;  %v5288_v26 = vor.u32 %v17554_v49, %v17552_v53  ;;  %v18858_v1 = vld [vmem:[#allocation46_spill] sm:$0xff]  ;;  %v17765_v49 = vld [vmem:[%s17144_s23] ss:$0 sm:$0xff] }
 0x49a   : > { %v17749_v33 = vcombine.low %v5252_v16, %v5266_v20  ;;  %v10037_v54 = vmax.f32 %v9821_v11, 0.0  ;;  %v9826_v22 = vadd.f32 %v17472_v8, %v9537_v28  ;;  %v9088_v40 = vsel %vm8781_vm14, %v9017_v7, %v18858_v1 }
 0x49b   : > { %v9829_v14 = vadd.f32 %v17526_v2, %v9540_v15  ;;  %v5275_v45 = vrot.slane %v5274_v25, 4  ;;  %v5279_v12 = vrot.slane %v5277_v61, 5  ;;  %v9176_v24 = vsel %vm8846_vm15, %v9088_v40, %v18859_v47  ;;  %v17769_v2 = vpop.permute.xlu0 %8196  ;;  %v9552_v25 = vpop.f32.mrf.mxu1 }
 0x49c   : > { %v10094_v52 = vpack.c.bf16 %v10037_v54, %v10036_v39  ;;  %v5289_v29 = vrot.slane %v5288_v26, 4  ;;  %v5291_v59 = vshll.u32 %v18860_v3, 16  ;;  %v10038_v8 = vmax.f32 %v9826_v22, 0.0  ;;  %v18861_v39 = vld [vmem:[#allocation54_spill] sm:$0xff]  ;;  %v17783_v0 = vpop.permute.xlu1 %7556  ;;  %v12894_v22 = vld [vmem:[#allocation2 + $0x1e0] sm:$0xf] }
 0x49d   : > { %v10039_v32 = vmax.f32 %v9829_v14, 0.0  ;;  %v5280_v53 = vsel %vm13932_vm13, %v5275_v45, %v5279_v12  ;;  %v9545_v7 = vadd.f32 %v17765_v49, %v17638_v30  ;;  %v5302_v38 = vor.u32 %v17642_v5, %v17640_v55  ;;  %v18862_v30 = vld [vmem:[#allocation34_spill] sm:$0xff]  ;;  %v9554_v54 = vpop.f32.mrf.mxu1  ;;  %v17794_v14 = vpop.f32.mrf.mxu0 }
 0x49e   : > { %12465 = vmatprep.mubr.msk.bf16.mxu0 %vm8684_vm10, %v10094_v52  ;;  %v5293_v44 = vrot.slane %v5291_v59, 5  ;;  %v5305_v16 = vshll.u32 %v18861_v39, 16  ;;  %v5316_v11 = vor.u32 %v17650_v58, %v17646_v63  ;;  %v5319_v57 = vshll.u32 %v18862_v30, 16  ;;  %v18863_v52 = vld [vmem:[#allocation66_spill] sm:$0xff]  ;;  %v18866_v39 = vld [vmem:[#allocation24_spill] sm:$0xff]  ;;  %v18869_v54 = vld [vmem:[#allocation37_spill] sm:$0xff] }
 0x49f   : > { %9663 = vmatmul.mubr.bf16.gmra.mxu1 %v8917_v51  ;;  %v10095_v28 = vpack.c.bf16 %v10039_v32, %v10038_v8  ;;  %v9834_v20 = vadd.f32 %v17606_v17, %v9545_v7  ;;  %v9548_v15 = vadd.f32 %v17765_v49, %v17668_v62  ;;  %v5303_v5 = vrot.slane %v5302_v38, 4  ;;  %v12895_v62 = vld [vmem:[#allocation2 + $0x1e8] sm:$0xf]  ;;  %v18865_v7 = vld [vmem:[#allocation19_spill] sm:$0xff]  ;;  %v17818_v30 = vpop.f32.mrf.mxu0 }
 0x4a0   : > { %9670 = vmatprep.mubr.bf16.mxu1 %v9176_v24  ;;  %v5294_v55 = vsel %vm13932_vm13, %v5289_v29, %v5293_v44  ;;  %v5307_v63 = vrot.slane %v5305_v16, 5  ;;  %v5317_v58 = vrot.slane %v5316_v11, 4  ;;  %v5321_v17 = vrot.slane %v5319_v57, 5  ;;  %v9555_v24 = vpop.f32.mrf.mxu1  ;;  %v17800_v29 = vpop.permute.xlu0 %8420  ;;  %v18864_v32 = vld [vmem:[#allocation29_spill] sm:$0xff]  ;;  %v18867_v11 = vld [vmem:[#allocation31_spill] sm:$0xff] }
 0x4a1   : > { %v17787_v61 = vcombine.low %v5280_v53, %v5294_v55  ;;  %12466 = vmatmul.mubr.msk.bf16.gmra.mxu0 %vm8684_vm10, %v10095_v28  ;;  %v9837_v51 = vadd.f32 %v17648_v35, %v9548_v15  ;;  %v11420_v26 = vcombine.low %v12894_v22, %v12895_v62  ;;  %v9553_v40 = vadd.f32 %v17765_v49, %v9552_v25  ;;  %v18868_v57 = vld [vmem:[#allocation21_spill] sm:$0xff]  ;;  %v12896_v55 = vld [vmem:[#allocation2 + $0x1f0] sm:$0xf]  ;;  %v18870_v62 = vld [vmem:[#allocation72_spill] sm:$0xff] }
 0x4a2   : > { %v5308_v1 = vsel %vm13932_vm13, %v5303_v5, %v5307_v63  ;;  %v10040_v45 = vmax.f32 %v9834_v20, 0.0  ;;  %v5322_v12 = vsel %vm13932_vm13, %v5317_v58, %v5321_v17  ;;  %v9556_v8 = vadd.f32 %v17765_v49, %v9555_v24  ;;  %v9557_v38 = vpop.f32.mrf.mxu1  ;;  %v17815_v20 = vpop.permute.xlu1 %7716  ;;  %v12897_v5 = vld [vmem:[#allocation2 + $0x1f8] sm:$0xf] }
 0x4a3   : > { %v10041_v47 = vmax.f32 %v9837_v51, 0.0  ;;  %v8759_v35 = vsel %vm8684_vm10, %v11420_v26, %v18863_v52  ;;  %v17802_v3 = vcombine.low %v5308_v1, %v5322_v12  ;;  %v9842_v59 = vadd.f32 %v17576_v41, %v9553_v40  ;;  %v17823_v51 = vpop.f32.mrf.mxu0  ;;  %v18871_v1 = vld [vmem:[#allocation26_spill] sm:$0xff] }
 0x4a4   : > { %v8831_v53 = vsel %vm8781_vm14, %v8759_v35, %v18864_v32  ;;  %v9020_v9 = vsel %vm8684_vm10, %v17610_v31, %v18865_v7  ;;  %v9845_v41 = vadd.f32 %v17620_v48, %v9556_v8  ;;  %v11421_v63 = vcombine.low %v12896_v55, %v12897_v5  ;;  %v8581_v58 = vpop.permute.xlu0 %8580  ;;  %v12899_v8 = vld [vmem:[#allocation2 + $0x208] sm:$0xf] }
 0x4a5   : > { %v10096_v44 = vpack.c.bf16 %v10041_v47, %v10040_v45  ;;  %v8920_v16 = vsel %vm8846_vm15, %v8831_v53, %v18866_v39  ;;  %v9090_v28 = vsel %vm8781_vm14, %v9020_v9, %v18867_v11  ;;  %v10042_v31 = vmax.f32 %v9842_v59, 0.0  ;;  %v18872_v45 = vld [vmem:[#allocation28_spill] sm:$0xff]  ;;  %v17839_v24 = vpop.f32.mrf.mxu0  ;;  %v18873_v7 = vld [vmem:[#allocation69_spill] sm:$0xff] }
 0x4a6   : > { %v9179_v15 = vsel %vm8846_vm15, %v9090_v28, %v18868_v57  ;;  %v10043_v25 = vmax.f32 %v9845_v41, 0.0  ;;  %v8762_v48 = vsel %vm8684_vm10, %v11421_v63, %v18869_v54  ;;  %v17827_v22 = vpop.permute.xlu1 %7940  ;;  %v9023_v40 = vsel %vm8684_vm10, %v17644_v10, %v18871_v1  ;;  %v12898_v59 = vld [vmem:[#allocation2 + $0x200] sm:$0xf] }
 0x4a7   : > { %9671 = vmatmul.mubr.bf16.gmra.mxu1 %v8920_v16  ;;  %12469 = vmatprep.mubr.msk.bf16.mxu0 %vm8684_vm10, %v10096_v44  ;;  %v8833_v26 = vsel %vm8781_vm14, %v8762_v48, %v18870_v62  ;;  %v9092_v47 = vsel %vm8781_vm14, %v9023_v40, %v17586_v56  ;;  %v11422_v32 = vcombine.low %v12898_v59, %v12899_v8  ;;  %v17845_v10 = vpop.f32.mrf.mxu0 }
 0x4a8   : > { %9678 = vmatprep.mubr.bf16.mxu1 %v9179_v15  ;;  %v10097_v17 = vpack.c.bf16 %v10043_v25, %v10042_v31  ;;  %v8923_v12 = vsel %vm8846_vm15, %v8833_v26, %v18872_v45  ;;  %v9182_v52 = vsel %vm8846_vm15, %v9092_v47, %v17618_v21  ;;  %v8199_v35 = vpop.permute.xlu0 %8198  ;;  %v9026_v44 = vsel %vm8684_vm10, %v17670_v19, %v17666_v37  ;;  %v12900_v37 = vld [vmem:[#allocation2 + $0x210] sm:$0xf]  ;;  %v12901_v19 = vld [vmem:[#allocation2 + $0x218] sm:$0xf] }
 0x4a9   : > { %v8765_v9 = vsel %vm8684_vm10, %v11422_v32, %v18873_v7  ;;  %v9094_v38 = vsel %vm8781_vm14, %v9026_v44, %v17698_v23  ;;  %v17858_v11 = vpop.f32.mrf.mxu0  ;;  %v11423_v15 = vcombine.low %v12900_v37, %v12901_v19  ;;  %v12902_v45 = vld [vmem:[#allocation2 + $0x230] sm:$0xf]  ;;  %v9032_v47 = vsel %vm8684_vm10, %v17749_v33, %v8199_v35 }
 0x4aa   : > { %12470 = vmatmul.mubr.msk.bf16.gmra.mxu0 %vm8684_vm10, %v10097_v17  ;;  %v17843_v53 = vpop.permute.xlu1 %7558  ;;  %v8835_v56 = vsel %vm8781_vm14, %v8765_v9, %v17604_v60  ;;  %v9185_v28 = vsel %vm8846_vm15, %v9094_v38, %v17732_v34  ;;  %v9029_v17 = vsel %vm8684_vm10, %v17714_v13, %v17769_v2  ;;  %v12903_v13 = vld [vmem:[#allocation2 + $0x238] sm:$0xf]  ;;  %v12905_v9 = vld [vmem:[#allocation2 + $0x248] sm:$0xf] }
 0x4ab   : > { %v8926_v21 = vsel %vm8846_vm15, %v8835_v56, %v17634_v18  ;;  %v17863_v31 = vpop.f32.mrf.mxu0  ;;  %v8768_v55 = vsel %vm8684_vm10, %v11423_v15, %v17677_v42  ;;  %v11424_v2 = vcombine.low %v12902_v45, %v12903_v13  ;;  %v12908_v45 = vld [vmem:[#allocation2 + $0x260] sm:$0xf]  ;;  %v12909_v13 = vld [vmem:[#allocation2 + $0x268] sm:$0xf] }
 0x4ac   : > { %v8837_v63 = vsel %vm8781_vm14, %v8768_v55, %v17712_v36 }
 0x4ad   : > { %v8423_v39 = vpop.permute.xlu0 %8422  ;;  %v8929_v48 = vsel %vm8846_vm15, %v8837_v63, %v17747_v6  ;;  %v17880_v40 = vpop.f32.mrf.mxu0 }
 0x4ae   : > { %v7719_v41 = vpop.permute.xlu1 %7718  ;;  %v9098_v59 = vsel %vm8781_vm14, %v9032_v47, %v8423_v39 }
 0x4af   : > { %9679 = vmatmul.mubr.bf16.gmra.mxu1 %v8923_v12  ;;  %v17883_v6 = vpop.f32.mrf.mxu0 }
 0x4b0   : > { %9686 = vmatprep.mubr.bf16.mxu1 %v9182_v52 }
 0x4b1   : > { %v17895_v32 = vpop.f32.mrf.mxu0 }
 0x4b2   : > { %v9560_v16 = vpop.f32.mrf.mxu1  ;;  %v7943_v62 = vpop.permute.xlu1 %7942 }
 0x4b3   : > { %v9561_v60 = vadd.f32 %v17765_v49, %v9560_v16 }
 0x4b4   : > { %v9562_v57 = vpop.f32.mrf.mxu1 }
 0x4b5   : > { %v9850_v23 = vadd.f32 %v17704_v27, %v9561_v60  ;;  %v9096_v27 = vsel %vm8781_vm14, %v9029_v17, %v17800_v29  ;;  %v8771_v29 = vsel %vm8684_vm10, %v11424_v2, %v17783_v0  ;;  %v12904_v0 = vld [vmem:[#allocation2 + $0x240] sm:$0xf]  ;;  %v11427_v2 = vcombine.low %v12908_v45, %v12909_v13 }
 0x4b6   : > { %v9563_v18 = vpop.f32.mrf.mxu1  ;;  %v8583_v5 = vpop.permute.xlu0 %8582  ;;  %v9188_v42 = vsel %vm8846_vm15, %v9096_v27, %v8581_v58  ;;  %v8839_v58 = vsel %vm8781_vm14, %v8771_v29, %v17815_v20  ;;  %v11425_v56 = vcombine.low %v12904_v0, %v12905_v9 }
 0x4b7   : > { %9687 = vmatmul.mubr.bf16.gmra.mxu1 %v8926_v21  ;;  %v9564_v25 = vadd.f32 %v17765_v49, %v9563_v18  ;;  %v10044_v26 = vmax.f32 %v9850_v23, 0.0  ;;  %v8932_v52 = vsel %vm8846_vm15, %v8839_v58, %v17827_v22  ;;  %v9191_v8 = vsel %vm8846_vm15, %v9098_v59, %v8583_v5  ;;  %v17897_v21 = vpop.f32.mrf.mxu0  ;;  %v12907_v23 = vld [vmem:[#allocation2 + $0x258] sm:$0xf] }
 0x4b8   : > { %9694 = vmatprep.mubr.bf16.mxu1 %v9185_v28  ;;  %v9565_v34 = vpop.f32.mrf.mxu1  ;;  %v8774_v33 = vsel %vm8684_vm10, %v11425_v56, %v17843_v53 }
 0x4b9   : > { %v9853_v54 = vadd.f32 %v17754_v46, %v9564_v25  ;;  %v8841_v35 = vsel %vm8781_vm14, %v8774_v33, %v7719_v41  ;;  %v17908_v19 = vpop.f32.mrf.mxu0 }
 0x4ba   : > { %v8935_v16 = vsel %vm8846_vm15, %v8841_v35, %v7943_v62 }
 0x4bb   : > { %v10045_v1 = vmax.f32 %v9853_v54, 0.0  ;;  %v8201_v46 = vpop.permute.xlu0 %8200  ;;  %v17913_v5 = vpop.f32.mrf.mxu0 }
 0x4bc   : > { %v9035_v38 = vsel %vm8684_vm10, %v17787_v61, %v8201_v46  ;;  %v12906_v61 = vld [vmem:[#allocation2 + $0x250] sm:$0xf] }
 0x4bd   : > { %v10098_v36 = vpack.c.bf16 %v10045_v1, %v10044_v26  ;;  %v11426_v25 = vcombine.low %v12906_v61, %v12907_v23 }
 0x4be   : > { %v7561_v12 = vpop.permute.xlu1 %7560 }
 0x4bf   : > { %9695 = vmatmul.mubr.bf16.gmra.mxu1 %v8929_v48  ;;  %12473 = vmatprep.mubr.msk.bf16.mxu0 %vm8684_vm10, %v10098_v36  ;;  %v8777_v34 = vsel %vm8684_vm10, %v11426_v25, %v7561_v12 }
 0x4c0   : > { %9702 = vmatprep.mubr.bf16.mxu1 %v9188_v42  ;;  %v17918_v42 = vpop.f32.mrf.mxu0 }
 0x4c1   : > { %v8425_v7 = vpop.permute.xlu0 %8424 }
 0x4c2   : > { %v7721_v44 = vpop.permute.xlu1 %7720  ;;  %v9100_v28 = vsel %vm8781_vm14, %v9035_v38, %v8425_v7  ;;  %v17921_v26 = vpop.f32.mrf.mxu0 }
 0x4c3   : > { %v8843_v54 = vsel %vm8781_vm14, %v8777_v34, %v7721_v44 }
 0x4c4   : > { %v17923_v36 = vpop.f32.mrf.mxu0 }
 0x4c6   : > { %v7945_v53 = vpop.permute.xlu1 %7944 }
 0x4c7   : > { %9703 = vmatmul.mubr.bf16.gmra.mxu1 %v8932_v52  ;;  %v8938_v48 = vsel %vm8846_vm15, %v8843_v54, %v7945_v53  ;;  %v17929_v52 = vpop.f32.mrf.mxu0 }
 0x4c8   : > { %9710 = vmatprep.mubr.bf16.mxu1 %v9191_v8  ;;  %v9568_v20 = vpop.f32.mrf.mxu1 }
 0x4c9   : > { %v9569_v22 = vadd.f32 %v17765_v49, %v9568_v20 }
 0x4ca   : > { %v9570_v39 = vpop.f32.mrf.mxu1 }
 0x4cb   : > { %v9858_v15 = vadd.f32 %v17683_v4, %v9569_v22 }
 0x4cc   : > { %v9571_v37 = vpop.f32.mrf.mxu1 }
 0x4cd   : > { %v8585_v60 = vpop.permute.xlu0 %8584  ;;  %v9572_v41 = vadd.f32 %v17765_v49, %v9571_v37  ;;  %v10046_v63 = vmax.f32 %v9858_v15, 0.0 }
 0x4ce   : > { %v9194_v57 = vsel %vm8846_vm15, %v9100_v28, %v8585_v60  ;;  %v9573_v18 = vpop.f32.mrf.mxu1 }
 0x4cf   : > { %9711 = vmatmul.mubr.bf16.gmra.mxu1 %v8935_v16  ;;  %v9861_v55 = vadd.f32 %v17725_v43, %v9572_v41 }
 0x4d0   : > { %9718 = vmatprep.mubr.bf16.mxu1 %v9194_v57 }
 0x4d1   : > { %v10047_v17 = vmax.f32 %v9861_v55, 0.0 }
 0x4d3   : > { %v10099_v4 = vpack.c.bf16 %v10047_v17, %v10046_v63  ;;  %v8203_v62 = vpop.permute.xlu0 %8202 }
 0x4d4   : > { %v9038_v46 = vsel %vm8684_vm10, %v17802_v3, %v8203_v62  ;;  %v17935_v3 = vpop.f32.mrf.mxu0 }
 0x4d5   : > { %12474 = vmatmul.mubr.msk.bf16.gmra.mxu0 %vm8684_vm10, %v10099_v4 }
 0x4d6   : > { %v7563_v27 = vpop.permute.xlu1 %7562  ;;  %v17939_v22 = vpop.f32.mrf.mxu0 }
 0x4d7   : > { %9719 = vmatmul.mubr.bf16.gmra.mxu1 %v8938_v48  ;;  %v8780_v12 = vsel %vm8684_vm10, %v11427_v2, %v7563_v27 }
 0x4d8   : > { %v8427_v1 = vpop.permute.xlu0 %8426  ;;  %v17942_v39 = vpop.f32.mrf.mxu0 }
 0x4d9   : > { %v9102_v58 = vsel %vm8781_vm14, %v9038_v46, %v8427_v1 }
 0x4da   : > { %v7723_v43 = vpop.permute.xlu1 %7722  ;;  %v17944_v57 = vpop.f32.mrf.mxu0 }
 0x4db   : > { %v8845_v59 = vsel %vm8781_vm14, %v8780_v12, %v7723_v43 }
 0x4dc   : > { %v17947_v37 = vpop.f32.mrf.mxu0 }
 0x4de   : > { %v7947_v29 = vpop.permute.xlu1 %7946  ;;  %v17949_v53 = vpop.f32.mrf.mxu0 }
 0x4df   : > { %v8941_v7 = vsel %vm8846_vm15, %v8845_v59, %v7947_v29 }
 0x4e3   : > { %v8587_v47 = vpop.permute.xlu0 %8586 }
 0x4e4   : > { %v9197_v8 = vsel %vm8846_vm15, %v9102_v58, %v8587_v47 }
 0x4e5   : > { %9726 = vmatprep.mubr.bf16.mxu1 %v9197_v8  ;;  %v9576_v0 = vpop.f32.mrf.mxu1 }
 0x4e6   : > { %9727 = vmatmul.mubr.bf16.gmra.mxu1 %v8941_v7  ;;  %v9577_v9 = vadd.f32 %v17765_v49, %v9576_v0 }
 0x4e7   : > { %v9578_v56 = vpop.f32.mrf.mxu1 }
 0x4e8   : > { %v9866_v20 = vadd.f32 %v17794_v14, %v9577_v9  ;;  %v17951_v14 = vpop.f32.mrf.mxu0 }
 0x4e9   : > { %v9579_v44 = vpop.f32.mrf.mxu1 }
 0x4ea   : > { %v9580_v33 = vadd.f32 %v17765_v49, %v9579_v44  ;;  %v10048_v16 = vmax.f32 %v9866_v20, 0.0 }
 0x4eb   : > { %v9581_v35 = vpop.f32.mrf.mxu1 }
 0x4ec   : > { %v9869_v38 = vadd.f32 %v17823_v51, %v9580_v33  ;;  %v17954_v51 = vpop.f32.mrf.mxu0 }
 0x4ee   : > { %v10049_v28 = vmax.f32 %v9869_v38, 0.0  ;;  %v17958_v34 = vpop.f32.mrf.mxu0 }
 0x4f0   : > { %v10100_v60 = vpack.c.bf16 %v10049_v28, %v10048_v16  ;;  %v17961_v48 = vpop.f32.mrf.mxu0 }
 0x4f2   : > { %12477 = vmatprep.mubr.msk.bf16.mxu0 %vm8684_vm10, %v10100_v60  ;;  %v17963_v4 = vpop.f32.mrf.mxu0 }
 0x4f4   : > { %v17967_v1 = vpop.f32.mrf.mxu0 }
 0x4f6   : > { %v17972_v29 = vpop.f32.mrf.mxu0 }
 0x4f8   : > { %v17974_v59 = vpop.f32.mrf.mxu0 }
 0x4fa   : > { %v17977_v7 = vpop.f32.mrf.mxu0 }
 0x4fc   : > { %v9584_v15 = vpop.f32.mrf.mxu1  ;;  %v17980_v56 = vpop.f32.mrf.mxu0 }
 0x4fd   : > { %v9585_v41 = vadd.f32 %v17765_v49, %v9584_v15 }
 0x4fe   : > { %v9586_v18 = vpop.f32.mrf.mxu1  ;;  %v17985_v35 = vpop.f32.mrf.mxu0 }
 0x4ff   : > { %v9874_v23 = vadd.f32 %v17777_v50, %v9585_v41 }
 0x500   : > { %v9587_v61 = vpop.f32.mrf.mxu1  ;;  %v17987_v60 = vpop.f32.mrf.mxu0 }
 0x501   : > { %v9588_v25 = vadd.f32 %v17765_v49, %v9587_v61  ;;  %v10050_v17 = vmax.f32 %v9874_v23, 0.0 }
 0x502   : > { %v9589_v55 = vpop.f32.mrf.mxu1  ;;  %v17990_v15 = vpop.f32.mrf.mxu0 }
 0x503   : > { %v9877_v63 = vadd.f32 %v17818_v30, %v9588_v25 }
 0x504   : > { %v17993_v61 = vpop.f32.mrf.mxu0 }
 0x505   : > { %v10051_v54 = vmax.f32 %v9877_v63, 0.0 }
 0x507   : > { %v10101_v27 = vpack.c.bf16 %v10051_v54, %v10050_v17  ;;  %v17998_v17 = vpop.f32.mrf.mxu0 }
 0x508   : > { %v9592_v62 = vpop.f32.mrf.mxu1 }
 0x509   : > { %12478 = vmatmul.mubr.msk.bf16.gmra.mxu0 %vm8684_vm10, %v10101_v27  ;;  %v9593_v43 = vadd.f32 %v17765_v49, %v9592_v62 }
 0x50a   : > { %v9594_v50 = vpop.f32.mrf.mxu1 }
 0x50b   : > { %v9882_v13 = vadd.f32 %v17845_v10, %v9593_v43 }
 0x50c   : > { %v9595_v45 = vpop.f32.mrf.mxu1 }
 0x50d   : > { %v9596_v30 = vadd.f32 %v17765_v49, %v9595_v45  ;;  %v10052_v12 = vmax.f32 %v9882_v13, 0.0  ;;  %v18008_v45 = vld [vmem:[%s18004_s21] ss:$0 sm:$0xff]  ;;  %v18010_v13 = vpop.f32.mrf.mxu0 }
 0x50e   : > { %v9597_v2 = vpop.f32.mrf.mxu1 }
 0x50f   : > { %v9885_v46 = vadd.f32 %v17863_v31, %v9596_v30 }
 0x511   : > { %v10053_v58 = vmax.f32 %v9885_v46, 0.0 }
 0x513   : > { %v10102_v47 = vpack.c.bf16 %v10053_v58, %v10052_v12  ;;  %v11844_v58 = vld [vmem:[%s13182_s19] sm:$0xff]  }
 0x515   : > { %12481 = vmatprep.mubr.msk.bf16.mxu0 %vm8684_vm10, %v10102_v47 }
 0x516   : > { %v9600_v8 = vpop.f32.mrf.mxu1 }
 0x517   : > { %v9601_v0 = vadd.f32 %v17765_v49, %v9600_v8 }
 0x518   : > { %v9602_v10 = vpop.f32.mrf.mxu1 }
 0x519   : > { %v9890_v31 = vadd.f32 %v17839_v24, %v9601_v0 }
 0x51a   : > { %v9603_v9 = vpop.f32.mrf.mxu1 }
 0x51b   : > { %v9604_v44 = vadd.f32 %v17765_v49, %v9603_v9  ;;  %v10054_v38 = vmax.f32 %v9890_v31, 0.0 }
 0x51c   : > { %v9605_v20 = vpop.f32.mrf.mxu1 }
 0x51d   : > { %v9893_v33 = vadd.f32 %v17858_v11, %v9604_v44  ;;  %v11845_v44 = vunpack.c.l.bf16 %v11844_v58 }
 0x51f   : > { %v10055_v16 = vmax.f32 %v9893_v33, 0.0 }
 0x521   : > { %v10103_v28 = vpack.c.bf16 %v10055_v16, %v10054_v38 }
 0x523   : > { %12482 = vmatmul.mubr.msk.bf16.gmra.mxu0 %vm8684_vm10, %v10103_v28 }
 0x526   : > { %v9608_v41 = vpop.f32.mrf.mxu1 }
 0x527   : > { %v9609_v24 = vadd.f32 %v17765_v49, %v9608_v41 }
 0x528   : > { %v9610_v18 = vpop.f32.mrf.mxu1 }
 0x529   : > { %v9898_v23 = vadd.f32 %v17883_v6, %v9609_v24 }
 0x52a   : > { %v9611_v11 = vpop.f32.mrf.mxu1 }
 0x52b   : > { %v9612_v25 = vadd.f32 %v17765_v49, %v9611_v11  ;;  %v10056_v54 = vmax.f32 %v9898_v23, 0.0  ;;  %v11846_v11 = vunpack.c.h.bf16 %v11844_v58 }
 0x52c   : > { %v9613_v55 = vpop.f32.mrf.mxu1 }
 0x52d   : > { %v9901_v63 = vadd.f32 %v17897_v21, %v9612_v25  ;;  %v12131_v21 = vld [vmem:[%s13182_s19 + $0x8] sm:$0xff]  }
 0x52e   : > { %v11849_v8 = vunpack.c.l.bf16 %v12131_v21  ;;  %v11850_v33 = vunpack.c.h.bf16 %v12131_v21 }
 0x52f   : > { %v10057_v27 = vmax.f32 %v9901_v63, 0.0  ;;  %v9616_v62 = vpop.f32.mrf.mxu1 }
 0x530   : > { %v9617_v43 = vadd.f32 %v17765_v49, %v9616_v62 }
 0x531   : > { %v10104_v6 = vpack.c.bf16 %v10057_v27, %v10056_v54  ;;  %v9618_v50 = vpop.f32.mrf.mxu1 }
 0x532   : > { %v9906_v2 = vadd.f32 %v17880_v40, %v9617_v43 }
 0x533   : > { %v9619_v30 = vpop.f32.mrf.mxu1  ;;  %12485 = vmatprep.mubr.msk.bf16.mxu0 %vm8684_vm10, %v10104_v6 }
 0x534   : > { %v9620_v46 = vadd.f32 %v17765_v49, %v9619_v30  ;;  %v12455_v12 = vpop.f32.mrf.mxu0  ;;  %v10058_v38 = vmax.f32 %v9906_v2, 0.0 }
 0x535   : > { %v9621_v47 = vpop.f32.mrf.mxu1  ;;  %v10410_v0 = vadd.f32 %v12455_v12, %v18008_v45 }
 0x536   : > { %v9909_v10 = vadd.f32 %v17895_v32, %v9620_v46  ;;  %v10401_v9 = vpop.f32.mrf.mxu0 }
 0x537   : > { %v9624_v31 = vpop.f32.mrf.mxu1  ;;  %v10402_v20 = vadd.f32 %v18008_v45, %v10401_v9  ;;  %v10658_v41 = vadd.f32 %v11849_v8, %v10410_v0 }
 0x538   : > { %v10059_v16 = vmax.f32 %v9909_v10, 0.0  ;;  %v9625_v40 = vadd.f32 %v17765_v49, %v9624_v31  ;;  %v12456_v28 = vpop.f32.mrf.mxu0 }
 0x539   : > { %v9626_v24 = vpop.f32.mrf.mxu1  ;;  %v10413_v18 = vadd.f32 %v12456_v28, %v18008_v45  ;;  %v10656_v32 = vadd.f32 %v11845_v44, %v10402_v20  ;;  %v10722_v43 = vmax.f32 %v10658_v41, 0.0 }
 0x53a   : > { %v10105_v23 = vpack.c.bf16 %v10059_v16, %v10058_v38  ;;  %v10404_v25 = vpop.f32.mrf.mxu0  ;;  %v9914_v27 = vadd.f32 %v17913_v5, %v9625_v40  ;;  %v12133_v38 = vld [vmem:[%s13182_s19 + $0x18] sm:$0xff]  }
 0x53b   : > { %v9627_v55 = vpop.f32.mrf.mxu1  ;;  %v10659_v63 = vadd.f32 %v11850_v33, %v10413_v18  ;;  %v10405_v54 = vadd.f32 %v18008_v45, %v10404_v25  ;;  %v10720_v2 = vmax.f32 %v10656_v32, 0.0  ;;  %v12132_v18 = vld [vmem:[%s13182_s19 + $0x10] sm:$0xff]  }
 0x53c   : > { %v9628_v62 = vadd.f32 %v17765_v49, %v9627_v55  ;;  %12486 = vmatmul.mubr.msk.bf16.gmra.mxu0 %vm8684_vm10, %v10105_v23  ;;  %v10060_v47 = vmax.f32 %v9914_v27, 0.0  ;;  %v11857_v23 = vunpack.c.l.bf16 %v12133_v38  ;;  %v11858_v27 = vunpack.c.h.bf16 %v12133_v38 }
 0x53d   : > { %v10723_v6 = vmax.f32 %v10659_v63, 0.0  ;;  %v9629_v50 = vpop.f32.mrf.mxu1  ;;  %v10657_v21 = vadd.f32 %v11846_v11, %v10405_v54  ;;  %v11853_v63 = vunpack.c.l.bf16 %v12132_v18 }
 0x53e   : > { %v9917_v30 = vadd.f32 %v17921_v26, %v9628_v62 }
 0x53f   : > { %v11979_v46 = vpack.c.bf16 %v10723_v6, %v10722_v43  ;;  %v10721_v12 = vmax.f32 %v10657_v21, 0.0  ;;  %v9632_v58 = vpop.f32.mrf.mxu1 }
 0x540   : > { %v10061_v8 = vmax.f32 %v9917_v30, 0.0  ;;  %v9633_v0 = vadd.f32 %v17765_v49, %v9632_v58  ;;  %v11854_v30 = vunpack.c.h.bf16 %v12132_v18 }
 0x541   : > { %12162 = vst [vmem:[%s18029_s10 + $0x8] sm:$0xff] %v11979_v46   ;;  %v11974_v5 = vpack.c.bf16 %v10721_v12, %v10720_v2  ;;  %v9634_v10 = vpop.f32.mrf.mxu1 }
 0x542   : > { %v10106_v9 = vpack.c.bf16 %v10061_v8, %v10060_v47  ;;  %v9922_v31 = vadd.f32 %v17908_v19, %v9633_v0 }
 0x543   : > { %11975 = vst [vmem:[%s18029_s10] sm:$0xff] %v11974_v5   ;;  %v9635_v26 = vpop.f32.mrf.mxu1 }
 0x544   : > { %v9636_v44 = vadd.f32 %v17765_v49, %v9635_v26  ;;  %12489 = vmatprep.mubr.msk.bf16.mxu0 %vm8684_vm10, %v10106_v9  ;;  %v10062_v40 = vmax.f32 %v9922_v31, 0.0 }
 0x545   : > { %v9637_v20 = vpop.f32.mrf.mxu1 }
 0x546   : > { %v9925_v33 = vadd.f32 %v17918_v42, %v9636_v44 }
 0x547   : > { %v9640_v16 = vpop.f32.mrf.mxu1 }
 0x548   : > { %v10063_v28 = vmax.f32 %v9925_v33, 0.0  ;;  %v9641_v41 = vadd.f32 %v17765_v49, %v9640_v16  ;;  %v12459_v24 = vpop.f32.mrf.mxu0 }
 0x549   : > { %v9642_v11 = vpop.f32.mrf.mxu1  ;;  %v10426_v25 = vadd.f32 %v12459_v24, %v18008_v45 }
 0x54a   : > { %v10107_v19 = vpack.c.bf16 %v10063_v28, %v10062_v40  ;;  %v10417_v32 = vpop.f32.mrf.mxu0  ;;  %v9930_v42 = vadd.f32 %v17929_v52, %v9641_v41  ;;  %v12135_v11 = vld [vmem:[%s13182_s19 + $0x28] sm:$0xff]  }
 0x54b   : > { %v9643_v55 = vpop.f32.mrf.mxu1  ;;  %v10418_v54 = vadd.f32 %v18008_v45, %v10417_v32  ;;  %v10662_v50 = vadd.f32 %v11857_v23, %v10426_v25 }
 0x54c   : > { %v9644_v62 = vadd.f32 %v17765_v49, %v9643_v55  ;;  %12490 = vmatmul.mubr.msk.bf16.gmra.mxu0 %vm8684_vm10, %v10107_v19  ;;  %v12460_v43 = vpop.f32.mrf.mxu0  ;;  %v10064_v0 = vmax.f32 %v9930_v42, 0.0 }
 0x54d   : > { %v9645_v6 = vpop.f32.mrf.mxu1  ;;  %v10429_v21 = vadd.f32 %v12460_v43, %v18008_v45  ;;  %v10660_v58 = vadd.f32 %v11853_v63, %v10418_v54  ;;  %v10726_v9 = vmax.f32 %v10662_v50, 0.0  ;;  %v11865_v63 = vunpack.c.l.bf16 %v12135_v11 }
 0x54e   : > { %v9933_v2 = vadd.f32 %v17939_v22, %v9644_v62  ;;  %v10420_v46 = vpop.f32.mrf.mxu0  ;;  %v11866_v6 = vunpack.c.h.bf16 %v12135_v11 }
 0x54f   : > { %v9648_v12 = vpop.f32.mrf.mxu1  ;;  %v10663_v47 = vadd.f32 %v11858_v27, %v10429_v21  ;;  %v10421_v8 = vadd.f32 %v18008_v45, %v10420_v46  ;;  %v10724_v22 = vmax.f32 %v10660_v58, 0.0  ;;  %v12134_v27 = vld [vmem:[%s13182_s19 + $0x20] sm:$0xff]  }
 0x550   : > { %v10065_v52 = vmax.f32 %v9933_v2, 0.0  ;;  %v9649_v5 = vadd.f32 %v17765_v49, %v9648_v12  ;;  %v11861_v21 = vunpack.c.l.bf16 %v12134_v27 }
 0x551   : > { %v9650_v10 = vpop.f32.mrf.mxu1  ;;  %v10727_v26 = vmax.f32 %v10663_v47, 0.0  ;;  %v10661_v31 = vadd.f32 %v11854_v30, %v10421_v8  ;;  %v12137_v47 = vld [vmem:[%s13182_s19 + $0x38] sm:$0xff]  }
 0x552   : > { %v10108_v44 = vpack.c.bf16 %v10065_v52, %v10064_v0  ;;  %v9938_v16 = vadd.f32 %v17923_v36, %v9649_v5  ;;  %v11862_v0 = vunpack.c.h.bf16 %v12134_v27 }
 0x553   : > { %v9651_v20 = vpop.f32.mrf.mxu1  ;;  %v11989_v33 = vpack.c.bf16 %v10727_v26, %v10726_v9  ;;  %v10725_v38 = vmax.f32 %v10661_v31, 0.0  ;;  %v12136_v26 = vld [vmem:[%s13182_s19 + $0x30] sm:$0xff]  }
 0x554   : > { %v9652_v40 = vadd.f32 %v17765_v49, %v9651_v20  ;;  %12493 = vmatprep.mubr.msk.bf16.mxu0 %vm8684_vm10, %v10108_v44  ;;  %v10066_v23 = vmax.f32 %v9938_v16, 0.0 }
 0x555   : > { %v9653_v28 = vpop.f32.mrf.mxu1  ;;  %12164 = vst [vmem:[%s18029_s10 + $0x18] sm:$0xff] %v11989_v33   ;;  %v11984_v41 = vpack.c.bf16 %v10725_v38, %v10724_v22  ;;  %v11873_v22 = vunpack.c.l.bf16 %v12137_v47 }
 0x556   : > { %v9941_v24 = vadd.f32 %v17935_v3, %v9652_v40 }
 0x557   : > { %v9656_v18 = vpop.f32.mrf.mxu1  ;;  %12163 = vst [vmem:[%s18029_s10 + $0x10] sm:$0xff] %v11984_v41  }
 0x558   : > { %v10067_v25 = vmax.f32 %v9941_v24, 0.0  ;;  %v9657_v19 = vadd.f32 %v17765_v49, %v9656_v18  ;;  %v11869_v18 = vunpack.c.l.bf16 %v12136_v26 }
 0x559   : > { %v9658_v32 = vpop.f32.mrf.mxu1  ;;  %v12463_v55 = vpop.f32.mrf.mxu0 }
 0x55a   : > { %v10109_v36 = vpack.c.bf16 %v10067_v25, %v10066_v23  ;;  %v10442_v54 = vadd.f32 %v12463_v55, %v18008_v45  ;;  %v9946_v43 = vadd.f32 %v17944_v57, %v9657_v19  ;;  %v11874_v19 = vunpack.c.h.bf16 %v12137_v47 }
 0x55b   : > { %v9659_v42 = vpop.f32.mrf.mxu1  ;;  %v10433_v62 = vpop.f32.mrf.mxu0 }
 0x55c   : > { %v9660_v3 = vadd.f32 %v17765_v49, %v9659_v42  ;;  %12494 = vmatmul.mubr.msk.bf16.gmra.mxu0 %vm8684_vm10, %v10109_v36  ;;  %v10434_v30 = vadd.f32 %v18008_v45, %v10433_v62  ;;  %v10666_v12 = vadd.f32 %v11865_v63, %v10442_v54  ;;  %v10068_v52 = vmax.f32 %v9946_v43, 0.0 }
 0x55d   : > { %v9661_v50 = vpop.f32.mrf.mxu1  ;;  %v12464_v2 = vpop.f32.mrf.mxu0  ;;  %v11870_v62 = vunpack.c.h.bf16 %v12136_v26 }
 0x55e   : > { %v9949_v46 = vadd.f32 %v17949_v53, %v9660_v3  ;;  %v10445_v58 = vadd.f32 %v12464_v2, %v18008_v45  ;;  %v10664_v44 = vadd.f32 %v11861_v21, %v10434_v30  ;;  %v10730_v38 = vmax.f32 %v10666_v12, 0.0 }
 0x55f   : > { %v9664_v8 = vpop.f32.mrf.mxu1  ;;  %v10436_v57 = vpop.f32.mrf.mxu0 }
 0x560   : > { %v10069_v5 = vmax.f32 %v9949_v46, 0.0  ;;  %v9665_v10 = vadd.f32 %v17765_v49, %v9664_v8  ;;  %v10667_v9 = vadd.f32 %v11866_v6, %v10445_v58  ;;  %v10437_v20 = vadd.f32 %v18008_v45, %v10436_v57  ;;  %v12139_v57 = vld [vmem:[%s13182_s19 + $0x48] sm:$0xff]  }
 0x561   : > { %v9666_v31 = vpop.f32.mrf.mxu1  ;;  %v12467_v33 = vpop.f32.mrf.mxu0  ;;  %v10728_v55 = vmax.f32 %v10664_v44, 0.0 }
 0x562   : > { %v10110_v53 = vpack.c.bf16 %v10069_v5, %v10068_v52  ;;  %v10731_v16 = vmax.f32 %v10667_v9, 0.0  ;;  %v10458_v40 = vadd.f32 %v12467_v33, %v18008_v45  ;;  %v9954_v28 = vadd.f32 %v17942_v39, %v9665_v10 }
 0x563   : > { %v9667_v41 = vpop.f32.mrf.mxu1  ;;  %v10665_v24 = vadd.f32 %v11862_v0, %v10437_v20  ;;  %v10449_v11 = vpop.f32.mrf.mxu0  ;;  %v12138_v20 = vld [vmem:[%s13182_s19 + $0x40] sm:$0xff]   ;;  %v11881_v33 = vunpack.c.l.bf16 %v12139_v57 }
 0x564   : > { %v9668_v23 = vadd.f32 %v17765_v49, %v9667_v41  ;;  %12497 = vmatprep.mubr.msk.bf16.mxu0 %vm8684_vm10, %v10110_v53  ;;  %v11999_v25 = vpack.c.bf16 %v10731_v16, %v10730_v38  ;;  %v10450_v63 = vadd.f32 %v18008_v45, %v10449_v11  ;;  %v10670_v39 = vadd.f32 %v11873_v22, %v10458_v40 }
 0x565   : > { %v9669_v32 = vpop.f32.mrf.mxu1  ;;  %v10729_v36 = vmax.f32 %v10665_v24, 0.0  ;;  %v12468_v54 = vpop.f32.mrf.mxu0  ;;  %v10070_v43 = vmax.f32 %v9954_v28, 0.0  ;;  %v11882_v24 = vunpack.c.h.bf16 %v12139_v57 }
 0x566   : > { %v9957_v27 = vadd.f32 %v17947_v37, %v9668_v23  ;;  %12166 = vst [vmem:[%s18029_s10 + $0x28] sm:$0xff] %v11999_v25   ;;  %v10461_v42 = vadd.f32 %v12468_v54, %v18008_v45  ;;  %v10668_v50 = vadd.f32 %v11869_v18, %v10450_v63  ;;  %v10734_v47 = vmax.f32 %v10670_v39, 0.0 }
 0x567   : > { %v9672_v3 = vpop.f32.mrf.mxu1  ;;  %v11994_v6 = vpack.c.bf16 %v10729_v36, %v10728_v55  ;;  %v10452_v21 = vpop.f32.mrf.mxu0  ;;  %v11878_v36 = vunpack.c.h.bf16 %v12138_v20 }
 0x568   : > { %v10071_v30 = vmax.f32 %v9957_v27, 0.0  ;;  %v9673_v2 = vadd.f32 %v17765_v49, %v9672_v3  ;;  %v10671_v46 = vadd.f32 %v11874_v19, %v10461_v42  ;;  %v10453_v12 = vadd.f32 %v18008_v45, %v10452_v21 }
 0x569   : > { %v9674_v58 = vpop.f32.mrf.mxu1  ;;  %12165 = vst [vmem:[%s18029_s10 + $0x20] sm:$0xff] %v11994_v6   ;;  %v10732_v5 = vmax.f32 %v10668_v50, 0.0 }
 0x56a   : > { %v10111_v37 = vpack.c.bf16 %v10071_v30, %v10070_v43  ;;  %v10735_v8 = vmax.f32 %v10671_v46, 0.0  ;;  %v10669_v0 = vadd.f32 %v11870_v62, %v10453_v12  ;;  %v9962_v10 = vadd.f32 %v17954_v51, %v9673_v2  ;;  %v12471_v44 = vpop.f32.mrf.mxu0 }
 0x56b   : > { %v9675_v52 = vpop.f32.mrf.mxu1  ;;  %v10474_v53 = vadd.f32 %v12471_v44, %v18008_v45  ;;  %v11877_v51 = vunpack.c.l.bf16 %v12138_v20 }
 0x56c   : > { %v9676_v9 = vadd.f32 %v17765_v49, %v9675_v52  ;;  %12498 = vmatmul.mubr.msk.bf16.gmra.mxu0 %vm8684_vm10, %v10111_v37  ;;  %v12009_v26 = vpack.c.bf16 %v10735_v8, %v10734_v47  ;;  %v10733_v31 = vmax.f32 %v10669_v0, 0.0  ;;  %v10465_v40 = vpop.f32.mrf.mxu0  ;;  %v10072_v18 = vmax.f32 %v9962_v10, 0.0 }
 0x56d   : > { %v9677_v22 = vpop.f32.mrf.mxu1  ;;  %v10466_v41 = vadd.f32 %v18008_v45, %v10465_v40  ;;  %v10674_v32 = vadd.f32 %v11881_v33, %v10474_v53 }
 0x56e   : > { %v9965_v38 = vadd.f32 %v17961_v48, %v9676_v9  ;;  %12168 = vst [vmem:[%s18029_s10 + $0x38] sm:$0xff] %v12009_v26   ;;  %v12004_v16 = vpack.c.bf16 %v10733_v31, %v10732_v5  ;;  %v12472_v25 = vpop.f32.mrf.mxu0 }
 0x56f   : > { %v9680_v28 = vpop.f32.mrf.mxu1  ;;  %v10477_v55 = vadd.f32 %v12472_v25, %v18008_v45  ;;  %v10672_v27 = vadd.f32 %v11877_v51, %v10466_v41  ;;  %v10738_v6 = vmax.f32 %v10674_v32, 0.0 }
 0x570   : > { %v10073_v11 = vmax.f32 %v9965_v38, 0.0  ;;  %v9681_v23 = vadd.f32 %v17765_v49, %v9680_v28  ;;  %12167 = vst [vmem:[%s18029_s10 + $0x30] sm:$0xff] %v12004_v16   ;;  %v10468_v63 = vpop.f32.mrf.mxu0  ;;  %v18107_v16 = vld [vmem:[%s17144_s23] ss:$0 sm:$0xff]  ;;  %s10913_s23 = scalar_lea.sflag [#allocation5], %s13155_s11 }
 0x571   : > { %v9682_v19 = vpop.f32.mrf.mxu1  ;;  %v10675_v39 = vadd.f32 %v11882_v24, %v10477_v55  ;;  %v10469_v42 = vadd.f32 %v18008_v45, %v10468_v63  ;;  %v10736_v46 = vmax.f32 %v10672_v27, 0.0 }
 0x572   : > { %v10112_v48 = vpack.c.bf16 %v10073_v11, %v10072_v18  ;;  %v9970_v62 = vadd.f32 %v17951_v14, %v9681_v23 }
 0x573   : > { %v9683_v54 = vpop.f32.mrf.mxu1  ;;  %v10739_v50 = vmax.f32 %v10675_v39, 0.0  ;;  %v10673_v21 = vadd.f32 %v11878_v36, %v10469_v42 }
 0x574   : > { %v9684_v43 = vadd.f32 %v17765_v49, %v9683_v54  ;;  %12501 = vmatprep.mubr.msk.bf16.mxu0 %vm8684_vm10, %v10112_v48  ;;  %v10074_v37 = vmax.f32 %v9970_v62, 0.0  ;;  %v12141_v62 = vld [vmem:[%s13182_s19 + $0x58] sm:$0xff]  }
 0x575   : > { %v9685_v3 = vpop.f32.mrf.mxu1  ;;  %v12019_v12 = vpack.c.bf16 %v10739_v50, %v10738_v6  ;;  %v10737_v58 = vmax.f32 %v10673_v21, 0.0  ;;  %v12140_v21 = vld [vmem:[%s13182_s19 + $0x50] sm:$0xff]  }
 0x576   : > { %v9973_v30 = vadd.f32 %v17958_v34, %v9684_v43 }
 0x577   : > { %v9688_v2 = vpop.f32.mrf.mxu1  ;;  %12170 = vst [vmem:[%s18029_s10 + $0x48] sm:$0xff] %v12019_v12   ;;  %v12014_v0 = vpack.c.bf16 %v10737_v58, %v10736_v46 }
 0x578   : > { %v10075_v47 = vmax.f32 %v9973_v30, 0.0  ;;  %v9689_v14 = vadd.f32 %v17765_v49, %v9688_v2  ;;  %v11889_v2 = vunpack.c.l.bf16 %v12141_v62 }
 0x579   : > { %v9690_v8 = vpop.f32.mrf.mxu1  ;;  %12169 = vst [vmem:[%s18029_s10 + $0x40] sm:$0xff] %v12014_v0  }
 0x57a   : > { %v10113_v57 = vpack.c.bf16 %v10075_v47, %v10074_v37  ;;  %v9978_v5 = vadd.f32 %v17967_v1, %v9689_v14  ;;  %v11885_v37 = vunpack.c.l.bf16 %v12140_v21  ;;  %v11890_v14 = vunpack.c.h.bf16 %v12141_v62 }
 0x57b   : > { %v9691_v52 = vpop.f32.mrf.mxu1 }
 0x57c   : > { %v9692_v10 = vadd.f32 %v17765_v49, %v9691_v52  ;;  %12502 = vmatmul.mubr.msk.bf16.gmra.mxu0 %vm8684_vm10, %v10113_v57  ;;  %v10076_v31 = vmax.f32 %v9978_v5, 0.0 }
 0x57d   : > { %v9693_v34 = vpop.f32.mrf.mxu1 }
 0x57e   : > { %v9981_v9 = vadd.f32 %v17974_v59, %v9692_v10  ;;  %v11886_v10 = vunpack.c.h.bf16 %v12140_v21 }
 0x57f   : > { %v9696_v26 = vpop.f32.mrf.mxu1 }
 0x580   : > { %v10077_v44 = vmax.f32 %v9981_v9, 0.0  ;;  %v9697_v20 = vadd.f32 %v17765_v49, %v9696_v26 }
 0x581   : > { %v9698_v22 = vpop.f32.mrf.mxu1 }
 0x582   : > { %v10114_v33 = vpack.c.bf16 %v10077_v44, %v10076_v31  ;;  %v9986_v38 = vadd.f32 %v17963_v4, %v9697_v20 }
 0x583   : > { %v9699_v53 = vpop.f32.mrf.mxu1 }
 0x584   : > { %v9700_v1 = vadd.f32 %v18107_v16, %v9699_v53  ;;  %12505 = vmatprep.mubr.msk.bf16.mxu0 %vm8684_vm10, %v10114_v33  ;;  %v10078_v51 = vmax.f32 %v9986_v38, 0.0 }
 0x585   : > { %v9701_v40 = vpop.f32.mrf.mxu1 }
 0x586   : > { %v9989_v28 = vadd.f32 %v17972_v29, %v9700_v1 }
 0x587   : > { %v9704_v59 = vpop.f32.mrf.mxu1 }
 0x588   : > { %v10079_v41 = vmax.f32 %v9989_v28, 0.0  ;;  %v9705_v24 = vadd.f32 %v18107_v16, %v9704_v59 }
 0x589   : > { %v9706_v49 = vpop.f32.mrf.mxu1 }
 0x58a   : > { %v10115_v18 = vpack.c.bf16 %v10079_v41, %v10078_v51  ;;  %v9994_v23 = vadd.f32 %v17980_v56, %v9705_v24 }
 0x58b   : > { %v9707_v11 = vpop.f32.mrf.mxu1 }
 0x58c   : > { %v9708_v4 = vadd.f32 %v18107_v16, %v9707_v11  ;;  %12506 = vmatmul.mubr.msk.bf16.gmra.mxu0 %vm8684_vm10, %v10115_v18  ;;  %v10080_v29 = vmax.f32 %v9994_v23, 0.0 }
 0x58d   : > { %v9709_v25 = vpop.f32.mrf.mxu1 }
 0x58e   : > { %v9997_v19 = vadd.f32 %v17987_v60, %v9708_v4 }
 0x58f   : > { %v9712_v32 = vpop.f32.mrf.mxu1 }
 0x590   : > { %v10081_v55 = vmax.f32 %v9997_v19, 0.0  ;;  %v9713_v36 = vadd.f32 %v18107_v16, %v9712_v32  ;;  %v12143_v32 = vld [vmem:[%s13182_s19 + $0x68] sm:$0xff]  }
 0x591   : > { %v9714_v48 = vpop.f32.mrf.mxu1 }
 0x592   : > { %v10116_v63 = vpack.c.bf16 %v10081_v55, %v10080_v29  ;;  %v10002_v27 = vadd.f32 %v17977_v7, %v9713_v36  ;;  %v12142_v55 = vld [vmem:[%s13182_s19 + $0x60] sm:$0xff]   ;;  %v11897_v36 = vunpack.c.l.bf16 %v12143_v32 }
 0x593   : > { %v9715_v54 = vpop.f32.mrf.mxu1 }
 0x594   : > { %v9716_v56 = vadd.f32 %v18107_v16, %v9715_v54  ;;  %12509 = vmatprep.mubr.msk.bf16.mxu0 %vm8684_vm10, %v10116_v63  ;;  %v10082_v43 = vmax.f32 %v10002_v27, 0.0  ;;  %v11893_v54 = vunpack.c.l.bf16 %v12142_v55 }
 0x595   : > { %v9717_v39 = vpop.f32.mrf.mxu1  ;;  %v12475_v50 = vpop.f32.mrf.mxu0 }
 0x596   : > { %v10005_v42 = vadd.f32 %v17985_v35, %v9716_v56  ;;  %v10490_v46 = vadd.f32 %v12475_v50, %v18008_v45  ;;  %v11894_v39 = vunpack.c.h.bf16 %v12142_v55 }
 0x597   : > { %v9720_v60 = vpop.f32.mrf.mxu1  ;;  %v10481_v12 = vpop.f32.mrf.mxu0 }
 0x598   : > { %v10083_v3 = vmax.f32 %v10005_v42, 0.0  ;;  %v9721_v6 = vadd.f32 %v18107_v16, %v9720_v60  ;;  %v10482_v47 = vadd.f32 %v18008_v45, %v10481_v12  ;;  %v10678_v52 = vadd.f32 %v11889_v2, %v10490_v46 }
 0x599   : > { %v9722_v30 = vpop.f32.mrf.mxu1  ;;  %v12476_v0 = vpop.f32.mrf.mxu0 }
 0x59a   : > { %v10117_v7 = vpack.c.bf16 %v10083_v3, %v10082_v43  ;;  %v10010_v35 = vadd.f32 %v17993_v61, %v9721_v6  ;;  %v10493_v5 = vadd.f32 %v12476_v0, %v18008_v45  ;;  %v10676_v26 = vadd.f32 %v11885_v37, %v10482_v47 }
 0x59b   : > { %v9723_v58 = vpop.f32.mrf.mxu1  ;;  %v10484_v9 = vpop.f32.mrf.mxu0  ;;  %v10742_v22 = vmax.f32 %v10678_v52, 0.0 }
 0x59c   : > { %v9724_v8 = vadd.f32 %v18107_v16, %v9723_v58  ;;  %12510 = vmatmul.mubr.msk.bf16.gmra.mxu0 %vm8684_vm10, %v10117_v7  ;;  %v10679_v31 = vadd.f32 %v11890_v14, %v10493_v5  ;;  %v10485_v44 = vadd.f32 %v18008_v45, %v10484_v9  ;;  %v10084_v61 = vmax.f32 %v10010_v35, 0.0  ;;  %v12145_v7 = vld [vmem:[%s13182_s19 + $0x78] sm:$0xff]   ;;  %v12144_v58 = vld [vmem:[%s13182_s19 + $0x70] sm:$0xff]  }
 0x59d   : > { %v9725_v57 = vpop.f32.mrf.mxu1  ;;  %v10740_v1 = vmax.f32 %v10676_v26, 0.0  ;;  %v11905_v37 = vunpack.c.l.bf16 %v12145_v7  ;;  %v11901_v35 = vunpack.c.l.bf16 %v12144_v58  ;;  %v11906_v0 = vunpack.c.h.bf16 %v12145_v7 }
 0x59e   : > { %v10013_v34 = vadd.f32 %v18010_v13, %v9724_v8  ;;  %v10743_v33 = vmax.f32 %v10679_v31, 0.0  ;;  %v10677_v53 = vadd.f32 %v11886_v10, %v10485_v44  ;;  %v11902_v10 = vunpack.c.h.bf16 %v12144_v58 }
 0x5a0   : > { %v10085_v20 = vmax.f32 %v10013_v34, 0.0  ;;  %v12029_v40 = vpack.c.bf16 %v10743_v33, %v10742_v22  ;;  %v10741_v28 = vmax.f32 %v10677_v53, 0.0 }
 0x5a2   : > { %v10118_v38 = vpack.c.bf16 %v10085_v20, %v10084_v61  ;;  %12172 = vst [vmem:[%s18029_s10 + $0x58] sm:$0xff] %v12029_v40   ;;  %v12024_v13 = vpack.c.bf16 %v10741_v28, %v10740_v1  ;;  %v12147_v1 = vld [vmem:[%s13182_s19 + $0x88] sm:$0xff]   ;;  %v12146_v28 = vld [vmem:[%s13182_s19 + $0x80] sm:$0xff]  }
 0x5a4   : > { %12513 = vmatprep.mubr.msk.bf16.mxu0 %vm8684_vm10, %v10118_v38  ;;  %12171 = vst [vmem:[%s18029_s10 + $0x50] sm:$0xff] %v12024_v13   ;;  %v11913_v13 = vunpack.c.l.bf16 %v12147_v1 }
 0x5a6   : > { %v9728_v59 = vpop.f32.mrf.mxu1 }
 0x5a7   : > { %v9729_v51 = vadd.f32 %v18107_v16, %v9728_v59 }
 0x5a8   : > { %v9730_v41 = vpop.f32.mrf.mxu1 }
 0x5a9   : > { %v10018_v49 = vadd.f32 %v17990_v15, %v9729_v51  ;;  %v11909_v41 = vunpack.c.l.bf16 %v12146_v28 }
 0x5aa   : > { %v9731_v24 = vpop.f32.mrf.mxu1 }
 0x5ab   : > { %v9732_v18 = vadd.f32 %v18107_v16, %v9731_v24  ;;  %v10086_v4 = vmax.f32 %v10018_v49, 0.0  ;;  %v11898_v16 = vunpack.c.h.bf16 %v12143_v32  ;;  %v11914_v49 = vunpack.c.h.bf16 %v12147_v1 }
 0x5ac   : > { %v9733_v11 = vpop.f32.mrf.mxu1 }
 0x5ad   : > { %v10021_v23 = vadd.f32 %v17998_v17, %v9732_v18 }
 0x5af   : > { %v10087_v25 = vmax.f32 %v10021_v23, 0.0 }
 0x5b1   : > { %v10119_v19 = vpack.c.bf16 %v10087_v25, %v10086_v4  ;;  %v11910_v4 = vunpack.c.h.bf16 %v12146_v28 }
 0x5b3   : > { %12514 = vmatmul.mubr.msk.bf16.gmra.mxu0 %vm8684_vm10, %v10119_v19 }
 0x5c9   : > { %v12479_v29 = vpop.f32.mrf.mxu0 }
 0x5ca   : > { %v10506_v48 = vadd.f32 %v12479_v29, %v18008_v45 }
 0x5cb   : > { %v10497_v63 = vpop.f32.mrf.mxu0 }
 0x5cc   : > { %v10498_v15 = vadd.f32 %v18008_v45, %v10497_v63  ;;  %v10682_v17 = vadd.f32 %v11897_v36, %v10506_v48 }
 0x5cd   : > { %v12480_v27 = vpop.f32.mrf.mxu0 }
 0x5ce   : > { %v10509_v56 = vadd.f32 %v12480_v27, %v18008_v45  ;;  %v10680_v62 = vadd.f32 %v11893_v54, %v10498_v15  ;;  %v10746_v3 = vmax.f32 %v10682_v17, 0.0  ;;  %v12149_v27 = vld [vmem:[%s13182_s19 + $0x98] sm:$0xff]  }
 0x5cf   : > { %v10500_v42 = vpop.f32.mrf.mxu0 }
 0x5d0   : > { %v10683_v60 = vadd.f32 %v11898_v16, %v10509_v56  ;;  %v10501_v43 = vadd.f32 %v18008_v45, %v10500_v42  ;;  %v10744_v21 = vmax.f32 %v10680_v62, 0.0  ;;  %v12148_v56 = vld [vmem:[%s13182_s19 + $0x90] sm:$0xff]  }
 0x5d2   : > { %v10747_v6 = vmax.f32 %v10683_v60, 0.0  ;;  %v10681_v50 = vadd.f32 %v11894_v39, %v10501_v43  ;;  %v11921_v39 = vunpack.c.l.bf16 %v12149_v27  ;;  %v11917_v60 = vunpack.c.l.bf16 %v12148_v56 }
 0x5d4   : > { %v12039_v30 = vpack.c.bf16 %v10747_v6, %v10746_v3  ;;  %v10745_v2 = vmax.f32 %v10681_v50, 0.0  ;;  %v11922_v3 = vunpack.c.h.bf16 %v12149_v27 }
 0x5d6   : > { %12174 = vst [vmem:[%s18029_s10 + $0x68] sm:$0xff] %v12039_v30   ;;  %v12034_v46 = vpack.c.bf16 %v10745_v2, %v10744_v21  ;;  %v11918_v30 = vunpack.c.h.bf16 %v12148_v56 }
 0x5d8   : > { %12173 = vst [vmem:[%s18029_s10 + $0x60] sm:$0xff] %v12034_v46  }
 0x5e3   : > { %v12483_v12 = vpop.f32.mrf.mxu0 }
 0x5e4   : > { %v10522_v47 = vadd.f32 %v12483_v12, %v18008_v45 }
 0x5e5   : > { %v10513_v14 = vpop.f32.mrf.mxu0 }
 0x5e6   : > { %v10514_v8 = vadd.f32 %v18008_v45, %v10513_v14  ;;  %v10686_v52 = vadd.f32 %v11905_v37, %v10522_v47 }
 0x5e7   : > { %v12484_v57 = vpop.f32.mrf.mxu0 }
 0x5e8   : > { %v10525_v5 = vadd.f32 %v12484_v57, %v18008_v45  ;;  %v10684_v9 = vadd.f32 %v11901_v35, %v10514_v8  ;;  %v10750_v44 = vmax.f32 %v10686_v52, 0.0  ;;  %v12151_v57 = vld [vmem:[%s13182_s19 + $0xa8] sm:$0xff]  }
 0x5e9   : > { %v10516_v34 = vpop.f32.mrf.mxu0 }
 0x5ea   : > { %v10687_v26 = vadd.f32 %v11906_v0, %v10525_v5  ;;  %v10517_v31 = vadd.f32 %v18008_v45, %v10516_v34  ;;  %v10748_v22 = vmax.f32 %v10684_v9, 0.0  ;;  %v12150_v5 = vld [vmem:[%s13182_s19 + $0xa0] sm:$0xff]  }
 0x5ec   : > { %v10751_v61 = vmax.f32 %v10687_v26, 0.0  ;;  %v10685_v20 = vadd.f32 %v11902_v10, %v10517_v31  ;;  %v11929_v10 = vunpack.c.l.bf16 %v12151_v57  ;;  %v11925_v26 = vunpack.c.l.bf16 %v12150_v5 }
 0x5ee   : > { %v12049_v33 = vpack.c.bf16 %v10751_v61, %v10750_v44  ;;  %v10749_v53 = vmax.f32 %v10685_v20, 0.0  ;;  %v11930_v44 = vunpack.c.h.bf16 %v12151_v57 }
 0x5f0   : > { %12176 = vst [vmem:[%s18029_s10 + $0x78] sm:$0xff] %v12049_v33   ;;  %v12044_v38 = vpack.c.bf16 %v10749_v53, %v10748_v22  ;;  %v11926_v33 = vunpack.c.h.bf16 %v12150_v5 }
 0x5f2   : > { %12175 = vst [vmem:[%s18029_s10 + $0x70] sm:$0xff] %v12044_v38  }
 0x5fc   : > { %v12487_v40 = vpop.f32.mrf.mxu0 }
 0x5fd   : > { %v10538_v59 = vadd.f32 %v12487_v40, %v18008_v45 }
 0x5fe   : > { %v10529_v51 = vpop.f32.mrf.mxu0 }
 0x5ff   : > { %v10530_v24 = vadd.f32 %v18008_v45, %v10529_v51  ;;  %v10690_v11 = vadd.f32 %v11913_v13, %v10538_v59 }
 0x600   : > { %v12488_v18 = vpop.f32.mrf.mxu0 }
 0x601   : > { %v10541_v23 = vadd.f32 %v12488_v18, %v18008_v45  ;;  %v10688_v19 = vadd.f32 %v11909_v41, %v10530_v24  ;;  %v10754_v55 = vmax.f32 %v10690_v11, 0.0  ;;  %v12153_v18 = vld [vmem:[%s13182_s19 + $0xb8] sm:$0xff]  }
 0x602   : > { %v10532_v25 = vpop.f32.mrf.mxu0 }
 0x603   : > { %v10691_v32 = vadd.f32 %v11914_v49, %v10541_v23  ;;  %v10533_v29 = vadd.f32 %v18008_v45, %v10532_v25  ;;  %v10752_v63 = vmax.f32 %v10688_v19, 0.0  ;;  %v12152_v23 = vld [vmem:[%s13182_s19 + $0xb0] sm:$0xff]  }
 0x605   : > { %v10755_v36 = vmax.f32 %v10691_v32, 0.0  ;;  %v10689_v48 = vadd.f32 %v11910_v4, %v10533_v29  ;;  %v11937_v4 = vunpack.c.l.bf16 %v12153_v18  ;;  %v11933_v32 = vunpack.c.l.bf16 %v12152_v23 }
 0x607   : > { %v12059_v54 = vpack.c.bf16 %v10755_v36, %v10754_v55  ;;  %v10753_v15 = vmax.f32 %v10689_v48, 0.0  ;;  %v11938_v55 = vunpack.c.h.bf16 %v12153_v18 }
 0x609   : > { %12178 = vst [vmem:[%s18029_s10 + $0x88] sm:$0xff] %v12059_v54   ;;  %v12054_v16 = vpack.c.bf16 %v10753_v15, %v10752_v63  ;;  %v11934_v54 = vunpack.c.h.bf16 %v12152_v23 }
 0x60b   : > { %12177 = vst [vmem:[%s18029_s10 + $0x80] sm:$0xff] %v12054_v16  }
 0x60c   : > { %v12491_v17 = vpop.f32.mrf.mxu0 }
 0x60d   : > { %v10554_v42 = vadd.f32 %v12491_v17, %v18008_v45 }
 0x60e   : > { %v10545_v62 = vpop.f32.mrf.mxu0 }
 0x60f   : > { %v10546_v43 = vadd.f32 %v18008_v45, %v10545_v62  ;;  %v10694_v50 = vadd.f32 %v11921_v39, %v10554_v42 }
 0x610   : > { %v12492_v6 = vpop.f32.mrf.mxu0 }
 0x611   : > { %v10557_v21 = vadd.f32 %v12492_v6, %v18008_v45  ;;  %v10692_v46 = vadd.f32 %v11917_v60, %v10546_v43  ;;  %v10758_v58 = vmax.f32 %v10694_v50, 0.0  ;;  %v12155_v6 = vld [vmem:[%s13182_s19 + $0xc8] sm:$0xff]  }
 0x612   : > { %v10548_v2 = vpop.f32.mrf.mxu0 }
 0x613   : > { %v10695_v7 = vadd.f32 %v11922_v3, %v10557_v21  ;;  %v10549_v12 = vadd.f32 %v18008_v45, %v10548_v2  ;;  %v10756_v14 = vmax.f32 %v10692_v46, 0.0  ;;  %v12154_v21 = vld [vmem:[%s13182_s19 + $0xc0] sm:$0xff]  }
 0x615   : > { %v10759_v37 = vmax.f32 %v10695_v7, 0.0  ;;  %v10693_v47 = vadd.f32 %v11918_v30, %v10549_v12  ;;  %v11945_v30 = vunpack.c.l.bf16 %v12155_v6  ;;  %v11941_v7 = vunpack.c.l.bf16 %v12154_v21 }
 0x617   : > { %v12069_v35 = vpack.c.bf16 %v10759_v37, %v10758_v58  ;;  %v10757_v8 = vmax.f32 %v10693_v47, 0.0  ;;  %v11946_v58 = vunpack.c.h.bf16 %v12155_v6 }
 0x619   : > { %12180 = vst [vmem:[%s18029_s10 + $0x98] sm:$0xff] %v12069_v35   ;;  %v12064_v0 = vpack.c.bf16 %v10757_v8, %v10756_v14  ;;  %v11942_v35 = vunpack.c.h.bf16 %v12154_v21 }
 0x61b   : > { %12179 = vst [vmem:[%s18029_s10 + $0x90] sm:$0xff] %v12064_v0  }
 0x61c   : > { %v12495_v52 = vpop.f32.mrf.mxu0 }
 0x61d   : > { %v10570_v34 = vadd.f32 %v12495_v52, %v18008_v45 }
 0x61e   : > { %v10561_v9 = vpop.f32.mrf.mxu0 }
 0x61f   : > { %v10562_v31 = vadd.f32 %v18008_v45, %v10561_v9  ;;  %v10698_v20 = vadd.f32 %v11929_v10, %v10570_v34 }
 0x620   : > { %v12496_v61 = vpop.f32.mrf.mxu0 }
 0x621   : > { %v10573_v22 = vadd.f32 %v12496_v61, %v18008_v45  ;;  %v10696_v38 = vadd.f32 %v11925_v26, %v10562_v31  ;;  %v10762_v28 = vmax.f32 %v10698_v20, 0.0  ;;  %v12157_v61 = vld [vmem:[%s13182_s19 + $0xd8] sm:$0xff]  }
 0x622   : > { %v10564_v53 = vpop.f32.mrf.mxu0 }
 0x623   : > { %v10699_v1 = vadd.f32 %v11930_v44, %v10573_v22  ;;  %v10565_v40 = vadd.f32 %v18008_v45, %v10564_v53  ;;  %v10760_v51 = vmax.f32 %v10696_v38, 0.0  ;;  %v12156_v22 = vld [vmem:[%s13182_s19 + $0xd0] sm:$0xff]   ;;  %v18200_v53 = vld [vmem:[%s18004_s21] ss:$0 sm:$0xff] }
 0x625   : > { %v10763_v13 = vmax.f32 %v10699_v1, 0.0  ;;  %v10697_v59 = vadd.f32 %v11926_v33, %v10565_v40  ;;  %v11953_v33 = vunpack.c.l.bf16 %v12157_v61  ;;  %v11949_v40 = vunpack.c.l.bf16 %v12156_v22 }
 0x627   : > { %v12079_v41 = vpack.c.bf16 %v10763_v13, %v10762_v28  ;;  %v10761_v24 = vmax.f32 %v10697_v59, 0.0  ;;  %v11954_v28 = vunpack.c.h.bf16 %v12157_v61 }
 0x629   : > { %12182 = vst [vmem:[%s18029_s10 + $0xa8] sm:$0xff] %v12079_v41   ;;  %v12074_v49 = vpack.c.bf16 %v10761_v24, %v10760_v51  ;;  %v11950_v41 = vunpack.c.h.bf16 %v12156_v22 }
 0x62b   : > { %12181 = vst [vmem:[%s18029_s10 + $0xa0] sm:$0xff] %v12074_v49  }
 0x62c   : > { %v12499_v11 = vpop.f32.mrf.mxu0 }
 0x62d   : > { %v10586_v25 = vadd.f32 %v12499_v11, %v18008_v45 }
 0x62e   : > { %v10577_v19 = vpop.f32.mrf.mxu0 }
 0x62f   : > { %v10578_v29 = vadd.f32 %v18008_v45, %v10577_v19  ;;  %v10702_v48 = vadd.f32 %v11937_v4, %v10586_v25 }
 0x630   : > { %v12500_v36 = vpop.f32.mrf.mxu0 }
 0x631   : > { %v10589_v63 = vadd.f32 %v12500_v36, %v18008_v45  ;;  %v10700_v16 = vadd.f32 %v11933_v32, %v10578_v29  ;;  %v10766_v56 = vmax.f32 %v10702_v48, 0.0  ;;  %v12159_v36 = vld [vmem:[%s13182_s19 + $0xe8] sm:$0xff]  }
 0x632   : > { %v10580_v15 = vpop.f32.mrf.mxu0 }
 0x633   : > { %v10703_v27 = vadd.f32 %v11938_v55, %v10589_v63  ;;  %v10581_v17 = vadd.f32 %v18008_v45, %v10580_v15  ;;  %v10764_v62 = vmax.f32 %v10700_v16, 0.0  ;;  %v12158_v63 = vld [vmem:[%s13182_s19 + $0xe0] sm:$0xff]  }
 0x635   : > { %v10767_v39 = vmax.f32 %v10703_v27, 0.0  ;;  %v10701_v42 = vadd.f32 %v11934_v54, %v10581_v17  ;;  %v11961_v54 = vunpack.c.l.bf16 %v12159_v36  ;;  %v11957_v27 = vunpack.c.l.bf16 %v12158_v63 }
 0x637   : > { %v12089_v60 = vpack.c.bf16 %v10767_v39, %v10766_v56  ;;  %v10765_v43 = vmax.f32 %v10701_v42, 0.0  ;;  %v11962_v56 = vunpack.c.h.bf16 %v12159_v36 }
 0x639   : > { %12184 = vst [vmem:[%s18029_s10 + $0xb8] sm:$0xff] %v12089_v60   ;;  %v12084_v3 = vpack.c.bf16 %v10765_v43, %v10764_v62  ;;  %v11958_v60 = vunpack.c.h.bf16 %v12158_v63 }
 0x63b   : > { %12183 = vst [vmem:[%s18029_s10 + $0xb0] sm:$0xff] %v12084_v3  }
 0x63c   : > { %v12503_v50 = vpop.f32.mrf.mxu0 }
 0x63d   : > { %v10602_v2 = vadd.f32 %v12503_v50, %v18008_v45 }
 0x63e   : > { %v10593_v46 = vpop.f32.mrf.mxu0 }
 0x63f   : > { %v10594_v12 = vadd.f32 %v18008_v45, %v10593_v46  ;;  %v10706_v47 = vadd.f32 %v11945_v30, %v10602_v2 }
 0x640   : > { %v12504_v37 = vpop.f32.mrf.mxu0 }
 0x641   : > { %v10605_v14 = vadd.f32 %v12504_v37, %v18008_v45  ;;  %v10704_v0 = vadd.f32 %v11941_v7, %v10594_v12  ;;  %v10770_v5 = vmax.f32 %v10706_v47, 0.0  ;;  %v12161_v37 = vld [vmem:[%s13182_s19 + $0xf8] sm:$0xff]  }
 0x642   : > { %v10596_v8 = vpop.f32.mrf.mxu0 }
 0x643   : > { %v10707_v57 = vadd.f32 %v11946_v58, %v10605_v14  ;;  %v10597_v52 = vadd.f32 %v18008_v45, %v10596_v8  ;;  %v10768_v9 = vmax.f32 %v10704_v0, 0.0  ;;  %v12160_v14 = vld [vmem:[%s13182_s19 + $0xf0] sm:$0xff]   ;;  %s11842_s19 = sshll.u32 %s13012_s27, 12  ;;  %s13027_s27 = smov [#allocation6]  }
 0x644   : > { %s18227_s22 = scalar_lea.hbm %s18288_s7, %s11842_s19  ;;  %s12944_s13 = sshll.u32 %s13027_s27, 4  ;;  %s12945_s13 = int_to_ptr.vmem [resolvable:$false] %s12944_s13 }
 0x645   : > { %v10771_v10 = vmax.f32 %v10707_v57, 0.0  ;;  %v10705_v34 = vadd.f32 %v11942_v35, %v10597_v52  ;;  %v11969_v35 = vunpack.c.l.bf16 %v12161_v37  ;;  %v11965_v57 = vunpack.c.l.bf16 %v12160_v14  ;;  %s12946_s21 = scalar_lea.vmem %s12945_s13, 8192  ;;  %p12947_p1 = scmp.lt.s32.totalorder %s18230_s12, %s12945_s13 }
 0x646   : > { %p12948_p2 = scmp.lt.s32.totalorder %s12946_s21, %s12940_s30 }
 0x647   : > { %v12099_v26 = vpack.c.bf16 %v10771_v10, %v10770_v5  ;;  %v10769_v31 = vmax.f32 %v10705_v34, 0.0  ;;  %v11970_v5 = vunpack.c.h.bf16 %v12161_v37 }
 0x648   : > { %p12949_p3 = por %p12948_p2, %p12947_p1 }
 0x649   : > { %12186 = vst [vmem:[%s18029_s10 + $0xc8] sm:$0xff] %v12099_v26   ;;  %v12094_v44 = vpack.c.bf16 %v10769_v31, %v10768_v9  ;;  %v11966_v26 = vunpack.c.h.bf16 %v12160_v14 }
 0x64a   : > { %p12950_p5 = pnand %p12949_p3, %p12943_p0 }
 0x64b   : > { %12185 = vst [vmem:[%s18029_s10 + $0xc0] sm:$0xff] %v12094_v44  }
 0x64c   : > { %v12507_v20 = vpop.f32.mrf.mxu0 }
 0x64d   : > { %v10618_v38 = vadd.f32 %v18200_v53, %v12507_v20 }
 0x64e   : > { %v10609_v1 = vpop.f32.mrf.mxu0 }
 0x64f   : > { %v10610_v45 = vadd.f32 %v18200_v53, %v10609_v1  ;;  %v10710_v59 = vadd.f32 %v11953_v33, %v10618_v38 }
 0x650   : > { %v12508_v13 = vpop.f32.mrf.mxu0 }
 0x651   : > { %v10621_v51 = vadd.f32 %v18200_v53, %v12508_v13  ;;  %v10708_v49 = vadd.f32 %v11949_v40, %v10610_v45  ;;  %v10774_v23 = vmax.f32 %v10710_v59, 0.0 }
 0x652   : > { %v10612_v24 = vpop.f32.mrf.mxu0 }
 0x653   : > { %v10711_v18 = vadd.f32 %v11954_v28, %v10621_v51  ;;  %v10613_v11 = vadd.f32 %v18200_v53, %v10612_v24  ;;  %v10772_v19 = vmax.f32 %v10708_v49, 0.0 }
 0x655   : > { %v10775_v4 = vmax.f32 %v10711_v18, 0.0  ;;  %v10709_v25 = vadd.f32 %v11950_v41, %v10613_v11 }
 0x657   : > { %v12109_v32 = vpack.c.bf16 %v10775_v4, %v10774_v23  ;;  %v10773_v29 = vmax.f32 %v10709_v25, 0.0 }
 0x659   : > { %12188 = vst [vmem:[%s18029_s10 + $0xd8] sm:$0xff] %v12109_v32   ;;  %v12104_v55 = vpack.c.bf16 %v10773_v29, %v10772_v19 }
 0x65b   : > { %12187 = vst [vmem:[%s18029_s10 + $0xd0] sm:$0xff] %v12104_v55  }
 0x65c   : > { %v12511_v48 = vpop.f32.mrf.mxu0 }
 0x65d   : > { %v10634_v15 = vadd.f32 %v18200_v53, %v12511_v48 }
 0x65e   : > { %v10625_v16 = vpop.f32.mrf.mxu0 }
 0x65f   : > { %v10626_v17 = vadd.f32 %v18200_v53, %v10625_v16  ;;  %v10714_v42 = vadd.f32 %v11961_v54, %v10634_v15 }
 0x660   : > { %v12512_v39 = vpop.f32.mrf.mxu0 }
 0x661   : > { %v10637_v62 = vadd.f32 %v18200_v53, %v12512_v39  ;;  %v10712_v3 = vadd.f32 %v11957_v27, %v10626_v17  ;;  %v10778_v21 = vmax.f32 %v10714_v42, 0.0 }
 0x662   : > { %v10628_v43 = vpop.f32.mrf.mxu0 }
 0x663   : > { %v10715_v6 = vadd.f32 %v11962_v56, %v10637_v62  ;;  %v10629_v50 = vadd.f32 %v18200_v53, %v10628_v43  ;;  %v10776_v46 = vmax.f32 %v10712_v3, 0.0 }
 0x665   : > { %v10779_v30 = vmax.f32 %v10715_v6, 0.0  ;;  %v10713_v2 = vadd.f32 %v11958_v60, %v10629_v50 }
 0x667   : > { %v12119_v7 = vpack.c.bf16 %v10779_v30, %v10778_v21  ;;  %v10777_v12 = vmax.f32 %v10713_v2, 0.0 }
 0x669   : > { %12190 = vst [vmem:[%s18029_s10 + $0xe8] sm:$0xff] %v12119_v7   ;;  %v12114_v58 = vpack.c.bf16 %v10777_v12, %v10776_v46 }
 0x66b   : > { %12189 = vst [vmem:[%s18029_s10 + $0xe0] sm:$0xff] %v12114_v58  }
 0x673   : > { %v12515_v47 = vpop.f32.mrf.mxu0 }
 0x674   : > { %v10650_v8 = vadd.f32 %v18200_v53, %v12515_v47 }
 0x675   : > { %v10641_v0 = vpop.f32.mrf.mxu0 }
 0x676   : > { %v10642_v52 = vadd.f32 %v18200_v53, %v10641_v0  ;;  %v10718_v34 = vadd.f32 %v11969_v35, %v10650_v8 }
 0x677   : > { %v12516_v10 = vpop.f32.mrf.mxu0 }
 0x678   : > { %v10653_v9 = vadd.f32 %v18200_v53, %v12516_v10  ;;  %v10716_v44 = vadd.f32 %v11965_v57, %v10642_v52  ;;  %v10782_v22 = vmax.f32 %v10718_v34, 0.0 }
 0x679   : > { %v10644_v31 = vpop.f32.mrf.mxu0 }
 0x67a   : > { %v10719_v61 = vadd.f32 %v11970_v5, %v10653_v9  ;;  %v10645_v20 = vadd.f32 %v18200_v53, %v10644_v31  ;;  %v10780_v1 = vmax.f32 %v10716_v44, 0.0 }
 0x67c   : > { %v10783_v33 = vmax.f32 %v10719_v61, 0.0  ;;  %v10717_v38 = vadd.f32 %v11966_v26, %v10645_v20 }
 0x67e   : > { %v12129_v40 = vpack.c.bf16 %v10783_v33, %v10782_v22  ;;  %v10781_v45 = vmax.f32 %v10717_v38, 0.0 }
 0x680   : > { %12192 = vst [vmem:[%s18029_s10 + $0xf8] sm:$0xff] %v12129_v40   ;;  %v12124_v28 = vpack.c.bf16 %v10781_v45, %v10780_v1 }
 0x682   : > { %12191 = vst [vmem:[%s18029_s10 + $0xf0] sm:$0xff] %v12124_v28  }
 0x683   : > { %12953 = shalt.err (!%p12950_p5)
}
 0x684   : > { %s12954_s20 = scalar_lea.hbm %s18227_s22, 4096  ;;  %s12958_s18 = scalar_lea.hbm %s18288_s7, 8192 }
 0x685   : > { %p12955_p6 = scmp.ne.s32.totalorder %s18227_s22, %s12954_s20  ;;  %p12959_p4 = scmp.lt.s32.totalorder %s18227_s22, %s18288_s7 }
 0x686   : > { %p12960_p13 = scmp.lt.s32.totalorder %s12958_s18, %s12954_s20 }
 0x687   : > { %p12956_p7 = pnand %p12955_p6, %p13120_p9 }
 0x688   : > { %p12961_p12 = por %p12960_p13, %p12959_p4 }
 0x689   : > { %p12957_p10 = pneg %p12956_p7 }
 0x68b   : > { %p12962_p8 = pnand %p12961_p12, %p12957_p10 }
 0x68d   : > { %12965 = shalt.err (!%p12962_p8)
}
 0x68e   : > { %s13028_s30 = smov 4  }
 0x68f   : > { %12536 = dma.vmem_to_hbm [thread:$0]  (%p13120_p9), %s18230_s12, 4096, %s18227_s22, %s10913_s23, %s13025_s8, %s13025_s8, %s13028_s30  }
 0x690 PF: > { %s10944_s13 = sand.u32 1, %s13000_s24   ;;  %p18874_p11 = scmp.ne.s32.totalorder %s18346_s16, 0 }
 0x691   : > { %p18875_p0 = scmp.ge.s32.totalorder %s13020_s29, 2  ;;  %s10945_s21 = scalar_lea.sflag [#allocation5], %s10944_s13 }
 0x693   : > { %p12543_p1 = pnand %p18875_p0, %p18874_p11 }
 0x695   : > { %p12544_p2 = pneg %p12543_p1 }
 0x697   : > { %12995 = dma.done.wait (%p12544_p2), %s10945_s21, 4096  }
 0x698   : > { %12997 = vsyncadd (%p12544_p2), %s10945_s21, 4294963200  ;;  %s23_s29 = sadd.s32 1, %s13020_s29   ;;  %s18876_s24 = smov %s13004_s25 }
 0x699   : > { %p20_p3 = scmp.ge.s32.totalorder %s23_s29, 4   ;;  %s18877_s25 = smov %s13008_s26 }
 0x69a   : > { %s18878_s26 = smov %s13125_s15  ;;  %s18879_s27 = smov %s13016_s28 }
 0x69b   : > { %s18880_s28 = smov %s18882_s9  ;;  %22 = sbr.rel (!%p20_p3) target bundleno = 6 (0x6), region = 114 }
 0x6a0   :  { %10950 = vsyncpa [#allocation4], 1 }
 0x6a1   :  { %10952 = vsyncpa [#allocation4 + $0x1], 1 }
 0x6a2   :  { %10953 = vsyncpa [#allocation5], 1 }
 0x6a3   :  { %10955 = vsyncpa [#allocation5 + $0x1], 1 }

</bundles_post_ra>
